<compile_context>
chip_gen: v5e
topology: v5e:2x2
jax: 0.10.0
libtpu: 0.0.40
codegen_flags: <defaults>
</compile_context>

<pallas_src>
import functools

import numpy as np

import jax
import jax.numpy as jnp
from jax.experimental import pallas as pl
from jax.experimental.pallas import tpu as pltpu


# ----------------------------------------------------------------------------
# Host-side lowering: ConvTranspose2d -> dense operator on flattened NCHW maps
# ----------------------------------------------------------------------------
def _convt_dense(w, cout_scale, h_in, stride, pad):
    """Dense D such that out.reshape(N, Cout*Ho*Wo) = x.reshape(N, Cin*H*W) @ D.

    `w` is a PyTorch ConvTranspose2d weight (Cin, Cout, kH, kW); `cout_scale`
    (per output channel) folds eval-mode BatchNorm into the weight.  Output
    pixel mapping follows PyTorch semantics: oh = stride*ih + kh - pad,
    out-of-range taps are dropped (zero padding), no output_padding.
    """
    w = np.asarray(w, np.float32)
    cin, cout, kh, kw = w.shape
    h_out = (h_in - 1) * stride - 2 * pad + kh
    ws = w * np.asarray(cout_scale, np.float32)[None, :, None, None]
    dense = np.zeros((cin * h_in * h_in, cout * h_out * h_out), np.float32)
    rows_c = np.arange(cin)
    cols_c = np.arange(cout)
    for ih in range(h_in):
        for iw in range(h_in):
            rows = (rows_c * h_in + ih) * h_in + iw            # (Cin,)
            for a in range(kh):
                oh = stride * ih + a - pad
                if oh < 0 or oh >= h_out:
                    continue
                for b in range(kw):
                    ow = stride * iw + b - pad
                    if ow < 0 or ow >= h_out:
                        continue
                    cols = (cols_c * h_out + oh) * h_out + ow  # (Cout,)
                    dense[rows[:, None], cols[None, :]] += ws[:, :, a, b]
    return dense


# ----------------------------------------------------------------------------
# Pallas kernel: one batch-row tile of the fused 3-layer decoder
# ----------------------------------------------------------------------------
def _netg_kernel(z_ref, w1_ref, b1_ref, w2_ref, b2_ref, w3_ref, b3_ref, o_ref):
    # layer 1: ConvT(nz -> 2*ngf, 4,1,0) + BN + ReLU   (BN folded into w1/b1)
    # bf16 x bf16 dot, f32 accumulation; epilogue math stays in f32.
    h = jnp.dot(z_ref[...], w1_ref[...], preferred_element_type=jnp.float32)
    h = jnp.maximum(h + b1_ref[...], 0.0)                     # [TM, 2*ngf*4*4]
    # layer 2: ConvT(2*ngf -> ngf, 4,2,1) + BN + ReLU  (BN folded into w2/b2)
    h = jnp.dot(h.astype(jnp.bfloat16), w2_ref[...],
                preferred_element_type=jnp.float32)
    h = jnp.maximum(h + b2_ref[...], 0.0)                     # [TM, ngf*8*8]
    # layer 3: ConvT(ngf -> nc, 4,2,1) + bias + Tanh
    h = jnp.dot(h.astype(jnp.bfloat16), w3_ref[...],
                preferred_element_type=jnp.float32)
    o_ref[...] = jnp.tanh(h + b3_ref[...]).astype(o_ref.dtype)  # [TM, nc*16*16]


@functools.partial(jax.jit, static_argnames=("tm",))
def _netg_forward(z2d, w1, b1, w2, b2, w3, b3, *, tm=256):
    n, k = z2d.shape
    out_dim = w3.shape[1]
    n_blocks = pl.cdiv(n, tm)
    n_pad = n_blocks * tm
    if n_pad != n:                       # pad batch rows up to a tile multiple
        z2d = jnp.pad(z2d, ((0, n_pad - n), (0, 0)))

    flops = 2 * n_pad * (w1.shape[0] * w1.shape[1]
                         + w2.shape[0] * w2.shape[1]
                         + w3.shape[0] * w3.shape[1])
    bytes_accessed = (z2d.size * 2 + out_dim * n_pad * 2
                      + (w1.size + w2.size + w3.size) * 2
                      + (b1.size + b2.size + b3.size) * 4)

    out = pl.pallas_call(
        _netg_kernel,
        out_shape=jax.ShapeDtypeStruct((n_pad, out_dim), jnp.bfloat16),
        grid_spec=pltpu.PrefetchScalarGridSpec(
            num_scalar_prefetch=0,
            grid=(n_blocks,),
            in_specs=[
                pl.BlockSpec((tm, k), lambda i: (i, 0)),        # z tile
                pl.BlockSpec(w1.shape, lambda i: (0, 0)),       # weights/biases
                pl.BlockSpec(b1.shape, lambda i: (0, 0)),       #   stay resident
                pl.BlockSpec(w2.shape, lambda i: (0, 0)),
                pl.BlockSpec(b2.shape, lambda i: (0, 0)),
                pl.BlockSpec(w3.shape, lambda i: (0, 0)),
                pl.BlockSpec(b3.shape, lambda i: (0, 0)),
            ],
            out_specs=pl.BlockSpec((tm, out_dim), lambda i: (i, 0)),
        ),
        compiler_params=pltpu.CompilerParams(
            dimension_semantics=("parallel",)),   # shard batch across v7x TCs
        cost_estimate=pl.CostEstimate(
            flops=flops,
            transcendentals=n_pad * out_dim,      # tanh
            bytes_accessed=bytes_accessed),
    )(z2d, w1, b1, w2, b2, w3, b3)
    return out[:n]


# ----------------------------------------------------------------------------
# Plain-JAX reference (explicit conv-transpose), used only for the self-check
# ----------------------------------------------------------------------------
def _ref_conv_transpose(x, w, stride, pad):
    n, cin, h, wd = x.shape
    _, cout, kk, _ = w.shape
    ho = (h - 1) * stride - 2 * pad + kk
    wo = (wd - 1) * stride - 2 * pad + kk
    patches = jnp.einsum("nchw,cokl->noklhw", x, w,
                         precision=jax.lax.Precision.HIGHEST)
    out = jnp.zeros((n, cout, ho + 2 * pad, wo + 2 * pad), jnp.float32)
    for kh in range(kk):
        for kw in range(kk):
            out = out.at[:, :, kh:kh + stride * h:stride,
                         kw:kw + stride * wd:stride].add(patches[:, :, kh, kw])
    return out[:, :, pad:pad + ho, pad:pad + wo]


# ----------------------------------------------------------------------------
# NetG
# ----------------------------------------------------------------------------
class NetG:
    """forward(input) = decoder(input); decoder = DCGAN-style deconv stack.

    Output is NCHW bfloat16 (kernel writeback is HBM-bound on v6e/v7x; cast to
    f32 outside if a consumer requires it).
    """

    def __init__(self, nz=16, ngf=8, nc=3, key=jax.random.PRNGKey(0)):
        self.nz, self.ngf, self.nc = nz, ngf, nc
        k1, k2, k3 = jax.random.split(key, 3)
        std = 0.02  # DCGAN init
        # PyTorch ConvTranspose2d weight layout: (Cin, Cout, kH, kW)
        self.w1 = std * jax.random.normal(k1, (nz, 2 * ngf, 4, 4), jnp.float32)
        self.b1 = jnp.zeros((2 * ngf,), jnp.float32)
        self.w2 = std * jax.random.normal(k2, (2 * ngf, ngf, 4, 4), jnp.float32)
        self.b2 = jnp.zeros((ngf,), jnp.float32)
        self.w3 = std * jax.random.normal(k3, (ngf, nc, 4, 4), jnp.float32)
        self.b3 = jnp.zeros((nc,), jnp.float32)
        # BatchNorm (eval): gamma=1, beta=0, running_mean=0, running_var=1.
        # NOTE: the fold below (shift = bias * scale) is only valid for these
        # init stats; with trained BN stats use
        #   shift = beta + scale * (bias - running_mean)
        # and rebuild w1d/w2d.
        eps = 1e-5
        self.bn_scale1 = jnp.full((2 * ngf,), 1.0 / np.sqrt(1.0 + eps), jnp.float32)
        self.bn_shift1 = self.b1 * self.bn_scale1
        self.bn_scale2 = jnp.full((ngf,), 1.0 / np.sqrt(1.0 + eps), jnp.float32)
        self.bn_shift2 = self.b2 * self.bn_scale2

        # Fold BN/bias and pre-lower each deconv into a dense operator.
        # Weights stored bf16 (halves weight DMA, native MXU rate); biases f32.
        self.w1d = jnp.asarray(_convt_dense(self.w1, self.bn_scale1, 1, 1, 0),
                               jnp.bfloat16)                                   # [16, 256]
        self.b1v = jnp.repeat(self.bn_shift1, 4 * 4)[None, :]                  # [1, 256]
        self.w2d = jnp.asarray(_convt_dense(self.w2, self.bn_scale2, 4, 2, 1),
                               jnp.bfloat16)                                   # [256, 512]
        self.b2v = jnp.repeat(self.bn_shift2, 8 * 8)[None, :]                  # [1, 512]
        self.w3d = jnp.asarray(_convt_dense(self.w3, np.ones(nc, np.float32),
                                            8, 2, 1), jnp.bfloat16)            # [512, 768]
        self.b3v = jnp.repeat(self.b3, 16 * 16)[None, :]                       # [1, 768]

    def __call__(self, z_nchw):
        n = z_nchw.shape[0]
        z2d = z_nchw.reshape(n, self.nz).astype(jnp.bfloat16)
        out2d = _netg_forward(z2d, self.w1d, self.b1v, self.w2d, self.b2v,
                              self.w3d, self.b3v, tm=256)
        # kernel output columns are ordered (channel, y, x) -> metadata-only
        # reshape straight to NCHW.
        return out2d.reshape(n, self.nc, 16, 16)

    def reference(self, z_nchw):
        """Pure-JAX f32 forward with explicit conv-transpose (self-check only)."""
        x = _ref_conv_transpose(z_nchw.astype(jnp.float32), self.w1, 1, 0)
        x = jnp.maximum(x * self.bn_scale1[None, :, None, None]
                        + self.bn_shift1[None, :, None, None], 0.0)
        x = _ref_conv_transpose(x, self.w2, 2, 1)
        x = jnp.maximum(x * self.bn_scale2[None, :, None, None]
                        + self.bn_shift2[None, :, None, None], 0.0)
        x = _ref_conv_transpose(x, self.w3, 2, 1)
        return jnp.tanh(x + self.b3[None, :, None, None])


if __name__ == "__main__":
    key = jax.random.PRNGKey(0)
    netg = NetG(nz=16, ngf=8, nc=3, key=key)
    # Batch of 256 latent vectors: fills the MXU M dimension (multiple of
    # 128/256) as recommended; still a tiny problem (~0.8 MB of output).
    n = 256
    z = jax.random.normal(jax.random.fold_in(key, 7), (n, 16, 1, 1), jnp.float32)

    out = jax.block_until_ready(netg(z))
    assert out.shape == (n, 3, 16, 16), out.shape
    assert out.dtype == jnp.bfloat16, out.dtype
    assert bool(jnp.all(jnp.isfinite(out.astype(jnp.float32))))

    # cross-check the fused bf16 Pallas kernel against the plain-JAX f32
    # reference (tolerance relaxed for bf16 weight/output rounding)
    ref = jax.block_until_ready(netg.reference(z))
    max_err = float(jnp.max(jnp.abs(out.astype(jnp.float32) - ref)))
    assert max_err < 1e-2, f"mismatch vs reference: {max_err}"

    print("KERNEL_OK")
</pallas_src>

<mosaic_0001>
module attributes {stable_mosaic.version = 11 : i64} {
  func.func @_netg_kernel(%arg0: i32, %arg1: memref<256x16xbf16, #tpu.memory_space<vmem>>, %arg2: memref<16x256xbf16, #tpu.memory_space<vmem>>, %arg3: memref<1x256xf32, #tpu.memory_space<vmem>>, %arg4: memref<256x512xbf16, #tpu.memory_space<vmem>>, %arg5: memref<1x512xf32, #tpu.memory_space<vmem>>, %arg6: memref<512x768xbf16, #tpu.memory_space<vmem>>, %arg7: memref<1x768xf32, #tpu.memory_space<vmem>>, %arg8: memref<256x768xbf16, #tpu.memory_space<vmem>>) attributes {dimension_semantics = [#tpu.dimension_semantics<parallel>], iteration_bounds = array<i64: 1>, scalar_prefetch = 0 : i64, scratch_operands = 0 : i64, tpu.core_type = #tpu.core_type<tc>, window_params = [{transform_indices = @transform_0, window_bounds = array<i64: 256, 16>}, {pipeline_mode = #tpu.pipeline_mode<synchronous>, transform_indices = @transform_1, window_bounds = array<i64: 16, 256>}, {pipeline_mode = #tpu.pipeline_mode<synchronous>, transform_indices = @transform_2, window_bounds = array<i64: 1, 256>}, {pipeline_mode = #tpu.pipeline_mode<synchronous>, transform_indices = @transform_3, window_bounds = array<i64: 256, 512>}, {pipeline_mode = #tpu.pipeline_mode<synchronous>, transform_indices = @transform_4, window_bounds = array<i64: 1, 512>}, {pipeline_mode = #tpu.pipeline_mode<synchronous>, transform_indices = @transform_5, window_bounds = array<i64: 512, 768>}, {pipeline_mode = #tpu.pipeline_mode<synchronous>, transform_indices = @transform_6, window_bounds = array<i64: 1, 768>}, {transform_indices = @transform_7, window_bounds = array<i64: 256, 768>}]} {
    %c0 = arith.constant 0 : index
    %c0_0 = arith.constant 0 : index
    %0 = vector.load %arg1[%c0, %c0_0] : memref<256x16xbf16, #tpu.memory_space<vmem>>, vector<256x16xbf16>
    %c0_1 = arith.constant 0 : index
    %c0_2 = arith.constant 0 : index
    %1 = vector.load %arg2[%c0_1, %c0_2] : memref<16x256xbf16, #tpu.memory_space<vmem>>, vector<16x256xbf16>
    %cst = arith.constant dense<0.000000e+00> : vector<256x256xf32>
    %2 = tpu.matmul %0, %1, %cst {dimension_numbers = #tpu.dot_dimension_numbers<[1], [0], [0], [1], [0, 0, 1, 1], [], []>} : vector<256x16xbf16>, vector<16x256xbf16>, vector<256x256xf32> -> vector<256x256xf32>
    %c0_3 = arith.constant 0 : index
    %c0_4 = arith.constant 0 : index
    %3 = vector.load %arg3[%c0_3, %c0_4] : memref<1x256xf32, #tpu.memory_space<vmem>>, vector<1x256xf32>
    %4 = vector.broadcast %3 : vector<1x256xf32> to vector<256x256xf32>
    %5 = arith.addf %2, %4 : vector<256x256xf32>
    %cst_5 = arith.constant 0.000000e+00 : f32
    %6 = vector.broadcast %cst_5 : f32 to vector<256x256xf32>
    %7 = arith.maximumf %5, %6 : vector<256x256xf32>
    %8 = arith.truncf %7 : vector<256x256xf32> to vector<256x256xbf16>
    %c0_6 = arith.constant 0 : index
    %c0_7 = arith.constant 0 : index
    %9 = vector.load %arg4[%c0_6, %c0_7] : memref<256x512xbf16, #tpu.memory_space<vmem>>, vector<256x512xbf16>
    %cst_8 = arith.constant dense<0.000000e+00> : vector<256x512xf32>
    %10 = tpu.matmul %8, %9, %cst_8 {dimension_numbers = #tpu.dot_dimension_numbers<[1], [0], [0], [1], [0, 0, 1, 1], [], []>} : vector<256x256xbf16>, vector<256x512xbf16>, vector<256x512xf32> -> vector<256x512xf32>
    %c0_9 = arith.constant 0 : index
    %c0_10 = arith.constant 0 : index
    %11 = vector.load %arg5[%c0_9, %c0_10] : memref<1x512xf32, #tpu.memory_space<vmem>>, vector<1x512xf32>
    %12 = vector.broadcast %11 : vector<1x512xf32> to vector<256x512xf32>
    %13 = arith.addf %10, %12 : vector<256x512xf32>
    %cst_11 = arith.constant 0.000000e+00 : f32
    %14 = vector.broadcast %cst_11 : f32 to vector<256x512xf32>
    %15 = arith.maximumf %13, %14 : vector<256x512xf32>
    %16 = arith.truncf %15 : vector<256x512xf32> to vector<256x512xbf16>
    %c0_12 = arith.constant 0 : index
    %c0_13 = arith.constant 0 : index
    %17 = vector.load %arg6[%c0_12, %c0_13] : memref<512x768xbf16, #tpu.memory_space<vmem>>, vector<512x768xbf16>
    %cst_14 = arith.constant dense<0.000000e+00> : vector<256x768xf32>
    %18 = tpu.matmul %16, %17, %cst_14 {dimension_numbers = #tpu.dot_dimension_numbers<[1], [0], [0], [1], [0, 0, 1, 1], [], []>} : vector<256x512xbf16>, vector<512x768xbf16>, vector<256x768xf32> -> vector<256x768xf32>
    %c0_15 = arith.constant 0 : index
    %c0_16 = arith.constant 0 : index
    %19 = vector.load %arg7[%c0_15, %c0_16] : memref<1x768xf32, #tpu.memory_space<vmem>>, vector<1x768xf32>
    %20 = vector.broadcast %19 : vector<1x768xf32> to vector<256x768xf32>
    %21 = arith.addf %18, %20 : vector<256x768xf32>
    %22 = math.tanh %21 : vector<256x768xf32>
    %23 = arith.truncf %22 : vector<256x768xf32> to vector<256x768xbf16>
    %c0_17 = arith.constant 0 : index
    %c0_18 = arith.constant 0 : index
    %24 = vector.load %arg8[%c0_17, %c0_18] : memref<256x768xbf16, #tpu.memory_space<vmem>>, vector<256x768xbf16>
    tpu.vector_store %arg8[%c0_17, %c0_18], %23 {strides = array<i32>} : memref<256x768xbf16, #tpu.memory_space<vmem>>, vector<256x768xbf16>,
    return
  }
  func.func @transform_0(%arg0: i32) -> (i32, i32) {
    %c0_i32 = arith.constant 0 : i32
    %c0_i32_0 = arith.constant 0 : i32
    return %arg0, %c0_i32 : i32, i32
  }
  func.func @transform_1(%arg0: i32) -> (i32, i32) {
    %c0_i32 = arith.constant 0 : i32
    %c0_i32_0 = arith.constant 0 : i32
    %c0_i32_1 = arith.constant 0 : i32
    return %c0_i32, %c0_i32_0 : i32, i32
  }
  func.func @transform_2(%arg0: i32) -> (i32, i32) {
    %c0_i32 = arith.constant 0 : i32
    %c0_i32_0 = arith.constant 0 : i32
    %c0_i32_1 = arith.constant 0 : i32
    return %c0_i32, %c0_i32_0 : i32, i32
  }
  func.func @transform_3(%arg0: i32) -> (i32, i32) {
    %c0_i32 = arith.constant 0 : i32
    %c0_i32_0 = arith.constant 0 : i32
    %c0_i32_1 = arith.constant 0 : i32
    return %c0_i32, %c0_i32_0 : i32, i32
  }
  func.func @transform_4(%arg0: i32) -> (i32, i32) {
    %c0_i32 = arith.constant 0 : i32
    %c0_i32_0 = arith.constant 0 : i32
    %c0_i32_1 = arith.constant 0 : i32
    return %c0_i32, %c0_i32_0 : i32, i32
  }
  func.func @transform_5(%arg0: i32) -> (i32, i32) {
    %c0_i32 = arith.constant 0 : i32
    %c0_i32_0 = arith.constant 0 : i32
    %c0_i32_1 = arith.constant 0 : i32
    return %c0_i32, %c0_i32_0 : i32, i32
  }
  func.func @transform_6(%arg0: i32) -> (i32, i32) {
    %c0_i32 = arith.constant 0 : i32
    %c0_i32_0 = arith.constant 0 : i32
    %c0_i32_1 = arith.constant 0 : i32
    return %c0_i32, %c0_i32_0 : i32, i32
  }
  func.func @transform_7(%arg0: i32) -> (i32, i32) {
    %c0_i32 = arith.constant 0 : i32
    %c0_i32_0 = arith.constant 0 : i32
    return %arg0, %c0_i32 : i32, i32
  }
}

</mosaic_0001>

<bundles_post_ra>
// kernel: _netg_forward.1
= control target key start
LH: loop header
LB: loop body
LE: loop exit
PB: predicated region body
PF: predicated region fallthrough
CT: control target
= control target key end

     0   :  { %12 = vsyncpa [#allocation3], 0  ;;  %s9055_s0 = inlined_call_operand.vmem [shape: bf16[256,16], index: 0, kind: input, shape index: {}]   ;;  %s9056_s1 = inlined_call_operand.vmem [shape: bf16[16,256], index: 1, kind: input, shape index: {}]   ;;  %s9057_s2 = inlined_call_operand.vmem [shape: f32[1,256], index: 2, kind: input, shape index: {}]   ;;  %s9058_s3 = inlined_call_operand.hbm [shape: bf16[256,512], index: 3, kind: input, shape index: {}]   ;;  %s9059_s4 = inlined_call_operand.vmem [shape: f32[1,512], index: 4, kind: input, shape index: {}]   ;;  %s9060_s5 = inlined_call_operand.hbm [shape: bf16[512,768], index: 5, kind: input, shape index: {}]   ;;  %s9061_s6 = inlined_call_operand.vmem [shape: f32[1,768], index: 6, kind: input, shape index: {}]   ;;  %s9062_s7 = inlined_call_operand.hbm [shape: bf16[256,768], index: 7, kind: output, shape index: {}]  }
   0x1   :  { %13 = vsyncpa [#allocation6], 0 }
   0x2   :  { %14 = vsyncpa [#allocation4], 0  ;;  %s25_s26 = sshll.u32 %s9058_s3, 4  ;;  %s7401_s27 = smov [#allocation2]   ;;  %s26_s26 = int_to_ptr.hbm [resolvable:$true] %s25_s26 }
   0x3   :  { %s27_s28 = sshll.u32 %s7401_s27, 4  ;;  %s40_s8 = sshll.u32 %s9060_s5, 4  ;;  %s28_s28 = int_to_ptr.vmem [resolvable:$true] %s27_s28  ;;  %s41_s8 = int_to_ptr.hbm [resolvable:$true] %s40_s8 }
   0x4   :  { %s7402_s9 = smov 256   ;;  %s7403_s10 = smov 16  }
   0x5   :  { %33 = dma.hbm_to_vmem [thread:$0]  %s26_s26, 8192, %s28_s28, [#allocation3], %s7402_s9, %s7402_s9, %s7403_s10  }
   0x6   :  { %s7404_s11 = smov [#allocation5]   ;;  %s7405_s13 = smov 384  }
   0x7   :  { %s42_s12 = sshll.u32 %s7404_s11, 4  ;;  %s7406_s14 = smov 24   ;;  %s43_s12 = int_to_ptr.vmem [resolvable:$true] %s42_s12 }
   0x8   :  { %48 = dma.hbm_to_vmem [thread:$0]  %s41_s8, 24576, %s43_s12, [#allocation6], %s7405_s13, %s7405_s13, %s7406_s14  }
   0x9   :  { %7395 = dma.done.wait [#allocation3], 8192  }
   0xa   :  { %7396 = vsyncadd [#allocation3], 4294959104 }
   0xb   :  { %7397 = dma.done.wait [#allocation6], 24576  }
   0xc   :  { %7398 = vsyncadd [#allocation6], 4294942720  ;;  %v5583_v0 = vld [vmem:[%s9056_s1] sm:$0xf]  ;;  %v6662_v1 = vld [vmem:[%s9056_s1 + $0x4] sm:$0xf0] }
   0xd   :  { %v6661_v2 = vld [vmem:[%s9056_s1 + $0x4] sm:$0xf]  ;;  %v5584_v3 = vor.u32 %v6662_v1, %v5583_v0  ;;  %v5585_v4 = vld [vmem:[%s9056_s1 + $0x8] sm:$0xf0]  ;;  %vm190_vm0 = vcmask 130048   ;;  %v6655_v28 = vld [vmem:[%s9055_s0 + $0x50] sm:$0xff] }
   0xe   :  { %v6645_v5 = vld [vmem:[%s9055_s0] sm:$0xff]  ;;  %v5588_v6 = vor.u32 %v6661_v2, %v5585_v4  ;;  %v6654_v8 = vld [vmem:[%s9055_s0 + $0x48] sm:$0xff]  ;;  %v6725_v10 = vld [vmem:[#allocation2 + $0x1ec] sm:$0xf0]  ;;  %s5503_s17 = sshll.u32 %s9062_s7, 4  ;;  %s5504_s17 = int_to_ptr.hbm [resolvable:$true] %s5503_s17 }
   0xf   :  { %v7475_v7 = vld [vmem:[%s9055_s0 + $0x40] sm:$0xff]  ;;  %246 = vmatpush.bf16.msra.mxu0 %v5584_v3  ;;  %6919 = vmatpush.bf16.msra.mxu2 %v5584_v3  ;;  %v6693_v12 = vld [vmem:[#allocation2 + $0xec] sm:$0xf0]  ;;  %v5737_v16 = vld [vmem:[#allocation2 + $0xf0] sm:$0xf0] }
  0x10   :  { %v5863_v9 = vld [vmem:[#allocation2 + $0x1e0] sm:$0xf]  ;;  %335 = vmatpush.bf16.msra.mxu1 %v5588_v6  ;;  %6920 = vmatpush.bf16.msra.mxu3 %v5588_v6  ;;  %v6691_v15 = vld [vmem:[#allocation2 + $0xe4] sm:$0xf]  ;;  %v5865_v19 = vld [vmem:[#allocation2 + $0x1f0] sm:$0xf0] }
  0x11   :  { %v5735_v11 = vld [vmem:[#allocation2 + $0xe0] sm:$0xf]  ;;  %v5864_v13 = vor.u32 %v6725_v10, %v5863_v9  ;;  %v5740_v17 = vor.u32 %v6691_v15, %v5737_v16  ;;  %v6723_v18 = vld [vmem:[#allocation2 + $0x1e4] sm:$0xf]  ;;  %v6689_v22 = vld [vmem:[#allocation2 + $0xcc] sm:$0xf0] }
  0x12   :  { %v5736_v14 = vor.u32 %v6693_v12, %v5735_v11  ;;  %5589 = vmatmul.msk.bf16.vlgmr.msra.gmra.mxu0 %vm190_vm0, %v6645_v5  ;;  %5598 = vmatmul.msk.bf16.vlgmr.msra.gmra.mxu2 %vm190_vm0, %v6654_v8  ;;  %v5719_v20 = vld [vmem:[#allocation2 + $0xc0] sm:$0xf]  ;;  %v5868_v21 = vor.u32 %v6723_v18, %v5865_v19  ;;  %v6721_v24 = vld [vmem:[#allocation2 + $0x1cc] sm:$0xf0]  ;;  %v6646_v27 = vld [vmem:[%s9055_s0 + $0x8] sm:$0xff] }
  0x13   :  { %5605 = vmatmul.msk.bf16.vlgmr.msra.gmra.mxu1 %vm190_vm0, %v6645_v5  ;;  %5613 = vmatmul.msk.bf16.vlgmr.msra.gmra.mxu3 %vm190_vm0, %v7475_v7  ;;  %v5847_v23 = vld [vmem:[#allocation2 + $0x1c0] sm:$0xf]  ;;  %v5720_v25 = vor.u32 %v6689_v22, %v5719_v20  ;;  %v6687_v29 = vld [vmem:[#allocation2 + $0xc4] sm:$0xf]  ;;  %v5721_v30 = vld [vmem:[#allocation2 + $0xd0] sm:$0xf0] }
  0x14   :  { %996 = vmatpush.bf16.msrb.mxu3 %v5864_v13  ;;  %907 = vmatpush.bf16.msrb.mxu2 %v5736_v14  ;;  %v5848_v26 = vor.u32 %v6721_v24, %v5847_v23  ;;  %v5724_v31 = vor.u32 %v6687_v29, %v5721_v30  ;;  %v6719_v32 = vld [vmem:[#allocation2 + $0x1c4] sm:$0xf]  ;;  %v5849_v33 = vld [vmem:[#allocation2 + $0x1d0] sm:$0xf0]  ;;  %v5703_v34 = vld [vmem:[#allocation2 + $0xa0] sm:$0xf] }
  0x15   :  { %1085 = vmatpush.bf16.msrb.mxu0 %v5740_v17  ;;  %1174 = vmatpush.bf16.msrb.mxu1 %v5868_v21  ;;  %v5852_v35 = vor.u32 %v6719_v32, %v5849_v33  ;;  %v6685_v36 = vld [vmem:[#allocation2 + $0xac] sm:$0xf0]  ;;  %v5831_v37 = vld [vmem:[#allocation2 + $0x1a0] sm:$0xf]  ;;  %v6656_v42 = vld [vmem:[%s9055_s0 + $0x58] sm:$0xff] }
  0x16   :  { %v6717_v38 = vld [vmem:[#allocation2 + $0x1ac] sm:$0xf0]  ;;  %v5704_v39 = vor.u32 %v6685_v36, %v5703_v34  ;;  %v6715_v43 = vld [vmem:[#allocation2 + $0x1a4] sm:$0xf]  ;;  %v5833_v44 = vld [vmem:[#allocation2 + $0x1b0] sm:$0xf0] }
  0x17   :  { %v5832_v40 = vor.u32 %v6717_v38, %v5831_v37  ;;  %v6647_v41 = vld [vmem:[%s9055_s0 + $0x10] sm:$0xff]  ;;  %v5836_v45 = vor.u32 %v6715_v43, %v5833_v44  ;;  %v5687_v46 = vld [vmem:[#allocation2 + $0x80] sm:$0xf]  ;;  %v6683_v48 = vld [vmem:[#allocation2 + $0xa4] sm:$0xf] }
  0x18   :  { %908 = vmatpush.bf16.msrb.mxu2 %v5720_v25  ;;  %997 = vmatpush.bf16.msrb.mxu3 %v5848_v26  ;;  %v6681_v47 = vld [vmem:[#allocation2 + $0x8c] sm:$0xf0]  ;;  %v5705_v50 = vld [vmem:[#allocation2 + $0xb0] sm:$0xf0]  ;;  %v5815_v51 = vld [vmem:[#allocation2 + $0x180] sm:$0xf] }
  0x19   :  { %1086 = vmatpush.bf16.msrb.mxu0 %v5724_v31  ;;  %1175 = vmatpush.bf16.msrb.mxu1 %v5852_v35  ;;  %v5688_v49 = vor.u32 %v6681_v47, %v5687_v46  ;;  %v6713_v52 = vld [vmem:[#allocation2 + $0x18c] sm:$0xf0]  ;;  %v5708_v53 = vor.u32 %v6683_v48, %v5705_v50  ;;  %v6648_v55 = vld [vmem:[%s9055_s0 + $0x18] sm:$0xff]  ;;  %v6657_v56 = vld [vmem:[%s9055_s0 + $0x60] sm:$0xff] }
  0x1a   :  { %v5816_v54 = vor.u32 %v6713_v52, %v5815_v51  ;;  %v5671_v57 = vld [vmem:[#allocation2 + $0x60] sm:$0xf]  ;;  %v6677_v58 = vld [vmem:[#allocation2 + $0x6c] sm:$0xf0]  ;;  %v6711_v60 = vld [vmem:[#allocation2 + $0x184] sm:$0xf] }
  0x1b   :  { %v5672_v59 = vor.u32 %v6677_v58, %v5671_v57  ;;  %v5817_v61 = vld [vmem:[#allocation2 + $0x190] sm:$0xf0]  ;;  %v6679_v62 = vld [vmem:[#allocation2 + $0x84] sm:$0xf]  ;;  %v5799_v1 = vld [vmem:[#allocation2 + $0x160] sm:$0xf] }
  0x1c   :  { %909 = vmatpush.bf16.msrb.mxu2 %v5704_v39  ;;  %998 = vmatpush.bf16.msrb.mxu3 %v5832_v40  ;;  %v5820_v63 = vor.u32 %v6711_v60, %v5817_v61  ;;  %v5689_v0 = vld [vmem:[#allocation2 + $0x90] sm:$0xf0]  ;;  %v6709_v2 = vld [vmem:[#allocation2 + $0x16c] sm:$0xf0]  ;;  %v6649_v5 = vld [vmem:[%s9055_s0 + $0x20] sm:$0xff] }
  0x1d   :  { %1176 = vmatpush.bf16.msrb.mxu1 %v5836_v45  ;;  %1087 = vmatpush.bf16.msrb.mxu0 %v5708_v53  ;;  %v5692_v3 = vor.u32 %v6679_v62, %v5689_v0  ;;  %v5800_v4 = vor.u32 %v6709_v2, %v5799_v1  ;;  %v6658_v6 = vld [vmem:[%s9055_s0 + $0x68] sm:$0xff]  ;;  %v6673_v9 = vld [vmem:[#allocation2 + $0x4c] sm:$0xf0]  ;;  %v6707_v11 = vld [vmem:[#allocation2 + $0x164] sm:$0xf] }
  0x1e   :  { %v5801_v12 = vld [vmem:[#allocation2 + $0x170] sm:$0xf0]  ;;  %v5783_v13 = vld [vmem:[#allocation2 + $0x140] sm:$0xf]  ;;  %v6705_v15 = vld [vmem:[#allocation2 + $0x14c] sm:$0xf0] }
  0x1f   :  { %v5804_v14 = vor.u32 %v6707_v11, %v5801_v12  ;;  %v6675_v16 = vld [vmem:[#allocation2 + $0x64] sm:$0xf]  ;;  %v5673_v17 = vld [vmem:[#allocation2 + $0x70] sm:$0xf0]  ;;  %v5784_v18 = vor.u32 %v6705_v15, %v5783_v13  ;;  %v6650_v20 = vld [vmem:[%s9055_s0 + $0x28] sm:$0xff] }
  0x20   :  { %910 = vmatpush.bf16.msrb.mxu2 %v5688_v49  ;;  %999 = vmatpush.bf16.msrb.mxu3 %v5816_v54  ;;  %v5676_v19 = vor.u32 %v6675_v16, %v5673_v17  ;;  %v6659_v21 = vld [vmem:[%s9055_s0 + $0x70] sm:$0xff]  ;;  %v5639_v22 = vld [vmem:[#allocation2 + $0x20] sm:$0xf]  ;;  %v6703_v25 = vld [vmem:[#allocation2 + $0x144] sm:$0xf] }
  0x21   :  { %1177 = vmatpush.bf16.msrb.mxu1 %v5820_v63  ;;  %1088 = vmatpush.bf16.msrb.mxu0 %v5692_v3  ;;  %v6669_v23 = vld [vmem:[#allocation2 + $0x2c] sm:$0xf0]  ;;  %v5785_v26 = vld [vmem:[#allocation2 + $0x150] sm:$0xf0]  ;;  %v6671_v30 = vld [vmem:[#allocation2 + $0x44] sm:$0xf] }
  0x22   :  { %5590 = vmatmul.msk.bf16.gmra.mxu0 %vm190_vm0, %v6646_v27  ;;  %5599 = vmatmul.msk.bf16.gmra.mxu2 %vm190_vm0, %v6655_v28  ;;  %v5640_v24 = vor.u32 %v6669_v23, %v5639_v22  ;;  %v6701_v29 = vld [vmem:[#allocation2 + $0x12c] sm:$0xf0]  ;;  %v5657_v31 = vld [vmem:[#allocation2 + $0x50] sm:$0xf0]  ;;  %v6660_v35 = vld [vmem:[%s9055_s0 + $0x78] sm:$0xff] }
  0x23   :  { %5606 = vmatmul.msk.bf16.gmra.mxu1 %vm190_vm0, %v6646_v27  ;;  %5614 = vmatmul.msk.bf16.gmra.mxu3 %vm190_vm0, %v6654_v8  ;;  %v5655_v8 = vld [vmem:[#allocation2 + $0x40] sm:$0xf]  ;;  %v5660_v33 = vor.u32 %v6671_v30, %v5657_v31  ;;  %v6651_v34 = vld [vmem:[%s9055_s0 + $0x30] sm:$0xff]  ;;  %v6699_v38 = vld [vmem:[#allocation2 + $0x124] sm:$0xf] }
  0x24   :  { %911 = vmatpush.bf16.msrb.mxu2 %v5672_v59  ;;  %1000 = vmatpush.bf16.msrb.mxu3 %v5800_v4  ;;  %v5656_v10 = vor.u32 %v6673_v9, %v5655_v8  ;;  %v5767_v27 = vld [vmem:[#allocation2 + $0x120] sm:$0xf]  ;;  %v6665_v37 = vld [vmem:[#allocation2 + $0xc] sm:$0xf0]  ;;  %v5769_v40 = vld [vmem:[#allocation2 + $0x130] sm:$0xf0] }
  0x25   :  { %1178 = vmatpush.bf16.msrb.mxu1 %v5804_v14  ;;  %1089 = vmatpush.bf16.msrb.mxu0 %v5676_v19  ;;  %v5768_v32 = vor.u32 %v6701_v29, %v5767_v27  ;;  %v5623_v36 = vld [vmem:[#allocation2] sm:$0xf]  ;;  %v6697_v43 = vld [vmem:[#allocation2 + $0x10c] sm:$0xf0]  ;;  %v6667_v44 = vld [vmem:[#allocation2 + $0x24] sm:$0xf] }
  0x26   :  { %v5624_v39 = vor.u32 %v6665_v37, %v5623_v36  ;;  %v5641_v46 = vld [vmem:[#allocation2 + $0x30] sm:$0xf0]  ;;  %v6695_v47 = vld [vmem:[#allocation2 + $0x104] sm:$0xf]  ;;  %v6652_v53 = vld [vmem:[%s9055_s0 + $0x38] sm:$0xff] }
  0x27   :  { %v5753_v48 = vld [vmem:[#allocation2 + $0x110] sm:$0xf0]  ;;  %v5644_v49 = vor.u32 %v6667_v44, %v5641_v46  ;;  %v6663_v51 = vld [vmem:[#allocation2 + $0x4] sm:$0xf]  ;;  %v5871_v58 = vld [vmem:[#allocation2 + $0x1e8] sm:$0xf] }
  0x28   :  { %912 = vmatpush.bf16.msrb.mxu2 %v5656_v10  ;;  %1001 = vmatpush.bf16.msrb.mxu3 %v5784_v18  ;;  %v5756_v50 = vor.u32 %v6695_v47, %v5753_v48  ;;  %v5625_v52 = vld [vmem:[#allocation2 + $0x10] sm:$0xf0]  ;;  %v6726_v59 = vld [vmem:[#allocation2 + $0x1f4] sm:$0xf0]  ;;  %v94_v61 = vld [vmem:[%s9057_s2] sm:$0x3] }
  0x29   :  { %1090 = vmatpush.bf16.msrb.mxu0 %v5660_v33  ;;  %v5628_v54 = vor.u32 %v6663_v51, %v5625_v52  ;;  %v5872_v60 = vor.u32 %v6726_v59, %v5871_v58  ;;  %v7554_v0 = vperm.slane %v94_v61, 1  ;;  %v7556_v1 = vperm.slane %v94_v61, 0  ;;  %v6724_v2 = vld [vmem:[#allocation2 + $0x1ec] sm:$0xf]  ;;  %v5873_v3 = vld [vmem:[#allocation2 + $0x1f8] sm:$0xf0] }
  0x2a   :  { %v5876_v4 = vor.u32 %v6724_v2, %v5873_v3  ;;  %v6692_v31 = vld [vmem:[#allocation2 + $0xec] sm:$0xf] }
  0x2b   :  { %v6720_v59 = vld [vmem:[#allocation2 + $0x1cc] sm:$0xf] }
  0x2c   :  { %913 = vmatpush.bf16.msrb.mxu2 %v5640_v24  ;;  %1002 = vmatpush.bf16.msrb.mxu3 %v5768_v32  ;;  %v5727_v24 = vld [vmem:[#allocation2 + $0xc8] sm:$0xf]  ;;  %v5745_v32 = vld [vmem:[#allocation2 + $0xf8] sm:$0xf0] }
  0x2d   :  { %1091 = vmatpush.bf16.msrb.mxu0 %v5644_v49  ;;  %v5748_v33 = vor.u32 %v6692_v31, %v5745_v32  ;;  %v5855_v49 = vld [vmem:[#allocation2 + $0x1c8] sm:$0xf]  ;;  %v6688_v31 = vld [vmem:[#allocation2 + $0xcc] sm:$0xf]  ;;  %v5729_v32 = vld [vmem:[#allocation2 + $0xd8] sm:$0xf0] }
  0x30   :  { %914 = vmatpush.bf16.msrb.mxu2 %v5624_v39 }
  0x31   :  { %1092 = vmatpush.bf16.msrb.mxu0 %v5628_v54 }
  0x32   :  { %5591 = vmatmul.msk.bf16.gmra.mxu0 %vm190_vm0, %v6647_v41  ;;  %5600 = vmatmul.msk.bf16.gmra.mxu2 %vm190_vm0, %v6656_v42 }
  0x33   :  { %5607 = vmatmul.msk.bf16.gmra.mxu1 %vm190_vm0, %v6647_v41  ;;  %5615 = vmatmul.msk.bf16.gmra.mxu3 %vm190_vm0, %v6655_v28  ;;  %v5788_v28 = vor.u32 %v6703_v25, %v5785_v26  ;;  %v5772_v41 = vor.u32 %v6699_v38, %v5769_v40  ;;  %v6690_v25 = vld [vmem:[#allocation2 + $0xd4] sm:$0xf0] }
  0x34   :  { %v5728_v27 = vor.u32 %v6690_v25, %v5727_v24  ;;  %v6686_v24 = vld [vmem:[#allocation2 + $0xb4] sm:$0xf0] }
  0x35   :  { %1179 = vmatpush.bf16.msrb.mxu1 %v5788_v28  ;;  %1441 = vmatpush.bf16.msra.mxu0 %v5748_v33  ;;  %v5732_v33 = vor.u32 %v6688_v31, %v5729_v32 }
  0x39   :  { %1180 = vmatpush.bf16.msrb.mxu1 %v5772_v41  ;;  %1442 = vmatpush.bf16.msra.mxu0 %v5732_v33 }
  0x3d   :  { %1181 = vmatpush.bf16.msrb.mxu1 %v5756_v50  ;;  %v6722_v50 = vld [vmem:[#allocation2 + $0x1d4] sm:$0xf0] }
  0x3e   :  { %v5856_v52 = vor.u32 %v6722_v50, %v5855_v49 }
  0x41   :  { %1530 = vmatpush.bf16.msra.mxu1 %v5876_v4 }
  0x42   :  { %5592 = vmatmul.msk.bf16.gmra.mxu0 %vm190_vm0, %v6648_v55  ;;  %5601 = vmatmul.msk.bf16.gmra.mxu2 %vm190_vm0, %v6657_v56 }
  0x43   :  { %5608 = vmatmul.msk.bf16.gmra.mxu1 %vm190_vm0, %v6648_v55  ;;  %5616 = vmatmul.msk.bf16.gmra.mxu3 %vm190_vm0, %v6656_v42  ;;  %v5751_v42 = vld [vmem:[#allocation2 + $0x100] sm:$0xf]  ;;  %v5743_v55 = vld [vmem:[#allocation2 + $0xe8] sm:$0xf] }
  0x44   :  { %v5752_v45 = vor.u32 %v6697_v43, %v5751_v42 }
  0x46   :  { %1003 = vmatpush.bf16.msrb.mxu3 %v5752_v45 }
  0x4a   :  { %1352 = vmatpush.bf16.msra.mxu3 %v5872_v60  ;;  %v5857_v60 = vld [vmem:[#allocation2 + $0x1d8] sm:$0xf0] }
  0x4b   :  { %v5860_v61 = vor.u32 %v6720_v59, %v5857_v60 }
  0x4d   :  { %1531 = vmatpush.bf16.msra.mxu1 %v5860_v61 }
  0x4e   :  { %1353 = vmatpush.bf16.msra.mxu3 %v5856_v52  ;;  %v5839_v52 = vld [vmem:[#allocation2 + $0x1a8] sm:$0xf] }
  0x52   :  { %5593 = vmatmul.msk.bf16.gmra.mxu0 %vm190_vm0, %v6649_v5  ;;  %5602 = vmatmul.msk.bf16.gmra.mxu2 %vm190_vm0, %v6658_v6 }
  0x53   :  { %5609 = vmatmul.msk.bf16.gmra.mxu1 %vm190_vm0, %v6649_v5  ;;  %5617 = vmatmul.msk.bf16.gmra.mxu3 %vm190_vm0, %v6657_v56  ;;  %v6694_v56 = vld [vmem:[#allocation2 + $0xf4] sm:$0xf0] }
  0x54   :  { %v5744_v57 = vor.u32 %v6694_v56, %v5743_v55 }
  0x56   :  { %1263 = vmatpush.bf16.msra.mxu2 %v5744_v57 }
  0x5a   :  { %1264 = vmatpush.bf16.msra.mxu2 %v5728_v27 }
  0x62   :  { %5594 = vmatmul.msk.bf16.gmra.mxu0 %vm190_vm0, %v6650_v20  ;;  %5603 = vmatmul.msk.bf16.gmra.mxu2 %vm190_vm0, %v6659_v21 }
  0x63   :  { %5610 = vmatmul.msk.bf16.gmra.mxu1 %vm190_vm0, %v6650_v20  ;;  %5618 = vmatmul.msk.bf16.gmra.mxu3 %vm190_vm0, %v6658_v6 }
  0x72   :  { %5595 = vmatmul.msk.bf16.gmra.mxu0 %vm190_vm0, %v6651_v34  ;;  %5604 = vmatmul.msk.bf16.gmra.mxu2 %vm190_vm0, %v6660_v35 }
  0x73   :  { %5611 = vmatmul.msk.bf16.gmra.mxu1 %vm190_vm0, %v6651_v34  ;;  %5619 = vmatmul.msk.bf16.gmra.mxu3 %vm190_vm0, %v6659_v21 }
  0x82   :  { %5596 = vmatmul.msk.bf16.gmra.mxu0 %vm190_vm0, %v6652_v53 }
  0x83   :  { %5612 = vmatmul.msk.bf16.gmra.mxu1 %vm190_vm0, %v6652_v53  ;;  %5620 = vmatmul.msk.bf16.gmra.mxu3 %vm190_vm0, %v6660_v35 }
  0x8f   :  { %v248_v62 = vpop.f32.mrf.mxu0 }
  0x90   :  { %v337_v63 = vpop.f32.mrf.mxu1  ;;  %v249_v6 = vadd.f32 %v248_v62, %v7556_v1 }
  0x91   :  { %v338_v5 = vadd.f32 %v337_v63, %v7554_v0 }
  0x92   :  { %5597 = vmatmul.msk.bf16.gmra.mxu0 %vm190_vm0, %v7475_v7  ;;  %v417_v15 = vmax.f32 %v249_v6, 0.0 }
  0x93   :  { %v418_v13 = vmax.f32 %v338_v5, 0.0 }
  0x95   :  { %v7562_v10 = vpop.f32.mrf.mxu2 }
  0x96   :  { %v377_v8 = vpop.f32.mrf.mxu3 }
  0x97   :  { %v250_v9 = vpop.f32.mrf.mxu0  ;;  %v378_v17 = vadd.f32 %v377_v8, %v7554_v0 }
  0x98   :  { %v251_v11 = vadd.f32 %v250_v9, %v7556_v1  ;;  %v339_v12 = vpop.f32.mrf.mxu1 }
  0x99   :  { %v340_v14 = vadd.f32 %v339_v12, %v7554_v0  ;;  %v450_v22 = vmax.f32 %v378_v17, 0.0 }
  0x9a   :  { %v419_v7 = vmax.f32 %v251_v11, 0.0 }
  0x9b   :  { %v420_v16 = vmax.f32 %v340_v14, 0.0 }
  0x9c   :  { %v7567_v18 = vpack.c.bf16 %v419_v7, %v417_v15 }
  0x9d   :  { %v7569_v19 = vpack.c.bf16 %v420_v16, %v418_v13  ;;  %v7575_v29 = vpop.f32.mrf.mxu2 }
  0x9e   :  { %915 = vmatmul.bf16.vlgmr.msrb.gmra.mxu2 %v7567_v18  ;;  %v379_v20 = vpop.f32.mrf.mxu3 }
  0x9f   :  { %1004 = vmatmul.bf16.vlgmr.msrb.gmra.mxu3 %v7569_v19  ;;  %1182 = vmatmul.bf16.vlgmr.msrb.gmra.mxu1 %v7569_v19  ;;  %v253_v21 = vpop.f32.mrf.mxu0  ;;  %v380_v23 = vadd.f32 %v379_v20, %v7554_v0 }
  0xa0   :  { %v342_v26 = vpop.f32.mrf.mxu1  ;;  %v254_v35 = vadd.f32 %v253_v21, %v7556_v1 }
  0xa1   :  { %v452_v28 = vmax.f32 %v380_v23, 0.0  ;;  %v343_v34 = vadd.f32 %v342_v26, %v7554_v0  ;;  %v5711_v23 = vld [vmem:[#allocation2 + $0xa8] sm:$0xf] }
  0xa2   :  { %1093 = vmatmul.bf16.vlgmr.msrb.gmra.mxu0 %v7567_v18  ;;  %v421_v42 = vmax.f32 %v254_v35, 0.0  ;;  %v5712_v26 = vor.u32 %v6686_v24, %v5711_v23 }
  0xa3   :  { %v7578_v30 = vpack.c.bf16 %v452_v28, %v450_v22  ;;  %v422_v40 = vmax.f32 %v343_v34, 0.0 }
  0xa4   :  { %1265 = vmatpush.bf16.msra.mxu2 %v5712_v26 }
  0xa5   :  { %v7585_v46 = vpop.f32.mrf.mxu2 }
  0xa6   :  { %v382_v36 = vpop.f32.mrf.mxu3 }
  0xa7   :  { %v255_v37 = vpop.f32.mrf.mxu0  ;;  %v383_v45 = vadd.f32 %v382_v36, %v7554_v0 }
  0xa8   :  { %v256_v38 = vadd.f32 %v255_v37, %v7556_v1  ;;  %v344_v39 = vpop.f32.mrf.mxu1 }
  0xa9   :  { %v345_v41 = vadd.f32 %v344_v39, %v7554_v0  ;;  %v454_v54 = vmax.f32 %v383_v45, 0.0 }
  0xaa   :  { %v423_v43 = vmax.f32 %v256_v38, 0.0 }
  0xab   :  { %v424_v44 = vmax.f32 %v345_v41, 0.0 }
  0xac   :  { %v7587_v47 = vpack.c.bf16 %v423_v43, %v421_v42 }
  0xad   :  { %v7589_v48 = vpack.c.bf16 %v424_v44, %v422_v40  ;;  %v7599_v63 = vpop.f32.mrf.mxu2 }
  0xae   :  { %920 = vmatmul.bf16.gmra.mxu2 %v7587_v47  ;;  %v384_v51 = vpop.f32.mrf.mxu3 }
  0xaf   :  { %1009 = vmatmul.bf16.gmra.mxu3 %v7589_v48  ;;  %1187 = vmatmul.bf16.gmra.mxu1 %v7589_v48  ;;  %v258_v53 = vpop.f32.mrf.mxu0  ;;  %v385_v55 = vadd.f32 %v384_v51, %v7554_v0 }
  0xb0   :  { %v347_v56 = vpop.f32.mrf.mxu1  ;;  %v259_v2 = vadd.f32 %v258_v53, %v7556_v1  ;;  %v6718_v53 = vld [vmem:[#allocation2 + $0x1b4] sm:$0xf0] }
  0xb1   :  { %v456_v57 = vmax.f32 %v385_v55, 0.0  ;;  %v348_v62 = vadd.f32 %v347_v56, %v7554_v0  ;;  %v5840_v55 = vor.u32 %v6718_v53, %v5839_v52 }
  0xb2   :  { %1098 = vmatmul.bf16.gmra.mxu0 %v7587_v47  ;;  %v425_v11 = vmax.f32 %v259_v2, 0.0 }
  0xb3   :  { %v7596_v58 = vpack.c.bf16 %v456_v57, %v454_v54  ;;  %v426_v8 = vmax.f32 %v348_v62, 0.0  ;;  %1354 = vmatpush.bf16.msra.mxu3 %v5840_v55 }
  0xb5   :  { %v7612_v21 = vpop.f32.mrf.mxu2 }
  0xb6   :  { %v387_v3 = vpop.f32.mrf.mxu3 }
  0xb7   :  { %v260_v4 = vpop.f32.mrf.mxu0  ;;  %v388_v14 = vadd.f32 %v387_v3, %v7554_v0  ;;  %v6716_v3 = vld [vmem:[#allocation2 + $0x1ac] sm:$0xf] }
  0xb8   :  { %v261_v5 = vadd.f32 %v260_v4, %v7556_v1  ;;  %v349_v6 = vpop.f32.mrf.mxu1  ;;  %v5841_v4 = vld [vmem:[#allocation2 + $0x1b8] sm:$0xf0] }
  0xb9   :  { %v350_v9 = vadd.f32 %v349_v6, %v7554_v0  ;;  %v458_v20 = vmax.f32 %v388_v14, 0.0 }
  0xba   :  { %v427_v12 = vmax.f32 %v261_v5, 0.0  ;;  %v5844_v5 = vor.u32 %v6716_v3, %v5841_v4 }
  0xbb   :  { %v428_v13 = vmax.f32 %v350_v9, 0.0 }
  0xbc   :  { %v7605_v15 = vpack.c.bf16 %v427_v12, %v425_v11  ;;  %1532 = vmatpush.bf16.msra.mxu1 %v5844_v5 }
  0xbd   :  { %v7607_v7 = vpack.c.bf16 %v428_v13, %v426_v8  ;;  %v7622_v42 = vpop.f32.mrf.mxu2 }
  0xbe   :  { %925 = vmatmul.bf16.gmra.mxu2 %v7605_v15  ;;  %v389_v16 = vpop.f32.mrf.mxu3 }
  0xbf   :  { %1014 = vmatmul.bf16.gmra.mxu3 %v7607_v7  ;;  %1192 = vmatmul.bf16.gmra.mxu1 %v7607_v7  ;;  %v263_v17 = vpop.f32.mrf.mxu0  ;;  %v390_v22 = vadd.f32 %v389_v16, %v7554_v0 }
  0xc0   :  { %v352_v25 = vpop.f32.mrf.mxu1  ;;  %v264_v35 = vadd.f32 %v263_v17, %v7556_v1 }
  0xc1   :  { %v460_v27 = vmax.f32 %v390_v22, 0.0  ;;  %v353_v34 = vadd.f32 %v352_v25, %v7554_v0 }
  0xc2   :  { %1103 = vmatmul.bf16.gmra.mxu0 %v7605_v15  ;;  %v429_v43 = vmax.f32 %v264_v35, 0.0  ;;  %v6682_v35 = vld [vmem:[#allocation2 + $0x94] sm:$0xf0] }
  0xc3   :  { %v7616_v28 = vpack.c.bf16 %v460_v27, %v458_v20  ;;  %v430_v40 = vmax.f32 %v353_v34, 0.0  ;;  %v5695_v34 = vld [vmem:[#allocation2 + $0x88] sm:$0xf] }
  0xc5   :  { %v7634_v62 = vpop.f32.mrf.mxu2 }
  0xc6   :  { %v392_v36 = vpop.f32.mrf.mxu3 }
  0xc7   :  { %v265_v37 = vpop.f32.mrf.mxu0  ;;  %v393_v49 = vadd.f32 %v392_v36, %v7554_v0 }
  0xc8   :  { %v266_v38 = vadd.f32 %v265_v37, %v7556_v1  ;;  %v354_v39 = vpop.f32.mrf.mxu1  ;;  %v5696_v37 = vor.u32 %v6682_v35, %v5695_v34 }
  0xc9   :  { %v355_v41 = vadd.f32 %v354_v39, %v7554_v0  ;;  %v462_v57 = vmax.f32 %v393_v49, 0.0 }
  0xca   :  { %v431_v44 = vmax.f32 %v266_v38, 0.0  ;;  %1266 = vmatpush.bf16.msra.mxu2 %v5696_v37 }
  0xcb   :  { %v432_v45 = vmax.f32 %v355_v41, 0.0  ;;  %v5713_v41 = vld [vmem:[#allocation2 + $0xb8] sm:$0xf0] }
  0xcc   :  { %v7625_v50 = vpack.c.bf16 %v431_v44, %v429_v43 }
  0xcd   :  { %v7627_v51 = vpack.c.bf16 %v432_v45, %v430_v40  ;;  %v7647_v26 = vpop.f32.mrf.mxu2  ;;  %v6684_v40 = vld [vmem:[#allocation2 + $0xac] sm:$0xf] }
  0xce   :  { %930 = vmatmul.bf16.gmra.mxu2 %v7625_v50  ;;  %v394_v54 = vpop.f32.mrf.mxu3  ;;  %v5716_v43 = vor.u32 %v6684_v40, %v5713_v41 }
  0xcf   :  { %1019 = vmatmul.bf16.gmra.mxu3 %v7627_v51  ;;  %1197 = vmatmul.bf16.gmra.mxu1 %v7627_v51  ;;  %v268_v56 = vpop.f32.mrf.mxu0  ;;  %v395_v59 = vadd.f32 %v394_v54, %v7554_v0 }
  0xd0   :  { %v357_v60 = vpop.f32.mrf.mxu1  ;;  %v269_v8 = vadd.f32 %v268_v56, %v7556_v1  ;;  %1443 = vmatpush.bf16.msra.mxu0 %v5716_v43 }
  0xd1   :  { %v464_v61 = vmax.f32 %v395_v59, 0.0  ;;  %v358_v6 = vadd.f32 %v357_v60, %v7554_v0 }
  0xd2   :  { %1108 = vmatmul.bf16.gmra.mxu0 %v7625_v50  ;;  %v433_v17 = vmax.f32 %v269_v8, 0.0  ;;  %v6714_v8 = vld [vmem:[#allocation2 + $0x194] sm:$0xf0] }
  0xd3   :  { %v7636_v2 = vpack.c.bf16 %v464_v61, %v462_v57  ;;  %v434_v14 = vmax.f32 %v358_v6, 0.0  ;;  %v5823_v6 = vld [vmem:[#allocation2 + $0x188] sm:$0xf] }
  0xd5   :  { %v7658_v53 = vpop.f32.mrf.mxu2 }
  0xd6   :  { %v397_v9 = vpop.f32.mrf.mxu3 }
  0xd7   :  { %v270_v11 = vpop.f32.mrf.mxu0  ;;  %v398_v23 = vadd.f32 %v397_v9, %v7554_v0 }
  0xd8   :  { %v271_v12 = vadd.f32 %v270_v11, %v7556_v1  ;;  %v359_v13 = vpop.f32.mrf.mxu1  ;;  %v5824_v11 = vor.u32 %v6714_v8, %v5823_v6 }
  0xd9   :  { %v360_v16 = vadd.f32 %v359_v13, %v7554_v0  ;;  %v466_v32 = vmax.f32 %v398_v23, 0.0  ;;  %v5825_v23 = vld [vmem:[#allocation2 + $0x198] sm:$0xf0] }
  0xda   :  { %v435_v20 = vmax.f32 %v271_v12, 0.0  ;;  %1355 = vmatpush.bf16.msra.mxu3 %v5824_v11 }
  0xdb   :  { %v436_v22 = vmax.f32 %v360_v16, 0.0 }
  0xdc   :  { %v7643_v24 = vpack.c.bf16 %v435_v20, %v433_v17 }
  0xdd   :  { %v7645_v25 = vpack.c.bf16 %v436_v22, %v434_v14  ;;  %v7671_v17 = vpop.f32.mrf.mxu2  ;;  %v6712_v22 = vld [vmem:[#allocation2 + $0x18c] sm:$0xf] }
  0xde   :  { %935 = vmatmul.bf16.gmra.mxu2 %v7643_v24  ;;  %v399_v27 = vpop.f32.mrf.mxu3 }
  0xdf   :  { %1024 = vmatmul.bf16.gmra.mxu3 %v7645_v25  ;;  %1202 = vmatmul.bf16.gmra.mxu1 %v7645_v25  ;;  %v273_v31 = vpop.f32.mrf.mxu0  ;;  %v400_v33 = vadd.f32 %v399_v27, %v7554_v0 }
  0xe0   :  { %v362_v36 = vpop.f32.mrf.mxu1  ;;  %v274_v45 = vadd.f32 %v273_v31, %v7556_v1  ;;  %v5828_v31 = vor.u32 %v6712_v22, %v5825_v23 }
  0xe1   :  { %v468_v38 = vmax.f32 %v400_v33, 0.0  ;;  %v363_v44 = vadd.f32 %v362_v36, %v7554_v0 }
  0xe2   :  { %1113 = vmatmul.bf16.gmra.mxu0 %v7643_v24  ;;  %v437_v59 = vmax.f32 %v274_v45, 0.0  ;;  %1533 = vmatpush.bf16.msra.mxu1 %v5828_v31 }
  0xe3   :  { %v7654_v39 = vpack.c.bf16 %v468_v38, %v466_v32  ;;  %v438_v56 = vmax.f32 %v363_v44, 0.0 }
  0xe5   :  { %v7680_v45 = vpop.f32.mrf.mxu2 }
  0xe6   :  { %v402_v49 = vpop.f32.mrf.mxu3 }
  0xe7   :  { %v275_v52 = vpop.f32.mrf.mxu0  ;;  %v403_v3 = vadd.f32 %v402_v49, %v7554_v0 }
  0xe8   :  { %v276_v54 = vadd.f32 %v275_v52, %v7556_v1  ;;  %v364_v55 = vpop.f32.mrf.mxu1 }
  0xe9   :  { %v365_v57 = vadd.f32 %v364_v55, %v7554_v0  ;;  %v470_v13 = vmax.f32 %v403_v3, 0.0 }
  0xea   :  { %v439_v60 = vmax.f32 %v276_v54, 0.0 }
  0xeb   :  { %v440_v61 = vmax.f32 %v365_v57, 0.0 }
  0xec   :  { %v7663_v4 = vpack.c.bf16 %v439_v60, %v437_v59  ;;  %v5679_v60 = vld [vmem:[#allocation2 + $0x68] sm:$0xf] }
  0xed   :  { %v7665_v5 = vpack.c.bf16 %v440_v61, %v438_v56  ;;  %v6678_v61 = vld [vmem:[#allocation2 + $0x74] sm:$0xf0] }
  0xee   :  { %940 = vmatmul.bf16.gmra.mxu2 %v7663_v4  ;;  %v404_v9 = vpop.f32.mrf.mxu3  ;;  %v5680_v6 = vor.u32 %v6678_v61, %v5679_v60 }
  0xef   :  { %1029 = vmatmul.bf16.gmra.mxu3 %v7665_v5  ;;  %1207 = vmatmul.bf16.gmra.mxu1 %v7665_v5  ;;  %v278_v12 = vpop.f32.mrf.mxu0  ;;  %v405_v14 = vadd.f32 %v404_v9, %v7554_v0 }
  0xf0   :  { %v367_v16 = vpop.f32.mrf.mxu1  ;;  %v279_v33 = vadd.f32 %v278_v12, %v7556_v1  ;;  %1267 = vmatpush.bf16.msra.mxu2 %v5680_v6  ;;  %v7695_v12 = vpop.f32.mrf.mxu2 }
  0xf1   :  { %v472_v20 = vmax.f32 %v405_v14, 0.0  ;;  %v368_v32 = vadd.f32 %v367_v16, %v7554_v0  ;;  %v6680_v16 = vld [vmem:[#allocation2 + $0x8c] sm:$0xf] }
  0xf2   :  { %1118 = vmatmul.bf16.gmra.mxu0 %v7663_v4  ;;  %v441_v41 = vmax.f32 %v279_v33, 0.0 }
  0xf3   :  { %v7674_v27 = vpack.c.bf16 %v472_v20, %v470_v13  ;;  %v442_v38 = vmax.f32 %v368_v32, 0.0  ;;  %v5697_v20 = vld [vmem:[#allocation2 + $0x98] sm:$0xf0] }
  0xf4   :  { %v5700_v23 = vor.u32 %v6680_v16, %v5697_v20 }
  0xf6   :  { %v407_v34 = vpop.f32.mrf.mxu3  ;;  %1444 = vmatpush.bf16.msra.mxu0 %v5700_v23 }
  0xf7   :  { %v280_v35 = vpop.f32.mrf.mxu0  ;;  %v408_v49 = vadd.f32 %v407_v34, %v7554_v0 }
  0xf8   :  { %v281_v36 = vadd.f32 %v280_v35, %v7556_v1  ;;  %v369_v37 = vpop.f32.mrf.mxu1 }
  0xf9   :  { %v370_v40 = vadd.f32 %v369_v37, %v7554_v0  ;;  %v474_v57 = vmax.f32 %v408_v49, 0.0 }
  0xfa   :  { %v443_v43 = vmax.f32 %v281_v36, 0.0 }
  0xfb   :  { %v444_v44 = vmax.f32 %v370_v40, 0.0 }
  0xfc   :  { %v7683_v52 = vpack.c.bf16 %v443_v43, %v441_v41 }
  0xfd   :  { %v7685_v54 = vpack.c.bf16 %v444_v44, %v442_v38  ;;  %v7706_v44 = vpop.f32.mrf.mxu2 }
  0xfe   :  { %945 = vmatmul.bf16.gmra.mxu2 %v7683_v52  ;;  %v409_v55 = vpop.f32.mrf.mxu3 }
  0xff   :  { %1034 = vmatmul.bf16.gmra.mxu3 %v7685_v54  ;;  %1212 = vmatmul.bf16.gmra.mxu1 %v7685_v54  ;;  %v283_v56 = vpop.f32.mrf.mxu0  ;;  %v410_v59 = vadd.f32 %v409_v55, %v7554_v0 }
 0x100   :  { %v372_v3 = vpop.f32.mrf.mxu1  ;;  %v284_v13 = vadd.f32 %v283_v56, %v7556_v1 }
 0x101   :  { %v476_v8 = vmax.f32 %v410_v59, 0.0  ;;  %v373_v11 = vadd.f32 %v372_v3, %v7554_v0  ;;  %v6710_v59 = vld [vmem:[#allocation2 + $0x174] sm:$0xf0] }
 0x102   :  { %1123 = vmatmul.bf16.gmra.mxu0 %v7683_v52  ;;  %v445_v35 = vmax.f32 %v284_v13, 0.0 }
 0x103   :  { %v7692_v9 = vpack.c.bf16 %v476_v8, %v474_v57  ;;  %v446_v33 = vmax.f32 %v373_v11, 0.0  ;;  %v5807_v57 = vld [vmem:[#allocation2 + $0x168] sm:$0xf]  ;;  %v6708_v8 = vld [vmem:[#allocation2 + $0x16c] sm:$0xf] }
 0x104   :  { %v5808_v61 = vor.u32 %v6710_v59, %v5807_v57  ;;  %v5809_v11 = vld [vmem:[#allocation2 + $0x178] sm:$0xf0]  ;;  %v294_v59 = vadd.f32 %v7562_v10, %v7556_v1 }
 0x105   :  { %v7716_v20 = vpop.f32.mrf.mxu2 }
 0x106   :  { %v412_v14 = vpop.f32.mrf.mxu3  ;;  %1356 = vmatpush.bf16.msra.mxu3 %v5808_v61 }
 0x107   :  { %v285_v22 = vpop.f32.mrf.mxu0  ;;  %v413_v38 = vadd.f32 %v412_v14, %v7554_v0  ;;  %v5812_v14 = vor.u32 %v6708_v8, %v5809_v11  ;;  %v6676_v8 = vld [vmem:[#allocation2 + $0x6c] sm:$0xf]  ;;  %v5681_v11 = vld [vmem:[#allocation2 + $0x78] sm:$0xf0] }
 0x108   :  { %v286_v31 = vadd.f32 %v285_v22, %v7556_v1  ;;  %v374_v32 = vpop.f32.mrf.mxu1 }
 0x109   :  { %v375_v34 = vadd.f32 %v374_v32, %v7554_v0  ;;  %v478_v55 = vmax.f32 %v413_v38, 0.0  ;;  %1534 = vmatpush.bf16.msra.mxu1 %v5812_v14  ;;  %v6674_v38 = vld [vmem:[#allocation2 + $0x54] sm:$0xf0]  ;;  %v5684_v14 = vor.u32 %v6676_v8, %v5681_v11  ;;  %v5791_v8 = vld [vmem:[#allocation2 + $0x148] sm:$0xf] }
 0x10a   :  { %v447_v36 = vmax.f32 %v286_v31, 0.0 }
 0x10b   :  { %v448_v37 = vmax.f32 %v375_v34, 0.0  ;;  %1445 = vmatpush.bf16.msra.mxu0 %v5684_v14 }
 0x10c   :  { %v7701_v40 = vpack.c.bf16 %v447_v36, %v445_v35 }
 0x10d   :  { %v7703_v41 = vpack.c.bf16 %v448_v37, %v446_v33  ;;  %v5663_v37 = vld [vmem:[#allocation2 + $0x48] sm:$0xf] }
 0x10e   :  { %950 = vmatmul.bf16.gmra.mxu2 %v7701_v40  ;;  %v414_v43 = vpop.f32.mrf.mxu3 }
 0x10f   :  { %1039 = vmatmul.bf16.gmra.mxu3 %v7703_v41  ;;  %1217 = vmatmul.bf16.gmra.mxu1 %v7703_v41  ;;  %v288_v49 = vpop.f32.mrf.mxu0  ;;  %v415_v56 = vadd.f32 %v414_v43, %v7554_v0  ;;  %v577_v0 = vld [vmem:[%s9059_s4] sm:$0xf] }
 0x110   :  { %v289_v6 = vadd.f32 %v288_v49, %v7556_v1  ;;  %v7723_v33 = vperm.slane %v577_v0, 1  ;;  %v7726_v34 = vperm.slane %v577_v0, 0  ;;  %v5664_v49 = vor.u32 %v6674_v38, %v5663_v37 }
 0x111   :  { %v480_v60 = vmax.f32 %v415_v56, 0.0 }
 0x112   :  { %1128 = vmatmul.bf16.gmra.mxu0 %v7701_v40  ;;  %v449_v22 = vmax.f32 %v289_v6, 0.0  ;;  %1268 = vmatpush.bf16.msra.mxu2 %v5664_v49 }
 0x113   :  { %v7712_v3 = vpack.c.bf16 %v480_v60, %v478_v55  ;;  %v296_v60 = vadd.f32 %v7575_v29, %v7556_v1 }
 0x115   :  { %v455_v0 = vmax.f32 %v296_v60, 0.0 }
 0x117   :  { %v290_v13 = vpop.f32.mrf.mxu0 }
 0x118   :  { %v291_v16 = vadd.f32 %v290_v13, %v7556_v1 }
 0x11a   :  { %v451_v23 = vmax.f32 %v291_v16, 0.0  ;;  %v453_v16 = vmax.f32 %v294_v59, 0.0 }
 0x11c   :  { %v7721_v31 = vpack.c.bf16 %v451_v23, %v449_v22  ;;  %v1183_v32 = vpop.f32.mrf.mxu1  ;;  %v7739_v10 = vpack.c.bf16 %v455_v0, %v453_v16  ;;  %v299_v0 = vadd.f32 %v7585_v46, %v7556_v1 }
 0x11e   :  { %955 = vmatmul.bf16.gmra.mxu2 %v7721_v31 }
 0x11f   :  { %1044 = vmatmul.bf16.gmra.mxu3 %v7578_v30  ;;  %1222 = vmatmul.bf16.gmra.mxu1 %v7578_v30  ;;  %v1094_v35 = vpop.f32.mrf.mxu0 }
 0x120   :  { %v1095_v36 = vadd.f32 %v1094_v35, %v7723_v33 }
 0x121   :  { %v916_v43 = vpop.f32.mrf.mxu2 }
 0x122   :  { %v1184_v55 = vadd.f32 %v1183_v32, %v1095_v36  ;;  %v917_v56 = vadd.f32 %v916_v43, %v7726_v34  ;;  %v1005_v57 = vpop.f32.mrf.mxu3  ;;  %1133 = vmatmul.bf16.gmra.mxu0 %v7721_v31 }
 0x124   :  { %v1006_v61 = vadd.f32 %v1005_v57, %v917_v56  ;;  %v1185_v6 = vpop.f32.mrf.mxu1  ;;  %v1620_v37 = vmax.f32 %v1184_v55, 0.0  ;;  %v6706_v55 = vld [vmem:[#allocation2 + $0x154] sm:$0xf0] }
 0x126   :  { %v1619_v49 = vmax.f32 %v1006_v61, 0.0 }
 0x127   :  { %v1096_v13 = vpop.f32.mrf.mxu0 }
 0x128   :  { %v1097_v22 = vadd.f32 %v1096_v13, %v7723_v33  ;;  %v5792_v13 = vor.u32 %v6706_v55, %v5791_v8 }
 0x129   :  { %v918_v23 = vpop.f32.mrf.mxu2 }
 0x12a   :  { %v1186_v32 = vadd.f32 %v1185_v6, %v1097_v22  ;;  %v919_v35 = vadd.f32 %v918_v23, %v7726_v34  ;;  %v1007_v36 = vpop.f32.mrf.mxu3  ;;  %1357 = vmatpush.bf16.msra.mxu3 %v5792_v13  ;;  %v301_v22 = vadd.f32 %v7599_v63, %v7556_v1 }
 0x12c   :  { %v1624_v29 = vmax.f32 %v1186_v32, 0.0  ;;  %v1008_v38 = vadd.f32 %v1007_v36, %v919_v35  ;;  %v1188_v43 = vpop.f32.mrf.mxu1  ;;  %v6704_v35 = vld [vmem:[#allocation2 + $0x14c] sm:$0xf]  ;;  %v5793_v36 = vld [vmem:[#allocation2 + $0x158] sm:$0xf0] }
 0x12e   :  { %v7741_v56 = vpack.c.bf16 %v1624_v29, %v1620_v37  ;;  %v1623_v57 = vmax.f32 %v1008_v38, 0.0  ;;  %960 = vmatmul.bf16.gmra.mxu2 %v7739_v10  ;;  %v5796_v29 = vor.u32 %v6704_v35, %v5793_v36  ;;  %v457_v38 = vmax.f32 %v299_v0, 0.0  ;;  %v5647_v36 = vld [vmem:[#allocation2 + $0x28] sm:$0xf] }
 0x12f   :  { %1049 = vmatmul.bf16.gmra.mxu3 %v7596_v58  ;;  %1227 = vmatmul.bf16.gmra.mxu1 %v7596_v58  ;;  %v1099_v59 = vpop.f32.mrf.mxu0 }
 0x130   :  { %v7746_v60 = vpack.c.bf16 %v1623_v57, %v1619_v49  ;;  %v1100_v6 = vadd.f32 %v1099_v59, %v7723_v33  ;;  %1535 = vmatpush.bf16.msra.mxu1 %v5796_v29 }
 0x131   :  { %v921_v11 = vpop.f32.mrf.mxu2 }
 0x132   :  { %v1189_v14 = vadd.f32 %v1188_v43, %v1100_v6  ;;  %v922_v61 = vadd.f32 %v921_v11, %v7726_v34  ;;  %v1010_v16 = vpop.f32.mrf.mxu3  ;;  %1138 = vmatmul.bf16.gmra.mxu0 %v7739_v10  ;;  %v459_v43 = vmax.f32 %v301_v22, 0.0 }
 0x134   :  { %v1011_v23 = vadd.f32 %v1010_v16, %v922_v61  ;;  %v1190_v32 = vpop.f32.mrf.mxu1  ;;  %v7757_v46 = vpack.c.bf16 %v459_v43, %v457_v38  ;;  %v1628_v55 = vmax.f32 %v1189_v14, 0.0  ;;  %v6670_v14 = vld [vmem:[#allocation2 + $0x34] sm:$0xf0] }
 0x135   :  { %v5648_v29 = vor.u32 %v6670_v14, %v5647_v36 }
 0x136   :  { %v1627_v61 = vmax.f32 %v1011_v23, 0.0 }
 0x137   :  { %v1101_v37 = vpop.f32.mrf.mxu0  ;;  %1269 = vmatpush.bf16.msra.mxu2 %v5648_v29 }
 0x138   :  { %v1102_v49 = vadd.f32 %v1101_v37, %v7723_v33 }
 0x139   :  { %v923_v57 = vpop.f32.mrf.mxu2 }
 0x13a   :  { %v1191_v59 = vadd.f32 %v1190_v32, %v1102_v49  ;;  %v924_v6 = vadd.f32 %v923_v57, %v7726_v34  ;;  %v1012_v8 = vpop.f32.mrf.mxu3  ;;  %v304_v49 = vadd.f32 %v7612_v21, %v7556_v1  ;;  %v306_v57 = vadd.f32 %v7622_v42, %v7556_v1 }
 0x13c   :  { %v1632_v63 = vmax.f32 %v1191_v59, 0.0  ;;  %v1013_v11 = vadd.f32 %v1012_v8, %v924_v6  ;;  %v1193_v13 = vpop.f32.mrf.mxu1  ;;  %v6672_v8 = vld [vmem:[#allocation2 + $0x4c] sm:$0xf] }
 0x13e   :  { %v7759_v16 = vpack.c.bf16 %v1632_v63, %v1628_v55  ;;  %v1631_v35 = vmax.f32 %v1013_v11, 0.0  ;;  %965 = vmatmul.bf16.gmra.mxu2 %v7757_v46  ;;  %v5665_v55 = vld [vmem:[#allocation2 + $0x58] sm:$0xf0] }
 0x13f   :  { %1054 = vmatmul.bf16.gmra.mxu3 %v7616_v28  ;;  %1232 = vmatmul.bf16.gmra.mxu1 %v7616_v28  ;;  %v1104_v0 = vpop.f32.mrf.mxu0  ;;  %v5668_v11 = vor.u32 %v6672_v8, %v5665_v55  ;;  %v5775_v55 = vld [vmem:[#allocation2 + $0x128] sm:$0xf] }
 0x140   :  { %9165 = vst [vmem:[#allocation11_spill] sm:$0xff] %v7759_v16  ;;  %v7764_v22 = vpack.c.bf16 %v1631_v35, %v1627_v61  ;;  %v1105_v32 = vadd.f32 %v1104_v0, %v7723_v33  ;;  %v461_v61 = vmax.f32 %v304_v49, 0.0 }
 0x141   :  { %v926_v37 = vpop.f32.mrf.mxu2  ;;  %1446 = vmatpush.bf16.msra.mxu0 %v5668_v11 }
 0x142   :  { %9166 = vst [vmem:[#allocation12_spill] sm:$0xff] %v7764_v22  ;;  %v1194_v38 = vadd.f32 %v1193_v13, %v1105_v32  ;;  %v927_v23 = vadd.f32 %v926_v37, %v7726_v34  ;;  %v1015_v43 = vpop.f32.mrf.mxu3  ;;  %1143 = vmatmul.bf16.gmra.mxu0 %v7757_v46  ;;  %v463_v13 = vmax.f32 %v306_v57, 0.0 }
 0x144   :  { %v1016_v59 = vadd.f32 %v1015_v43, %v927_v23  ;;  %v1195_v6 = vpop.f32.mrf.mxu1  ;;  %v7775_v21 = vpack.c.bf16 %v463_v13, %v461_v61  ;;  %v1636_v37 = vmax.f32 %v1194_v38, 0.0  ;;  %v6702_v38 = vld [vmem:[#allocation2 + $0x134] sm:$0xf0] }
 0x145   :  { %v5776_v11 = vor.u32 %v6702_v38, %v5775_v55 }
 0x146   :  { %v1635_v43 = vmax.f32 %v1016_v59, 0.0 }
 0x147   :  { %v1106_v63 = vpop.f32.mrf.mxu0  ;;  %1358 = vmatpush.bf16.msra.mxu3 %v5776_v11 }
 0x148   :  { %v1107_v35 = vadd.f32 %v1106_v63, %v7723_v33 }
 0x149   :  { %v928_v0 = vpop.f32.mrf.mxu2 }
 0x14a   :  { %v1196_v32 = vadd.f32 %v1195_v6, %v1107_v35  ;;  %v929_v36 = vadd.f32 %v928_v0, %v7726_v34  ;;  %v1017_v14 = vpop.f32.mrf.mxu3  ;;  %v309_v35 = vadd.f32 %v7634_v62, %v7556_v1  ;;  %v311_v0 = vadd.f32 %v7647_v26, %v7556_v1 }
 0x14c   :  { %v1640_v42 = vmax.f32 %v1196_v32, 0.0  ;;  %v1018_v29 = vadd.f32 %v1017_v14, %v929_v36  ;;  %v1198_v23 = vpop.f32.mrf.mxu1  ;;  %v6700_v14 = vld [vmem:[#allocation2 + $0x12c] sm:$0xf] }
 0x14e   :  { %v7777_v16 = vpack.c.bf16 %v1640_v42, %v1636_v37  ;;  %v1639_v8 = vmax.f32 %v1018_v29, 0.0  ;;  %970 = vmatmul.bf16.gmra.mxu2 %v7775_v21  ;;  %v5777_v37 = vld [vmem:[#allocation2 + $0x138] sm:$0xf0] }
 0x14f   :  { %1059 = vmatmul.bf16.gmra.mxu3 %v7636_v2  ;;  %1237 = vmatmul.bf16.gmra.mxu1 %v7636_v2  ;;  %v1109_v49 = vpop.f32.mrf.mxu0  ;;  %v5780_v29 = vor.u32 %v6700_v14, %v5777_v37  ;;  %v5631_v37 = vld [vmem:[#allocation2 + $0x8] sm:$0xf] }
 0x150   :  { %9167 = vst [vmem:[#allocation13_spill] sm:$0xff] %v7777_v16  ;;  %v7782_v57 = vpack.c.bf16 %v1639_v8, %v1635_v43  ;;  %v1110_v6 = vadd.f32 %v1109_v49, %v7723_v33  ;;  %v465_v43 = vmax.f32 %v309_v35, 0.0 }
 0x151   :  { %v931_v63 = vpop.f32.mrf.mxu2  ;;  %1536 = vmatpush.bf16.msra.mxu1 %v5780_v29 }
 0x152   :  { %9168 = vst [vmem:[#allocation14_spill] sm:$0xff] %v7782_v57  ;;  %v1199_v61 = vadd.f32 %v1198_v23, %v1110_v6  ;;  %v932_v59 = vadd.f32 %v931_v63, %v7726_v34  ;;  %v1020_v13 = vpop.f32.mrf.mxu3  ;;  %1148 = vmatmul.bf16.gmra.mxu0 %v7775_v21  ;;  %v467_v23 = vmax.f32 %v311_v0, 0.0 }
 0x154   :  { %v1021_v32 = vadd.f32 %v1020_v13, %v932_v59  ;;  %v1200_v36 = vpop.f32.mrf.mxu1  ;;  %v7793_v62 = vpack.c.bf16 %v467_v23, %v465_v43  ;;  %v1644_v63 = vmax.f32 %v1199_v61, 0.0  ;;  %v6666_v61 = vld [vmem:[#allocation2 + $0x14] sm:$0xf0] }
 0x155   :  { %v5632_v29 = vor.u32 %v6666_v61, %v5631_v37 }
 0x156   :  { %v1643_v13 = vmax.f32 %v1021_v32, 0.0 }
 0x157   :  { %v1111_v42 = vpop.f32.mrf.mxu0  ;;  %1270 = vmatpush.bf16.msra.mxu2 %v5632_v29 }
 0x158   :  { %v1112_v8 = vadd.f32 %v1111_v42, %v7723_v33 }
 0x159   :  { %v933_v49 = vpop.f32.mrf.mxu2 }
 0x15a   :  { %v1201_v6 = vadd.f32 %v1200_v36, %v1112_v8  ;;  %v934_v55 = vadd.f32 %v933_v49, %v7726_v34  ;;  %v1022_v38 = vpop.f32.mrf.mxu3  ;;  %v314_v8 = vadd.f32 %v7658_v53, %v7556_v1  ;;  %v316_v49 = vadd.f32 %v7671_v17, %v7556_v1 }
 0x15c   :  { %v1648_v26 = vmax.f32 %v1201_v6, 0.0  ;;  %v1023_v11 = vadd.f32 %v1022_v38, %v934_v55  ;;  %v1203_v59 = vpop.f32.mrf.mxu1  ;;  %v6668_v38 = vld [vmem:[#allocation2 + $0x2c] sm:$0xf] }
 0x15e   :  { %v7795_v16 = vpack.c.bf16 %v1648_v26, %v1644_v63  ;;  %v1647_v14 = vmax.f32 %v1023_v11, 0.0  ;;  %975 = vmatmul.bf16.gmra.mxu2 %v7793_v62  ;;  %v5649_v63 = vld [vmem:[#allocation2 + $0x38] sm:$0xf0] }
 0x15f   :  { %1064 = vmatmul.bf16.gmra.mxu3 %v7654_v39  ;;  %1242 = vmatmul.bf16.gmra.mxu1 %v7654_v39  ;;  %v1114_v35 = vpop.f32.mrf.mxu0  ;;  %v5652_v11 = vor.u32 %v6668_v38, %v5649_v63  ;;  %v5759_v63 = vld [vmem:[#allocation2 + $0x108] sm:$0xf] }
 0x160   :  { %9169 = vst [vmem:[#allocation15_spill] sm:$0xff] %v7795_v16  ;;  %v7800_v0 = vpack.c.bf16 %v1647_v14, %v1643_v13  ;;  %v1115_v36 = vadd.f32 %v1114_v35, %v7723_v33  ;;  %v469_v13 = vmax.f32 %v314_v8, 0.0 }
 0x161   :  { %v936_v42 = vpop.f32.mrf.mxu2  ;;  %1447 = vmatpush.bf16.msra.mxu0 %v5652_v11 }
 0x162   :  { %9170 = vst [vmem:[#allocation16_spill] sm:$0xff] %v7800_v0  ;;  %v1204_v43 = vadd.f32 %v1203_v59, %v1115_v36  ;;  %v937_v32 = vadd.f32 %v936_v42, %v7726_v34  ;;  %v1025_v23 = vpop.f32.mrf.mxu3  ;;  %1153 = vmatmul.bf16.gmra.mxu0 %v7793_v62  ;;  %v471_v59 = vmax.f32 %v316_v49, 0.0 }
 0x164   :  { %v1026_v6 = vadd.f32 %v1025_v23, %v937_v32  ;;  %v1205_v55 = vpop.f32.mrf.mxu1  ;;  %v7811_v53 = vpack.c.bf16 %v471_v59, %v469_v13  ;;  %v1652_v42 = vmax.f32 %v1204_v43, 0.0  ;;  %v6698_v43 = vld [vmem:[#allocation2 + $0x114] sm:$0xf0] }
 0x165   :  { %v5760_v11 = vor.u32 %v6698_v43, %v5759_v63 }
 0x166   :  { %v1651_v23 = vmax.f32 %v1026_v6, 0.0 }
 0x167   :  { %v1116_v26 = vpop.f32.mrf.mxu0  ;;  %1359 = vmatpush.bf16.msra.mxu3 %v5760_v11 }
 0x168   :  { %v1117_v14 = vadd.f32 %v1116_v26, %v7723_v33 }
 0x169   :  { %v938_v35 = vpop.f32.mrf.mxu2 }
 0x16a   :  { %v1206_v36 = vadd.f32 %v1205_v55, %v1117_v14  ;;  %v939_v37 = vadd.f32 %v938_v35, %v7726_v34  ;;  %v1027_v61 = vpop.f32.mrf.mxu3  ;;  %v319_v14 = vadd.f32 %v7680_v45, %v7556_v1  ;;  %v321_v35 = vadd.f32 %v7695_v12, %v7556_v1 }
 0x16c   :  { %v1656_v17 = vmax.f32 %v1206_v36, 0.0  ;;  %v1028_v29 = vadd.f32 %v1027_v61, %v939_v37  ;;  %v1208_v32 = vpop.f32.mrf.mxu1  ;;  %v6696_v61 = vld [vmem:[#allocation2 + $0x10c] sm:$0xf] }
 0x16e   :  { %v7813_v16 = vpack.c.bf16 %v1656_v17, %v1652_v42  ;;  %v1655_v38 = vmax.f32 %v1028_v29, 0.0  ;;  %980 = vmatmul.bf16.gmra.mxu2 %v7811_v53  ;;  %v5761_v42 = vld [vmem:[#allocation2 + $0x118] sm:$0xf0] }
 0x16f   :  { %1069 = vmatmul.bf16.gmra.mxu3 %v7674_v27  ;;  %1247 = vmatmul.bf16.gmra.mxu1 %v7674_v27  ;;  %v1119_v8 = vpop.f32.mrf.mxu0  ;;  %v5764_v29 = vor.u32 %v6696_v61, %v5761_v42 }
 0x170   :  { %9171 = vst [vmem:[#allocation17_spill] sm:$0xff] %v7813_v16  ;;  %v7818_v49 = vpack.c.bf16 %v1655_v38, %v1651_v23  ;;  %v1120_v55 = vadd.f32 %v1119_v8, %v7723_v33  ;;  %v473_v23 = vmax.f32 %v319_v14, 0.0  ;;  %v5633_v16 = vld [vmem:[#allocation2 + $0x18] sm:$0xf0] }
 0x171   :  { %v941_v26 = vpop.f32.mrf.mxu2  ;;  %1537 = vmatpush.bf16.msra.mxu1 %v5764_v29  ;;  %v6772_v29 = vld [vmem:[#allocation5 + $0x164] sm:$0xf0] }
 0x172   :  { %9172 = vst [vmem:[#allocation18_spill] sm:$0xff] %v7818_v49  ;;  %v1209_v13 = vadd.f32 %v1208_v32, %v1120_v55  ;;  %v942_v6 = vadd.f32 %v941_v26, %v7726_v34  ;;  %v1030_v59 = vpop.f32.mrf.mxu3  ;;  %1158 = vmatmul.bf16.gmra.mxu0 %v7811_v53  ;;  %v475_v32 = vmax.f32 %v321_v35, 0.0 }
 0x174   :  { %v1031_v36 = vadd.f32 %v1030_v59, %v942_v6  ;;  %v1210_v37 = vpop.f32.mrf.mxu1  ;;  %v7829_v45 = vpack.c.bf16 %v475_v32, %v473_v23  ;;  %v1660_v26 = vmax.f32 %v1209_v13, 0.0  ;;  %v6664_v59 = vld [vmem:[#allocation2 + $0xc] sm:$0xf] }
 0x175   :  { %v5636_v35 = vor.u32 %v6664_v59, %v5633_v16  ;;  %v324_v16 = vadd.f32 %v7706_v44, %v7556_v1 }
 0x176   :  { %v1659_v49 = vmax.f32 %v1031_v36, 0.0 }
 0x177   :  { %v1121_v17 = vpop.f32.mrf.mxu0  ;;  %1448 = vmatpush.bf16.msra.mxu0 %v5636_v35 }
 0x178   :  { %v1122_v38 = vadd.f32 %v1121_v17, %v7723_v33  ;;  %v6047_v17 = vld [vmem:[#allocation5 + $0x150] sm:$0xf] }
 0x179   :  { %v943_v8 = vpop.f32.mrf.mxu2  ;;  %v6048_v36 = vor.u32 %v6772_v29, %v6047_v17 }
 0x17a   :  { %v1211_v55 = vadd.f32 %v1210_v37, %v1122_v38  ;;  %v944_v63 = vadd.f32 %v943_v8, %v7726_v34  ;;  %v1032_v43 = vpop.f32.mrf.mxu3 }
 0x17b   :  { %2977 = vmatpush.bf16.msrb.mxu2 %v6048_v36 }
 0x17c   :  { %v1664_v12 = vmax.f32 %v1211_v55, 0.0  ;;  %v1033_v11 = vadd.f32 %v1032_v43, %v944_v63  ;;  %v1213_v6 = vpop.f32.mrf.mxu1 }
 0x17e   :  { %v7831_v61 = vpack.c.bf16 %v1664_v12, %v1660_v26  ;;  %v1663_v14 = vmax.f32 %v1033_v11, 0.0  ;;  %985 = vmatmul.bf16.gmra.mxu2 %v7829_v45  ;;  %v477_v26 = vmax.f32 %v324_v16, 0.0  ;;  %v6239_v16 = vld [vmem:[#allocation5 + $0x2d0] sm:$0xf] }
 0x17f   :  { %1074 = vmatmul.bf16.gmra.mxu3 %v7692_v9  ;;  %1252 = vmatmul.bf16.gmra.mxu1 %v7692_v9  ;;  %v1124_v37 = vpop.f32.mrf.mxu0 }
 0x180   :  { %9173 = vst [vmem:[#allocation19_spill] sm:$0xff] %v7831_v61  ;;  %v7836_v42 = vpack.c.bf16 %v1663_v14, %v1659_v49  ;;  %v1125_v13 = vadd.f32 %v1124_v37, %v7723_v33  ;;  %v326_v49 = vadd.f32 %v7716_v20, %v7556_v1 }
 0x181   :  { %v946_v23 = vpop.f32.mrf.mxu2 }
 0x182   :  { %v1214_v32 = vadd.f32 %v1213_v6, %v1125_v13  ;;  %v947_v38 = vadd.f32 %v946_v23, %v7726_v34  ;;  %v1035_v8 = vpop.f32.mrf.mxu3  ;;  %1163 = vmatmul.bf16.gmra.mxu0 %v7829_v45  ;;  %v479_v12 = vmax.f32 %v326_v49, 0.0 }
 0x184   :  { %v1036_v55 = vadd.f32 %v1035_v8, %v947_v38  ;;  %v1215_v63 = vpop.f32.mrf.mxu1  ;;  %v7847_v37 = vpack.c.bf16 %v479_v12, %v477_v26  ;;  %v1668_v13 = vmax.f32 %v1214_v32, 0.0  ;;  %v6820_v32 = vld [vmem:[#allocation5 + $0x2e4] sm:$0xf0] }
 0x186   :  { %v1667_v23 = vmax.f32 %v1036_v55, 0.0 }
 0x187   :  { %v1126_v43 = vpop.f32.mrf.mxu0 }
 0x188   :  { %v1127_v11 = vadd.f32 %v1126_v43, %v7723_v33 }
 0x189   :  { %v948_v6 = vpop.f32.mrf.mxu2 }
 0x18a   :  { %v1216_v59 = vadd.f32 %v1215_v63, %v1127_v11  ;;  %v949_v14 = vadd.f32 %v948_v6, %v7726_v34  ;;  %v1037_v35 = vpop.f32.mrf.mxu3  ;;  %v6240_v63 = vor.u32 %v6820_v32, %v6239_v16  ;;  %v6623_v6 = vld [vmem:[#allocation5 + $0x5d0] sm:$0xf] }
 0x18c   :  { %v1672_v17 = vmax.f32 %v1216_v59, 0.0  ;;  %v1038_v44 = vadd.f32 %v1037_v35, %v949_v14  ;;  %v1218_v29 = vpop.f32.mrf.mxu1  ;;  %3066 = vmatpush.bf16.msrb.mxu3 %v6240_v63  ;;  %v6916_v59 = vld [vmem:[#allocation5 + $0x5e4] sm:$0xf0] }
 0x18d   :  { %v6624_v35 = vor.u32 %v6916_v59, %v6623_v6  ;;  %v6023_v6 = vld [vmem:[#allocation5 + $0x120] sm:$0xf] }
 0x18e   :  { %v7849_v1 = vpack.c.bf16 %v1672_v17, %v1668_v13  ;;  %v1671_v20 = vmax.f32 %v1038_v44, 0.0  ;;  %990 = vmatmul.bf16.gmra.mxu2 %v7847_v37 }
 0x18f   :  { %1079 = vmatmul.bf16.gmra.mxu3 %v7712_v3  ;;  %1257 = vmatmul.bf16.gmra.mxu1 %v7712_v3  ;;  %v1129_v36 = vpop.f32.mrf.mxu0 }
 0x190   :  { %9174 = vst [vmem:[#allocation20_spill] sm:$0xff] %v7849_v1  ;;  %v7854_v38 = vpack.c.bf16 %v1671_v20, %v1667_v23  ;;  %v1130_v8 = vadd.f32 %v1129_v36, %v7723_v33  ;;  %3244 = vmatpush.bf16.msrb.mxu1 %v6624_v35 }
 0x191   :  { %v951_v49 = vpop.f32.mrf.mxu2 }
 0x192   :  { %9175 = vst [vmem:[#allocation21_spill] sm:$0xff] %v7854_v38  ;;  %v1219_v43 = vadd.f32 %v1218_v29, %v1130_v8  ;;  %v952_v55 = vadd.f32 %v951_v49, %v7726_v34  ;;  %v1040_v26 = vpop.f32.mrf.mxu3  ;;  %1168 = vmatmul.bf16.gmra.mxu0 %v7847_v37 }
 0x194   :  { %v1041_v12 = vadd.f32 %v1040_v26, %v952_v55  ;;  %v1220_v11 = vpop.f32.mrf.mxu1  ;;  %v1676_v20 = vmax.f32 %v1219_v43, 0.0  ;;  %v6766_v43 = vld [vmem:[#allocation5 + $0x134] sm:$0xf0] }
 0x196   :  { %v1675_v32 = vmax.f32 %v1041_v12, 0.0 }
 0x197   :  { %v1131_v14 = vpop.f32.mrf.mxu0 }
 0x198   :  { %v1132_v13 = vadd.f32 %v1131_v14, %v7723_v33  ;;  %v6024_v14 = vor.u32 %v6766_v43, %v6023_v6 }
 0x199   :  { %v953_v17 = vpop.f32.mrf.mxu2 }
 0x19a   :  { %v1221_v44 = vadd.f32 %v1220_v11, %v1132_v13  ;;  %v954_v23 = vadd.f32 %v953_v17, %v7726_v34  ;;  %v1042_v29 = vpop.f32.mrf.mxu3  ;;  %2978 = vmatpush.bf16.msrb.mxu2 %v6024_v14 }
 0x19c   :  { %v1680_v36 = vmax.f32 %v1221_v44, 0.0  ;;  %v1043_v8 = vadd.f32 %v1042_v29, %v954_v23  ;;  %v1223_v16 = vpop.f32.mrf.mxu1  ;;  %v6431_v23 = vld [vmem:[#allocation5 + $0x450] sm:$0xf] }
 0x19e   :  { %v7861_v49 = vpack.c.bf16 %v1680_v36, %v1676_v20  ;;  %v1679_v63 = vmax.f32 %v1043_v8, 0.0  ;;  %1271 = vmatmul.bf16.vlgmr.msra.gmra.mxu2 %v7567_v18 }
 0x19f   :  { %1360 = vmatmul.bf16.vlgmr.msra.gmra.mxu3 %v7569_v19  ;;  %1538 = vmatmul.bf16.vlgmr.msra.gmra.mxu1 %v7569_v19  ;;  %v1134_v55 = vpop.f32.mrf.mxu0  ;;  %v6868_v19 = vld [vmem:[#allocation5 + $0x464] sm:$0xf0] }
 0x1a0   :  { %9176 = vst [vmem:[#allocation22_spill] sm:$0xff] %v7861_v49  ;;  %v7866_v26 = vpack.c.bf16 %v1679_v63, %v1675_v32  ;;  %v1135_v11 = vadd.f32 %v1134_v55, %v7723_v33  ;;  %v6432_v20 = vor.u32 %v6868_v19, %v6431_v23  ;;  %v6215_v23 = vld [vmem:[#allocation5 + $0x2a0] sm:$0xf] }
 0x1a1   :  { %v956_v59 = vpop.f32.mrf.mxu2 }
 0x1a2   :  { %9177 = vst [vmem:[#allocation23_spill] sm:$0xff] %v7866_v26  ;;  %v1224_v35 = vadd.f32 %v1223_v16, %v1135_v11  ;;  %v957_v12 = vadd.f32 %v956_v59, %v7726_v34  ;;  %v1045_v13 = vpop.f32.mrf.mxu3  ;;  %1449 = vmatmul.bf16.vlgmr.msra.gmra.mxu0 %v7567_v18 }
 0x1a3   :  { %3155 = vmatpush.bf16.msrb.mxu0 %v6432_v20 }
 0x1a4   :  { %v1046_v17 = vadd.f32 %v1045_v13, %v957_v12  ;;  %v1225_v44 = vpop.f32.mrf.mxu1  ;;  %v1684_v55 = vmax.f32 %v1224_v35, 0.0  ;;  %v6814_v35 = vld [vmem:[#allocation5 + $0x2b4] sm:$0xf0] }
 0x1a6   :  { %v1683_v18 = vmax.f32 %v1046_v17, 0.0 }
 0x1a7   :  { %v1136_v29 = vpop.f32.mrf.mxu0 }
 0x1a8   :  { %v1137_v36 = vadd.f32 %v1136_v29, %v7723_v33  ;;  %v6216_v29 = vor.u32 %v6814_v35, %v6215_v23 }
 0x1a9   :  { %v958_v8 = vpop.f32.mrf.mxu2 }
 0x1aa   :  { %v1226_v32 = vadd.f32 %v1225_v44, %v1137_v36  ;;  %v959_v63 = vadd.f32 %v958_v8, %v7726_v34  ;;  %v1047_v16 = vpop.f32.mrf.mxu3  ;;  %3067 = vmatpush.bf16.msrb.mxu3 %v6216_v29 }
 0x1ac   :  { %v1688_v11 = vmax.f32 %v1226_v32, 0.0  ;;  %v1048_v6 = vadd.f32 %v1047_v16, %v959_v63  ;;  %v1228_v43 = vpop.f32.mrf.mxu1  ;;  %v6599_v63 = vld [vmem:[#allocation5 + $0x5a0] sm:$0xf] }
 0x1ae   :  { %v7873_v59 = vpack.c.bf16 %v1688_v11, %v1684_v55  ;;  %v1687_v14 = vmax.f32 %v1048_v6, 0.0  ;;  %1276 = vmatmul.bf16.gmra.mxu2 %v7587_v47 }
 0x1af   :  { %1365 = vmatmul.bf16.gmra.mxu3 %v7589_v48  ;;  %1543 = vmatmul.bf16.gmra.mxu1 %v7589_v48  ;;  %v1139_v12 = vpop.f32.mrf.mxu0  ;;  %v6910_v48 = vld [vmem:[#allocation5 + $0x5b4] sm:$0xf0] }
 0x1b0   :  { %9178 = vst [vmem:[#allocation24_spill] sm:$0xff] %v7873_v59  ;;  %v7878_v13 = vpack.c.bf16 %v1687_v14, %v1683_v18  ;;  %v1140_v44 = vadd.f32 %v1139_v12, %v7723_v33  ;;  %v6600_v55 = vor.u32 %v6910_v48, %v6599_v63  ;;  %v5999_v63 = vld [vmem:[#allocation5 + $0xf0] sm:$0xf] }
 0x1b1   :  { %v961_v19 = vpop.f32.mrf.mxu2 }
 0x1b2   :  { %9179 = vst [vmem:[#allocation25_spill] sm:$0xff] %v7878_v13  ;;  %v1229_v20 = vadd.f32 %v1228_v43, %v1140_v44  ;;  %v962_v17 = vadd.f32 %v961_v19, %v7726_v34  ;;  %v1050_v36 = vpop.f32.mrf.mxu3  ;;  %1454 = vmatmul.bf16.gmra.mxu0 %v7587_v47  ;;  %3245 = vmatpush.bf16.msrb.mxu1 %v6600_v55 }
 0x1b4   :  { %v1051_v8 = vadd.f32 %v1050_v36, %v962_v17  ;;  %v1230_v32 = vpop.f32.mrf.mxu1  ;;  %v1692_v12 = vmax.f32 %v1229_v20, 0.0  ;;  %v6760_v20 = vld [vmem:[#allocation5 + $0x104] sm:$0xf0] }
 0x1b6   :  { %v1691_v47 = vmax.f32 %v1051_v8, 0.0 }
 0x1b7   :  { %v1141_v16 = vpop.f32.mrf.mxu0 }
 0x1b8   :  { %v1142_v11 = vadd.f32 %v1141_v16, %v7723_v33  ;;  %v6000_v16 = vor.u32 %v6760_v20, %v5999_v63 }
 0x1b9   :  { %v963_v6 = vpop.f32.mrf.mxu2 }
 0x1ba   :  { %v1231_v18 = vadd.f32 %v1230_v32, %v1142_v11  ;;  %v964_v14 = vadd.f32 %v963_v6, %v7726_v34  ;;  %v1052_v43 = vpop.f32.mrf.mxu3  ;;  %2979 = vmatpush.bf16.msrb.mxu2 %v6000_v16 }
 0x1bc   :  { %v1696_v44 = vmax.f32 %v1231_v18, 0.0  ;;  %v1053_v23 = vadd.f32 %v1052_v43, %v964_v14  ;;  %v1233_v35 = vpop.f32.mrf.mxu1  ;;  %v6407_v14 = vld [vmem:[#allocation5 + $0x420] sm:$0xf] }
 0x1be   :  { %v7885_v19 = vpack.c.bf16 %v1696_v44, %v1692_v12  ;;  %v1695_v29 = vmax.f32 %v1053_v23, 0.0  ;;  %1281 = vmatmul.bf16.gmra.mxu2 %v7605_v15 }
 0x1bf   :  { %1370 = vmatmul.bf16.gmra.mxu3 %v7607_v7  ;;  %1548 = vmatmul.bf16.gmra.mxu1 %v7607_v7  ;;  %v1144_v17 = vpop.f32.mrf.mxu0  ;;  %v6862_v7 = vld [vmem:[#allocation5 + $0x434] sm:$0xf0] }
 0x1c0   :  { %v7890_v36 = vpack.c.bf16 %v1695_v29, %v1691_v47  ;;  %v1145_v32 = vadd.f32 %v1144_v17, %v7723_v33  ;;  %v6408_v12 = vor.u32 %v6862_v7, %v6407_v14  ;;  %v6191_v14 = vld [vmem:[#allocation5 + $0x270] sm:$0xf] }
 0x1c1   :  { %v966_v48 = vpop.f32.mrf.mxu2 }
 0x1c2   :  { %v1234_v55 = vadd.f32 %v1233_v35, %v1145_v32  ;;  %v967_v8 = vadd.f32 %v966_v48, %v7726_v34  ;;  %v1055_v11 = vpop.f32.mrf.mxu3  ;;  %1459 = vmatmul.bf16.gmra.mxu0 %v7605_v15 }
 0x1c3   :  { %3156 = vmatpush.bf16.msrb.mxu0 %v6408_v12 }
 0x1c4   :  { %v1056_v6 = vadd.f32 %v1055_v11, %v967_v8  ;;  %v1235_v18 = vpop.f32.mrf.mxu1  ;;  %v1700_v17 = vmax.f32 %v1234_v55, 0.0  ;;  %v6808_v55 = vld [vmem:[#allocation5 + $0x284] sm:$0xf0] }
 0x1c6   :  { %v1699_v15 = vmax.f32 %v1056_v6, 0.0 }
 0x1c7   :  { %v1146_v43 = vpop.f32.mrf.mxu0 }
 0x1c8   :  { %v1147_v44 = vadd.f32 %v1146_v43, %v7723_v33  ;;  %v6192_v43 = vor.u32 %v6808_v55, %v6191_v14 }
 0x1c9   :  { %v968_v23 = vpop.f32.mrf.mxu2 }
 0x1ca   :  { %v1236_v47 = vadd.f32 %v1235_v18, %v1147_v44  ;;  %v969_v29 = vadd.f32 %v968_v23, %v7726_v34  ;;  %v1057_v35 = vpop.f32.mrf.mxu3  ;;  %3068 = vmatpush.bf16.msrb.mxu3 %v6192_v43 }
 0x1cc   :  { %v1704_v32 = vmax.f32 %v1236_v47, 0.0  ;;  %v1058_v63 = vadd.f32 %v1057_v35, %v969_v29  ;;  %v1238_v20 = vpop.f32.mrf.mxu1  ;;  %v6575_v29 = vld [vmem:[#allocation5 + $0x570] sm:$0xf] }
 0x1ce   :  { %v7897_v48 = vpack.c.bf16 %v1704_v32, %v1700_v17  ;;  %v1703_v16 = vmax.f32 %v1058_v63, 0.0  ;;  %1286 = vmatmul.bf16.gmra.mxu2 %v7625_v50 }
 0x1cf   :  { %1375 = vmatmul.bf16.gmra.mxu3 %v7627_v51  ;;  %1553 = vmatmul.bf16.gmra.mxu1 %v7627_v51  ;;  %v1149_v8 = vpop.f32.mrf.mxu0  ;;  %v6904_v51 = vld [vmem:[#allocation5 + $0x584] sm:$0xf0] }
 0x1d0   :  { %v7902_v11 = vpack.c.bf16 %v1703_v16, %v1699_v15  ;;  %v1150_v18 = vadd.f32 %v1149_v8, %v7723_v33  ;;  %v6576_v17 = vor.u32 %v6904_v51, %v6575_v29  ;;  %v5975_v29 = vld [vmem:[#allocation5 + $0xc0] sm:$0xf] }
 0x1d1   :  { %v971_v7 = vpop.f32.mrf.mxu2 }
 0x1d2   :  { %v1239_v12 = vadd.f32 %v1238_v20, %v1150_v18  ;;  %v972_v6 = vadd.f32 %v971_v7, %v7726_v34  ;;  %v1060_v44 = vpop.f32.mrf.mxu3  ;;  %1464 = vmatmul.bf16.gmra.mxu0 %v7625_v50  ;;  %3246 = vmatpush.bf16.msrb.mxu1 %v6576_v17 }
 0x1d4   :  { %v1061_v23 = vadd.f32 %v1060_v44, %v972_v6  ;;  %v1240_v47 = vpop.f32.mrf.mxu1  ;;  %v1708_v8 = vmax.f32 %v1239_v12, 0.0  ;;  %v6754_v12 = vld [vmem:[#allocation5 + $0xd4] sm:$0xf0] }
 0x1d6   :  { %v1707_v50 = vmax.f32 %v1061_v23, 0.0 }
 0x1d7   :  { %v1151_v35 = vpop.f32.mrf.mxu0 }
 0x1d8   :  { %v1152_v32 = vadd.f32 %v1151_v35, %v7723_v33  ;;  %v5976_v35 = vor.u32 %v6754_v12, %v5975_v29 }
 0x1d9   :  { %v973_v63 = vpop.f32.mrf.mxu2 }
 0x1da   :  { %v1241_v15 = vadd.f32 %v1240_v47, %v1152_v32  ;;  %v974_v16 = vadd.f32 %v973_v63, %v7726_v34  ;;  %v1062_v20 = vpop.f32.mrf.mxu3  ;;  %2980 = vmatpush.bf16.msrb.mxu2 %v5976_v35 }
 0x1dc   :  { %v1712_v18 = vmax.f32 %v1241_v15, 0.0  ;;  %v1063_v14 = vadd.f32 %v1062_v20, %v974_v16  ;;  %v1243_v55 = vpop.f32.mrf.mxu1  ;;  %v6383_v16 = vld [vmem:[#allocation5 + $0x3f0] sm:$0xf] }
 0x1de   :  { %v7909_v7 = vpack.c.bf16 %v1712_v18, %v1708_v8  ;;  %v1711_v43 = vmax.f32 %v1063_v14, 0.0  ;;  %1291 = vmatmul.bf16.gmra.mxu2 %v7643_v24 }
 0x1df   :  { %1380 = vmatmul.bf16.gmra.mxu3 %v7645_v25  ;;  %1558 = vmatmul.bf16.gmra.mxu1 %v7645_v25  ;;  %v1154_v6 = vpop.f32.mrf.mxu0  ;;  %v6856_v25 = vld [vmem:[#allocation5 + $0x404] sm:$0xf0] }
 0x1e0   :  { %9180 = vst [vmem:[#allocation26_spill] sm:$0xff] %v7909_v7  ;;  %v7914_v44 = vpack.c.bf16 %v1711_v43, %v1707_v50  ;;  %v1155_v47 = vadd.f32 %v1154_v6, %v7723_v33  ;;  %v6384_v8 = vor.u32 %v6856_v25, %v6383_v16  ;;  %v6167_v16 = vld [vmem:[#allocation5 + $0x240] sm:$0xf] }
 0x1e1   :  { %v976_v51 = vpop.f32.mrf.mxu2 }
 0x1e2   :  { %v1244_v17 = vadd.f32 %v1243_v55, %v1155_v47  ;;  %v977_v23 = vadd.f32 %v976_v51, %v7726_v34  ;;  %v1065_v32 = vpop.f32.mrf.mxu3  ;;  %1469 = vmatmul.bf16.gmra.mxu0 %v7643_v24 }
 0x1e3   :  { %3157 = vmatpush.bf16.msrb.mxu0 %v6384_v8 }
 0x1e4   :  { %v1066_v63 = vadd.f32 %v1065_v32, %v977_v23  ;;  %v1245_v15 = vpop.f32.mrf.mxu1  ;;  %v1716_v6 = vmax.f32 %v1244_v17, 0.0  ;;  %v6802_v17 = vld [vmem:[#allocation5 + $0x254] sm:$0xf0] }
 0x1e6   :  { %v1715_v24 = vmax.f32 %v1066_v63, 0.0 }
 0x1e7   :  { %v1156_v20 = vpop.f32.mrf.mxu0 }
 0x1e8   :  { %v1157_v18 = vadd.f32 %v1156_v20, %v7723_v33  ;;  %v6168_v20 = vor.u32 %v6802_v17, %v6167_v16 }
 0x1e9   :  { %v978_v14 = vpop.f32.mrf.mxu2 }
 0x1ea   :  { %v1246_v50 = vadd.f32 %v1245_v15, %v1157_v18  ;;  %v979_v43 = vadd.f32 %v978_v14, %v7726_v34  ;;  %v1067_v55 = vpop.f32.mrf.mxu3  ;;  %3069 = vmatpush.bf16.msrb.mxu3 %v6168_v20 }
 0x1ec   :  { %v1720_v47 = vmax.f32 %v1246_v50, 0.0  ;;  %v1068_v29 = vadd.f32 %v1067_v55, %v979_v43  ;;  %v1248_v12 = vpop.f32.mrf.mxu1  ;;  %v6551_v43 = vld [vmem:[#allocation5 + $0x540] sm:$0xf] }
 0x1ee   :  { %v7921_v51 = vpack.c.bf16 %v1720_v47, %v1716_v6  ;;  %v1719_v35 = vmax.f32 %v1068_v29, 0.0  ;;  %1296 = vmatmul.bf16.gmra.mxu2 %v7663_v4 }
 0x1ef   :  { %1385 = vmatmul.bf16.gmra.mxu3 %v7665_v5  ;;  %1563 = vmatmul.bf16.gmra.mxu1 %v7665_v5  ;;  %v1159_v23 = vpop.f32.mrf.mxu0  ;;  %v6898_v5 = vld [vmem:[#allocation5 + $0x554] sm:$0xf0] }
 0x1f0   :  { %v7926_v32 = vpack.c.bf16 %v1719_v35, %v1715_v24  ;;  %v1160_v15 = vadd.f32 %v1159_v23, %v7723_v33  ;;  %v6552_v6 = vor.u32 %v6898_v5, %v6551_v43  ;;  %v5951_v43 = vld [vmem:[#allocation5 + $0x90] sm:$0xf] }
 0x1f1   :  { %v981_v25 = vpop.f32.mrf.mxu2 }
 0x1f2   :  { %v1249_v8 = vadd.f32 %v1248_v12, %v1160_v15  ;;  %v982_v63 = vadd.f32 %v981_v25, %v7726_v34  ;;  %v1070_v18 = vpop.f32.mrf.mxu3  ;;  %1474 = vmatmul.bf16.gmra.mxu0 %v7663_v4  ;;  %3247 = vmatpush.bf16.msrb.mxu1 %v6552_v6 }
 0x1f4   :  { %v1071_v14 = vadd.f32 %v1070_v18, %v982_v63  ;;  %v1250_v50 = vpop.f32.mrf.mxu1  ;;  %v1724_v23 = vmax.f32 %v1249_v8, 0.0  ;;  %v6748_v8 = vld [vmem:[#allocation5 + $0xa4] sm:$0xf0] }
 0x1f6   :  { %v1723_v4 = vmax.f32 %v1071_v14, 0.0 }
 0x1f7   :  { %v1161_v55 = vpop.f32.mrf.mxu0 }
 0x1f8   :  { %v1162_v47 = vadd.f32 %v1161_v55, %v7723_v33  ;;  %v5952_v55 = vor.u32 %v6748_v8, %v5951_v43 }
 0x1f9   :  { %v983_v29 = vpop.f32.mrf.mxu2 }
 0x1fa   :  { %v1251_v24 = vadd.f32 %v1250_v50, %v1162_v47  ;;  %v984_v35 = vadd.f32 %v983_v29, %v7726_v34  ;;  %v1072_v12 = vpop.f32.mrf.mxu3  ;;  %2981 = vmatpush.bf16.msrb.mxu2 %v5952_v55 }
 0x1fc   :  { %v1728_v15 = vmax.f32 %v1251_v24, 0.0  ;;  %v1073_v16 = vadd.f32 %v1072_v12, %v984_v35  ;;  %v1253_v17 = vpop.f32.mrf.mxu1  ;;  %v6359_v35 = vld [vmem:[#allocation5 + $0x3c0] sm:$0xf] }
 0x1fe   :  { %v7933_v25 = vpack.c.bf16 %v1728_v15, %v1724_v23  ;;  %v1727_v20 = vmax.f32 %v1073_v16, 0.0  ;;  %1301 = vmatmul.bf16.gmra.mxu2 %v7683_v52 }
 0x1ff   :  { %1390 = vmatmul.bf16.gmra.mxu3 %v7685_v54  ;;  %1568 = vmatmul.bf16.gmra.mxu1 %v7685_v54  ;;  %v1164_v63 = vpop.f32.mrf.mxu0  ;;  %v6850_v54 = vld [vmem:[#allocation5 + $0x3d4] sm:$0xf0] }
 0x200   :  { %9181 = vst [vmem:[#allocation27_spill] sm:$0xff] %v7933_v25  ;;  %v7938_v18 = vpack.c.bf16 %v1727_v20, %v1723_v4  ;;  %v1165_v50 = vadd.f32 %v1164_v63, %v7723_v33  ;;  %v6360_v23 = vor.u32 %v6850_v54, %v6359_v35  ;;  %v6143_v35 = vld [vmem:[#allocation5 + $0x210] sm:$0xf] }
 0x201   :  { %v986_v5 = vpop.f32.mrf.mxu2 }
 0x202   :  { %v1254_v6 = vadd.f32 %v1253_v17, %v1165_v50  ;;  %v987_v14 = vadd.f32 %v986_v5, %v7726_v34  ;;  %v1075_v47 = vpop.f32.mrf.mxu3  ;;  %1479 = vmatmul.bf16.gmra.mxu0 %v7683_v52 }
 0x203   :  { %3158 = vmatpush.bf16.msrb.mxu0 %v6360_v23 }
 0x204   :  { %v1076_v29 = vadd.f32 %v1075_v47, %v987_v14  ;;  %v1255_v24 = vpop.f32.mrf.mxu1  ;;  %v1732_v63 = vmax.f32 %v1254_v6, 0.0  ;;  %v6796_v6 = vld [vmem:[#allocation5 + $0x224] sm:$0xf0] }
 0x206   :  { %v1731_v52 = vmax.f32 %v1076_v29, 0.0 }
 0x207   :  { %v1166_v12 = vpop.f32.mrf.mxu0 }
 0x208   :  { %v1167_v15 = vadd.f32 %v1166_v12, %v7723_v33  ;;  %v6144_v12 = vor.u32 %v6796_v6, %v6143_v35 }
 0x209   :  { %v988_v16 = vpop.f32.mrf.mxu2 }
 0x20a   :  { %v1256_v4 = vadd.f32 %v1255_v24, %v1167_v15  ;;  %v989_v20 = vadd.f32 %v988_v16, %v7726_v34  ;;  %v1077_v17 = vpop.f32.mrf.mxu3  ;;  %3070 = vmatpush.bf16.msrb.mxu3 %v6144_v12 }
 0x20c   :  { %v1736_v50 = vmax.f32 %v1256_v4, 0.0  ;;  %v1078_v43 = vadd.f32 %v1077_v17, %v989_v20  ;;  %v1258_v8 = vpop.f32.mrf.mxu1  ;;  %v6527_v20 = vld [vmem:[#allocation5 + $0x510] sm:$0xf] }
 0x20e   :  { %v7945_v5 = vpack.c.bf16 %v1736_v50, %v1732_v63  ;;  %v1735_v55 = vmax.f32 %v1078_v43, 0.0  ;;  %1306 = vmatmul.bf16.gmra.mxu2 %v7701_v40 }
 0x20f   :  { %1395 = vmatmul.bf16.gmra.mxu3 %v7703_v41  ;;  %1573 = vmatmul.bf16.gmra.mxu1 %v7703_v41  ;;  %v1169_v14 = vpop.f32.mrf.mxu0  ;;  %v6892_v41 = vld [vmem:[#allocation5 + $0x524] sm:$0xf0] }
 0x210   :  { %v7950_v47 = vpack.c.bf16 %v1735_v55, %v1731_v52  ;;  %v1170_v24 = vadd.f32 %v1169_v14, %v7723_v33  ;;  %v6528_v63 = vor.u32 %v6892_v41, %v6527_v20  ;;  %v5927_v20 = vld [vmem:[#allocation5 + $0x60] sm:$0xf]  ;;  %v6742_v41 = vld [vmem:[#allocation5 + $0x74] sm:$0xf0] }
 0x211   :  { %v991_v54 = vpop.f32.mrf.mxu2 }
 0x212   :  { %v1259_v23 = vadd.f32 %v1258_v8, %v1170_v24  ;;  %v992_v29 = vadd.f32 %v991_v54, %v7726_v34  ;;  %v1080_v15 = vpop.f32.mrf.mxu3  ;;  %1484 = vmatmul.bf16.gmra.mxu0 %v7701_v40  ;;  %3248 = vmatpush.bf16.msrb.mxu1 %v6528_v63  ;;  %v7320_v40 = vld [vmem:[%s9059_s4] sm:$0xf] }
 0x213   :  { %v7960_v54 = vperm.slane %v7320_v40, 3 }
 0x214   :  { %v1081_v16 = vadd.f32 %v1080_v15, %v992_v29  ;;  %v1260_v4 = vpop.f32.mrf.mxu1  ;;  %v1740_v14 = vmax.f32 %v1259_v23, 0.0  ;;  %v7965_v15 = vperm.slane %v7320_v40, 2 }
 0x216   :  { %v1739_v12 = vmax.f32 %v1081_v16, 0.0  ;;  %v5928_v16 = vor.u32 %v6742_v41, %v5927_v20 }
 0x217   :  { %v1171_v17 = vpop.f32.mrf.mxu0 }
 0x218   :  { %v1172_v50 = vadd.f32 %v1171_v17, %v7723_v33  ;;  %2982 = vmatpush.bf16.msrb.mxu2 %v5928_v16 }
 0x219   :  { %v993_v43 = vpop.f32.mrf.mxu2 }
 0x21a   :  { %v1261_v52 = vadd.f32 %v1260_v4, %v1172_v50  ;;  %v994_v55 = vadd.f32 %v993_v43, %v7726_v34  ;;  %v1082_v8 = vpop.f32.mrf.mxu3 }
 0x21c   :  { %v1744_v24 = vmax.f32 %v1261_v52, 0.0  ;;  %v1083_v35 = vadd.f32 %v1082_v8, %v994_v55  ;;  %v1539_v6 = vpop.f32.mrf.mxu1  ;;  %v6335_v8 = vld [vmem:[#allocation5 + $0x390] sm:$0xf] }
 0x21e   :  { %v7962_v29 = vpack.c.bf16 %v1744_v24, %v1740_v14  ;;  %v1743_v33 = vmax.f32 %v1083_v35, 0.0  ;;  %1311 = vmatmul.bf16.gmra.mxu2 %v7721_v31 }
 0x21f   :  { %1400 = vmatmul.bf16.gmra.mxu3 %v7578_v30  ;;  %1578 = vmatmul.bf16.gmra.mxu1 %v7578_v30  ;;  %v1450_v34 = vpop.f32.mrf.mxu0  ;;  %v6844_v30 = vld [vmem:[#allocation5 + $0x3a4] sm:$0xf0] }
 0x220   :  { %v7969_v23 = vpack.c.bf16 %v1743_v33, %v1739_v12  ;;  %v1451_v4 = vadd.f32 %v1450_v34, %v7960_v54  ;;  %v6336_v24 = vor.u32 %v6844_v30, %v6335_v8  ;;  %v6119_v8 = vld [vmem:[#allocation5 + $0x1e0] sm:$0xf] }
 0x221   :  { %v1272_v17 = vpop.f32.mrf.mxu2 }
 0x222   :  { %v1540_v63 = vadd.f32 %v1539_v6, %v1451_v4  ;;  %v1273_v50 = vadd.f32 %v1272_v17, %v7965_v15  ;;  %v1361_v43 = vpop.f32.mrf.mxu3  ;;  %1489 = vmatmul.bf16.gmra.mxu0 %v7721_v31 }
 0x223   :  { %3159 = vmatpush.bf16.msrb.mxu0 %v6336_v24 }
 0x224   :  { %v1362_v52 = vadd.f32 %v1361_v43, %v1273_v50  ;;  %v1541_v55 = vpop.f32.mrf.mxu1  ;;  %v1622_v34 = vmax.f32 %v1540_v63, 0.0  ;;  %v6790_v63 = vld [vmem:[#allocation5 + $0x1f4] sm:$0xf0] }
 0x226   :  { %v1621_v31 = vmax.f32 %v1362_v52, 0.0 }
 0x227   :  { %v1452_v14 = vpop.f32.mrf.mxu0 }
 0x228   :  { %v1453_v35 = vadd.f32 %v1452_v14, %v7960_v54  ;;  %v6120_v14 = vor.u32 %v6790_v63, %v6119_v8 }
 0x229   :  { %v1274_v40 = vpop.f32.mrf.mxu2 }
 0x22a   :  { %v1542_v12 = vadd.f32 %v1541_v55, %v1453_v35  ;;  %v1275_v33 = vadd.f32 %v1274_v40, %v7965_v15  ;;  %v1363_v6 = vpop.f32.mrf.mxu3  ;;  %3071 = vmatpush.bf16.msrb.mxu3 %v6120_v14 }
 0x22c   :  { %v1626_v4 = vmax.f32 %v1542_v12, 0.0  ;;  %v1364_v20 = vadd.f32 %v1363_v6, %v1275_v33  ;;  %v1544_v41 = vpop.f32.mrf.mxu1  ;;  %v6503_v33 = vld [vmem:[#allocation5 + $0x4e0] sm:$0xf] }
 0x22e   :  { %v7976_v17 = vpack.c.bf16 %v1626_v4, %v1622_v34  ;;  %v1625_v16 = vmax.f32 %v1364_v20, 0.0  ;;  %1316 = vmatmul.bf16.gmra.mxu2 %v7739_v10 }
 0x22f   :  { %1405 = vmatmul.bf16.gmra.mxu3 %v7596_v58  ;;  %1583 = vmatmul.bf16.gmra.mxu1 %v7596_v58  ;;  %v1455_v50 = vpop.f32.mrf.mxu0  ;;  %v6886_v58 = vld [vmem:[#allocation5 + $0x4f4] sm:$0xf0] }
 0x230   :  { %9182 = vst [vmem:[#allocation28_spill] sm:$0xff] %v7976_v17  ;;  %v7981_v43 = vpack.c.bf16 %v1625_v16, %v1621_v31  ;;  %v1456_v55 = vadd.f32 %v1455_v50, %v7960_v54  ;;  %v6504_v34 = vor.u32 %v6886_v58, %v6503_v33  ;;  %v5903_v33 = vld [vmem:[#allocation5 + $0x30] sm:$0xf] }
 0x231   :  { %v1277_v30 = vpop.f32.mrf.mxu2 }
 0x232   :  { %9183 = vst [vmem:[#allocation29_spill] sm:$0xff] %v7981_v43  ;;  %v1545_v24 = vadd.f32 %v1544_v41, %v1456_v55  ;;  %v1278_v52 = vadd.f32 %v1277_v30, %v7965_v15  ;;  %v1366_v35 = vpop.f32.mrf.mxu3  ;;  %1494 = vmatmul.bf16.gmra.mxu0 %v7739_v10  ;;  %3249 = vmatpush.bf16.msrb.mxu1 %v6504_v34 }
 0x234   :  { %v1367_v40 = vadd.f32 %v1366_v35, %v1278_v52  ;;  %v1546_v12 = vpop.f32.mrf.mxu1  ;;  %v1630_v50 = vmax.f32 %v1545_v24, 0.0  ;;  %v6736_v24 = vld [vmem:[#allocation5 + $0x44] sm:$0xf0] }
 0x236   :  { %v1629_v10 = vmax.f32 %v1367_v40, 0.0 }
 0x237   :  { %v1457_v6 = vpop.f32.mrf.mxu0 }
 0x238   :  { %v1458_v4 = vadd.f32 %v1457_v6, %v7960_v54  ;;  %v5904_v6 = vor.u32 %v6736_v24, %v5903_v33 }
 0x239   :  { %v1279_v20 = vpop.f32.mrf.mxu2 }
 0x23a   :  { %v1547_v31 = vadd.f32 %v1546_v12, %v1458_v4  ;;  %v1280_v16 = vadd.f32 %v1279_v20, %v7965_v15  ;;  %v1368_v41 = vpop.f32.mrf.mxu3  ;;  %2983 = vmatpush.bf16.msrb.mxu2 %v5904_v6 }
 0x23c   :  { %v1634_v55 = vmax.f32 %v1547_v31, 0.0  ;;  %v1369_v8 = vadd.f32 %v1368_v41, %v1280_v16  ;;  %v1549_v63 = vpop.f32.mrf.mxu1  ;;  %v6311_v16 = vld [vmem:[#allocation5 + $0x360] sm:$0xf] }
 0x23e   :  { %v7988_v30 = vpack.c.bf16 %v1634_v55, %v1630_v50  ;;  %v1633_v14 = vmax.f32 %v1369_v8, 0.0  ;;  %1321 = vmatmul.bf16.gmra.mxu2 %v7757_v46 }
 0x23f   :  { %1410 = vmatmul.bf16.gmra.mxu3 %v7616_v28  ;;  %1588 = vmatmul.bf16.gmra.mxu1 %v7616_v28  ;;  %v1460_v52 = vpop.f32.mrf.mxu0  ;;  %v6838_v28 = vld [vmem:[#allocation5 + $0x374] sm:$0xf0] }
 0x240   :  { %9184 = vst [vmem:[#allocation30_spill] sm:$0xff] %v7988_v30  ;;  %v7993_v35 = vpack.c.bf16 %v1633_v14, %v1629_v10  ;;  %v1461_v12 = vadd.f32 %v1460_v52, %v7960_v54  ;;  %v6312_v50 = vor.u32 %v6838_v28, %v6311_v16  ;;  %v6095_v16 = vld [vmem:[#allocation5 + $0x1b0] sm:$0xf] }
 0x241   :  { %v1282_v58 = vpop.f32.mrf.mxu2 }
 0x242   :  { %9185 = vst [vmem:[#allocation31_spill] sm:$0xff] %v7993_v35  ;;  %v1550_v34 = vadd.f32 %v1549_v63, %v1461_v12  ;;  %v1283_v40 = vadd.f32 %v1282_v58, %v7965_v15  ;;  %v1371_v4 = vpop.f32.mrf.mxu3  ;;  %1499 = vmatmul.bf16.gmra.mxu0 %v7757_v46 }
 0x243   :  { %3160 = vmatpush.bf16.msrb.mxu0 %v6312_v50 }
 0x244   :  { %v1372_v20 = vadd.f32 %v1371_v4, %v1283_v40  ;;  %v1551_v31 = vpop.f32.mrf.mxu1  ;;  %v1638_v52 = vmax.f32 %v1550_v34, 0.0  ;;  %v6784_v34 = vld [vmem:[#allocation5 + $0x1c4] sm:$0xf0] }
 0x246   :  { %v1637_v46 = vmax.f32 %v1372_v20, 0.0 }
 0x247   :  { %v1462_v41 = vpop.f32.mrf.mxu0 }
 0x248   :  { %v1463_v55 = vadd.f32 %v1462_v41, %v7960_v54  ;;  %v6096_v41 = vor.u32 %v6784_v34, %v6095_v16 }
 0x249   :  { %v1284_v8 = vpop.f32.mrf.mxu2 }
 0x24a   :  { %v1552_v10 = vadd.f32 %v1551_v31, %v1463_v55  ;;  %v1285_v14 = vadd.f32 %v1284_v8, %v7965_v15  ;;  %v1373_v63 = vpop.f32.mrf.mxu3  ;;  %3072 = vmatpush.bf16.msrb.mxu3 %v6096_v41 }
 0x24c   :  { %v1642_v12 = vmax.f32 %v1552_v10, 0.0  ;;  %v1374_v33 = vadd.f32 %v1373_v63, %v1285_v14  ;;  %v1554_v24 = vpop.f32.mrf.mxu1  ;;  %v6479_v14 = vld [vmem:[#allocation5 + $0x4b0] sm:$0xf] }
 0x24e   :  { %v8000_v58 = vpack.c.bf16 %v1642_v12, %v1638_v52  ;;  %v1641_v6 = vmax.f32 %v1374_v33, 0.0  ;;  %1326 = vmatmul.bf16.gmra.mxu2 %v7775_v21 }
 0x24f   :  { %1415 = vmatmul.bf16.gmra.mxu3 %v7636_v2  ;;  %1593 = vmatmul.bf16.gmra.mxu1 %v7636_v2  ;;  %v1465_v40 = vpop.f32.mrf.mxu0  ;;  %v6880_v2 = vld [vmem:[#allocation5 + $0x4c4] sm:$0xf0] }
 0x250   :  { %9186 = vst [vmem:[#allocation32_spill] sm:$0xff] %v8000_v58  ;;  %v8005_v4 = vpack.c.bf16 %v1641_v6, %v1637_v46  ;;  %v1466_v31 = vadd.f32 %v1465_v40, %v7960_v54  ;;  %v6480_v52 = vor.u32 %v6880_v2, %v6479_v14  ;;  %v5879_v14 = vld [vmem:[#allocation5] sm:$0xf] }
 0x251   :  { %v1287_v28 = vpop.f32.mrf.mxu2 }
 0x252   :  { %9187 = vst [vmem:[#allocation33_spill] sm:$0xff] %v8005_v4  ;;  %v1555_v50 = vadd.f32 %v1554_v24, %v1466_v31  ;;  %v1288_v20 = vadd.f32 %v1287_v28, %v7965_v15  ;;  %v1376_v55 = vpop.f32.mrf.mxu3  ;;  %1504 = vmatmul.bf16.gmra.mxu0 %v7775_v21  ;;  %3250 = vmatpush.bf16.msrb.mxu1 %v6480_v52 }
 0x254   :  { %v1377_v8 = vadd.f32 %v1376_v55, %v1288_v20  ;;  %v1556_v10 = vpop.f32.mrf.mxu1  ;;  %v1646_v40 = vmax.f32 %v1555_v50, 0.0  ;;  %v6730_v50 = vld [vmem:[#allocation5 + $0x14] sm:$0xf0] }
 0x256   :  { %v1645_v21 = vmax.f32 %v1377_v8, 0.0 }
 0x257   :  { %v1467_v63 = vpop.f32.mrf.mxu0 }
 0x258   :  { %v1468_v12 = vadd.f32 %v1467_v63, %v7960_v54  ;;  %v5880_v63 = vor.u32 %v6730_v50, %v5879_v14 }
 0x259   :  { %v1289_v33 = vpop.f32.mrf.mxu2 }
 0x25a   :  { %v1557_v46 = vadd.f32 %v1556_v10, %v1468_v12  ;;  %v1290_v6 = vadd.f32 %v1289_v33, %v7965_v15  ;;  %v1378_v24 = vpop.f32.mrf.mxu3  ;;  %2984 = vmatpush.bf16.msrb.mxu2 %v5880_v63 }
 0x25c   :  { %v1650_v31 = vmax.f32 %v1557_v46, 0.0  ;;  %v1379_v16 = vadd.f32 %v1378_v24, %v1290_v6  ;;  %v1559_v34 = vpop.f32.mrf.mxu1  ;;  %v6287_v6 = vld [vmem:[#allocation5 + $0x330] sm:$0xf] }
 0x25e   :  { %v8012_v28 = vpack.c.bf16 %v1650_v31, %v1646_v40  ;;  %v1649_v41 = vmax.f32 %v1379_v16, 0.0  ;;  %1331 = vmatmul.bf16.gmra.mxu2 %v7793_v62 }
 0x25f   :  { %1420 = vmatmul.bf16.gmra.mxu3 %v7654_v39  ;;  %1598 = vmatmul.bf16.gmra.mxu1 %v7654_v39  ;;  %v1470_v20 = vpop.f32.mrf.mxu0  ;;  %v6832_v39 = vld [vmem:[#allocation5 + $0x344] sm:$0xf0] }
 0x260   :  { %9188 = vst [vmem:[#allocation34_spill] sm:$0xff] %v8012_v28  ;;  %v8017_v55 = vpack.c.bf16 %v1649_v41, %v1645_v21  ;;  %v1471_v10 = vadd.f32 %v1470_v20, %v7960_v54  ;;  %v6288_v40 = vor.u32 %v6832_v39, %v6287_v6  ;;  %v6071_v6 = vld [vmem:[#allocation5 + $0x180] sm:$0xf] }
 0x261   :  { %v1292_v2 = vpop.f32.mrf.mxu2 }
 0x262   :  { %9189 = vst [vmem:[#allocation35_spill] sm:$0xff] %v8017_v55  ;;  %v1560_v52 = vadd.f32 %v1559_v34, %v1471_v10  ;;  %v1293_v8 = vadd.f32 %v1292_v2, %v7965_v15  ;;  %v1381_v12 = vpop.f32.mrf.mxu3  ;;  %1509 = vmatmul.bf16.gmra.mxu0 %v7793_v62 }
 0x263   :  { %3161 = vmatpush.bf16.msrb.mxu0 %v6288_v40 }
 0x264   :  { %v1382_v33 = vadd.f32 %v1381_v12, %v1293_v8  ;;  %v1561_v46 = vpop.f32.mrf.mxu1  ;;  %v1654_v20 = vmax.f32 %v1560_v52, 0.0  ;;  %v6778_v52 = vld [vmem:[#allocation5 + $0x194] sm:$0xf0] }
 0x266   :  { %v1653_v62 = vmax.f32 %v1382_v33, 0.0 }
 0x267   :  { %v1472_v24 = vpop.f32.mrf.mxu0 }
 0x268   :  { %v1473_v31 = vadd.f32 %v1472_v24, %v7960_v54  ;;  %v6072_v24 = vor.u32 %v6778_v52, %v6071_v6 }
 0x269   :  { %v1294_v16 = vpop.f32.mrf.mxu2 }
 0x26a   :  { %v1562_v21 = vadd.f32 %v1561_v46, %v1473_v31  ;;  %v1295_v41 = vadd.f32 %v1294_v16, %v7965_v15  ;;  %v1383_v34 = vpop.f32.mrf.mxu3  ;;  %3073 = vmatpush.bf16.msrb.mxu3 %v6072_v24 }
 0x26c   :  { %v1658_v10 = vmax.f32 %v1562_v21, 0.0  ;;  %v1384_v14 = vadd.f32 %v1383_v34, %v1295_v41  ;;  %v1564_v50 = vpop.f32.mrf.mxu1  ;;  %v6455_v41 = vld [vmem:[#allocation5 + $0x480] sm:$0xf] }
 0x26e   :  { %v8024_v2 = vpack.c.bf16 %v1658_v10, %v1654_v20  ;;  %v1657_v63 = vmax.f32 %v1384_v14, 0.0  ;;  %1336 = vmatmul.bf16.gmra.mxu2 %v7811_v53 }
 0x26f   :  { %1425 = vmatmul.bf16.gmra.mxu3 %v7674_v27  ;;  %1603 = vmatmul.bf16.gmra.mxu1 %v7674_v27  ;;  %v1475_v8 = vpop.f32.mrf.mxu0  ;;  %v6874_v27 = vld [vmem:[#allocation5 + $0x494] sm:$0xf0] }
 0x270   :  { %9190 = vst [vmem:[#allocation36_spill] sm:$0xff] %v8024_v2  ;;  %v8029_v12 = vpack.c.bf16 %v1657_v63, %v1653_v62  ;;  %v1476_v46 = vadd.f32 %v1475_v8, %v7960_v54  ;;  %v6456_v20 = vor.u32 %v6874_v27, %v6455_v41 }
 0x271   :  { %v1297_v39 = vpop.f32.mrf.mxu2 }
 0x272   :  { %9191 = vst [vmem:[#allocation37_spill] sm:$0xff] %v8029_v12  ;;  %v1565_v40 = vadd.f32 %v1564_v50, %v1476_v46  ;;  %v1298_v33 = vadd.f32 %v1297_v39, %v7965_v15  ;;  %v1386_v31 = vpop.f32.mrf.mxu3  ;;  %1514 = vmatmul.bf16.gmra.mxu0 %v7811_v53  ;;  %3251 = vmatpush.bf16.msrb.mxu1 %v6456_v20  ;;  %v6263_v53 = vld [vmem:[#allocation5 + $0x300] sm:$0xf]  ;;  %v6826_v39 = vld [vmem:[#allocation5 + $0x314] sm:$0xf0] }
 0x273   :  { %v6264_v41 = vor.u32 %v6826_v39, %v6263_v53  ;;  %v6049_v20 = vld [vmem:[#allocation5 + $0x168] sm:$0xf0] }
 0x274   :  { %v1387_v16 = vadd.f32 %v1386_v31, %v1298_v33  ;;  %v1566_v21 = vpop.f32.mrf.mxu1  ;;  %v1662_v8 = vmax.f32 %v1565_v40, 0.0 }
 0x275   :  { %3162 = vmatpush.bf16.msrb.mxu0 %v6264_v41 }
 0x276   :  { %v1661_v24 = vmax.f32 %v1387_v16, 0.0 }
 0x277   :  { %v1477_v34 = vpop.f32.mrf.mxu0 }
 0x278   :  { %v1478_v10 = vadd.f32 %v1477_v34, %v7960_v54  ;;  %v6769_v34 = vld [vmem:[#allocation5 + $0x154] sm:$0xf] }
 0x279   :  { %v1299_v14 = vpop.f32.mrf.mxu2  ;;  %v6052_v16 = vor.u32 %v6769_v34, %v6049_v20 }
 0x27a   :  { %v1567_v62 = vadd.f32 %v1566_v21, %v1478_v10  ;;  %v1300_v63 = vadd.f32 %v1299_v14, %v7965_v15  ;;  %v1388_v50 = vpop.f32.mrf.mxu3 }
 0x27b   :  { %3333 = vmatpush.bf16.msra.mxu2 %v6052_v16 }
 0x27c   :  { %v1666_v46 = vmax.f32 %v1567_v62, 0.0  ;;  %v1389_v6 = vadd.f32 %v1388_v50, %v1300_v63  ;;  %v1569_v52 = vpop.f32.mrf.mxu1 }
 0x27e   :  { %v8036_v33 = vpack.c.bf16 %v1666_v46, %v1662_v8  ;;  %v1665_v31 = vmax.f32 %v1389_v6, 0.0  ;;  %1341 = vmatmul.bf16.gmra.mxu2 %v7829_v45 }
 0x27f   :  { %1430 = vmatmul.bf16.gmra.mxu3 %v7692_v9  ;;  %1608 = vmatmul.bf16.gmra.mxu1 %v7692_v9  ;;  %v1480_v21 = vpop.f32.mrf.mxu0 }
 0x280   :  { %9192 = vst [vmem:[#allocation38_spill] sm:$0xff] %v8036_v33  ;;  %v8041_v27 = vpack.c.bf16 %v1665_v31, %v1661_v24  ;;  %v1481_v40 = vadd.f32 %v1480_v21, %v7960_v54 }
 0x281   :  { %v1302_v10 = vpop.f32.mrf.mxu2 }
 0x282   :  { %9193 = vst [vmem:[#allocation39_spill] sm:$0xff] %v8041_v27  ;;  %v1570_v14 = vadd.f32 %v1569_v52, %v1481_v40  ;;  %v1303_v62 = vadd.f32 %v1302_v10, %v7965_v15  ;;  %v1391_v63 = vpop.f32.mrf.mxu3  ;;  %1519 = vmatmul.bf16.gmra.mxu0 %v7829_v45 }
 0x284   :  { %v1392_v50 = vadd.f32 %v1391_v63, %v1303_v62  ;;  %v1571_v8 = vpop.f32.mrf.mxu1  ;;  %v1670_v31 = vmax.f32 %v1570_v14, 0.0  ;;  %v6817_v62 = vld [vmem:[#allocation5 + $0x2d4] sm:$0xf]  ;;  %v6241_v14 = vld [vmem:[#allocation5 + $0x2e8] sm:$0xf0] }
 0x286   :  { %v1669_v40 = vmax.f32 %v1392_v50, 0.0 }
 0x287   :  { %v1482_v9 = vpop.f32.mrf.mxu0 }
 0x288   :  { %v1483_v46 = vadd.f32 %v1482_v9, %v7960_v54 }
 0x289   :  { %v1304_v6 = vpop.f32.mrf.mxu2 }
 0x28a   :  { %v1572_v53 = vadd.f32 %v1571_v8, %v1483_v46  ;;  %v1305_v39 = vadd.f32 %v1304_v6, %v7965_v15  ;;  %v1393_v24 = vpop.f32.mrf.mxu3  ;;  %v6244_v8 = vor.u32 %v6817_v62, %v6241_v14 }
 0x28c   :  { %v1674_v41 = vmax.f32 %v1572_v53, 0.0  ;;  %v1394_v21 = vadd.f32 %v1393_v24, %v1305_v39  ;;  %v1574_v52 = vpop.f32.mrf.mxu1  ;;  %3422 = vmatpush.bf16.msra.mxu3 %v6244_v8  ;;  %v6913_v39 = vld [vmem:[#allocation5 + $0x5d4] sm:$0xf] }
 0x28e   :  { %v8048_v34 = vpack.c.bf16 %v1674_v41, %v1670_v31  ;;  %v1673_v20 = vmax.f32 %v1394_v21, 0.0  ;;  %1346 = vmatmul.bf16.gmra.mxu2 %v7847_v37 }
 0x28f   :  { %1435 = vmatmul.bf16.gmra.mxu3 %v7712_v3  ;;  %1613 = vmatmul.bf16.gmra.mxu1 %v7712_v3  ;;  %v1485_v45 = vpop.f32.mrf.mxu0  ;;  %v6625_v3 = vld [vmem:[#allocation5 + $0x5e8] sm:$0xf0] }
 0x290   :  { %9194 = vst [vmem:[#allocation40_spill] sm:$0xff] %v8048_v34  ;;  %v8053_v10 = vpack.c.bf16 %v1673_v20, %v1669_v40  ;;  %v1486_v16 = vadd.f32 %v1485_v45, %v7960_v54  ;;  %v6628_v31 = vor.u32 %v6913_v39, %v6625_v3  ;;  %v6763_v39 = vld [vmem:[#allocation5 + $0x124] sm:$0xf] }
 0x291   :  { %v1307_v63 = vpop.f32.mrf.mxu2 }
 0x292   :  { %9195 = vst [vmem:[#allocation41_spill] sm:$0xff] %v8053_v10  ;;  %v1575_v9 = vadd.f32 %v1574_v52, %v1486_v16  ;;  %v1308_v50 = vadd.f32 %v1307_v63, %v7965_v15  ;;  %v1396_v46 = vpop.f32.mrf.mxu3  ;;  %1524 = vmatmul.bf16.gmra.mxu0 %v7847_v37  ;;  %3600 = vmatpush.bf16.msra.mxu1 %v6628_v31 }
 0x294   :  { %v1397_v6 = vadd.f32 %v1396_v46, %v1308_v50  ;;  %v1576_v53 = vpop.f32.mrf.mxu1  ;;  %v1678_v45 = vmax.f32 %v1575_v9, 0.0  ;;  %v6025_v9 = vld [vmem:[#allocation5 + $0x138] sm:$0xf0] }
 0x296   :  { %v1677_v37 = vmax.f32 %v1397_v6, 0.0 }
 0x297   :  { %v1487_v24 = vpop.f32.mrf.mxu0 }
 0x298   :  { %v1488_v41 = vadd.f32 %v1487_v24, %v7960_v54  ;;  %v6028_v24 = vor.u32 %v6763_v39, %v6025_v9 }
 0x299   :  { %v1309_v21 = vpop.f32.mrf.mxu2 }
 0x29a   :  { %v1577_v40 = vadd.f32 %v1576_v53, %v1488_v41  ;;  %v1310_v20 = vadd.f32 %v1309_v21, %v7965_v15  ;;  %v1398_v52 = vpop.f32.mrf.mxu3  ;;  %3334 = vmatpush.bf16.msra.mxu2 %v6028_v24 }
 0x29c   :  { %v1682_v16 = vmax.f32 %v1577_v40, 0.0  ;;  %v1399_v62 = vadd.f32 %v1398_v52, %v1310_v20  ;;  %v1579_v14 = vpop.f32.mrf.mxu1  ;;  %v6865_v20 = vld [vmem:[#allocation5 + $0x454] sm:$0xf]  ;;  %v6433_v52 = vld [vmem:[#allocation5 + $0x468] sm:$0xf0] }
 0x29e   :  { %v8060_v63 = vpack.c.bf16 %v1682_v16, %v1678_v45  ;;  %v1681_v8 = vmax.f32 %v1399_v62, 0.0  ;;  %2985 = vmatmul.bf16.vlgmr.msrb.gmra.mxu2 %v7746_v60  ;;  %v6436_v16 = vor.u32 %v6865_v20, %v6433_v52 }
 0x29f   :  { %3074 = vmatmul.bf16.vlgmr.msrb.gmra.mxu3 %v7741_v56  ;;  %3252 = vmatmul.bf16.vlgmr.msrb.gmra.mxu1 %v7976_v17  ;;  %v1490_v50 = vpop.f32.mrf.mxu0 }
 0x2a0   :  { %9196 = vst [vmem:[#allocation42_spill] sm:$0xff] %v8060_v63  ;;  %v8065_v46 = vpack.c.bf16 %v1681_v8, %v1677_v37  ;;  %v1491_v53 = vadd.f32 %v1490_v50, %v7960_v54  ;;  %3511 = vmatpush.bf16.msra.mxu0 %v6436_v16 }
 0x2a1   :  { %v1312_v3 = vpop.f32.mrf.mxu2 }
 0x2a2   :  { %9197 = vst [vmem:[#allocation43_spill] sm:$0xff] %v8065_v46  ;;  %v1580_v31 = vadd.f32 %v1579_v14, %v1491_v53  ;;  %v1313_v6 = vadd.f32 %v1312_v3, %v7965_v15  ;;  %v1401_v41 = vpop.f32.mrf.mxu3  ;;  %3163 = vmatmul.bf16.vlgmr.msrb.gmra.mxu0 %v7981_v43 }
 0x2a4   :  { %v1402_v21 = vadd.f32 %v1401_v41, %v1313_v6  ;;  %v1581_v40 = vpop.f32.mrf.mxu1  ;;  %v1686_v53 = vmax.f32 %v1580_v31, 0.0  ;;  %v9199_v41 = vld [vmem:[#allocation11_spill] sm:$0xff]  ;;  %v6217_v31 = vld [vmem:[#allocation5 + $0x2b8] sm:$0xf0] }
 0x2a6   :  { %v1685_v43 = vmax.f32 %v1402_v21, 0.0 }
 0x2a7   :  { %v1492_v45 = vpop.f32.mrf.mxu0 }
 0x2a8   :  { %v1493_v62 = vadd.f32 %v1492_v45, %v7960_v54  ;;  %v6811_v45 = vld [vmem:[#allocation5 + $0x2a4] sm:$0xf] }
 0x2a9   :  { %v1314_v37 = vpop.f32.mrf.mxu2 }
 0x2aa   :  { %v1582_v8 = vadd.f32 %v1581_v40, %v1493_v62  ;;  %v1315_v50 = vadd.f32 %v1314_v37, %v7965_v15  ;;  %v1403_v14 = vpop.f32.mrf.mxu3  ;;  %v6220_v62 = vor.u32 %v6811_v45, %v6217_v31 }
 0x2ac   :  { %v1690_v39 = vmax.f32 %v1582_v8, 0.0  ;;  %v1404_v9 = vadd.f32 %v1403_v14, %v1315_v50  ;;  %v1584_v3 = vpop.f32.mrf.mxu1  ;;  %3423 = vmatpush.bf16.msra.mxu3 %v6220_v62 }
 0x2ae   :  { %v8072_v24 = vpack.c.bf16 %v1690_v39, %v1686_v53  ;;  %v1689_v6 = vmax.f32 %v1404_v9, 0.0  ;;  %2990 = vmatmul.bf16.gmra.mxu2 %v7764_v22  ;;  %v6907_v53 = vld [vmem:[#allocation5 + $0x5a4] sm:$0xf]  ;;  %v6601_v39 = vld [vmem:[#allocation5 + $0x5b8] sm:$0xf0] }
 0x2af   :  { %3079 = vmatmul.bf16.gmra.mxu3 %v9199_v41  ;;  %3257 = vmatmul.bf16.gmra.mxu1 %v7988_v30  ;;  %v1495_v20 = vpop.f32.mrf.mxu0 }
 0x2b0   :  { %9198 = vst [vmem:[#allocation44_spill] sm:$0xff] %v8072_v24  ;;  %v8077_v52 = vpack.c.bf16 %v1689_v6, %v1685_v43  ;;  %v1496_v40 = vadd.f32 %v1495_v20, %v7960_v54  ;;  %v6604_v43 = vor.u32 %v6907_v53, %v6601_v39 }
 0x2b1   :  { %v1317_v16 = vpop.f32.mrf.mxu2 }
 0x2b2   :  { %9200 = vst [vmem:[#allocation45_spill] sm:$0xff] %v8077_v52  ;;  %v1585_v37 = vadd.f32 %v1584_v3, %v1496_v40  ;;  %v1318_v21 = vadd.f32 %v1317_v16, %v7965_v15  ;;  %v1406_v8 = vpop.f32.mrf.mxu3  ;;  %3168 = vmatmul.bf16.gmra.mxu0 %v7993_v35  ;;  %3601 = vmatpush.bf16.msra.mxu1 %v6604_v43 }
 0x2b4   :  { %v1407_v50 = vadd.f32 %v1406_v8, %v1318_v21  ;;  %v1586_v14 = vpop.f32.mrf.mxu1  ;;  %v1694_v40 = vmax.f32 %v1585_v37, 0.0  ;;  %v9201_v8 = vld [vmem:[#allocation13_spill] sm:$0xff]  ;;  %v6001_v37 = vld [vmem:[#allocation5 + $0x108] sm:$0xf0] }
 0x2b6   :  { %v1693_v35 = vmax.f32 %v1407_v50, 0.0 }
 0x2b7   :  { %v1497_v9 = vpop.f32.mrf.mxu0 }
 0x2b8   :  { %v1498_v6 = vadd.f32 %v1497_v9, %v7960_v54  ;;  %v6757_v9 = vld [vmem:[#allocation5 + $0xf4] sm:$0xf] }
 0x2b9   :  { %v1319_v20 = vpop.f32.mrf.mxu2  ;;  %v6004_v43 = vor.u32 %v6757_v9, %v6001_v37 }
 0x2ba   :  { %v1587_v30 = vadd.f32 %v1586_v14, %v1498_v6  ;;  %v1320_v45 = vadd.f32 %v1319_v20, %v7965_v15  ;;  %v1408_v3 = vpop.f32.mrf.mxu3 }
 0x2bb   :  { %3335 = vmatpush.bf16.msra.mxu2 %v6004_v43 }
 0x2bc   :  { %v1698_v31 = vmax.f32 %v1587_v30, 0.0  ;;  %v1409_v16 = vadd.f32 %v1408_v3, %v1320_v45  ;;  %v1589_v41 = vpop.f32.mrf.mxu1 }
 0x2be   :  { %v8084_v62 = vpack.c.bf16 %v1698_v31, %v1694_v40  ;;  %v1697_v21 = vmax.f32 %v1409_v16, 0.0  ;;  %2995 = vmatmul.bf16.gmra.mxu2 %v7782_v57  ;;  %v6859_v40 = vld [vmem:[#allocation5 + $0x424] sm:$0xf]  ;;  %v6409_v31 = vld [vmem:[#allocation5 + $0x438] sm:$0xf0] }
 0x2bf   :  { %3084 = vmatmul.bf16.gmra.mxu3 %v9201_v8  ;;  %3262 = vmatmul.bf16.gmra.mxu1 %v8000_v58  ;;  %v1500_v53 = vpop.f32.mrf.mxu0 }
 0x2c0   :  { %v8089_v39 = vpack.c.bf16 %v1697_v21, %v1693_v35  ;;  %v1501_v14 = vadd.f32 %v1500_v53, %v7960_v54  ;;  %v6412_v35 = vor.u32 %v6859_v40, %v6409_v31 }
 0x2c1   :  { %v1322_v30 = vpop.f32.mrf.mxu2 }
 0x2c2   :  { %9202 = vst [vmem:[#allocation46_spill] sm:$0xff] %v8089_v39  ;;  %v1590_v6 = vadd.f32 %v1589_v41, %v1501_v14  ;;  %v1323_v50 = vadd.f32 %v1322_v30, %v7965_v15  ;;  %v1411_v20 = vpop.f32.mrf.mxu3  ;;  %3173 = vmatmul.bf16.gmra.mxu0 %v8005_v4 }
 0x2c3   :  { %3512 = vmatpush.bf16.msra.mxu0 %v6412_v35 }
 0x2c4   :  { %v1412_v45 = vadd.f32 %v1411_v20, %v1323_v50  ;;  %v1591_v3 = vpop.f32.mrf.mxu1  ;;  %v1702_v14 = vmax.f32 %v1590_v6, 0.0  ;;  %v9203_v20 = vld [vmem:[#allocation15_spill] sm:$0xff]  ;;  %v6193_v6 = vld [vmem:[#allocation5 + $0x288] sm:$0xf0] }
 0x2c6   :  { %v1701_v4 = vmax.f32 %v1412_v45, 0.0 }
 0x2c7   :  { %v1502_v16 = vpop.f32.mrf.mxu0 }
 0x2c8   :  { %v1503_v21 = vadd.f32 %v1502_v16, %v7960_v54  ;;  %v6805_v16 = vld [vmem:[#allocation5 + $0x274] sm:$0xf] }
 0x2c9   :  { %v1324_v53 = vpop.f32.mrf.mxu2  ;;  %v6196_v35 = vor.u32 %v6805_v16, %v6193_v6 }
 0x2ca   :  { %v1592_v58 = vadd.f32 %v1591_v3, %v1503_v21  ;;  %v1325_v9 = vadd.f32 %v1324_v53, %v7965_v15  ;;  %v1413_v41 = vpop.f32.mrf.mxu3 }
 0x2cb   :  { %3424 = vmatpush.bf16.msra.mxu3 %v6196_v35 }
 0x2cc   :  { %v1706_v37 = vmax.f32 %v1592_v58, 0.0  ;;  %v1414_v30 = vadd.f32 %v1413_v41, %v1325_v9  ;;  %v1594_v8 = vpop.f32.mrf.mxu1 }
 0x2ce   :  { %v8096_v43 = vpack.c.bf16 %v1706_v37, %v1702_v14  ;;  %v1705_v50 = vmax.f32 %v1414_v30, 0.0  ;;  %3000 = vmatmul.bf16.gmra.mxu2 %v7800_v0  ;;  %v6901_v14 = vld [vmem:[#allocation5 + $0x574] sm:$0xf]  ;;  %v6577_v37 = vld [vmem:[#allocation5 + $0x588] sm:$0xf0] }
 0x2cf   :  { %3089 = vmatmul.bf16.gmra.mxu3 %v9203_v20  ;;  %3267 = vmatmul.bf16.gmra.mxu1 %v8012_v28  ;;  %v1505_v40 = vpop.f32.mrf.mxu0  ;;  %v9207_v0 = vld [vmem:[#allocation17_spill] sm:$0xff] }
 0x2d0   :  { %v8101_v31 = vpack.c.bf16 %v1705_v50, %v1701_v4  ;;  %v1506_v3 = vadd.f32 %v1505_v40, %v7960_v54  ;;  %v6580_v4 = vor.u32 %v6901_v14, %v6577_v37 }
 0x2d1   :  { %v1327_v58 = vpop.f32.mrf.mxu2 }
 0x2d2   :  { %9204 = vst [vmem:[#allocation47_spill] sm:$0xff] %v8101_v31  ;;  %v1595_v21 = vadd.f32 %v1594_v8, %v1506_v3  ;;  %v1328_v45 = vadd.f32 %v1327_v58, %v7965_v15  ;;  %v1416_v53 = vpop.f32.mrf.mxu3  ;;  %3178 = vmatmul.bf16.gmra.mxu0 %v8017_v55  ;;  %3602 = vmatpush.bf16.msra.mxu1 %v6580_v4 }
 0x2d4   :  { %v1417_v9 = vadd.f32 %v1416_v53, %v1328_v45  ;;  %v1596_v41 = vpop.f32.mrf.mxu1  ;;  %v1710_v3 = vmax.f32 %v1595_v21, 0.0  ;;  %v9206_v53 = vld [vmem:[#allocation18_spill] sm:$0xff] }
 0x2d5   :  { %v5977_v21 = vld [vmem:[#allocation5 + $0xd8] sm:$0xf0] }
 0x2d6   :  { %v1709_v55 = vmax.f32 %v1417_v9, 0.0 }
 0x2d7   :  { %v1507_v30 = vpop.f32.mrf.mxu0 }
 0x2d8   :  { %v1508_v50 = vadd.f32 %v1507_v30, %v7960_v54  ;;  %v6751_v30 = vld [vmem:[#allocation5 + $0xc4] sm:$0xf] }
 0x2d9   :  { %v1329_v40 = vpop.f32.mrf.mxu2  ;;  %v5980_v4 = vor.u32 %v6751_v30, %v5977_v21 }
 0x2da   :  { %v1597_v28 = vadd.f32 %v1596_v41, %v1508_v50  ;;  %v1330_v16 = vadd.f32 %v1329_v40, %v7965_v15  ;;  %v1418_v8 = vpop.f32.mrf.mxu3 }
 0x2db   :  { %3336 = vmatpush.bf16.msra.mxu2 %v5980_v4 }
 0x2dc   :  { %v1714_v6 = vmax.f32 %v1597_v28, 0.0  ;;  %v1419_v58 = vadd.f32 %v1418_v8, %v1330_v16  ;;  %v1599_v20 = vpop.f32.mrf.mxu1 }
 0x2de   :  { %v8108_v35 = vpack.c.bf16 %v1714_v6, %v1710_v3  ;;  %v1713_v45 = vmax.f32 %v1419_v58, 0.0  ;;  %3005 = vmatmul.bf16.gmra.mxu2 %v9206_v53  ;;  %v6853_v3 = vld [vmem:[#allocation5 + $0x3f4] sm:$0xf]  ;;  %v6385_v6 = vld [vmem:[#allocation5 + $0x408] sm:$0xf0] }
 0x2df   :  { %3094 = vmatmul.bf16.gmra.mxu3 %v9207_v0  ;;  %3272 = vmatmul.bf16.gmra.mxu1 %v8024_v2  ;;  %v1510_v14 = vpop.f32.mrf.mxu0 }
 0x2e0   :  { %9205 = vst [vmem:[#allocation48_spill] sm:$0xff] %v8108_v35  ;;  %v8113_v37 = vpack.c.bf16 %v1713_v45, %v1709_v55  ;;  %v1511_v41 = vadd.f32 %v1510_v14, %v7960_v54  ;;  %v6388_v55 = vor.u32 %v6853_v3, %v6385_v6  ;;  %v6799_v6 = vld [vmem:[#allocation5 + $0x244] sm:$0xf] }
 0x2e1   :  { %v1332_v28 = vpop.f32.mrf.mxu2 }
 0x2e2   :  { %9208 = vst [vmem:[#allocation49_spill] sm:$0xff] %v8113_v37  ;;  %v1600_v50 = vadd.f32 %v1599_v20, %v1511_v41  ;;  %v1333_v9 = vadd.f32 %v1332_v28, %v7965_v15  ;;  %v1421_v40 = vpop.f32.mrf.mxu3  ;;  %3183 = vmatmul.bf16.gmra.mxu0 %v8029_v12 }
 0x2e3   :  { %3513 = vmatpush.bf16.msra.mxu0 %v6388_v55 }
 0x2e4   :  { %v1422_v16 = vadd.f32 %v1421_v40, %v1333_v9  ;;  %v1601_v8 = vpop.f32.mrf.mxu1  ;;  %v1718_v41 = vmax.f32 %v1600_v50, 0.0  ;;  %v6169_v50 = vld [vmem:[#allocation5 + $0x258] sm:$0xf0] }
 0x2e6   :  { %v1717_v12 = vmax.f32 %v1422_v16, 0.0 }
 0x2e7   :  { %v1512_v58 = vpop.f32.mrf.mxu0 }
 0x2e8   :  { %v1513_v45 = vadd.f32 %v1512_v58, %v7960_v54  ;;  %v6172_v58 = vor.u32 %v6799_v6, %v6169_v50 }
 0x2e9   :  { %v1334_v14 = vpop.f32.mrf.mxu2 }
 0x2ea   :  { %v1602_v2 = vadd.f32 %v1601_v8, %v1513_v45  ;;  %v1335_v30 = vadd.f32 %v1334_v14, %v7965_v15  ;;  %v1423_v20 = vpop.f32.mrf.mxu3  ;;  %3425 = vmatpush.bf16.msra.mxu3 %v6172_v58 }
 0x2ec   :  { %v1722_v21 = vmax.f32 %v1602_v2, 0.0  ;;  %v1424_v28 = vadd.f32 %v1423_v20, %v1335_v30  ;;  %v1604_v0 = vpop.f32.mrf.mxu1  ;;  %v6895_v20 = vld [vmem:[#allocation5 + $0x544] sm:$0xf] }
 0x2ee   :  { %v8120_v4 = vpack.c.bf16 %v1722_v21, %v1718_v41  ;;  %v1721_v9 = vmax.f32 %v1424_v28, 0.0  ;;  %3010 = vmatmul.bf16.gmra.mxu2 %v7836_v42  ;;  %v6553_v41 = vld [vmem:[#allocation5 + $0x558] sm:$0xf0] }
 0x2ef   :  { %3099 = vmatmul.bf16.gmra.mxu3 %v7831_v61  ;;  %3277 = vmatmul.bf16.gmra.mxu1 %v8036_v33  ;;  %v1515_v40 = vpop.f32.mrf.mxu0 }
 0x2f0   :  { %v8125_v3 = vpack.c.bf16 %v1721_v9, %v1717_v12  ;;  %v1516_v8 = vadd.f32 %v1515_v40, %v7960_v54  ;;  %v6556_v12 = vor.u32 %v6895_v20, %v6553_v41  ;;  %v6745_v41 = vld [vmem:[#allocation5 + $0x94] sm:$0xf] }
 0x2f1   :  { %v1337_v2 = vpop.f32.mrf.mxu2 }
 0x2f2   :  { %9209 = vst [vmem:[#allocation50_spill] sm:$0xff] %v8125_v3  ;;  %v1605_v55 = vadd.f32 %v1604_v0, %v1516_v8  ;;  %v1338_v16 = vadd.f32 %v1337_v2, %v7965_v15  ;;  %v1426_v45 = vpop.f32.mrf.mxu3  ;;  %3188 = vmatmul.bf16.gmra.mxu0 %v8041_v27  ;;  %3603 = vmatpush.bf16.msra.mxu1 %v6556_v12 }
 0x2f4   :  { %v1427_v14 = vadd.f32 %v1426_v45, %v1338_v16  ;;  %v1606_v30 = vpop.f32.mrf.mxu1  ;;  %v1726_v8 = vmax.f32 %v1605_v55, 0.0  ;;  %v5953_v55 = vld [vmem:[#allocation5 + $0xa8] sm:$0xf0] }
 0x2f5   :  { %v5956_v12 = vor.u32 %v6745_v41, %v5953_v55 }
 0x2f6   :  { %v1725_v27 = vmax.f32 %v1427_v14, 0.0 }
 0x2f7   :  { %v1517_v21 = vpop.f32.mrf.mxu0  ;;  %3337 = vmatpush.bf16.msra.mxu2 %v5956_v12 }
 0x2f8   :  { %v1518_v28 = vadd.f32 %v1517_v21, %v7960_v54 }
 0x2f9   :  { %v1339_v9 = vpop.f32.mrf.mxu2 }
 0x2fa   :  { %v1607_v40 = vadd.f32 %v1606_v30, %v1518_v28  ;;  %v1340_v6 = vadd.f32 %v1339_v9, %v7965_v15  ;;  %v1428_v0 = vpop.f32.mrf.mxu3 }
 0x2fc   :  { %v1730_v50 = vmax.f32 %v1607_v40, 0.0  ;;  %v1429_v2 = vadd.f32 %v1428_v0, %v1340_v6  ;;  %v1609_v33 = vpop.f32.mrf.mxu1 }
 0x2fe   :  { %v8132_v58 = vpack.c.bf16 %v1730_v50, %v1726_v8  ;;  %v1729_v16 = vmax.f32 %v1429_v2, 0.0  ;;  %3015 = vmatmul.bf16.gmra.mxu2 %v7854_v38 }
 0x2ff   :  { %3104 = vmatmul.bf16.gmra.mxu3 %v7849_v1  ;;  %3282 = vmatmul.bf16.gmra.mxu1 %v8048_v34  ;;  %v1520_v45 = vpop.f32.mrf.mxu0  ;;  %v6361_v34 = vld [vmem:[#allocation5 + $0x3d8] sm:$0xf0] }
 0x300   :  { %9210 = vst [vmem:[#allocation51_spill] sm:$0xff] %v8132_v58  ;;  %v8137_v20 = vpack.c.bf16 %v1729_v16, %v1725_v27  ;;  %v1521_v30 = vadd.f32 %v1520_v45, %v7960_v54  ;;  %v6847_v45 = vld [vmem:[#allocation5 + $0x3c4] sm:$0xf] }
 0x301   :  { %v1342_v21 = vpop.f32.mrf.mxu2  ;;  %v6364_v41 = vor.u32 %v6847_v45, %v6361_v34 }
 0x302   :  { %9211 = vst [vmem:[#allocation52_spill] sm:$0xff] %v8137_v20  ;;  %v1610_v28 = vadd.f32 %v1609_v33, %v1521_v30  ;;  %v1343_v14 = vadd.f32 %v1342_v21, %v7965_v15  ;;  %v1431_v9 = vpop.f32.mrf.mxu3  ;;  %3193 = vmatmul.bf16.gmra.mxu0 %v8053_v10 }
 0x303   :  { %3514 = vmatpush.bf16.msra.mxu0 %v6364_v41 }
 0x304   :  { %v1432_v40 = vadd.f32 %v1431_v9, %v1343_v14  ;;  %v1611_v6 = vpop.f32.mrf.mxu1  ;;  %v1734_v33 = vmax.f32 %v1610_v28, 0.0 }
 0x306   :  { %v1733_v10 = vmax.f32 %v1432_v40, 0.0  ;;  %v6793_v40 = vld [vmem:[#allocation5 + $0x214] sm:$0xf] }
 0x307   :  { %v1522_v0 = vpop.f32.mrf.mxu0 }
 0x308   :  { %v1523_v8 = vadd.f32 %v1522_v0, %v7960_v54 }
 0x309   :  { %v1344_v27 = vpop.f32.mrf.mxu2 }
 0x30a   :  { %v1612_v50 = vadd.f32 %v1611_v6, %v1523_v8  ;;  %v1345_v2 = vadd.f32 %v1344_v27, %v7965_v15  ;;  %v1433_v16 = vpop.f32.mrf.mxu3 }
 0x30c   :  { %v1738_v30 = vmax.f32 %v1612_v50, 0.0  ;;  %v1434_v55 = vadd.f32 %v1433_v16, %v1345_v2  ;;  %v1614_v21 = vpop.f32.mrf.mxu1  ;;  %v6145_v50 = vld [vmem:[#allocation5 + $0x228] sm:$0xf0] }
 0x30d   :  { %v6148_v2 = vor.u32 %v6793_v40, %v6145_v50 }
 0x30e   :  { %v8144_v12 = vpack.c.bf16 %v1738_v30, %v1734_v33  ;;  %v1737_v14 = vmax.f32 %v1434_v55, 0.0  ;;  %3020 = vmatmul.bf16.gmra.mxu2 %v7866_v26 }
 0x30f   :  { %3109 = vmatmul.bf16.gmra.mxu3 %v7861_v49  ;;  %3287 = vmatmul.bf16.gmra.mxu1 %v8060_v63  ;;  %v1525_v9 = vpop.f32.mrf.mxu0 }
 0x310   :  { %v8149_v6 = vpack.c.bf16 %v1737_v14, %v1733_v10  ;;  %v1526_v34 = vadd.f32 %v1525_v9, %v7960_v54  ;;  %3426 = vmatpush.bf16.msra.mxu3 %v6148_v2  ;;  %v6529_v9 = vld [vmem:[#allocation5 + $0x528] sm:$0xf0] }
 0x311   :  { %v1347_v28 = vpop.f32.mrf.mxu2 }
 0x312   :  { %v1615_v0 = vadd.f32 %v1614_v21, %v1526_v34  ;;  %v1348_v8 = vadd.f32 %v1347_v28, %v7965_v15  ;;  %v1436_v27 = vpop.f32.mrf.mxu3  ;;  %3198 = vmatmul.bf16.gmra.mxu0 %v8065_v46  ;;  %v6889_v21 = vld [vmem:[#allocation5 + $0x514] sm:$0xf]  ;;  %v8159_v34 = vld [vmem:[%s9061_s6] sm:$0x3f] }
 0x313   :  { %9212 = vst [vmem:[#allocation53_spill] sm:$0xff] %v8159_v34  ;;  %v6532_v28 = vor.u32 %v6889_v21, %v6529_v9 }
 0x314   :  { %v1437_v16 = vadd.f32 %v1436_v27, %v1348_v8  ;;  %v1616_v45 = vpop.f32.mrf.mxu1  ;;  %v1742_v40 = vmax.f32 %v1615_v0, 0.0 }
 0x315   :  { %3604 = vmatpush.bf16.msra.mxu1 %v6532_v28 }
 0x316   :  { %v1741_v2 = vmax.f32 %v1437_v16, 0.0  ;;  %v6739_v16 = vld [vmem:[#allocation5 + $0x64] sm:$0xf] }
 0x317   :  { %v1527_v41 = vpop.f32.mrf.mxu0 }
 0x318   :  { %v1528_v33 = vadd.f32 %v1527_v41, %v7960_v54 }
 0x319   :  { %v1349_v10 = vpop.f32.mrf.mxu2 }
 0x31a   :  { %v1617_v30 = vadd.f32 %v1616_v45, %v1528_v33  ;;  %v1350_v55 = vadd.f32 %v1349_v10, %v7965_v15  ;;  %v1438_v14 = vpop.f32.mrf.mxu3  ;;  %v8165_v15 = vperm.slane %v8159_v34, 0 }
 0x31c   :  { %v1746_v8 = vmax.f32 %v1617_v30, 0.0  ;;  %v1439_v27 = vadd.f32 %v1438_v14, %v1350_v55  ;;  %v3253_v50 = vpop.f32.mrf.mxu1  ;;  %v5929_v55 = vld [vmem:[#allocation5 + $0x78] sm:$0xf0] }
 0x31d   :  { %v5932_v14 = vor.u32 %v6739_v16, %v5929_v55 }
 0x31e   :  { %v8161_v54 = vpack.c.bf16 %v1746_v8, %v1742_v40  ;;  %v1745_v45 = vmax.f32 %v1439_v27, 0.0  ;;  %3025 = vmatmul.bf16.gmra.mxu2 %v7878_v13 }
 0x31f   :  { %3114 = vmatmul.bf16.gmra.mxu3 %v7873_v59  ;;  %3292 = vmatmul.bf16.gmra.mxu1 %v8072_v24  ;;  %v3164_v41 = vpop.f32.mrf.mxu0  ;;  %v6841_v24 = vld [vmem:[#allocation5 + $0x394] sm:$0xf]  ;;  %v6337_v59 = vld [vmem:[#allocation5 + $0x3a8] sm:$0xf0] }
 0x320   :  { %9213 = vst [vmem:[#allocation54_spill] sm:$0xff] %v8161_v54  ;;  %v8169_v33 = vpack.c.bf16 %v1745_v45, %v1741_v2  ;;  %3338 = vmatpush.bf16.msra.mxu2 %v5932_v14 }
 0x321   :  { %v2986_v0 = vpop.f32.mrf.mxu2 }
 0x322   :  { %9214 = vst [vmem:[#allocation55_spill] sm:$0xff] %v8169_v33  ;;  %v2987_v10 = vadd.f32 %v2986_v0, %v8165_v15  ;;  %v3075_v30 = vpop.f32.mrf.mxu3  ;;  %3203 = vmatmul.bf16.gmra.mxu0 %v8077_v52  ;;  %v6340_v0 = vor.u32 %v6841_v24, %v6337_v59  ;;  %v6787_v59 = vld [vmem:[#allocation5 + $0x1e4] sm:$0xf]  ;;  %v6121_v24 = vld [vmem:[#allocation5 + $0x1f8] sm:$0xf0] }
 0x323   :  { %v6124_v55 = vor.u32 %v6787_v59, %v6121_v24  ;;  %v6733_v24 = vld [vmem:[#allocation5 + $0x34] sm:$0xf] }
 0x324   :  { %v3076_v21 = vadd.f32 %v3075_v30, %v2987_v10  ;;  %v3255_v9 = vpop.f32.mrf.mxu1  ;;  %3515 = vmatpush.bf16.msra.mxu0 %v6340_v0 }
 0x325   :  { %3427 = vmatpush.bf16.msra.mxu3 %v6124_v55  ;;  %v5905_v55 = vld [vmem:[#allocation5 + $0x48] sm:$0xf0] }
 0x326   :  { %v3165_v28 = vadd.f32 %v3164_v41, %v3076_v21 }
 0x327   :  { %v3166_v40 = vpop.f32.mrf.mxu0 }
 0x328   :  { %v8173_v8 = vadd.f32 %v3253_v50, %v3165_v28 }
 0x329   :  { %v2988_v27 = vpop.f32.mrf.mxu2 }
 0x32a   :  { %v2989_v2 = vadd.f32 %v2988_v27, %v8165_v15  ;;  %v3077_v45 = vpop.f32.mrf.mxu3  ;;  %6936 = vtanh.f32 %v8173_v8 }
 0x32c   :  { %v3078_v34 = vadd.f32 %v3077_v45, %v2989_v2  ;;  %v3258_v13 = vpop.f32.mrf.mxu1  ;;  %v6883_v2 = vld [vmem:[#allocation5 + $0x4e4] sm:$0xf]  ;;  %v6505_v45 = vld [vmem:[#allocation5 + $0x4f8] sm:$0xf0] }
 0x32d   :  { %v6508_v0 = vor.u32 %v6883_v2, %v6505_v45  ;;  %v6835_v45 = vld [vmem:[#allocation5 + $0x364] sm:$0xf] }
 0x32e   :  { %v3167_v52 = vadd.f32 %v3166_v40, %v3078_v34  ;;  %3030 = vmatmul.bf16.gmra.mxu2 %v7890_v36 }
 0x32f   :  { %3119 = vmatmul.bf16.gmra.mxu3 %v7885_v19  ;;  %3297 = vmatmul.bf16.gmra.mxu1 %v8084_v62  ;;  %v3169_v41 = vpop.f32.mrf.mxu0 }
 0x330   :  { %v8179_v50 = vadd.f32 %v3255_v9, %v3167_v52  ;;  %3605 = vmatpush.bf16.msra.mxu1 %v6508_v0  ;;  %v6313_v0 = vld [vmem:[#allocation5 + $0x378] sm:$0xf0] }
 0x331   :  { %v2991_v10 = vpop.f32.mrf.mxu2 }
 0x332   :  { %9215 = vst [vmem:[#allocation56_spill] sm:$0xff] %v8179_v50  ;;  %v2992_v30 = vadd.f32 %v2991_v10, %v8165_v15  ;;  %v3080_v16 = vpop.f32.mrf.mxu3  ;;  %3208 = vmatmul.bf16.gmra.mxu0 %v8089_v39 }
 0x334   :  { %v3081_v14 = vadd.f32 %v3080_v16, %v2992_v30  ;;  %v3260_v34 = vpop.f32.mrf.mxu1 }
 0x336   :  { %v3170_v21 = vadd.f32 %v3169_v41, %v3081_v14  ;;  %v5908_v14 = vor.u32 %v6733_v24, %v5905_v55  ;;  %v6781_v55 = vld [vmem:[#allocation5 + $0x1b4] sm:$0xf] }
 0x337   :  { %v3171_v28 = vpop.f32.mrf.mxu0 }
 0x338   :  { %v8183_v40 = vadd.f32 %v3258_v13, %v3170_v21  ;;  %3339 = vmatpush.bf16.msra.mxu2 %v5908_v14  ;;  %v6097_v14 = vld [vmem:[#allocation5 + $0x1c8] sm:$0xf0] }
 0x339   :  { %v2993_v27 = vpop.f32.mrf.mxu2 }
 0x33a   :  { %v2994_v52 = vadd.f32 %v2993_v27, %v8165_v15  ;;  %v3082_v9 = vpop.f32.mrf.mxu3 }
 0x33c   :  { %v3083_v10 = vadd.f32 %v3082_v9, %v2994_v52  ;;  %v3263_v50 = vpop.f32.mrf.mxu1 }
 0x33e   :  { %v3172_v39 = vadd.f32 %v3171_v28, %v3083_v10  ;;  %3035 = vmatmul.bf16.gmra.mxu2 %v7902_v11  ;;  %v6316_v10 = vor.u32 %v6835_v45, %v6313_v0  ;;  %v6877_v0 = vld [vmem:[#allocation5 + $0x4b4] sm:$0xf] }
 0x33f   :  { %3124 = vmatmul.bf16.gmra.mxu3 %v7897_v48  ;;  %3302 = vmatmul.bf16.gmra.mxu1 %v8096_v43  ;;  %v3174_v41 = vpop.f32.mrf.mxu0 }
 0x340   :  { %v8189_v13 = vadd.f32 %v3260_v34, %v3172_v39  ;;  %3516 = vmatpush.bf16.msra.mxu0 %v6316_v10  ;;  %v6481_v10 = vld [vmem:[#allocation5 + $0x4c8] sm:$0xf0] }
 0x341   :  { %v2996_v30 = vpop.f32.mrf.mxu2 }
 0x342   :  { %9216 = vst [vmem:[#allocation57_spill] sm:$0xff] %v8189_v13  ;;  %v2997_v16 = vadd.f32 %v2996_v30, %v8165_v15  ;;  %v3085_v59 = vpop.f32.mrf.mxu3  ;;  %3213 = vmatmul.bf16.gmra.mxu0 %v8101_v31 }
 0x344   :  { %v3086_v21 = vadd.f32 %v3085_v59, %v2997_v16  ;;  %v3265_v28 = vpop.f32.mrf.mxu1 }
 0x346   :  { %v3175_v27 = vadd.f32 %v3174_v41, %v3086_v21  ;;  %v6100_v21 = vor.u32 %v6781_v55, %v6097_v14  ;;  %v6727_v14 = vld [vmem:[#allocation5 + $0x4] sm:$0xf] }
 0x347   :  { %v3176_v52 = vpop.f32.mrf.mxu0 }
 0x348   :  { %v8193_v9 = vadd.f32 %v3263_v50, %v3175_v27  ;;  %3428 = vmatpush.bf16.msra.mxu3 %v6100_v21  ;;  %v5881_v21 = vld [vmem:[#allocation5 + $0x18] sm:$0xf0] }
 0x349   :  { %v2998_v2 = vpop.f32.mrf.mxu2 }
 0x34a   :  { %v2999_v39 = vadd.f32 %v2998_v2, %v8165_v15  ;;  %v3087_v34 = vpop.f32.mrf.mxu3 }
 0x34c   :  { %v3088_v30 = vadd.f32 %v3087_v34, %v2999_v39  ;;  %v3268_v13 = vpop.f32.mrf.mxu1 }
 0x34e   :  { %v3177_v31 = vadd.f32 %v3176_v52, %v3088_v30  ;;  %3040 = vmatmul.bf16.gmra.mxu2 %v7914_v44  ;;  %v6484_v30 = vor.u32 %v6877_v0, %v6481_v10  ;;  %v6829_v10 = vld [vmem:[#allocation5 + $0x334] sm:$0xf] }
 0x34f   :  { %3129 = vmatmul.bf16.gmra.mxu3 %v7909_v7  ;;  %3307 = vmatmul.bf16.gmra.mxu1 %v8108_v35  ;;  %v3179_v41 = vpop.f32.mrf.mxu0 }
 0x350   :  { %v8199_v50 = vadd.f32 %v3265_v28, %v3177_v31  ;;  %3606 = vmatpush.bf16.msra.mxu1 %v6484_v30  ;;  %v6289_v30 = vld [vmem:[#allocation5 + $0x348] sm:$0xf0] }
 0x351   :  { %v3001_v16 = vpop.f32.mrf.mxu2 }
 0x352   :  { %9217 = vst [vmem:[#allocation58_spill] sm:$0xff] %v8199_v50  ;;  %v3002_v59 = vadd.f32 %v3001_v16, %v8165_v15  ;;  %v3090_v24 = vpop.f32.mrf.mxu3  ;;  %3218 = vmatmul.bf16.gmra.mxu0 %v8113_v37 }
 0x354   :  { %v3091_v27 = vadd.f32 %v3090_v24, %v3002_v59  ;;  %v3270_v52 = vpop.f32.mrf.mxu1 }
 0x356   :  { %v3180_v2 = vadd.f32 %v3179_v41, %v3091_v27  ;;  %v5884_v27 = vor.u32 %v6727_v14, %v5881_v21  ;;  %v6775_v21 = vld [vmem:[#allocation5 + $0x184] sm:$0xf] }
 0x357   :  { %v3181_v39 = vpop.f32.mrf.mxu0 }
 0x358   :  { %v8203_v34 = vadd.f32 %v3268_v13, %v3180_v2  ;;  %3340 = vmatpush.bf16.msra.mxu2 %v5884_v27  ;;  %v6073_v27 = vld [vmem:[#allocation5 + $0x198] sm:$0xf0] }
 0x359   :  { %v3003_v45 = vpop.f32.mrf.mxu2 }
 0x35a   :  { %v3004_v31 = vadd.f32 %v3003_v45, %v8165_v15  ;;  %v3092_v28 = vpop.f32.mrf.mxu3 }
 0x35c   :  { %v3093_v16 = vadd.f32 %v3092_v28, %v3004_v31  ;;  %v3273_v50 = vpop.f32.mrf.mxu1 }
 0x35e   :  { %v3182_v37 = vadd.f32 %v3181_v39, %v3093_v16  ;;  %3045 = vmatmul.bf16.gmra.mxu2 %v7926_v32  ;;  %v6292_v16 = vor.u32 %v6829_v10, %v6289_v30  ;;  %v6871_v30 = vld [vmem:[#allocation5 + $0x484] sm:$0xf] }
 0x35f   :  { %3134 = vmatmul.bf16.gmra.mxu3 %v7921_v51  ;;  %3312 = vmatmul.bf16.gmra.mxu1 %v8120_v4  ;;  %v3184_v41 = vpop.f32.mrf.mxu0 }
 0x360   :  { %v8209_v13 = vadd.f32 %v3270_v52, %v3182_v37  ;;  %3517 = vmatpush.bf16.msra.mxu0 %v6292_v16 }
 0x361   :  { %v3006_v59 = vpop.f32.mrf.mxu2 }
 0x362   :  { %9218 = vst [vmem:[#allocation59_spill] sm:$0xff] %v8209_v13  ;;  %v3007_v24 = vadd.f32 %v3006_v59, %v8165_v15  ;;  %v3095_v55 = vpop.f32.mrf.mxu3  ;;  %3223 = vmatmul.bf16.gmra.mxu0 %v8125_v3 }
 0x364   :  { %v3096_v2 = vadd.f32 %v3095_v55, %v3007_v24  ;;  %v3275_v39 = vpop.f32.mrf.mxu1 }
 0x366   :  { %v3185_v45 = vadd.f32 %v3184_v41, %v3096_v2  ;;  %v6076_v2 = vor.u32 %v6775_v21, %v6073_v27 }
 0x367   :  { %v3186_v31 = vpop.f32.mrf.mxu0 }
 0x368   :  { %v8213_v28 = vadd.f32 %v3273_v50, %v3185_v45  ;;  %3429 = vmatpush.bf16.msra.mxu3 %v6076_v2 }
 0x369   :  { %v3008_v0 = vpop.f32.mrf.mxu2 }
 0x36a   :  { %v3009_v37 = vadd.f32 %v3008_v0, %v8165_v15  ;;  %v3097_v52 = vpop.f32.mrf.mxu3 }
 0x36c   :  { %v3098_v59 = vadd.f32 %v3097_v52, %v3009_v37  ;;  %v3278_v13 = vpop.f32.mrf.mxu1 }
 0x36e   :  { %v3187_v3 = vadd.f32 %v3186_v31, %v3098_v59  ;;  %3050 = vmatmul.bf16.gmra.mxu2 %v7938_v18 }
 0x36f   :  { %3139 = vmatmul.bf16.gmra.mxu3 %v7933_v25  ;;  %3317 = vmatmul.bf16.gmra.mxu1 %v8132_v58  ;;  %v3189_v41 = vpop.f32.mrf.mxu0  ;;  %v6265_v58 = vld [vmem:[#allocation5 + $0x318] sm:$0xf0] }
 0x370   :  { %v8219_v50 = vadd.f32 %v3275_v39, %v3187_v3  ;;  %v6457_v3 = vld [vmem:[#allocation5 + $0x498] sm:$0xf0] }
 0x371   :  { %v3011_v24 = vpop.f32.mrf.mxu2  ;;  %v6460_v59 = vor.u32 %v6871_v30, %v6457_v3 }
 0x372   :  { %9219 = vst [vmem:[#allocation60_spill] sm:$0xff] %v8219_v50  ;;  %v3012_v55 = vadd.f32 %v3011_v24, %v8165_v15  ;;  %v3100_v14 = vpop.f32.mrf.mxu3  ;;  %3228 = vmatmul.bf16.gmra.mxu0 %v8137_v20  ;;  %v6823_v20 = vld [vmem:[#allocation5 + $0x304] sm:$0xf] }
 0x373   :  { %3607 = vmatpush.bf16.msra.mxu1 %v6460_v59 }
 0x374   :  { %v3101_v45 = vadd.f32 %v3100_v14, %v3012_v55  ;;  %v3280_v31 = vpop.f32.mrf.mxu1  ;;  %v6268_v55 = vor.u32 %v6823_v20, %v6265_v58 }
 0x376   :  { %v3190_v0 = vadd.f32 %v3189_v41, %v3101_v45  ;;  %3518 = vmatpush.bf16.msra.mxu0 %v6268_v55  ;;  %v6055_v45 = vld [vmem:[#allocation5 + $0x158] sm:$0xf] }
 0x377   :  { %v3191_v37 = vpop.f32.mrf.mxu0 }
 0x378   :  { %v8223_v52 = vadd.f32 %v3278_v13, %v3190_v0  ;;  %v6773_v0 = vld [vmem:[#allocation5 + $0x16c] sm:$0xf0] }
 0x379   :  { %v3013_v10 = vpop.f32.mrf.mxu2 }
 0x37a   :  { %v3014_v39 = vadd.f32 %v3013_v10, %v8165_v15  ;;  %v3102_v16 = vpop.f32.mrf.mxu3 }
 0x37c   :  { %v3103_v24 = vadd.f32 %v3102_v16, %v3014_v39  ;;  %v3283_v50 = vpop.f32.mrf.mxu1 }
 0x37e   :  { %v3192_v21 = vadd.f32 %v3191_v37, %v3103_v24  ;;  %3055 = vmatmul.bf16.gmra.mxu2 %v7950_v47  ;;  %v6056_v37 = vor.u32 %v6773_v0, %v6055_v45  ;;  %v6821_v45 = vld [vmem:[#allocation5 + $0x2ec] sm:$0xf0] }
 0x37f   :  { %3144 = vmatmul.bf16.gmra.mxu3 %v7945_v5  ;;  %3322 = vmatmul.bf16.gmra.mxu1 %v8144_v12  ;;  %v3194_v13 = vpop.f32.mrf.mxu0 }
 0x380   :  { %v8229_v41 = vadd.f32 %v3280_v31, %v3192_v21  ;;  %3689 = vmatpush.bf16.msrb.mxu2 %v6056_v37 }
 0x381   :  { %v3016_v14 = vpop.f32.mrf.mxu2 }
 0x382   :  { %v3017_v27 = vadd.f32 %v3016_v14, %v8165_v15  ;;  %v3105_v2 = vpop.f32.mrf.mxu3  ;;  %3233 = vmatmul.bf16.gmra.mxu0 %v8149_v6 }
 0x384   :  { %v3106_v10 = vadd.f32 %v3105_v2, %v3017_v27  ;;  %v3285_v30 = vpop.f32.mrf.mxu1  ;;  %v6247_v2 = vld [vmem:[#allocation5 + $0x2d8] sm:$0xf] }
 0x385   :  { %v6248_v0 = vor.u32 %v6821_v45, %v6247_v2  ;;  %v9222_v45 = vld [vmem:[#allocation29_spill] sm:$0xff] }
 0x386   :  { %v3195_v58 = vadd.f32 %v3194_v13, %v3106_v10 }
 0x387   :  { %v3196_v20 = vpop.f32.mrf.mxu0  ;;  %3778 = vmatpush.bf16.msrb.mxu3 %v6248_v0  ;;  %v6031_v0 = vld [vmem:[#allocation5 + $0x128] sm:$0xf] }
 0x388   :  { %v8233_v3 = vadd.f32 %v3283_v50, %v3195_v58 }
 0x389   :  { %v3018_v39 = vpop.f32.mrf.mxu2 }
 0x38a   :  { %v3019_v31 = vadd.f32 %v3018_v39, %v8165_v15  ;;  %v3107_v16 = vpop.f32.mrf.mxu3 }
 0x38c   :  { %v3108_v59 = vadd.f32 %v3107_v16, %v3019_v31  ;;  %v3288_v24 = vpop.f32.mrf.mxu1 }
 0x38e   :  { %v3197_v21 = vadd.f32 %v3196_v20, %v3108_v59  ;;  %3060 = vmatmul.bf16.gmra.mxu2 %v7969_v23  ;;  %v6631_v59 = vld [vmem:[#allocation5 + $0x5d8] sm:$0xf] }
 0x38f   :  { %3149 = vmatmul.bf16.gmra.mxu3 %v7962_v29  ;;  %3327 = vmatmul.bf16.gmra.mxu1 %v8161_v54  ;;  %v3199_v55 = vpop.f32.mrf.mxu0 }
 0x390   :  { %v8239_v14 = vadd.f32 %v3285_v30, %v3197_v21  ;;  %v6917_v21 = vld [vmem:[#allocation5 + $0x5ec] sm:$0xf0] }
 0x391   :  { %v3021_v13 = vpop.f32.mrf.mxu2 }
 0x392   :  { %9220 = vst [vmem:[#allocation61_spill] sm:$0xff] %v8239_v14  ;;  %v3022_v50 = vadd.f32 %v3021_v13, %v8165_v15  ;;  %v3110_v27 = vpop.f32.mrf.mxu3  ;;  %3238 = vmatmul.bf16.gmra.mxu0 %v8169_v33  ;;  %v6632_v13 = vor.u32 %v6917_v21, %v6631_v59  ;;  %v6439_v21 = vld [vmem:[#allocation5 + $0x458] sm:$0xf] }
 0x394   :  { %v3111_v37 = vadd.f32 %v3110_v27, %v3022_v50  ;;  %v3290_v10 = vpop.f32.mrf.mxu1  ;;  %3956 = vmatpush.bf16.msrb.mxu1 %v6632_v13  ;;  %v6869_v13 = vld [vmem:[#allocation5 + $0x46c] sm:$0xf0] }
 0x396   :  { %v3200_v58 = vadd.f32 %v3199_v55, %v3111_v37  ;;  %v6767_v37 = vld [vmem:[#allocation5 + $0x13c] sm:$0xf0] }
 0x397   :  { %v3201_v20 = vpop.f32.mrf.mxu0 }
 0x398   :  { %v8243_v39 = vadd.f32 %v3288_v24, %v3200_v58  ;;  %v6032_v58 = vor.u32 %v6767_v37, %v6031_v0 }
 0x399   :  { %v3023_v31 = vpop.f32.mrf.mxu2 }
 0x39a   :  { %v3024_v30 = vadd.f32 %v3023_v31, %v8165_v15  ;;  %v3112_v16 = vpop.f32.mrf.mxu3  ;;  %3690 = vmatpush.bf16.msrb.mxu2 %v6032_v58 }
 0x39c   :  { %v3113_v14 = vadd.f32 %v3112_v16, %v3024_v30  ;;  %v3293_v54 = vpop.f32.mrf.mxu1 }
 0x39e   :  { %v3202_v33 = vadd.f32 %v3201_v20, %v3113_v14  ;;  %3341 = vmatmul.bf16.vlgmr.msra.gmra.mxu2 %v7746_v60 }
 0x39f   :  { %3430 = vmatmul.bf16.vlgmr.msra.gmra.mxu3 %v7741_v56  ;;  %3608 = vmatmul.bf16.vlgmr.msra.gmra.mxu1 %v7976_v17  ;;  %v3204_v55 = vpop.f32.mrf.mxu0 }
 0x3a0   :  { %v8249_v24 = vadd.f32 %v3290_v10, %v3202_v33 }
 0x3a1   :  { %v3026_v50 = vpop.f32.mrf.mxu2 }
 0x3a2   :  { %9221 = vst [vmem:[#allocation62_spill] sm:$0xff] %v8249_v24  ;;  %v3027_v27 = vadd.f32 %v3026_v50, %v8165_v15  ;;  %v3115_v2 = vpop.f32.mrf.mxu3  ;;  %3519 = vmatmul.bf16.vlgmr.msra.gmra.mxu0 %v9222_v45  ;;  %v6440_v50 = vor.u32 %v6869_v13, %v6439_v21 }
 0x3a4   :  { %v3116_v31 = vadd.f32 %v3115_v2, %v3027_v27  ;;  %v3295_v14 = vpop.f32.mrf.mxu1  ;;  %3867 = vmatpush.bf16.msrb.mxu0 %v6440_v50  ;;  %v9223_v27 = vld [vmem:[#allocation11_spill] sm:$0xff]  ;;  %v9224_v2 = vld [vmem:[#allocation30_spill] sm:$0xff] }
 0x3a6   :  { %v3205_v20 = vadd.f32 %v3204_v55, %v3116_v31  ;;  %v9226_v31 = vld [vmem:[#allocation31_spill] sm:$0xff] }
 0x3a7   :  { %v3206_v30 = vpop.f32.mrf.mxu0 }
 0x3a8   :  { %v8253_v16 = vadd.f32 %v3293_v54, %v3205_v20  ;;  %v6223_v20 = vld [vmem:[#allocation5 + $0x2a8] sm:$0xf] }
 0x3a9   :  { %v3028_v59 = vpop.f32.mrf.mxu2 }
 0x3aa   :  { %v3029_v33 = vadd.f32 %v3028_v59, %v8165_v15  ;;  %v3117_v10 = vpop.f32.mrf.mxu3  ;;  %v6815_v59 = vld [vmem:[#allocation5 + $0x2bc] sm:$0xf0] }
 0x3ac   :  { %v3118_v24 = vadd.f32 %v3117_v10, %v3029_v33  ;;  %v3298_v17 = vpop.f32.mrf.mxu1  ;;  %v6224_v33 = vor.u32 %v6815_v59, %v6223_v20 }
 0x3ae   :  { %v3207_v45 = vadd.f32 %v3206_v30, %v3118_v24  ;;  %3346 = vmatmul.bf16.gmra.mxu2 %v7764_v22  ;;  %3779 = vmatpush.bf16.msrb.mxu3 %v6224_v33 }
 0x3af   :  { %3435 = vmatmul.bf16.gmra.mxu3 %v9223_v27  ;;  %3613 = vmatmul.bf16.gmra.mxu1 %v9224_v2  ;;  %v3209_v55 = vpop.f32.mrf.mxu0  ;;  %v6911_v2 = vld [vmem:[#allocation5 + $0x5bc] sm:$0xf0] }
 0x3b0   :  { %v8259_v54 = vadd.f32 %v3295_v14, %v3207_v45 }
 0x3b1   :  { %v3031_v0 = vpop.f32.mrf.mxu2 }
 0x3b2   :  { %9225 = vst [vmem:[#allocation63_spill] sm:$0xff] %v8259_v54  ;;  %v3032_v37 = vadd.f32 %v3031_v0, %v8165_v15  ;;  %v3120_v58 = vpop.f32.mrf.mxu3  ;;  %3524 = vmatmul.bf16.gmra.mxu0 %v9226_v31  ;;  %v6607_v54 = vld [vmem:[#allocation5 + $0x5a8] sm:$0xf] }
 0x3b3   :  { %v6608_v0 = vor.u32 %v6911_v2, %v6607_v54  ;;  %v6007_v2 = vld [vmem:[#allocation5 + $0xf8] sm:$0xf]  ;;  %v6761_v54 = vld [vmem:[#allocation5 + $0x10c] sm:$0xf0] }
 0x3b4   :  { %v3121_v10 = vadd.f32 %v3120_v58, %v3032_v37  ;;  %v3300_v24 = vpop.f32.mrf.mxu1  ;;  %v9228_v37 = vld [vmem:[#allocation13_spill] sm:$0xff]  ;;  %v9229_v58 = vld [vmem:[#allocation32_spill] sm:$0xff] }
 0x3b5   :  { %3957 = vmatpush.bf16.msrb.mxu1 %v6608_v0 }
 0x3b6   :  { %v3210_v30 = vadd.f32 %v3209_v55, %v3121_v10  ;;  %v9231_v10 = vld [vmem:[#allocation33_spill] sm:$0xff] }
 0x3b7   :  { %v3211_v21 = vpop.f32.mrf.mxu0 }
 0x3b8   :  { %v8263_v13 = vadd.f32 %v3298_v17, %v3210_v30  ;;  %v6008_v30 = vor.u32 %v6761_v54, %v6007_v2 }
 0x3b9   :  { %v3033_v50 = vpop.f32.mrf.mxu2 }
 0x3ba   :  { %9227 = vst [vmem:[#allocation64_spill] sm:$0xff] %v8263_v13  ;;  %v3034_v45 = vadd.f32 %v3033_v50, %v8165_v15  ;;  %v3122_v14 = vpop.f32.mrf.mxu3  ;;  %3691 = vmatpush.bf16.msrb.mxu2 %v6008_v30  ;;  %v9232_v13 = vld [vmem:[#allocation16_spill] sm:$0xff] }
 0x3bc   :  { %v3123_v27 = vadd.f32 %v3122_v14, %v3034_v45  ;;  %v3303_v22 = vpop.f32.mrf.mxu1 }
 0x3be   :  { %v3212_v31 = vadd.f32 %v3211_v21, %v3123_v27  ;;  %3351 = vmatmul.bf16.gmra.mxu2 %v7782_v57 }
 0x3bf   :  { %3440 = vmatmul.bf16.gmra.mxu3 %v9228_v37  ;;  %3618 = vmatmul.bf16.gmra.mxu1 %v9229_v58  ;;  %v3214_v55 = vpop.f32.mrf.mxu0  ;;  %v6863_v58 = vld [vmem:[#allocation5 + $0x43c] sm:$0xf0] }
 0x3c0   :  { %v8269_v17 = vadd.f32 %v3300_v24, %v3212_v31 }
 0x3c1   :  { %v3036_v20 = vpop.f32.mrf.mxu2 }
 0x3c2   :  { %9230 = vst [vmem:[#allocation65_spill] sm:$0xff] %v8269_v17  ;;  %v3037_v59 = vadd.f32 %v3036_v20, %v8165_v15  ;;  %v3125_v33 = vpop.f32.mrf.mxu3  ;;  %3529 = vmatmul.bf16.gmra.mxu0 %v9231_v10  ;;  %v6415_v17 = vld [vmem:[#allocation5 + $0x428] sm:$0xf] }
 0x3c3   :  { %v6416_v20 = vor.u32 %v6863_v58, %v6415_v17  ;;  %v6199_v58 = vld [vmem:[#allocation5 + $0x278] sm:$0xf]  ;;  %v6809_v17 = vld [vmem:[#allocation5 + $0x28c] sm:$0xf0] }
 0x3c4   :  { %v3126_v50 = vadd.f32 %v3125_v33, %v3037_v59  ;;  %v3305_v27 = vpop.f32.mrf.mxu1  ;;  %v9233_v59 = vld [vmem:[#allocation15_spill] sm:$0xff]  ;;  %v9234_v33 = vld [vmem:[#allocation34_spill] sm:$0xff] }
 0x3c5   :  { %3868 = vmatpush.bf16.msrb.mxu0 %v6416_v20 }
 0x3c6   :  { %v3215_v21 = vadd.f32 %v3214_v55, %v3126_v50  ;;  %v9236_v50 = vld [vmem:[#allocation35_spill] sm:$0xff] }
 0x3c7   :  { %v3216_v45 = vpop.f32.mrf.mxu0 }
 0x3c8   :  { %v8273_v14 = vadd.f32 %v3303_v22, %v3215_v21  ;;  %v6200_v21 = vor.u32 %v6809_v17, %v6199_v58 }
 0x3c9   :  { %v3038_v0 = vpop.f32.mrf.mxu2 }
 0x3ca   :  { %v3039_v31 = vadd.f32 %v3038_v0, %v8165_v15  ;;  %v3127_v24 = vpop.f32.mrf.mxu3  ;;  %3780 = vmatpush.bf16.msrb.mxu3 %v6200_v21 }
 0x3cc   :  { %v3128_v37 = vadd.f32 %v3127_v24, %v3039_v31  ;;  %v3308_v57 = vpop.f32.mrf.mxu1 }
 0x3ce   :  { %v3217_v10 = vadd.f32 %v3216_v45, %v3128_v37  ;;  %3356 = vmatmul.bf16.gmra.mxu2 %v9232_v13 }
 0x3cf   :  { %3445 = vmatmul.bf16.gmra.mxu3 %v9233_v59  ;;  %3623 = vmatmul.bf16.gmra.mxu1 %v9234_v33  ;;  %v3219_v55 = vpop.f32.mrf.mxu0  ;;  %v6905_v33 = vld [vmem:[#allocation5 + $0x58c] sm:$0xf0] }
 0x3d0   :  { %v8279_v22 = vadd.f32 %v3305_v27, %v3217_v10 }
 0x3d1   :  { %v3041_v2 = vpop.f32.mrf.mxu2 }
 0x3d2   :  { %9235 = vst [vmem:[#allocation66_spill] sm:$0xff] %v8279_v22  ;;  %v3042_v54 = vadd.f32 %v3041_v2, %v8165_v15  ;;  %v3130_v30 = vpop.f32.mrf.mxu3  ;;  %3534 = vmatmul.bf16.gmra.mxu0 %v9236_v50  ;;  %v6583_v22 = vld [vmem:[#allocation5 + $0x578] sm:$0xf] }
 0x3d3   :  { %v6584_v2 = vor.u32 %v6905_v33, %v6583_v22  ;;  %v5983_v33 = vld [vmem:[#allocation5 + $0xc8] sm:$0xf]  ;;  %v6755_v22 = vld [vmem:[#allocation5 + $0xdc] sm:$0xf0] }
 0x3d4   :  { %v3131_v0 = vadd.f32 %v3130_v30, %v3042_v54  ;;  %v3310_v37 = vpop.f32.mrf.mxu1  ;;  %v9237_v54 = vld [vmem:[#allocation17_spill] sm:$0xff]  ;;  %v9238_v30 = vld [vmem:[#allocation36_spill] sm:$0xff] }
 0x3d5   :  { %3958 = vmatpush.bf16.msrb.mxu1 %v6584_v2 }
 0x3d6   :  { %v3220_v45 = vadd.f32 %v3219_v55, %v3131_v0  ;;  %v9240_v0 = vld [vmem:[#allocation37_spill] sm:$0xff] }
 0x3d7   :  { %v3221_v31 = vpop.f32.mrf.mxu0 }
 0x3d8   :  { %v8283_v24 = vadd.f32 %v3308_v57, %v3220_v45  ;;  %v5984_v45 = vor.u32 %v6755_v22, %v5983_v33 }
 0x3d9   :  { %v3043_v20 = vpop.f32.mrf.mxu2 }
 0x3da   :  { %v3044_v10 = vadd.f32 %v3043_v20, %v8165_v15  ;;  %v3132_v27 = vpop.f32.mrf.mxu3  ;;  %3692 = vmatpush.bf16.msrb.mxu2 %v5984_v45  ;;  %v9243_v45 = vld [vmem:[#allocation39_spill] sm:$0xff] }
 0x3dc   :  { %v3133_v59 = vadd.f32 %v3132_v27, %v3044_v10  ;;  %v3313_v13 = vpop.f32.mrf.mxu1 }
 0x3de   :  { %v3222_v50 = vadd.f32 %v3221_v31, %v3133_v59  ;;  %3361 = vmatmul.bf16.gmra.mxu2 %v9206_v53 }
 0x3df   :  { %3450 = vmatmul.bf16.gmra.mxu3 %v9237_v54  ;;  %3628 = vmatmul.bf16.gmra.mxu1 %v9238_v30  ;;  %v3224_v55 = vpop.f32.mrf.mxu0  ;;  %v6857_v30 = vld [vmem:[#allocation5 + $0x40c] sm:$0xf0] }
 0x3e0   :  { %v8289_v57 = vadd.f32 %v3310_v37, %v3222_v50 }
 0x3e1   :  { %v3046_v58 = vpop.f32.mrf.mxu2 }
 0x3e2   :  { %9239 = vst [vmem:[#allocation67_spill] sm:$0xff] %v8289_v57  ;;  %v3047_v17 = vadd.f32 %v3046_v58, %v8165_v15  ;;  %v3135_v21 = vpop.f32.mrf.mxu3  ;;  %3539 = vmatmul.bf16.gmra.mxu0 %v9240_v0  ;;  %v6391_v57 = vld [vmem:[#allocation5 + $0x3f8] sm:$0xf] }
 0x3e3   :  { %v6392_v58 = vor.u32 %v6857_v30, %v6391_v57  ;;  %v6175_v30 = vld [vmem:[#allocation5 + $0x248] sm:$0xf]  ;;  %v6803_v57 = vld [vmem:[#allocation5 + $0x25c] sm:$0xf0] }
 0x3e4   :  { %v3136_v20 = vadd.f32 %v3135_v21, %v3047_v17  ;;  %v3315_v59 = vpop.f32.mrf.mxu1  ;;  %v9241_v17 = vld [vmem:[#allocation38_spill] sm:$0xff] }
 0x3e5   :  { %3869 = vmatpush.bf16.msrb.mxu0 %v6392_v58  ;;  %v6559_v58 = vld [vmem:[#allocation5 + $0x548] sm:$0xf] }
 0x3e6   :  { %v3225_v31 = vadd.f32 %v3224_v55, %v3136_v20  ;;  %v6176_v20 = vor.u32 %v6803_v57, %v6175_v30 }
 0x3e7   :  { %v3226_v10 = vpop.f32.mrf.mxu0 }
 0x3e8   :  { %v8293_v27 = vadd.f32 %v3313_v13, %v3225_v31  ;;  %3781 = vmatpush.bf16.msrb.mxu3 %v6176_v20  ;;  %v9246_v20 = vld [vmem:[#allocation41_spill] sm:$0xff] }
 0x3e9   :  { %v3048_v2 = vpop.f32.mrf.mxu2 }
 0x3ea   :  { %v3049_v50 = vadd.f32 %v3048_v2, %v8165_v15  ;;  %v3137_v37 = vpop.f32.mrf.mxu3 }
 0x3ec   :  { %v3138_v54 = vadd.f32 %v3137_v37, %v3049_v50  ;;  %v3318_v53 = vpop.f32.mrf.mxu1 }
 0x3ee   :  { %v3227_v0 = vadd.f32 %v3226_v10, %v3138_v54  ;;  %3366 = vmatmul.bf16.gmra.mxu2 %v7836_v42 }
 0x3ef   :  { %3455 = vmatmul.bf16.gmra.mxu3 %v7831_v61  ;;  %3633 = vmatmul.bf16.gmra.mxu1 %v9241_v17  ;;  %v3229_v55 = vpop.f32.mrf.mxu0 }
 0x3f0   :  { %v8299_v13 = vadd.f32 %v3315_v59, %v3227_v0 }
 0x3f1   :  { %v3051_v21 = vpop.f32.mrf.mxu2 }
 0x3f2   :  { %9242 = vst [vmem:[#allocation68_spill] sm:$0xff] %v8299_v13  ;;  %v3052_v33 = vadd.f32 %v3051_v21, %v8165_v15  ;;  %v3140_v22 = vpop.f32.mrf.mxu3  ;;  %3544 = vmatmul.bf16.gmra.mxu0 %v9243_v45  ;;  %v6899_v13 = vld [vmem:[#allocation5 + $0x55c] sm:$0xf0] }
 0x3f3   :  { %v6560_v21 = vor.u32 %v6899_v13, %v6559_v58  ;;  %v5959_v13 = vld [vmem:[#allocation5 + $0x98] sm:$0xf] }
 0x3f4   :  { %v3141_v31 = vadd.f32 %v3140_v22, %v3052_v33  ;;  %v3320_v54 = vpop.f32.mrf.mxu1  ;;  %v9244_v33 = vld [vmem:[#allocation40_spill] sm:$0xff] }
 0x3f5   :  { %3959 = vmatpush.bf16.msrb.mxu1 %v6560_v21 }
 0x3f6   :  { %v3230_v10 = vadd.f32 %v3229_v55, %v3141_v31  ;;  %v6749_v31 = vld [vmem:[#allocation5 + $0xac] sm:$0xf0] }
 0x3f7   :  { %v3231_v2 = vpop.f32.mrf.mxu0 }
 0x3f8   :  { %v8303_v50 = vadd.f32 %v3318_v53, %v3230_v10  ;;  %v5960_v10 = vor.u32 %v6749_v31, %v5959_v13  ;;  %v6367_v31 = vld [vmem:[#allocation5 + $0x3c8] sm:$0xf] }
 0x3f9   :  { %v3053_v37 = vpop.f32.mrf.mxu2 }
 0x3fa   :  { %v3054_v0 = vadd.f32 %v3053_v37, %v8165_v15  ;;  %v3142_v59 = vpop.f32.mrf.mxu3  ;;  %3693 = vmatpush.bf16.msrb.mxu2 %v5960_v10  ;;  %v6851_v10 = vld [vmem:[#allocation5 + $0x3dc] sm:$0xf0] }
 0x3fc   :  { %v3143_v17 = vadd.f32 %v3142_v59, %v3054_v0  ;;  %v3323_v61 = vpop.f32.mrf.mxu1 }
 0x3fe   :  { %v3232_v45 = vadd.f32 %v3231_v2, %v3143_v17  ;;  %3371 = vmatmul.bf16.gmra.mxu2 %v7854_v38 }
 0x3ff   :  { %3460 = vmatmul.bf16.gmra.mxu3 %v7849_v1  ;;  %3638 = vmatmul.bf16.gmra.mxu1 %v9244_v33  ;;  %v3234_v55 = vpop.f32.mrf.mxu0 }
 0x400   :  { %v8309_v53 = vadd.f32 %v3320_v54, %v3232_v45 }
 0x401   :  { %v3056_v22 = vpop.f32.mrf.mxu2 }
 0x402   :  { %9245 = vst [vmem:[#allocation69_spill] sm:$0xff] %v8309_v53  ;;  %v3057_v30 = vadd.f32 %v3056_v22, %v8165_v15  ;;  %v3145_v57 = vpop.f32.mrf.mxu3  ;;  %3549 = vmatmul.bf16.gmra.mxu0 %v9246_v20 }
 0x404   :  { %v3146_v37 = vadd.f32 %v3145_v57, %v3057_v30  ;;  %v3325_v17 = vpop.f32.mrf.mxu1 }
 0x406   :  { %v3235_v2 = vadd.f32 %v3234_v55, %v3146_v37 }
 0x407   :  { %v3236_v0 = vpop.f32.mrf.mxu0 }
 0x408   :  { %v8313_v59 = vadd.f32 %v3323_v61, %v3235_v2 }
 0x409   :  { %v3058_v58 = vpop.f32.mrf.mxu2 }
 0x40a   :  { %9247 = vst [vmem:[#allocation70_spill] sm:$0xff] %v8313_v59  ;;  %v3059_v45 = vadd.f32 %v3058_v58, %v8165_v15  ;;  %v3147_v54 = vpop.f32.mrf.mxu3  ;;  %v9249_v59 = vld [vmem:[#allocation25_spill] sm:$0xff] }
 0x40c   :  { %v3148_v21 = vadd.f32 %v3147_v54, %v3059_v45  ;;  %v3328_v53 = vpop.f32.mrf.mxu1 }
 0x40e   :  { %v3237_v22 = vadd.f32 %v3236_v0, %v3148_v21  ;;  %3376 = vmatmul.bf16.gmra.mxu2 %v7866_v26  ;;  %v6368_v0 = vor.u32 %v6851_v10, %v6367_v31 }
 0x40f   :  { %3465 = vmatmul.bf16.gmra.mxu3 %v7861_v49  ;;  %3643 = vmatmul.bf16.gmra.mxu1 %v8060_v63  ;;  %v3239_v30 = vpop.f32.mrf.mxu0  ;;  %v6797_v63 = vld [vmem:[#allocation5 + $0x22c] sm:$0xf0] }
 0x410   :  { %v8319_v57 = vadd.f32 %v3325_v17, %v3237_v22  ;;  %3870 = vmatpush.bf16.msrb.mxu0 %v6368_v0 }
 0x411   :  { %v3061_v55 = vpop.f32.mrf.mxu2 }
 0x412   :  { %9248 = vst [vmem:[#allocation71_spill] sm:$0xff] %v8319_v57  ;;  %v3062_v61 = vadd.f32 %v3061_v55, %v8165_v15  ;;  %v3150_v13 = vpop.f32.mrf.mxu3  ;;  %3554 = vmatmul.bf16.gmra.mxu0 %v8065_v46  ;;  %v6151_v57 = vld [vmem:[#allocation5 + $0x218] sm:$0xf] }
 0x413   :  { %v6152_v26 = vor.u32 %v6797_v63, %v6151_v57  ;;  %v6535_v63 = vld [vmem:[#allocation5 + $0x518] sm:$0xf]  ;;  %v6893_v57 = vld [vmem:[#allocation5 + $0x52c] sm:$0xf0] }
 0x414   :  { %v3151_v37 = vadd.f32 %v3150_v13, %v3062_v61  ;;  %v3330_v2 = vpop.f32.mrf.mxu1  ;;  %v9250_v61 = vld [vmem:[#allocation53_spill] sm:$0xff] }
 0x415   :  { %v8328_v13 = vperm.slane %v9250_v61, 1  ;;  %3782 = vmatpush.bf16.msrb.mxu3 %v6152_v26 }
 0x416   :  { %v3240_v58 = vadd.f32 %v3239_v30, %v3151_v37  ;;  %v9251_v30 = vld [vmem:[#allocation24_spill] sm:$0xff] }
 0x417   :  { %v3241_v45 = vpop.f32.mrf.mxu0 }
 0x418   :  { %v8323_v54 = vadd.f32 %v3328_v53, %v3240_v58  ;;  %v9252_v53 = vld [vmem:[#allocation44_spill] sm:$0xff]  ;;  %v9254_v58 = vld [vmem:[#allocation45_spill] sm:$0xff] }
 0x419   :  { %v3063_v21 = vpop.f32.mrf.mxu2 }
 0x41a   :  { %v3064_v17 = vadd.f32 %v3063_v21, %v8165_v15  ;;  %v3152_v22 = vpop.f32.mrf.mxu3 }
 0x41c   :  { %v3153_v55 = vadd.f32 %v3152_v22, %v3064_v17  ;;  %v3609_v49 = vpop.f32.mrf.mxu1  ;;  %v6536_v17 = vor.u32 %v6893_v57, %v6535_v63 }
 0x41e   :  { %v3242_v46 = vadd.f32 %v3241_v45, %v3153_v55  ;;  %3381 = vmatmul.bf16.gmra.mxu2 %v9249_v59  ;;  %3960 = vmatpush.bf16.msrb.mxu1 %v6536_v17  ;;  %v6343_v17 = vld [vmem:[#allocation5 + $0x398] sm:$0xf] }
 0x41f   :  { %3470 = vmatmul.bf16.gmra.mxu3 %v9251_v30  ;;  %3648 = vmatmul.bf16.gmra.mxu1 %v9252_v53  ;;  %v3520_v31 = vpop.f32.mrf.mxu0 }
 0x420   :  { %v8332_v10 = vadd.f32 %v3330_v2, %v3242_v46 }
 0x421   :  { %v3342_v15 = vpop.f32.mrf.mxu2 }
 0x422   :  { %9253 = vst [vmem:[#allocation53_spill] sm:$0xff] %v8332_v10  ;;  %v3343_v37 = vadd.f32 %v3342_v15, %v8328_v13  ;;  %v3431_v0 = vpop.f32.mrf.mxu3  ;;  %3559 = vmatmul.bf16.gmra.mxu0 %v9254_v58  ;;  %v5935_v15 = vld [vmem:[#allocation5 + $0x68] sm:$0xf]  ;;  %v6743_v10 = vld [vmem:[#allocation5 + $0x7c] sm:$0xf0] }
 0x423   :  { %v5936_v30 = vor.u32 %v6743_v10, %v5935_v15 }
 0x424   :  { %v3432_v45 = vadd.f32 %v3431_v0, %v3343_v37  ;;  %v3611_v21 = vpop.f32.mrf.mxu1  ;;  %v6937_v37 = vpop.eup %6936  ;;  %v9255_v0 = vld [vmem:[#allocation56_spill] sm:$0xff] }
 0x425   :  { %3694 = vmatpush.bf16.msrb.mxu2 %v5936_v30 }
 0x426   :  { %v3521_v22 = vadd.f32 %v3520_v31, %v3432_v45 }
 0x427   :  { %v3522_v26 = vpop.f32.mrf.mxu0 }
 0x428   :  { %v3610_v55 = vadd.f32 %v3609_v49, %v3521_v22  ;;  %v6845_v22 = vld [vmem:[#allocation5 + $0x3ac] sm:$0xf0] }
 0x429   :  { %v3344_v61 = vpop.f32.mrf.mxu2 }
 0x42a   :  { %6938 = vtanh.f32 %v3610_v55  ;;  %v3345_v46 = vadd.f32 %v3344_v61, %v8328_v13  ;;  %v3433_v2 = vpop.f32.mrf.mxu3  ;;  %v6344_v61 = vor.u32 %v6845_v22, %v6343_v17 }
 0x42b   :  { %6940 = vtanh.f32 %v9255_v0  ;;  %v6127_v0 = vld [vmem:[#allocation5 + $0x1e8] sm:$0xf] }
 0x42c   :  { %v3434_v53 = vadd.f32 %v3433_v2, %v3345_v46  ;;  %v3614_v58 = vpop.f32.mrf.mxu1  ;;  %3871 = vmatpush.bf16.msrb.mxu0 %v6344_v61 }
 0x42e   :  { %v3523_v59 = vadd.f32 %v3522_v26, %v3434_v53  ;;  %3386 = vmatmul.bf16.gmra.mxu2 %v7890_v36  ;;  %v9256_v53 = vld [vmem:[#allocation46_spill] sm:$0xff] }
 0x42f   :  { %3475 = vmatmul.bf16.gmra.mxu3 %v7885_v19  ;;  %3653 = vmatmul.bf16.gmra.mxu1 %v8084_v62  ;;  %v3525_v49 = vpop.f32.mrf.mxu0 }
 0x430   :  { %v6939_v8 = vpop.eup %6938  ;;  %v3612_v31 = vadd.f32 %v3611_v21, %v3523_v59 }
 0x431   :  { %v5305_v63 = vpack.c.bf16 %v6939_v8, %v6937_v37  ;;  %v3347_v57 = vpop.f32.mrf.mxu2  ;;  %v6941_v59 = vpop.eup %6940 }
 0x432   :  { %6942 = vtanh.f32 %v3612_v31  ;;  %v3348_v45 = vadd.f32 %v3347_v57, %v8328_v13  ;;  %v3436_v10 = vpop.f32.mrf.mxu3  ;;  %3564 = vmatmul.bf16.gmra.mxu0 %v9256_v53 }
 0x433   :  { %5401 = vst [vmem:[#allocation7] sm:$0xff] %v5305_v63  ;;  %6944 = vtanh.f32 %v8183_v40  ;;  %v6791_v63 = vld [vmem:[#allocation5 + $0x1fc] sm:$0xf0] }
 0x434   :  { %v3437_v26 = vadd.f32 %v3436_v10, %v3348_v45  ;;  %v3616_v55 = vpop.f32.mrf.mxu1  ;;  %v6128_v10 = vor.u32 %v6791_v63, %v6127_v0 }
 0x436   :  { %v3526_v46 = vadd.f32 %v3525_v49, %v3437_v26  ;;  %3783 = vmatpush.bf16.msrb.mxu3 %v6128_v10  ;;  %v9257_v26 = vld [vmem:[#allocation57_spill] sm:$0xff] }
 0x437   :  { %v3527_v30 = vpop.f32.mrf.mxu0 }
 0x438   :  { %v6943_v21 = vpop.eup %6942  ;;  %v3615_v2 = vadd.f32 %v3614_v58, %v3526_v46 }
 0x439   :  { %v5308_v15 = vpack.c.bf16 %v6943_v21, %v6941_v59  ;;  %v3349_v37 = vpop.f32.mrf.mxu2  ;;  %v6945_v17 = vpop.eup %6944 }
 0x43a   :  { %6946 = vtanh.f32 %v3615_v2  ;;  %v3350_v8 = vadd.f32 %v3349_v37, %v8328_v13  ;;  %v3438_v31 = vpop.f32.mrf.mxu3  ;;  %v6511_v2 = vld [vmem:[#allocation5 + $0x4e8] sm:$0xf] }
 0x43b   :  { %5404 = vst [vmem:[#allocation7 + $0x18] sm:$0xff] %v5308_v15  ;;  %6948 = vtanh.f32 %v9257_v26  ;;  %v6887_v15 = vld [vmem:[#allocation5 + $0x4fc] sm:$0xf0]  ;;  %v5911_v26 = vld [vmem:[#allocation5 + $0x38] sm:$0xf] }
 0x43c   :  { %v3439_v57 = vadd.f32 %v3438_v31, %v3350_v8  ;;  %v3619_v45 = vpop.f32.mrf.mxu1  ;;  %v6512_v31 = vor.u32 %v6887_v15, %v6511_v2 }
 0x43e   :  { %v3528_v49 = vadd.f32 %v3527_v30, %v3439_v57  ;;  %3391 = vmatmul.bf16.gmra.mxu2 %v7902_v11  ;;  %v9258_v30 = vld [vmem:[#allocation47_spill] sm:$0xff]  ;;  %3961 = vmatpush.bf16.msrb.mxu1 %v6512_v31 }
 0x43f   :  { %3480 = vmatmul.bf16.gmra.mxu3 %v7897_v48  ;;  %3658 = vmatmul.bf16.gmra.mxu1 %v8096_v43  ;;  %v3530_v40 = vpop.f32.mrf.mxu0 }
 0x440   :  { %v6947_v58 = vpop.eup %6946  ;;  %v3617_v22 = vadd.f32 %v3616_v55, %v3528_v49 }
 0x441   :  { %v5311_v61 = vpack.c.bf16 %v6947_v58, %v6945_v17  ;;  %v3352_v46 = vpop.f32.mrf.mxu2  ;;  %v6949_v63 = vpop.eup %6948 }
 0x442   :  { %6950 = vtanh.f32 %v3617_v22  ;;  %v3353_v59 = vadd.f32 %v3352_v46, %v8328_v13  ;;  %v3441_v21 = vpop.f32.mrf.mxu3  ;;  %3569 = vmatmul.bf16.gmra.mxu0 %v9258_v30 }
 0x443   :  { %5407 = vst [vmem:[#allocation7 + $0x30] sm:$0xff] %v5311_v61  ;;  %6952 = vtanh.f32 %v8193_v9  ;;  %v6737_v61 = vld [vmem:[#allocation5 + $0x4c] sm:$0xf0] }
 0x444   :  { %v3442_v37 = vadd.f32 %v3441_v21, %v3353_v59  ;;  %v3621_v8 = vpop.f32.mrf.mxu1  ;;  %v5912_v21 = vor.u32 %v6737_v61, %v5911_v26 }
 0x446   :  { %v3531_v0 = vadd.f32 %v3530_v40, %v3442_v37  ;;  %3695 = vmatpush.bf16.msrb.mxu2 %v5912_v21  ;;  %v9259_v37 = vld [vmem:[#allocation58_spill] sm:$0xff] }
 0x447   :  { %v3532_v55 = vpop.f32.mrf.mxu0 }
 0x448   :  { %v6951_v57 = vpop.eup %6950  ;;  %v3620_v10 = vadd.f32 %v3619_v45, %v3531_v0 }
 0x449   :  { %v5314_v49 = vpack.c.bf16 %v6951_v57, %v6949_v63  ;;  %v3354_v17 = vpop.f32.mrf.mxu2  ;;  %v6953_v2 = vpop.eup %6952 }
 0x44a   :  { %6954 = vtanh.f32 %v3620_v10  ;;  %v3355_v58 = vadd.f32 %v3354_v17, %v8328_v13  ;;  %v3443_v22 = vpop.f32.mrf.mxu3  ;;  %v6319_v10 = vld [vmem:[#allocation5 + $0x368] sm:$0xf] }
 0x44b   :  { %5410 = vst [vmem:[#allocation7 + $0x48] sm:$0xff] %v5314_v49  ;;  %6956 = vtanh.f32 %v9259_v37  ;;  %v6839_v49 = vld [vmem:[#allocation5 + $0x37c] sm:$0xf0]  ;;  %v6103_v37 = vld [vmem:[#allocation5 + $0x1b8] sm:$0xf] }
 0x44c   :  { %v3444_v46 = vadd.f32 %v3443_v22, %v3355_v58  ;;  %v3624_v59 = vpop.f32.mrf.mxu1  ;;  %v6320_v22 = vor.u32 %v6839_v49, %v6319_v10 }
 0x44e   :  { %v3533_v40 = vadd.f32 %v3532_v55, %v3444_v46  ;;  %3396 = vmatmul.bf16.gmra.mxu2 %v7914_v44  ;;  %v9260_v55 = vld [vmem:[#allocation49_spill] sm:$0xff]  ;;  %3872 = vmatpush.bf16.msrb.mxu0 %v6320_v22 }
 0x44f   :  { %3485 = vmatmul.bf16.gmra.mxu3 %v7909_v7  ;;  %3663 = vmatmul.bf16.gmra.mxu1 %v8108_v35  ;;  %v3535_v9 = vpop.f32.mrf.mxu0 }
 0x450   :  { %v6955_v45 = vpop.eup %6954  ;;  %v3622_v15 = vadd.f32 %v3621_v8, %v3533_v40 }
 0x451   :  { %v5317_v31 = vpack.c.bf16 %v6955_v45, %v6953_v2  ;;  %v3357_v0 = vpop.f32.mrf.mxu2  ;;  %v6957_v8 = vpop.eup %6956 }
 0x452   :  { %6958 = vtanh.f32 %v3622_v15  ;;  %v3358_v63 = vadd.f32 %v3357_v0, %v8328_v13  ;;  %v3446_v57 = vpop.f32.mrf.mxu3  ;;  %3574 = vmatmul.bf16.gmra.mxu0 %v9260_v55 }
 0x453   :  { %5413 = vst [vmem:[#allocation7 + $0x60] sm:$0xff] %v5317_v31  ;;  %6960 = vtanh.f32 %v8203_v34  ;;  %v6785_v31 = vld [vmem:[#allocation5 + $0x1cc] sm:$0xf0] }
 0x454   :  { %v3447_v17 = vadd.f32 %v3446_v57, %v3358_v63  ;;  %v3626_v58 = vpop.f32.mrf.mxu1  ;;  %v6104_v57 = vor.u32 %v6785_v31, %v6103_v37 }
 0x456   :  { %v3536_v26 = vadd.f32 %v3535_v9, %v3447_v17  ;;  %3784 = vmatpush.bf16.msrb.mxu3 %v6104_v57  ;;  %v9261_v17 = vld [vmem:[#allocation59_spill] sm:$0xff] }
 0x457   :  { %v3537_v61 = vpop.f32.mrf.mxu0 }
 0x458   :  { %v6959_v46 = vpop.eup %6958  ;;  %v3625_v21 = vadd.f32 %v3624_v59, %v3536_v26 }
 0x459   :  { %v5320_v40 = vpack.c.bf16 %v6959_v46, %v6957_v8  ;;  %v3359_v2 = vpop.f32.mrf.mxu2  ;;  %v6961_v10 = vpop.eup %6960 }
 0x45a   :  { %6962 = vtanh.f32 %v3625_v21  ;;  %v3360_v45 = vadd.f32 %v3359_v2, %v8328_v13  ;;  %v3448_v15 = vpop.f32.mrf.mxu3  ;;  %v6487_v21 = vld [vmem:[#allocation5 + $0x4b8] sm:$0xf] }
 0x45b   :  { %5416 = vst [vmem:[#allocation7 + $0x78] sm:$0xff] %v5320_v40  ;;  %6964 = vtanh.f32 %v9261_v17  ;;  %v6881_v40 = vld [vmem:[#allocation5 + $0x4cc] sm:$0xf0]  ;;  %v5887_v17 = vld [vmem:[#allocation5 + $0x8] sm:$0xf] }
 0x45c   :  { %v3449_v0 = vadd.f32 %v3448_v15, %v3360_v45  ;;  %v3629_v63 = vpop.f32.mrf.mxu1  ;;  %v6488_v15 = vor.u32 %v6881_v40, %v6487_v21 }
 0x45e   :  { %v3538_v9 = vadd.f32 %v3537_v61, %v3449_v0  ;;  %3401 = vmatmul.bf16.gmra.mxu2 %v7926_v32  ;;  %v9262_v61 = vld [vmem:[#allocation50_spill] sm:$0xff]  ;;  %3962 = vmatpush.bf16.msrb.mxu1 %v6488_v15  ;;  %v9264_v15 = vld [vmem:[#allocation60_spill] sm:$0xff] }
 0x45f   :  { %3490 = vmatmul.bf16.gmra.mxu3 %v7921_v51  ;;  %3668 = vmatmul.bf16.gmra.mxu1 %v8120_v4  ;;  %v3540_v34 = vpop.f32.mrf.mxu0 }
 0x460   :  { %v6963_v59 = vpop.eup %6962  ;;  %v3627_v49 = vadd.f32 %v3626_v58, %v3538_v9 }
 0x461   :  { %v5323_v22 = vpack.c.bf16 %v6963_v59, %v6961_v10  ;;  %v3362_v26 = vpop.f32.mrf.mxu2  ;;  %v6965_v31 = vpop.eup %6964 }
 0x462   :  { %6966 = vtanh.f32 %v3627_v49  ;;  %v3363_v8 = vadd.f32 %v3362_v26, %v8328_v13  ;;  %v3451_v46 = vpop.f32.mrf.mxu3  ;;  %3579 = vmatmul.bf16.gmra.mxu0 %v9262_v61 }
 0x463   :  { %5419 = vst [vmem:[#allocation7 + $0x90] sm:$0xff] %v5323_v22  ;;  %6968 = vtanh.f32 %v8213_v28  ;;  %v6731_v22 = vld [vmem:[#allocation5 + $0x1c] sm:$0xf0] }
 0x464   :  { %v3452_v2 = vadd.f32 %v3451_v46, %v3363_v8  ;;  %v3631_v45 = vpop.f32.mrf.mxu1  ;;  %v5888_v46 = vor.u32 %v6731_v22, %v5887_v17 }
 0x466   :  { %v3541_v37 = vadd.f32 %v3540_v34, %v3452_v2  ;;  %3696 = vmatpush.bf16.msrb.mxu2 %v5888_v46 }
 0x467   :  { %v3542_v58 = vpop.f32.mrf.mxu0 }
 0x468   :  { %v6967_v0 = vpop.eup %6966  ;;  %v3630_v57 = vadd.f32 %v3629_v63, %v3541_v37  ;;  %v9263_v63 = vld [vmem:[#allocation51_spill] sm:$0xff] }
 0x469   :  { %v5326_v9 = vpack.c.bf16 %v6967_v0, %v6965_v31  ;;  %v3364_v10 = vpop.f32.mrf.mxu2  ;;  %v6969_v21 = vpop.eup %6968 }
 0x46a   :  { %6970 = vtanh.f32 %v3630_v57  ;;  %v3365_v59 = vadd.f32 %v3364_v10, %v8328_v13  ;;  %v3453_v49 = vpop.f32.mrf.mxu3  ;;  %v6833_v10 = vld [vmem:[#allocation5 + $0x34c] sm:$0xf0] }
 0x46b   :  { %5422 = vst [vmem:[#allocation7 + $0xa8] sm:$0xff] %v5326_v9  ;;  %6972 = vtanh.f32 %v9264_v15  ;;  %v6295_v9 = vld [vmem:[#allocation5 + $0x338] sm:$0xf]  ;;  %v6779_v15 = vld [vmem:[#allocation5 + $0x19c] sm:$0xf0] }
 0x46c   :  { %v3454_v26 = vadd.f32 %v3453_v49, %v3365_v59  ;;  %v3634_v8 = vpop.f32.mrf.mxu1  ;;  %v6296_v17 = vor.u32 %v6833_v10, %v6295_v9 }
 0x46e   :  { %v3543_v34 = vadd.f32 %v3542_v58, %v3454_v26  ;;  %3406 = vmatmul.bf16.gmra.mxu2 %v7938_v18  ;;  %v9265_v58 = vld [vmem:[#allocation52_spill] sm:$0xff]  ;;  %3873 = vmatpush.bf16.msrb.mxu0 %v6296_v17 }
 0x46f   :  { %3495 = vmatmul.bf16.gmra.mxu3 %v7933_v25  ;;  %3673 = vmatmul.bf16.gmra.mxu1 %v9263_v63  ;;  %v3545_v28 = vpop.f32.mrf.mxu0 }
 0x470   :  { %v6971_v40 = vpop.eup %6970  ;;  %v3632_v2 = vadd.f32 %v3631_v45, %v3543_v34 }
 0x471   :  { %v5329_v37 = vpack.c.bf16 %v6971_v40, %v6969_v21  ;;  %v3367_v31 = vpop.f32.mrf.mxu2  ;;  %v6973_v45 = vpop.eup %6972 }
 0x472   :  { %6974 = vtanh.f32 %v3632_v2  ;;  %v3368_v0 = vadd.f32 %v3367_v31, %v8328_v13  ;;  %v3456_v57 = vpop.f32.mrf.mxu3  ;;  %3584 = vmatmul.bf16.gmra.mxu0 %v9265_v58  ;;  %v6079_v2 = vld [vmem:[#allocation5 + $0x188] sm:$0xf] }
 0x473   :  { %5425 = vst [vmem:[#allocation7 + $0xc0] sm:$0xff] %v5329_v37  ;;  %6976 = vtanh.f32 %v8223_v52  ;;  %v6463_v31 = vld [vmem:[#allocation5 + $0x488] sm:$0xf] }
 0x474   :  { %v3457_v59 = vadd.f32 %v3456_v57, %v3368_v0  ;;  %v3636_v49 = vpop.f32.mrf.mxu1  ;;  %v6080_v0 = vor.u32 %v6779_v15, %v6079_v2  ;;  %v6875_v57 = vld [vmem:[#allocation5 + $0x49c] sm:$0xf0] }
 0x476   :  { %v3546_v22 = vadd.f32 %v3545_v28, %v3457_v59  ;;  %v6464_v28 = vor.u32 %v6875_v57, %v6463_v31  ;;  %3785 = vmatpush.bf16.msrb.mxu3 %v6080_v0  ;;  %v6827_v59 = vld [vmem:[#allocation5 + $0x31c] sm:$0xf0] }
 0x477   :  { %v3547_v26 = vpop.f32.mrf.mxu0 }
 0x478   :  { %v6975_v46 = vpop.eup %6974  ;;  %v3635_v34 = vadd.f32 %v3634_v8, %v3546_v22  ;;  %3963 = vmatpush.bf16.msrb.mxu1 %v6464_v28  ;;  %v6271_v8 = vld [vmem:[#allocation5 + $0x308] sm:$0xf] }
 0x479   :  { %v5332_v21 = vpack.c.bf16 %v6975_v46, %v6973_v45  ;;  %v3369_v40 = vpop.f32.mrf.mxu2  ;;  %v6272_v17 = vor.u32 %v6827_v59, %v6271_v8  ;;  %v6977_v22 = vpop.eup %6976  ;;  %v6770_v59 = vld [vmem:[#allocation5 + $0x15c] sm:$0xf] }
 0x47a   :  { %6978 = vtanh.f32 %v3635_v34  ;;  %v3370_v37 = vadd.f32 %v3369_v40, %v8328_v13  ;;  %v3458_v58 = vpop.f32.mrf.mxu3 }
 0x47b   :  { %5428 = vst [vmem:[#allocation7 + $0xd8] sm:$0xff] %v5332_v21  ;;  %3874 = vmatpush.bf16.msrb.mxu0 %v6272_v17  ;;  %6980 = vtanh.f32 %v8229_v41 }
 0x47c   :  { %v3459_v9 = vadd.f32 %v3458_v58, %v3370_v37  ;;  %v3639_v10 = vpop.f32.mrf.mxu1 }
 0x47e   :  { %v3548_v52 = vadd.f32 %v3547_v26, %v3459_v9  ;;  %3411 = vmatmul.bf16.gmra.mxu2 %v7950_v47 }
 0x47f   :  { %3500 = vmatmul.bf16.gmra.mxu3 %v7945_v5  ;;  %3678 = vmatmul.bf16.gmra.mxu1 %v8144_v12  ;;  %v3550_v45 = vpop.f32.mrf.mxu0 }
 0x480   :  { %v6979_v46 = vpop.eup %6978  ;;  %v3637_v34 = vadd.f32 %v3636_v49, %v3548_v52  ;;  %v6057_v52 = vld [vmem:[#allocation5 + $0x170] sm:$0xf0] }
 0x481   :  { %v5335_v58 = vpack.c.bf16 %v6979_v46, %v6977_v22  ;;  %v3372_v21 = vpop.f32.mrf.mxu2  ;;  %v6981_v37 = vpop.eup %6980  ;;  %v6060_v46 = vor.u32 %v6770_v59, %v6057_v52 }
 0x482   :  { %6982 = vtanh.f32 %v3637_v34  ;;  %v3373_v40 = vadd.f32 %v3372_v21, %v8328_v13  ;;  %v3461_v26 = vpop.f32.mrf.mxu3  ;;  %3589 = vmatmul.bf16.gmra.mxu0 %v8149_v6 }
 0x483   :  { %5431 = vst [vmem:[#allocation7 + $0xf0] sm:$0xff] %v5335_v58  ;;  %6984 = vtanh.f32 %v8233_v3  ;;  %4045 = vmatpush.bf16.msra.mxu2 %v6060_v46 }
 0x484   :  { %v3462_v2 = vadd.f32 %v3461_v26, %v3373_v40  ;;  %v3641_v15 = vpop.f32.mrf.mxu1  ;;  %v9267_v40 = vld [vmem:[#allocation61_spill] sm:$0xff] }
 0x486   :  { %v3551_v31 = vadd.f32 %v3550_v45, %v3462_v2 }
 0x487   :  { %v3552_v0 = vpop.f32.mrf.mxu0 }
 0x488   :  { %v6983_v57 = vpop.eup %6982  ;;  %v3640_v28 = vadd.f32 %v3639_v10, %v3551_v31  ;;  %v9266_v10 = vld [vmem:[#allocation54_spill] sm:$0xff] }
 0x489   :  { %v5338_v49 = vpack.c.bf16 %v6983_v57, %v6981_v37  ;;  %v3374_v41 = vpop.f32.mrf.mxu2  ;;  %v6985_v45 = vpop.eup %6984 }
 0x48a   :  { %6986 = vtanh.f32 %v3640_v28  ;;  %v3375_v9 = vadd.f32 %v3374_v41, %v8328_v13  ;;  %v3463_v8 = vpop.f32.mrf.mxu3 }
 0x48b   :  { %5434 = vst [vmem:[#allocation7 + $0x108] sm:$0xff] %v5338_v49  ;;  %6988 = vtanh.f32 %v9267_v40 }
 0x48c   :  { %v3464_v17 = vadd.f32 %v3463_v8, %v3375_v9  ;;  %v3644_v22 = vpop.f32.mrf.mxu1 }
 0x48e   :  { %v3553_v34 = vadd.f32 %v3552_v0, %v3464_v17  ;;  %3416 = vmatmul.bf16.gmra.mxu2 %v7969_v23  ;;  %v9268_v0 = vld [vmem:[#allocation55_spill] sm:$0xff] }
 0x48f   :  { %3505 = vmatmul.bf16.gmra.mxu3 %v7962_v29  ;;  %3683 = vmatmul.bf16.gmra.mxu1 %v9266_v10  ;;  %v3555_v3 = vpop.f32.mrf.mxu0 }
 0x490   :  { %v6987_v58 = vpop.eup %6986  ;;  %v3642_v21 = vadd.f32 %v3641_v15, %v3553_v34  ;;  %v6818_v34 = vld [vmem:[#allocation5 + $0x2dc] sm:$0xf] }
 0x491   :  { %v5341_v26 = vpack.c.bf16 %v6987_v58, %v6985_v45  ;;  %v3377_v2 = vpop.f32.mrf.mxu2  ;;  %v6989_v41 = vpop.eup %6988  ;;  %v6249_v45 = vld [vmem:[#allocation5 + $0x2f0] sm:$0xf0] }
 0x492   :  { %6990 = vtanh.f32 %v3642_v21  ;;  %v3378_v31 = vadd.f32 %v3377_v2, %v8328_v13  ;;  %v3466_v37 = vpop.f32.mrf.mxu3  ;;  %3594 = vmatmul.bf16.gmra.mxu0 %v9268_v0  ;;  %v6252_v40 = vor.u32 %v6818_v34, %v6249_v45 }
 0x493   :  { %5437 = vst [vmem:[#allocation7 + $0x120] sm:$0xff] %v5341_v26  ;;  %6992 = vtanh.f32 %v8243_v39  ;;  %v9269_v39 = vld [vmem:[#allocation28_spill] sm:$0xff] }
 0x494   :  { %v3467_v57 = vadd.f32 %v3466_v37, %v3378_v31  ;;  %v3646_v28 = vpop.f32.mrf.mxu1  ;;  %4134 = vmatpush.bf16.msra.mxu3 %v6252_v40  ;;  %v9270_v37 = vld [vmem:[#allocation62_spill] sm:$0xff] }
 0x496   :  { %v3556_v49 = vadd.f32 %v3555_v3, %v3467_v57 }
 0x497   :  { %v3557_v9 = vpop.f32.mrf.mxu0 }
 0x498   :  { %v6991_v8 = vpop.eup %6990  ;;  %v3645_v59 = vadd.f32 %v3644_v22, %v3556_v49 }
 0x499   :  { %v5344_v15 = vpack.c.bf16 %v6991_v8, %v6989_v41  ;;  %v3379_v52 = vpop.f32.mrf.mxu2  ;;  %v6993_v3 = vpop.eup %6992 }
 0x49a   :  { %6994 = vtanh.f32 %v3645_v59  ;;  %v3380_v17 = vadd.f32 %v3379_v52, %v8328_v13  ;;  %v3468_v46 = vpop.f32.mrf.mxu3  ;;  %v6914_v59 = vld [vmem:[#allocation5 + $0x5dc] sm:$0xf] }
 0x49b   :  { %5440 = vst [vmem:[#allocation7 + $0x138] sm:$0xff] %v5344_v15  ;;  %6996 = vtanh.f32 %v9270_v37  ;;  %v6633_v15 = vld [vmem:[#allocation5 + $0x5f0] sm:$0xf0]  ;;  %v6764_v37 = vld [vmem:[#allocation5 + $0x12c] sm:$0xf] }
 0x49c   :  { %v3469_v58 = vadd.f32 %v3468_v46, %v3380_v17  ;;  %v3649_v21 = vpop.f32.mrf.mxu1  ;;  %v6636_v46 = vor.u32 %v6914_v59, %v6633_v15  ;;  %v9272_v59 = vld [vmem:[#allocation12_spill] sm:$0xff] }
 0x49e   :  { %v3558_v26 = vadd.f32 %v3557_v9, %v3469_v58  ;;  %3697 = vmatmul.bf16.vlgmr.msrb.gmra.mxu2 %v7746_v60  ;;  %v9271_v9 = vld [vmem:[#allocation29_spill] sm:$0xff]  ;;  %4312 = vmatpush.bf16.msra.mxu1 %v6636_v46 }
 0x49f   :  { %3786 = vmatmul.bf16.vlgmr.msrb.gmra.mxu3 %v7741_v56  ;;  %3964 = vmatmul.bf16.vlgmr.msrb.gmra.mxu1 %v9269_v39  ;;  %v3560_v22 = vpop.f32.mrf.mxu0 }
 0x4a0   :  { %v6995_v2 = vpop.eup %6994  ;;  %v3647_v31 = vadd.f32 %v3646_v28, %v3558_v26 }
 0x4a1   :  { %v5347_v57 = vpack.c.bf16 %v6995_v2, %v6993_v3  ;;  %v3382_v49 = vpop.f32.mrf.mxu2  ;;  %v6997_v45 = vpop.eup %6996 }
 0x4a2   :  { %6998 = vtanh.f32 %v3647_v31  ;;  %v3383_v41 = vadd.f32 %v3382_v49, %v8328_v13  ;;  %v3471_v8 = vpop.f32.mrf.mxu3  ;;  %3875 = vmatmul.bf16.vlgmr.msrb.gmra.mxu0 %v9271_v9 }
 0x4a3   :  { %5443 = vst [vmem:[#allocation7 + $0x150] sm:$0xff] %v5347_v57  ;;  %7000 = vtanh.f32 %v8253_v16  ;;  %v6033_v57 = vld [vmem:[#allocation5 + $0x140] sm:$0xf0] }
 0x4a4   :  { %v3472_v52 = vadd.f32 %v3471_v8, %v3383_v41  ;;  %v3651_v17 = vpop.f32.mrf.mxu1  ;;  %v6036_v8 = vor.u32 %v6764_v37, %v6033_v57 }
 0x4a6   :  { %v3561_v34 = vadd.f32 %v3560_v22, %v3472_v52  ;;  %v9273_v52 = vld [vmem:[#allocation11_spill] sm:$0xff]  ;;  %4046 = vmatpush.bf16.msra.mxu2 %v6036_v8 }
 0x4a7   :  { %v3562_v28 = vpop.f32.mrf.mxu0 }
 0x4a8   :  { %v6999_v58 = vpop.eup %6998  ;;  %v3650_v40 = vadd.f32 %v3649_v21, %v3561_v34  ;;  %v9274_v21 = vld [vmem:[#allocation30_spill] sm:$0xff] }
 0x4a9   :  { %v5350_v26 = vpack.c.bf16 %v6999_v58, %v6997_v45  ;;  %v3384_v3 = vpop.f32.mrf.mxu2  ;;  %v7001_v15 = vpop.eup %7000  ;;  %v9275_v45 = vld [vmem:[#allocation63_spill] sm:$0xff] }
 0x4aa   :  { %7002 = vtanh.f32 %v3650_v40  ;;  %v3385_v2 = vadd.f32 %v3384_v3, %v8328_v13  ;;  %v3473_v31 = vpop.f32.mrf.mxu3 }
 0x4ab   :  { %5446 = vst [vmem:[#allocation7 + $0x168] sm:$0xff] %v5350_v26  ;;  %7004 = vtanh.f32 %v9275_v45 }
 0x4ac   :  { %v3474_v49 = vadd.f32 %v3473_v31, %v3385_v2  ;;  %v3654_v41 = vpop.f32.mrf.mxu1  ;;  %v6866_v2 = vld [vmem:[#allocation5 + $0x45c] sm:$0xf]  ;;  %v6441_v31 = vld [vmem:[#allocation5 + $0x470] sm:$0xf0] }
 0x4ae   :  { %v3563_v22 = vadd.f32 %v3562_v28, %v3474_v49  ;;  %3702 = vmatmul.bf16.gmra.mxu2 %v9272_v59  ;;  %v9276_v28 = vld [vmem:[#allocation31_spill] sm:$0xff]  ;;  %v6444_v49 = vor.u32 %v6866_v2, %v6441_v31  ;;  %v9278_v31 = vld [vmem:[#allocation14_spill] sm:$0xff] }
 0x4af   :  { %3791 = vmatmul.bf16.gmra.mxu3 %v9273_v52  ;;  %3969 = vmatmul.bf16.gmra.mxu1 %v9274_v21  ;;  %v3565_v16 = vpop.f32.mrf.mxu0  ;;  %v6225_v52 = vld [vmem:[#allocation5 + $0x2c0] sm:$0xf0] }
 0x4b0   :  { %v7003_v46 = vpop.eup %7002  ;;  %v3652_v34 = vadd.f32 %v3651_v17, %v3563_v22  ;;  %4223 = vmatpush.bf16.msra.mxu0 %v6444_v49 }
 0x4b1   :  { %v5353_v58 = vpack.c.bf16 %v7003_v46, %v7001_v15  ;;  %v3387_v40 = vpop.f32.mrf.mxu2  ;;  %v7005_v17 = vpop.eup %7004  ;;  %v9277_v15 = vld [vmem:[#allocation64_spill] sm:$0xff] }
 0x4b2   :  { %7006 = vtanh.f32 %v3652_v34  ;;  %v3388_v26 = vadd.f32 %v3387_v40, %v8328_v13  ;;  %v3476_v3 = vpop.f32.mrf.mxu3  ;;  %3880 = vmatmul.bf16.gmra.mxu0 %v9276_v28 }
 0x4b3   :  { %5449 = vst [vmem:[#allocation7 + $0x180] sm:$0xff] %v5353_v58  ;;  %7008 = vtanh.f32 %v9277_v15  ;;  %v6812_v58 = vld [vmem:[#allocation5 + $0x2ac] sm:$0xf] }
 0x4b4   :  { %v3477_v37 = vadd.f32 %v3476_v3, %v3388_v26  ;;  %v3656_v57 = vpop.f32.mrf.mxu1  ;;  %v6228_v2 = vor.u32 %v6812_v58, %v6225_v52 }
 0x4b6   :  { %v3566_v21 = vadd.f32 %v3565_v16, %v3477_v37  ;;  %4135 = vmatpush.bf16.msra.mxu3 %v6228_v2 }
 0x4b7   :  { %v3567_v8 = vpop.f32.mrf.mxu0 }
 0x4b8   :  { %v7007_v22 = vpop.eup %7006  ;;  %v3655_v45 = vadd.f32 %v3654_v41, %v3566_v21  ;;  %v9279_v41 = vld [vmem:[#allocation13_spill] sm:$0xff]  ;;  %v9280_v21 = vld [vmem:[#allocation32_spill] sm:$0xff] }
 0x4b9   :  { %v5356_v46 = vpack.c.bf16 %v7007_v22, %v7005_v17  ;;  %v3389_v34 = vpop.f32.mrf.mxu2  ;;  %v7009_v37 = vpop.eup %7008 }
 0x4ba   :  { %7010 = vtanh.f32 %v3655_v45  ;;  %v3390_v40 = vadd.f32 %v3389_v34, %v8328_v13  ;;  %v3478_v28 = vpop.f32.mrf.mxu3  ;;  %v9281_v45 = vld [vmem:[#allocation65_spill] sm:$0xff]  ;;  %v6908_v34 = vld [vmem:[#allocation5 + $0x5ac] sm:$0xf] }
 0x4bb   :  { %5452 = vst [vmem:[#allocation7 + $0x198] sm:$0xff] %v5356_v46  ;;  %7012 = vtanh.f32 %v9281_v45 }
 0x4bc   :  { %v3479_v26 = vadd.f32 %v3478_v28, %v3390_v40  ;;  %v3659_v3 = vpop.f32.mrf.mxu1  ;;  %v6609_v40 = vld [vmem:[#allocation5 + $0x5c0] sm:$0xf0] }
 0x4bd   :  { %v6612_v2 = vor.u32 %v6908_v34, %v6609_v40  ;;  %v9283_v40 = vld [vmem:[#allocation16_spill] sm:$0xff] }
 0x4be   :  { %v3568_v16 = vadd.f32 %v3567_v8, %v3479_v26  ;;  %3707 = vmatmul.bf16.gmra.mxu2 %v9278_v31  ;;  %v9282_v8 = vld [vmem:[#allocation33_spill] sm:$0xff] }
 0x4bf   :  { %3796 = vmatmul.bf16.gmra.mxu3 %v9279_v41  ;;  %3974 = vmatmul.bf16.gmra.mxu1 %v9280_v21  ;;  %v3570_v49 = vpop.f32.mrf.mxu0 }
 0x4c0   :  { %v7011_v17 = vpop.eup %7010  ;;  %v3657_v22 = vadd.f32 %v3656_v57, %v3568_v16  ;;  %4313 = vmatpush.bf16.msra.mxu1 %v6612_v2  ;;  %v9284_v2 = vld [vmem:[#allocation15_spill] sm:$0xff] }
 0x4c1   :  { %v5359_v15 = vpack.c.bf16 %v7011_v17, %v7009_v37  ;;  %v3392_v46 = vpop.f32.mrf.mxu2  ;;  %v7013_v41 = vpop.eup %7012 }
 0x4c2   :  { %7014 = vtanh.f32 %v3657_v22  ;;  %v3393_v28 = vadd.f32 %v3392_v46, %v8328_v13  ;;  %v3481_v52 = vpop.f32.mrf.mxu3  ;;  %3885 = vmatmul.bf16.gmra.mxu0 %v9282_v8  ;;  %v6009_v8 = vld [vmem:[#allocation5 + $0x110] sm:$0xf0] }
 0x4c3   :  { %5455 = vst [vmem:[#allocation7 + $0x1b0] sm:$0xff] %v5359_v15  ;;  %7016 = vtanh.f32 %v8273_v14  ;;  %v6758_v15 = vld [vmem:[#allocation5 + $0xfc] sm:$0xf] }
 0x4c4   :  { %v3482_v58 = vadd.f32 %v3481_v52, %v3393_v28  ;;  %v3661_v26 = vpop.f32.mrf.mxu1  ;;  %v6012_v34 = vor.u32 %v6758_v15, %v6009_v8 }
 0x4c6   :  { %v3571_v21 = vadd.f32 %v3570_v49, %v3482_v58  ;;  %4047 = vmatpush.bf16.msra.mxu2 %v6012_v34 }
 0x4c7   :  { %v3572_v57 = vpop.f32.mrf.mxu0 }
 0x4c8   :  { %v7015_v16 = vpop.eup %7014  ;;  %v3660_v45 = vadd.f32 %v3659_v3, %v3571_v21  ;;  %v9285_v3 = vld [vmem:[#allocation34_spill] sm:$0xff] }
 0x4c9   :  { %v5362_v37 = vpack.c.bf16 %v7015_v16, %v7013_v41  ;;  %v3394_v17 = vpop.f32.mrf.mxu2  ;;  %v7017_v58 = vpop.eup %7016  ;;  %v9286_v16 = vld [vmem:[#allocation66_spill] sm:$0xff] }
 0x4ca   :  { %7018 = vtanh.f32 %v3660_v45  ;;  %v3395_v22 = vadd.f32 %v3394_v17, %v8328_v13  ;;  %v3483_v46 = vpop.f32.mrf.mxu3 }
 0x4cb   :  { %5458 = vst [vmem:[#allocation7 + $0x1c8] sm:$0xff] %v5362_v37  ;;  %7020 = vtanh.f32 %v9286_v16 }
 0x4cc   :  { %v3484_v28 = vadd.f32 %v3483_v46, %v3395_v22  ;;  %v3664_v52 = vpop.f32.mrf.mxu1  ;;  %v6860_v22 = vld [vmem:[#allocation5 + $0x42c] sm:$0xf]  ;;  %v6417_v46 = vld [vmem:[#allocation5 + $0x440] sm:$0xf0] }
 0x4ce   :  { %v3573_v49 = vadd.f32 %v3572_v57, %v3484_v28  ;;  %3712 = vmatmul.bf16.gmra.mxu2 %v9283_v40  ;;  %v9287_v57 = vld [vmem:[#allocation35_spill] sm:$0xff] }
 0x4cf   :  { %3801 = vmatmul.bf16.gmra.mxu3 %v9284_v2  ;;  %3979 = vmatmul.bf16.gmra.mxu1 %v9285_v3  ;;  %v3575_v14 = vpop.f32.mrf.mxu0  ;;  %v6420_v3 = vor.u32 %v6860_v22, %v6417_v46 }
 0x4d0   :  { %v7019_v41 = vpop.eup %7018  ;;  %v3662_v21 = vadd.f32 %v3661_v26, %v3573_v49 }
 0x4d1   :  { %v5365_v45 = vpack.c.bf16 %v7019_v41, %v7017_v58  ;;  %v3397_v37 = vpop.f32.mrf.mxu2  ;;  %4224 = vmatpush.bf16.msra.mxu0 %v6420_v3  ;;  %v7021_v26 = vpop.eup %7020  ;;  %v9288_v3 = vld [vmem:[#allocation18_spill] sm:$0xff] }
 0x4d2   :  { %7022 = vtanh.f32 %v3662_v21  ;;  %v3398_v17 = vadd.f32 %v3397_v37, %v8328_v13  ;;  %v3486_v8 = vpop.f32.mrf.mxu3  ;;  %3890 = vmatmul.bf16.gmra.mxu0 %v9287_v57  ;;  %v6201_v57 = vld [vmem:[#allocation5 + $0x290] sm:$0xf0] }
 0x4d3   :  { %5461 = vst [vmem:[#allocation7 + $0x1e0] sm:$0xff] %v5365_v45  ;;  %7024 = vtanh.f32 %v8283_v24  ;;  %v6806_v45 = vld [vmem:[#allocation5 + $0x27c] sm:$0xf]  ;;  %v9290_v24 = vld [vmem:[#allocation36_spill] sm:$0xff] }
 0x4d4   :  { %v3487_v15 = vadd.f32 %v3486_v8, %v3398_v17  ;;  %v3666_v28 = vpop.f32.mrf.mxu1  ;;  %v6204_v22 = vor.u32 %v6806_v45, %v6201_v57 }
 0x4d6   :  { %v3576_v2 = vadd.f32 %v3575_v14, %v3487_v15  ;;  %4136 = vmatpush.bf16.msra.mxu3 %v6204_v22 }
 0x4d7   :  { %v3577_v34 = vpop.f32.mrf.mxu0 }
 0x4d8   :  { %v7023_v49 = vpop.eup %7022  ;;  %v3665_v16 = vadd.f32 %v3664_v52, %v3576_v2  ;;  %v9289_v52 = vld [vmem:[#allocation17_spill] sm:$0xff] }
 0x4d9   :  { %v5368_v58 = vpack.c.bf16 %v7023_v49, %v7021_v26  ;;  %v3399_v41 = vpop.f32.mrf.mxu2  ;;  %v7025_v46 = vpop.eup %7024  ;;  %v9291_v49 = vld [vmem:[#allocation67_spill] sm:$0xff] }
 0x4da   :  { %7026 = vtanh.f32 %v3665_v16  ;;  %v3400_v21 = vadd.f32 %v3399_v41, %v8328_v13  ;;  %v3488_v37 = vpop.f32.mrf.mxu3 }
 0x4db   :  { %5464 = vst [vmem:[#allocation7 + $0x1f8] sm:$0xff] %v5368_v58  ;;  %7028 = vtanh.f32 %v9291_v49 }
 0x4dc   :  { %v3489_v17 = vadd.f32 %v3488_v37, %v3400_v21  ;;  %v3669_v8 = vpop.f32.mrf.mxu1  ;;  %v6902_v21 = vld [vmem:[#allocation5 + $0x57c] sm:$0xf]  ;;  %v6585_v37 = vld [vmem:[#allocation5 + $0x590] sm:$0xf0] }
 0x4dd   :  { %v6588_v22 = vor.u32 %v6902_v21, %v6585_v37 }
 0x4de   :  { %v3578_v14 = vadd.f32 %v3577_v34, %v3489_v17  ;;  %3717 = vmatmul.bf16.gmra.mxu2 %v9288_v3  ;;  %v9292_v34 = vld [vmem:[#allocation37_spill] sm:$0xff] }
 0x4df   :  { %3806 = vmatmul.bf16.gmra.mxu3 %v9289_v52  ;;  %3984 = vmatmul.bf16.gmra.mxu1 %v9290_v24  ;;  %v3580_v2 = vpop.f32.mrf.mxu0 }
 0x4e0   :  { %v7027_v15 = vpop.eup %7026  ;;  %v3667_v26 = vadd.f32 %v3666_v28, %v3578_v14  ;;  %4314 = vmatpush.bf16.msra.mxu1 %v6588_v22  ;;  %v9295_v22 = vld [vmem:[#allocation68_spill] sm:$0xff] }
 0x4e1   :  { %v5371_v16 = vpack.c.bf16 %v7027_v15, %v7025_v46  ;;  %v3402_v58 = vpop.f32.mrf.mxu2  ;;  %v7029_v52 = vpop.eup %7028 }
 0x4e2   :  { %7030 = vtanh.f32 %v3667_v26  ;;  %v3403_v41 = vadd.f32 %v3402_v58, %v8328_v13  ;;  %v3491_v57 = vpop.f32.mrf.mxu3  ;;  %3895 = vmatmul.bf16.gmra.mxu0 %v9292_v34  ;;  %v5985_v34 = vld [vmem:[#allocation5 + $0xe0] sm:$0xf0] }
 0x4e3   :  { %5467 = vst [vmem:[#allocation7 + $0x210] sm:$0xff] %v5371_v16  ;;  %7032 = vtanh.f32 %v8293_v27  ;;  %v6752_v16 = vld [vmem:[#allocation5 + $0xcc] sm:$0xf] }
 0x4e4   :  { %v3492_v45 = vadd.f32 %v3491_v57, %v3403_v41  ;;  %v3671_v17 = vpop.f32.mrf.mxu1  ;;  %v5988_v21 = vor.u32 %v6752_v16, %v5985_v34 }
 0x4e6   :  { %v3581_v24 = vadd.f32 %v3580_v2, %v3492_v45  ;;  %v9293_v45 = vld [vmem:[#allocation19_spill] sm:$0xff]  ;;  %4048 = vmatpush.bf16.msra.mxu2 %v5988_v21 }
 0x4e7   :  { %v3582_v28 = vpop.f32.mrf.mxu0 }
 0x4e8   :  { %v7031_v14 = vpop.eup %7030  ;;  %v3670_v49 = vadd.f32 %v3669_v8, %v3581_v24  ;;  %v9294_v8 = vld [vmem:[#allocation38_spill] sm:$0xff] }
 0x4e9   :  { %v5374_v46 = vpack.c.bf16 %v7031_v14, %v7029_v52  ;;  %v3404_v15 = vpop.f32.mrf.mxu2  ;;  %v7033_v37 = vpop.eup %7032 }
 0x4ea   :  { %7034 = vtanh.f32 %v3670_v49  ;;  %v3405_v26 = vadd.f32 %v3404_v15, %v8328_v13  ;;  %v3493_v58 = vpop.f32.mrf.mxu3  ;;  %v6854_v15 = vld [vmem:[#allocation5 + $0x3fc] sm:$0xf] }
 0x4eb   :  { %5470 = vst [vmem:[#allocation7 + $0x228] sm:$0xff] %v5374_v46  ;;  %7036 = vtanh.f32 %v9295_v22 }
 0x4ec   :  { %v3494_v41 = vadd.f32 %v3493_v58, %v3405_v26  ;;  %v3674_v57 = vpop.f32.mrf.mxu1  ;;  %v6393_v26 = vld [vmem:[#allocation5 + $0x410] sm:$0xf0] }
 0x4ee   :  { %v3583_v2 = vadd.f32 %v3582_v28, %v3494_v41  ;;  %3722 = vmatmul.bf16.gmra.mxu2 %v7836_v42  ;;  %v9296_v28 = vld [vmem:[#allocation39_spill] sm:$0xff]  ;;  %v6396_v41 = vor.u32 %v6854_v15, %v6393_v26 }
 0x4ef   :  { %3811 = vmatmul.bf16.gmra.mxu3 %v9293_v45  ;;  %3989 = vmatmul.bf16.gmra.mxu1 %v9294_v8  ;;  %v3585_v27 = vpop.f32.mrf.mxu0 }
 0x4f0   :  { %v7035_v52 = vpop.eup %7034  ;;  %v3672_v24 = vadd.f32 %v3671_v17, %v3583_v2  ;;  %4225 = vmatpush.bf16.msra.mxu0 %v6396_v41 }
 0x4f1   :  { %v5377_v14 = vpack.c.bf16 %v7035_v52, %v7033_v37  ;;  %v3407_v49 = vpop.f32.mrf.mxu2  ;;  %v7037_v17 = vpop.eup %7036 }
 0x4f2   :  { %7038 = vtanh.f32 %v3672_v24  ;;  %v3408_v46 = vadd.f32 %v3407_v49, %v8328_v13  ;;  %v3496_v34 = vpop.f32.mrf.mxu3  ;;  %3900 = vmatmul.bf16.gmra.mxu0 %v9296_v28  ;;  %v6177_v28 = vld [vmem:[#allocation5 + $0x260] sm:$0xf0] }
 0x4f3   :  { %5473 = vst [vmem:[#allocation7 + $0x240] sm:$0xff] %v5377_v14  ;;  %7040 = vtanh.f32 %v8303_v50  ;;  %v6800_v14 = vld [vmem:[#allocation5 + $0x24c] sm:$0xf] }
 0x4f4   :  { %v3497_v58 = vadd.f32 %v3496_v34, %v3408_v46  ;;  %v3676_v16 = vpop.f32.mrf.mxu1  ;;  %v6180_v15 = vor.u32 %v6800_v14, %v6177_v28 }
 0x4f6   :  { %v3586_v8 = vadd.f32 %v3585_v27, %v3497_v58  ;;  %4137 = vmatpush.bf16.msra.mxu3 %v6180_v15  ;;  %v9297_v58 = vld [vmem:[#allocation69_spill] sm:$0xff] }
 0x4f7   :  { %v3587_v21 = vpop.f32.mrf.mxu0 }
 0x4f8   :  { %v7039_v2 = vpop.eup %7038  ;;  %v3675_v22 = vadd.f32 %v3674_v57, %v3586_v8 }
 0x4f9   :  { %v5380_v37 = vpack.c.bf16 %v7039_v2, %v7037_v17  ;;  %v3409_v52 = vpop.f32.mrf.mxu2  ;;  %v7041_v26 = vpop.eup %7040 }
 0x4fa   :  { %7042 = vtanh.f32 %v3675_v22  ;;  %v3410_v24 = vadd.f32 %v3409_v52, %v8328_v13  ;;  %v3498_v49 = vpop.f32.mrf.mxu3  ;;  %v6561_v22 = vld [vmem:[#allocation5 + $0x560] sm:$0xf0] }
 0x4fb   :  { %5476 = vst [vmem:[#allocation7 + $0x258] sm:$0xff] %v5380_v37  ;;  %7044 = vtanh.f32 %v9297_v58 }
 0x4fc   :  { %v3499_v46 = vadd.f32 %v3498_v49, %v3410_v24  ;;  %v3679_v34 = vpop.f32.mrf.mxu1 }
 0x4fe   :  { %v3588_v27 = vadd.f32 %v3587_v21, %v3499_v46  ;;  %3727 = vmatmul.bf16.gmra.mxu2 %v7854_v38  ;;  %v6896_v21 = vld [vmem:[#allocation5 + $0x54c] sm:$0xf] }
 0x4ff   :  { %3816 = vmatmul.bf16.gmra.mxu3 %v7849_v1  ;;  %3994 = vmatmul.bf16.gmra.mxu1 %v9244_v33  ;;  %v3590_v50 = vpop.f32.mrf.mxu0  ;;  %v6564_v24 = vor.u32 %v6896_v21, %v6561_v22  ;;  %v6369_v22 = vld [vmem:[#allocation5 + $0x3e0] sm:$0xf0] }
 0x500   :  { %v7043_v57 = vpop.eup %7042  ;;  %v3677_v8 = vadd.f32 %v3676_v16, %v3588_v27  ;;  %v9298_v27 = vld [vmem:[#allocation70_spill] sm:$0xff] }
 0x501   :  { %v5383_v41 = vpack.c.bf16 %v7043_v57, %v7041_v26  ;;  %v3412_v17 = vpop.f32.mrf.mxu2  ;;  %4315 = vmatpush.bf16.msra.mxu1 %v6564_v24  ;;  %v7045_v14 = vpop.eup %7044 }
 0x502   :  { %7046 = vtanh.f32 %v3677_v8  ;;  %v3413_v2 = vadd.f32 %v3412_v17, %v8328_v13  ;;  %v3501_v28 = vpop.f32.mrf.mxu3  ;;  %3905 = vmatmul.bf16.gmra.mxu0 %v9246_v20  ;;  %v5961_v17 = vld [vmem:[#allocation5 + $0xb0] sm:$0xf0]  ;;  %v9299_v20 = vld [vmem:[#allocation23_spill] sm:$0xff] }
 0x503   :  { %5479 = vst [vmem:[#allocation7 + $0x270] sm:$0xff] %v5383_v41  ;;  %7048 = vtanh.f32 %v9298_v27  ;;  %v6746_v41 = vld [vmem:[#allocation5 + $0x9c] sm:$0xf] }
 0x504   :  { %v3502_v37 = vadd.f32 %v3501_v28, %v3413_v2  ;;  %v3681_v52 = vpop.f32.mrf.mxu1  ;;  %v5964_v21 = vor.u32 %v6746_v41, %v5961_v17  ;;  %v9303_v41 = vld [vmem:[#allocation43_spill] sm:$0xff]  ;;  %v6794_v17 = vld [vmem:[#allocation5 + $0x21c] sm:$0xf] }
 0x506   :  { %v3591_v49 = vadd.f32 %v3590_v50, %v3502_v37  ;;  %v6848_v50 = vld [vmem:[#allocation5 + $0x3cc] sm:$0xf]  ;;  %4049 = vmatpush.bf16.msra.mxu2 %v5964_v21 }
 0x507   :  { %v3592_v16 = vpop.f32.mrf.mxu0  ;;  %v6372_v37 = vor.u32 %v6848_v50, %v6369_v22 }
 0x508   :  { %v7047_v46 = vpop.eup %7046  ;;  %v3680_v15 = vadd.f32 %v3679_v34, %v3591_v49  ;;  %v9300_v49 = vld [vmem:[#allocation22_spill] sm:$0xff] }
 0x509   :  { %v5386_v26 = vpack.c.bf16 %v7047_v46, %v7045_v14  ;;  %v3414_v57 = vpop.f32.mrf.mxu2  ;;  %v7049_v34 = vpop.eup %7048  ;;  %v9301_v14 = vld [vmem:[#allocation42_spill] sm:$0xff]  ;;  %4226 = vmatpush.bf16.msra.mxu0 %v6372_v37 }
 0x50a   :  { %7050 = vtanh.f32 %v3680_v15  ;;  %v3415_v8 = vadd.f32 %v3414_v57, %v8328_v13  ;;  %v3503_v58 = vpop.f32.mrf.mxu3 }
 0x50b   :  { %5482 = vst [vmem:[#allocation7 + $0x288] sm:$0xff] %v5386_v26  ;;  %v9302_v26 = vld [vmem:[#allocation71_spill] sm:$0xff] }
 0x50c   :  { %v3504_v2 = vadd.f32 %v3503_v58, %v3415_v8  ;;  %v3684_v28 = vpop.f32.mrf.mxu1  ;;  %7052 = vtanh.f32 %v9302_v26 }
 0x50e   :  { %v3593_v24 = vadd.f32 %v3592_v16, %v3504_v2  ;;  %3732 = vmatmul.bf16.gmra.mxu2 %v9299_v20  ;;  %v6153_v2 = vld [vmem:[#allocation5 + $0x230] sm:$0xf0] }
 0x50f   :  { %3821 = vmatmul.bf16.gmra.mxu3 %v9300_v49  ;;  %3999 = vmatmul.bf16.gmra.mxu1 %v9301_v14  ;;  %v3595_v46 = vpop.f32.mrf.mxu0  ;;  %v6156_v50 = vor.u32 %v6794_v17, %v6153_v2  ;;  %v6537_v49 = vld [vmem:[#allocation5 + $0x530] sm:$0xf0]  ;;  %v9306_v2 = vld [vmem:[#allocation24_spill] sm:$0xff] }
 0x510   :  { %v7051_v15 = vpop.eup %7050  ;;  %v3682_v27 = vadd.f32 %v3681_v52, %v3593_v24  ;;  %v9304_v17 = vld [vmem:[#allocation25_spill] sm:$0xff] }
 0x511   :  { %v5389_v57 = vpack.c.bf16 %v7051_v15, %v7049_v34  ;;  %v3417_v8 = vpop.f32.mrf.mxu2  ;;  %4138 = vmatpush.bf16.msra.mxu3 %v6156_v50  ;;  %v9307_v50 = vld [vmem:[#allocation44_spill] sm:$0xff] }
 0x512   :  { %7054 = vtanh.f32 %v3682_v27  ;;  %v3418_v58 = vadd.f32 %v3417_v8, %v8328_v13  ;;  %v3506_v16 = vpop.f32.mrf.mxu3  ;;  %3910 = vmatmul.bf16.gmra.mxu0 %v9303_v41  ;;  %v7053_v21 = vpop.eup %7052  ;;  %v6890_v41 = vld [vmem:[#allocation5 + $0x51c] sm:$0xf] }
 0x513   :  { %5485 = vst [vmem:[#allocation7 + $0x2a0] sm:$0xff] %v5389_v57  ;;  %7056 = vtanh.f32 %v8323_v54  ;;  %v6540_v57 = vor.u32 %v6890_v41, %v6537_v49  ;;  %v8462_v54 = vld [vmem:[%s9061_s6] sm:$0x3f] }
 0x514   :  { %v3507_v22 = vadd.f32 %v3506_v16, %v3418_v58  ;;  %v3686_v14 = vpop.f32.mrf.mxu1  ;;  %9305 = vst [vmem:[#allocation56_spill] sm:$0xff] %v8462_v54 }
 0x515   :  { %4316 = vmatpush.bf16.msra.mxu1 %v6540_v57 }
 0x516   :  { %v3596_v52 = vadd.f32 %v3595_v46, %v3507_v22 }
 0x517   :  { %v3597_v37 = vpop.f32.mrf.mxu0 }
 0x518   :  { %v7055_v24 = vpop.eup %7054  ;;  %v3685_v26 = vadd.f32 %v3684_v28, %v3596_v52  ;;  %v8465_v28 = vperm.slane %v8462_v54, 2  ;;  %v9308_v52 = vld [vmem:[#allocation53_spill] sm:$0xff]  ;;  %v6842_v54 = vld [vmem:[#allocation5 + $0x39c] sm:$0xf] }
 0x519   :  { %v5392_v34 = vpack.c.bf16 %v7055_v24, %v7053_v21  ;;  %v3419_v15 = vpop.f32.mrf.mxu2 }
 0x51a   :  { %7058 = vtanh.f32 %v3685_v26  ;;  %v3420_v27 = vadd.f32 %v3419_v15, %v8328_v13  ;;  %v3508_v8 = vpop.f32.mrf.mxu3  ;;  %v7057_v13 = vpop.eup %7056  ;;  %v6740_v15 = vld [vmem:[#allocation5 + $0x6c] sm:$0xf] }
 0x51b   :  { %5488 = vst [vmem:[#allocation7 + $0x2b8] sm:$0xff] %v5392_v34  ;;  %7060 = vtanh.f32 %v9308_v52  ;;  %v9309_v34 = vld [vmem:[#allocation45_spill] sm:$0xff] }
 0x51c   :  { %v3509_v58 = vadd.f32 %v3508_v8, %v3420_v27  ;;  %v3965_v16 = vpop.f32.mrf.mxu1  ;;  %v5937_v27 = vld [vmem:[#allocation5 + $0x80] sm:$0xf0] }
 0x51d   :  { %v5940_v8 = vor.u32 %v6740_v15, %v5937_v27 }
 0x51e   :  { %v3598_v46 = vadd.f32 %v3597_v37, %v3509_v58  ;;  %3737 = vmatmul.bf16.gmra.mxu2 %v9304_v17 }
 0x51f   :  { %3826 = vmatmul.bf16.gmra.mxu3 %v9306_v2  ;;  %4004 = vmatmul.bf16.gmra.mxu1 %v9307_v50  ;;  %v3876_v49 = vpop.f32.mrf.mxu0 }
 0x520   :  { %v7059_v41 = vpop.eup %7058  ;;  %v3687_v22 = vadd.f32 %v3686_v14, %v3598_v46  ;;  %4050 = vmatpush.bf16.msra.mxu2 %v5940_v8 }
 0x521   :  { %v5395_v21 = vpack.c.bf16 %v7059_v41, %v7057_v13  ;;  %v3698_v37 = vpop.f32.mrf.mxu2  ;;  %v7061_v2 = vpop.eup %7060 }
 0x522   :  { %7062 = vtanh.f32 %v3687_v22  ;;  %v3699_v24 = vadd.f32 %v3698_v37, %v8465_v28  ;;  %v3787_v26 = vpop.f32.mrf.mxu3  ;;  %3915 = vmatmul.bf16.gmra.mxu0 %v9309_v34  ;;  %v6345_v34 = vld [vmem:[#allocation5 + $0x3b0] sm:$0xf0] }
 0x523   :  { %5491 = vst [vmem:[#allocation7 + $0x2d0] sm:$0xff] %v5395_v21  ;;  %v6348_v17 = vor.u32 %v6842_v54, %v6345_v34  ;;  %v6788_v54 = vld [vmem:[#allocation5 + $0x1ec] sm:$0xf]  ;;  %v6129_v34 = vld [vmem:[#allocation5 + $0x200] sm:$0xf0] }
 0x524   :  { %v3788_v57 = vadd.f32 %v3787_v26, %v3699_v24  ;;  %v3967_v58 = vpop.f32.mrf.mxu1  ;;  %v6132_v27 = vor.u32 %v6788_v54, %v6129_v34  ;;  %v6734_v34 = vld [vmem:[#allocation5 + $0x3c] sm:$0xf] }
 0x525   :  { %4227 = vmatpush.bf16.msra.mxu0 %v6348_v17 }
 0x526   :  { %v3877_v50 = vadd.f32 %v3876_v49, %v3788_v57  ;;  %4139 = vmatpush.bf16.msra.mxu3 %v6132_v27  ;;  %v5913_v27 = vld [vmem:[#allocation5 + $0x50] sm:$0xf0] }
 0x527   :  { %v3878_v14 = vpop.f32.mrf.mxu0 }
 0x528   :  { %v7063_v46 = vpop.eup %7062  ;;  %v8472_v52 = vadd.f32 %v3965_v16, %v3877_v50 }
 0x529   :  { %v5398_v13 = vpack.c.bf16 %v7063_v46, %v7061_v2  ;;  %v3700_v41 = vpop.f32.mrf.mxu2 }
 0x52a   :  { %v3701_v22 = vadd.f32 %v3700_v41, %v8465_v28  ;;  %v3789_v37 = vpop.f32.mrf.mxu3  ;;  %7064 = vtanh.f32 %v8472_v52 }
 0x52b   :  { %5494 = vst [vmem:[#allocation7 + $0x2e8] sm:$0xff] %v5398_v13 }
 0x52c   :  { %v3790_v21 = vadd.f32 %v3789_v37, %v3701_v22  ;;  %v3970_v15 = vpop.f32.mrf.mxu1  ;;  %v6884_v22 = vld [vmem:[#allocation5 + $0x4ec] sm:$0xf]  ;;  %v6513_v37 = vld [vmem:[#allocation5 + $0x500] sm:$0xf0] }
 0x52e   :  { %v3879_v24 = vadd.f32 %v3878_v14, %v3790_v21  ;;  %3742 = vmatmul.bf16.gmra.mxu2 %v7890_v36  ;;  %v6516_v21 = vor.u32 %v6884_v22, %v6513_v37  ;;  %v6836_v37 = vld [vmem:[#allocation5 + $0x36c] sm:$0xf] }
 0x52f   :  { %3831 = vmatmul.bf16.gmra.mxu3 %v7885_v19  ;;  %4009 = vmatmul.bf16.gmra.mxu1 %v8084_v62  ;;  %v3881_v16 = vpop.f32.mrf.mxu0 }
 0x530   :  { %v8478_v2 = vadd.f32 %v3967_v58, %v3879_v24  ;;  %4317 = vmatpush.bf16.msra.mxu1 %v6516_v21  ;;  %v6321_v21 = vld [vmem:[#allocation5 + $0x380] sm:$0xf0] }
 0x531   :  { %v3703_v50 = vpop.f32.mrf.mxu2 }
 0x532   :  { %v3704_v49 = vadd.f32 %v3703_v50, %v8465_v28  ;;  %v3792_v26 = vpop.f32.mrf.mxu3  ;;  %3920 = vmatmul.bf16.gmra.mxu0 %v9256_v53 }
 0x534   :  { %v3793_v17 = vadd.f32 %v3792_v26, %v3704_v49  ;;  %v3972_v8 = vpop.f32.mrf.mxu1 }
 0x536   :  { %v3882_v57 = vadd.f32 %v3881_v16, %v3793_v17  ;;  %v5916_v17 = vor.u32 %v6734_v34, %v5913_v27  ;;  %v6782_v27 = vld [vmem:[#allocation5 + $0x1bc] sm:$0xf] }
 0x537   :  { %v3883_v14 = vpop.f32.mrf.mxu0 }
 0x538   :  { %v8482_v46 = vadd.f32 %v3970_v15, %v3882_v57  ;;  %4051 = vmatpush.bf16.msra.mxu2 %v5916_v17  ;;  %v6105_v17 = vld [vmem:[#allocation5 + $0x1d0] sm:$0xf0] }
 0x539   :  { %v3705_v13 = vpop.f32.mrf.mxu2 }
 0x53a   :  { %v3706_v58 = vadd.f32 %v3705_v13, %v8465_v28  ;;  %v3794_v41 = vpop.f32.mrf.mxu3 }
 0x53c   :  { %v3795_v24 = vadd.f32 %v3794_v41, %v3706_v58  ;;  %v3975_v50 = vpop.f32.mrf.mxu1 }
 0x53e   :  { %v3884_v53 = vadd.f32 %v3883_v14, %v3795_v24  ;;  %3747 = vmatmul.bf16.gmra.mxu2 %v7902_v11  ;;  %v6324_v24 = vor.u32 %v6836_v37, %v6321_v21  ;;  %v6878_v21 = vld [vmem:[#allocation5 + $0x4bc] sm:$0xf] }
 0x53f   :  { %3836 = vmatmul.bf16.gmra.mxu3 %v7897_v48  ;;  %4014 = vmatmul.bf16.gmra.mxu1 %v8096_v43  ;;  %v3886_v16 = vpop.f32.mrf.mxu0 }
 0x540   :  { %v8488_v15 = vadd.f32 %v3972_v8, %v3884_v53  ;;  %4228 = vmatpush.bf16.msra.mxu0 %v6324_v24  ;;  %v6489_v24 = vld [vmem:[#allocation5 + $0x4d0] sm:$0xf0] }
 0x541   :  { %v3708_v49 = vpop.f32.mrf.mxu2 }
 0x542   :  { %9310 = vst [vmem:[#allocation57_spill] sm:$0xff] %v8488_v15  ;;  %v3709_v26 = vadd.f32 %v3708_v49, %v8465_v28  ;;  %v3797_v54 = vpop.f32.mrf.mxu3  ;;  %3925 = vmatmul.bf16.gmra.mxu0 %v9258_v30 }
 0x544   :  { %v3798_v57 = vadd.f32 %v3797_v54, %v3709_v26  ;;  %v3977_v14 = vpop.f32.mrf.mxu1 }
 0x546   :  { %v3887_v13 = vadd.f32 %v3886_v16, %v3798_v57  ;;  %v6108_v57 = vor.u32 %v6782_v27, %v6105_v17  ;;  %v6728_v17 = vld [vmem:[#allocation5 + $0xc] sm:$0xf] }
 0x547   :  { %v3888_v58 = vpop.f32.mrf.mxu0 }
 0x548   :  { %v8492_v41 = vadd.f32 %v3975_v50, %v3887_v13  ;;  %4140 = vmatpush.bf16.msra.mxu3 %v6108_v57  ;;  %v5889_v57 = vld [vmem:[#allocation5 + $0x20] sm:$0xf0] }
 0x549   :  { %v3710_v22 = vpop.f32.mrf.mxu2 }
 0x54a   :  { %v3711_v53 = vadd.f32 %v3710_v22, %v8465_v28  ;;  %v3799_v8 = vpop.f32.mrf.mxu3 }
 0x54c   :  { %v3800_v49 = vadd.f32 %v3799_v8, %v3711_v53  ;;  %v3980_v15 = vpop.f32.mrf.mxu1 }
 0x54e   :  { %v3889_v30 = vadd.f32 %v3888_v58, %v3800_v49  ;;  %3752 = vmatmul.bf16.gmra.mxu2 %v7914_v44  ;;  %v6492_v49 = vor.u32 %v6878_v21, %v6489_v24  ;;  %v6830_v24 = vld [vmem:[#allocation5 + $0x33c] sm:$0xf] }
 0x54f   :  { %3841 = vmatmul.bf16.gmra.mxu3 %v7909_v7  ;;  %4019 = vmatmul.bf16.gmra.mxu1 %v8108_v35  ;;  %v3891_v16 = vpop.f32.mrf.mxu0 }
 0x550   :  { %v8498_v50 = vadd.f32 %v3977_v14, %v3889_v30  ;;  %4318 = vmatpush.bf16.msra.mxu1 %v6492_v49  ;;  %v6297_v49 = vld [vmem:[#allocation5 + $0x350] sm:$0xf0] }
 0x551   :  { %v3713_v26 = vpop.f32.mrf.mxu2 }
 0x552   :  { %9311 = vst [vmem:[#allocation58_spill] sm:$0xff] %v8498_v50  ;;  %v3714_v54 = vadd.f32 %v3713_v26, %v8465_v28  ;;  %v3802_v34 = vpop.f32.mrf.mxu3  ;;  %3930 = vmatmul.bf16.gmra.mxu0 %v9260_v55 }
 0x554   :  { %v3803_v13 = vadd.f32 %v3802_v34, %v3714_v54  ;;  %v3982_v58 = vpop.f32.mrf.mxu1 }
 0x556   :  { %v3892_v22 = vadd.f32 %v3891_v16, %v3803_v13  ;;  %v5892_v13 = vor.u32 %v6728_v17, %v5889_v57  ;;  %v9314_v57 = vld [vmem:[#allocation52_spill] sm:$0xff] }
 0x557   :  { %v3893_v53 = vpop.f32.mrf.mxu0 }
 0x558   :  { %v8502_v8 = vadd.f32 %v3980_v15, %v3892_v22  ;;  %4052 = vmatpush.bf16.msra.mxu2 %v5892_v13  ;;  %v6776_v13 = vld [vmem:[#allocation5 + $0x18c] sm:$0xf] }
 0x559   :  { %v3715_v37 = vpop.f32.mrf.mxu2 }
 0x55a   :  { %v3716_v30 = vadd.f32 %v3715_v37, %v8465_v28  ;;  %v3804_v14 = vpop.f32.mrf.mxu3 }
 0x55c   :  { %v3805_v26 = vadd.f32 %v3804_v14, %v3716_v30  ;;  %v3985_v50 = vpop.f32.mrf.mxu1 }
 0x55e   :  { %v3894_v55 = vadd.f32 %v3893_v53, %v3805_v26  ;;  %3757 = vmatmul.bf16.gmra.mxu2 %v7926_v32  ;;  %v6300_v26 = vor.u32 %v6830_v24, %v6297_v49 }
 0x55f   :  { %3846 = vmatmul.bf16.gmra.mxu3 %v7921_v51  ;;  %4024 = vmatmul.bf16.gmra.mxu1 %v8120_v4  ;;  %v3896_v16 = vpop.f32.mrf.mxu0 }
 0x560   :  { %v8508_v15 = vadd.f32 %v3982_v58, %v3894_v55  ;;  %4229 = vmatpush.bf16.msra.mxu0 %v6300_v26  ;;  %v6872_v26 = vld [vmem:[#allocation5 + $0x48c] sm:$0xf] }
 0x561   :  { %v3718_v54 = vpop.f32.mrf.mxu2 }
 0x562   :  { %9312 = vst [vmem:[#allocation59_spill] sm:$0xff] %v8508_v15  ;;  %v3719_v34 = vadd.f32 %v3718_v54, %v8465_v28  ;;  %v3807_v27 = vpop.f32.mrf.mxu3  ;;  %3935 = vmatmul.bf16.gmra.mxu0 %v9262_v61 }
 0x564   :  { %v3808_v22 = vadd.f32 %v3807_v27, %v3719_v34  ;;  %v3987_v53 = vpop.f32.mrf.mxu1 }
 0x566   :  { %v3897_v37 = vadd.f32 %v3896_v16, %v3808_v22  ;;  %v6081_v22 = vld [vmem:[#allocation5 + $0x1a0] sm:$0xf0] }
 0x567   :  { %v3898_v30 = vpop.f32.mrf.mxu0 }
 0x568   :  { %v8512_v14 = vadd.f32 %v3985_v50, %v3897_v37  ;;  %v6084_v37 = vor.u32 %v6776_v13, %v6081_v22 }
 0x569   :  { %v3720_v21 = vpop.f32.mrf.mxu2 }
 0x56a   :  { %v3721_v55 = vadd.f32 %v3720_v21, %v8465_v28  ;;  %v3809_v58 = vpop.f32.mrf.mxu3  ;;  %4141 = vmatpush.bf16.msra.mxu3 %v6084_v37 }
 0x56c   :  { %v3810_v54 = vadd.f32 %v3809_v58, %v3721_v55  ;;  %v3990_v15 = vpop.f32.mrf.mxu1 }
 0x56e   :  { %v3899_v61 = vadd.f32 %v3898_v30, %v3810_v54  ;;  %3762 = vmatmul.bf16.gmra.mxu2 %v7938_v18 }
 0x56f   :  { %3851 = vmatmul.bf16.gmra.mxu3 %v7933_v25  ;;  %4029 = vmatmul.bf16.gmra.mxu1 %v9263_v63  ;;  %v3901_v16 = vpop.f32.mrf.mxu0  ;;  %v6273_v25 = vld [vmem:[#allocation5 + $0x320] sm:$0xf0] }
 0x570   :  { %v8518_v50 = vadd.f32 %v3987_v53, %v3899_v61  ;;  %v6465_v61 = vld [vmem:[#allocation5 + $0x4a0] sm:$0xf0] }
 0x571   :  { %v3723_v34 = vpop.f32.mrf.mxu2 }
 0x572   :  { %9313 = vst [vmem:[#allocation60_spill] sm:$0xff] %v8518_v50  ;;  %v3724_v27 = vadd.f32 %v3723_v34, %v8465_v28  ;;  %v3812_v17 = vpop.f32.mrf.mxu3  ;;  %3940 = vmatmul.bf16.gmra.mxu0 %v9314_v57  ;;  %v6468_v34 = vor.u32 %v6872_v26, %v6465_v61  ;;  %v6824_v57 = vld [vmem:[#allocation5 + $0x30c] sm:$0xf] }
 0x574   :  { %v3813_v21 = vadd.f32 %v3812_v17, %v3724_v27  ;;  %v3992_v30 = vpop.f32.mrf.mxu1  ;;  %4319 = vmatpush.bf16.msra.mxu1 %v6468_v34  ;;  %v6276_v27 = vor.u32 %v6824_v57, %v6273_v25 }
 0x576   :  { %v3902_v55 = vadd.f32 %v3901_v16, %v3813_v21  ;;  %4230 = vmatpush.bf16.msra.mxu0 %v6276_v27  ;;  %v6063_v21 = vld [vmem:[#allocation5 + $0x160] sm:$0xf] }
 0x577   :  { %v3903_v58 = vpop.f32.mrf.mxu0 }
 0x578   :  { %v8522_v24 = vadd.f32 %v3990_v15, %v3902_v55  ;;  %v6774_v55 = vld [vmem:[#allocation5 + $0x174] sm:$0xf0] }
 0x579   :  { %v3725_v49 = vpop.f32.mrf.mxu2 }
 0x57a   :  { %v3726_v53 = vadd.f32 %v3725_v49, %v8465_v28  ;;  %v3814_v54 = vpop.f32.mrf.mxu3 }
 0x57c   :  { %v3815_v50 = vadd.f32 %v3814_v54, %v3726_v53  ;;  %v3995_v63 = vpop.f32.mrf.mxu1 }
 0x57e   :  { %v3904_v13 = vadd.f32 %v3903_v58, %v3815_v50  ;;  %3767 = vmatmul.bf16.gmra.mxu2 %v7950_v47  ;;  %v6064_v50 = vor.u32 %v6774_v55, %v6063_v21  ;;  %v6822_v21 = vld [vmem:[#allocation5 + $0x2f4] sm:$0xf0] }
 0x57f   :  { %3856 = vmatmul.bf16.gmra.mxu3 %v7945_v5  ;;  %4034 = vmatmul.bf16.gmra.mxu1 %v8144_v12  ;;  %v3906_v15 = vpop.f32.mrf.mxu0 }
 0x580   :  { %v8528_v16 = vadd.f32 %v3992_v30, %v3904_v13  ;;  %4401 = vmatpush.bf16.msrb.mxu2 %v6064_v50 }
 0x581   :  { %v3728_v17 = vpop.f32.mrf.mxu2 }
 0x582   :  { %v3729_v22 = vadd.f32 %v3728_v17, %v8465_v28  ;;  %v3817_v37 = vpop.f32.mrf.mxu3  ;;  %3945 = vmatmul.bf16.gmra.mxu0 %v8149_v6 }
 0x584   :  { %v3818_v58 = vadd.f32 %v3817_v37, %v3729_v22  ;;  %v3997_v49 = vpop.f32.mrf.mxu1  ;;  %v6255_v37 = vld [vmem:[#allocation5 + $0x2e0] sm:$0xf] }
 0x585   :  { %v6256_v55 = vor.u32 %v6822_v21, %v6255_v37  ;;  %v6039_v21 = vld [vmem:[#allocation5 + $0x130] sm:$0xf] }
 0x586   :  { %v3907_v25 = vadd.f32 %v3906_v15, %v3818_v58 }
 0x587   :  { %v3908_v57 = vpop.f32.mrf.mxu0  ;;  %4490 = vmatpush.bf16.msrb.mxu3 %v6256_v55  ;;  %v6768_v55 = vld [vmem:[#allocation5 + $0x144] sm:$0xf0] }
 0x588   :  { %v8532_v26 = vadd.f32 %v3995_v63, %v3907_v25 }
 0x589   :  { %v3730_v61 = vpop.f32.mrf.mxu2 }
 0x58a   :  { %v3731_v30 = vadd.f32 %v3730_v61, %v8465_v28  ;;  %v3819_v53 = vpop.f32.mrf.mxu3 }
 0x58c   :  { %v3820_v54 = vadd.f32 %v3819_v53, %v3731_v30  ;;  %v4000_v34 = vpop.f32.mrf.mxu1 }
 0x58e   :  { %v3909_v13 = vadd.f32 %v3908_v57, %v3820_v54  ;;  %3772 = vmatmul.bf16.gmra.mxu2 %v7969_v23  ;;  %v6639_v54 = vld [vmem:[#allocation5 + $0x5e0] sm:$0xf] }
 0x58f   :  { %3861 = vmatmul.bf16.gmra.mxu3 %v7962_v29  ;;  %4039 = vmatmul.bf16.gmra.mxu1 %v9266_v10  ;;  %v3911_v27 = vpop.f32.mrf.mxu0 }
 0x590   :  { %v8538_v17 = vadd.f32 %v3997_v49, %v3909_v13  ;;  %v6918_v13 = vld [vmem:[#allocation5 + $0x5f4] sm:$0xf0] }
 0x591   :  { %v3733_v15 = vpop.f32.mrf.mxu2 }
 0x592   :  { %9315 = vst [vmem:[#allocation61_spill] sm:$0xff] %v8538_v17  ;;  %v3734_v63 = vadd.f32 %v3733_v15, %v8465_v28  ;;  %v3822_v22 = vpop.f32.mrf.mxu3  ;;  %3950 = vmatmul.bf16.gmra.mxu0 %v9268_v0  ;;  %v6640_v15 = vor.u32 %v6918_v13, %v6639_v54  ;;  %v6447_v54 = vld [vmem:[#allocation5 + $0x460] sm:$0xf]  ;;  %v6870_v13 = vld [vmem:[#allocation5 + $0x474] sm:$0xf0] }
 0x594   :  { %v3823_v50 = vadd.f32 %v3822_v22, %v3734_v63  ;;  %v4002_v58 = vpop.f32.mrf.mxu1  ;;  %4668 = vmatpush.bf16.msrb.mxu1 %v6640_v15  ;;  %v6448_v15 = vor.u32 %v6870_v13, %v6447_v54 }
 0x596   :  { %v3912_v25 = vadd.f32 %v3911_v27, %v3823_v50  ;;  %v6040_v50 = vor.u32 %v6768_v55, %v6039_v21  ;;  %4579 = vmatpush.bf16.msrb.mxu0 %v6448_v15 }
 0x597   :  { %v3913_v57 = vpop.f32.mrf.mxu0 }
 0x598   :  { %v8542_v61 = vadd.f32 %v4000_v34, %v3912_v25  ;;  %4402 = vmatpush.bf16.msrb.mxu2 %v6040_v50 }
 0x599   :  { %v3735_v30 = vpop.f32.mrf.mxu2 }
 0x59a   :  { %v3736_v49 = vadd.f32 %v3735_v30, %v8465_v28  ;;  %v3824_v53 = vpop.f32.mrf.mxu3 }
 0x59c   :  { %v3825_v17 = vadd.f32 %v3824_v53, %v3736_v49  ;;  %v4005_v10 = vpop.f32.mrf.mxu1 }
 0x59e   :  { %v3914_v0 = vadd.f32 %v3913_v57, %v3825_v17  ;;  %4053 = vmatmul.bf16.vlgmr.msra.gmra.mxu2 %v7746_v60 }
 0x59f   :  { %4142 = vmatmul.bf16.vlgmr.msra.gmra.mxu3 %v7741_v56  ;;  %4320 = vmatmul.bf16.vlgmr.msra.gmra.mxu1 %v9269_v39  ;;  %v3916_v27 = vpop.f32.mrf.mxu0 }
 0x5a0   :  { %v8548_v34 = vadd.f32 %v4002_v58, %v3914_v0 }
 0x5a1   :  { %v3738_v63 = vpop.f32.mrf.mxu2 }
 0x5a2   :  { %9316 = vst [vmem:[#allocation28_spill] sm:$0xff] %v8548_v34  ;;  %v3739_v22 = vadd.f32 %v3738_v63, %v8465_v28  ;;  %v3827_v37 = vpop.f32.mrf.mxu3  ;;  %4231 = vmatmul.bf16.vlgmr.msra.gmra.mxu0 %v9271_v9 }
 0x5a4   :  { %v3828_v25 = vadd.f32 %v3827_v37, %v3739_v22  ;;  %v4007_v17 = vpop.f32.mrf.mxu1  ;;  %v9317_v22 = vld [vmem:[#allocation11_spill] sm:$0xff]  ;;  %v9318_v37 = vld [vmem:[#allocation30_spill] sm:$0xff] }
 0x5a6   :  { %v3917_v57 = vadd.f32 %v3916_v27, %v3828_v25  ;;  %v9320_v25 = vld [vmem:[#allocation31_spill] sm:$0xff] }
 0x5a7   :  { %v3918_v30 = vpop.f32.mrf.mxu0 }
 0x5a8   :  { %v8552_v49 = vadd.f32 %v4005_v10, %v3917_v57  ;;  %v6231_v57 = vld [vmem:[#allocation5 + $0x2b0] sm:$0xf] }
 0x5a9   :  { %v3740_v53 = vpop.f32.mrf.mxu2 }
 0x5aa   :  { %v3741_v0 = vadd.f32 %v3740_v53, %v8465_v28  ;;  %v3829_v58 = vpop.f32.mrf.mxu3  ;;  %v6816_v53 = vld [vmem:[#allocation5 + $0x2c4] sm:$0xf0] }
 0x5ac   :  { %v3830_v63 = vadd.f32 %v3829_v58, %v3741_v0  ;;  %v4010_v34 = vpop.f32.mrf.mxu1  ;;  %v6232_v0 = vor.u32 %v6816_v53, %v6231_v57 }
 0x5ae   :  { %v3919_v9 = vadd.f32 %v3918_v30, %v3830_v63  ;;  %4058 = vmatmul.bf16.gmra.mxu2 %v9272_v59  ;;  %4491 = vmatpush.bf16.msrb.mxu3 %v6232_v0 }
 0x5af   :  { %4147 = vmatmul.bf16.gmra.mxu3 %v9317_v22  ;;  %4325 = vmatmul.bf16.gmra.mxu1 %v9318_v37  ;;  %v3921_v27 = vpop.f32.mrf.mxu0  ;;  %v6912_v37 = vld [vmem:[#allocation5 + $0x5c4] sm:$0xf0] }
 0x5b0   :  { %v8558_v10 = vadd.f32 %v4007_v17, %v3919_v9 }
 0x5b1   :  { %v3743_v21 = vpop.f32.mrf.mxu2 }
 0x5b2   :  { %9319 = vst [vmem:[#allocation62_spill] sm:$0xff] %v8558_v10  ;;  %v3744_v55 = vadd.f32 %v3743_v21, %v8465_v28  ;;  %v3832_v50 = vpop.f32.mrf.mxu3  ;;  %4236 = vmatmul.bf16.gmra.mxu0 %v9320_v25  ;;  %v6615_v10 = vld [vmem:[#allocation5 + $0x5b0] sm:$0xf] }
 0x5b3   :  { %v6616_v21 = vor.u32 %v6912_v37, %v6615_v10  ;;  %v6015_v37 = vld [vmem:[#allocation5 + $0x100] sm:$0xf]  ;;  %v6762_v10 = vld [vmem:[#allocation5 + $0x114] sm:$0xf0] }
 0x5b4   :  { %v3833_v58 = vadd.f32 %v3832_v50, %v3744_v55  ;;  %v4012_v30 = vpop.f32.mrf.mxu1  ;;  %v9321_v55 = vld [vmem:[#allocation13_spill] sm:$0xff]  ;;  %v9322_v50 = vld [vmem:[#allocation32_spill] sm:$0xff] }
 0x5b5   :  { %4669 = vmatpush.bf16.msrb.mxu1 %v6616_v21 }
 0x5b6   :  { %v3922_v54 = vadd.f32 %v3921_v27, %v3833_v58  ;;  %v9324_v58 = vld [vmem:[#allocation33_spill] sm:$0xff] }
 0x5b7   :  { %v3923_v13 = vpop.f32.mrf.mxu0 }
 0x5b8   :  { %v8562_v15 = vadd.f32 %v4010_v34, %v3922_v54  ;;  %v6016_v54 = vor.u32 %v6762_v10, %v6015_v37 }
 0x5b9   :  { %v3745_v63 = vpop.f32.mrf.mxu2 }
 0x5ba   :  { %v3746_v9 = vadd.f32 %v3745_v63, %v8465_v28  ;;  %v3834_v17 = vpop.f32.mrf.mxu3  ;;  %4403 = vmatpush.bf16.msrb.mxu2 %v6016_v54 }
 0x5bc   :  { %v3835_v22 = vadd.f32 %v3834_v17, %v3746_v9  ;;  %v4015_v59 = vpop.f32.mrf.mxu1 }
 0x5be   :  { %v3924_v25 = vadd.f32 %v3923_v13, %v3835_v22  ;;  %4063 = vmatmul.bf16.gmra.mxu2 %v9278_v31 }
 0x5bf   :  { %4152 = vmatmul.bf16.gmra.mxu3 %v9321_v55  ;;  %4330 = vmatmul.bf16.gmra.mxu1 %v9322_v50  ;;  %v3926_v27 = vpop.f32.mrf.mxu0  ;;  %v6864_v50 = vld [vmem:[#allocation5 + $0x444] sm:$0xf0] }
 0x5c0   :  { %v8568_v34 = vadd.f32 %v4012_v30, %v3924_v25 }
 0x5c1   :  { %v3748_v57 = vpop.f32.mrf.mxu2 }
 0x5c2   :  { %9323 = vst [vmem:[#allocation63_spill] sm:$0xff] %v8568_v34  ;;  %v3749_v53 = vadd.f32 %v3748_v57, %v8465_v28  ;;  %v3837_v0 = vpop.f32.mrf.mxu3  ;;  %4241 = vmatmul.bf16.gmra.mxu0 %v9324_v58  ;;  %v6423_v34 = vld [vmem:[#allocation5 + $0x430] sm:$0xf] }
 0x5c3   :  { %v6424_v57 = vor.u32 %v6864_v50, %v6423_v34  ;;  %v6207_v50 = vld [vmem:[#allocation5 + $0x280] sm:$0xf]  ;;  %v6810_v34 = vld [vmem:[#allocation5 + $0x294] sm:$0xf0] }
 0x5c4   :  { %v3838_v63 = vadd.f32 %v3837_v0, %v3749_v53  ;;  %v4017_v22 = vpop.f32.mrf.mxu1  ;;  %v9325_v53 = vld [vmem:[#allocation15_spill] sm:$0xff]  ;;  %v9326_v0 = vld [vmem:[#allocation34_spill] sm:$0xff] }
 0x5c5   :  { %4580 = vmatpush.bf16.msrb.mxu0 %v6424_v57 }
 0x5c6   :  { %v3927_v13 = vadd.f32 %v3926_v27, %v3838_v63  ;;  %v9328_v63 = vld [vmem:[#allocation35_spill] sm:$0xff] }
 0x5c7   :  { %v3928_v9 = vpop.f32.mrf.mxu0 }
 0x5c8   :  { %v8572_v17 = vadd.f32 %v4015_v59, %v3927_v13  ;;  %v6208_v13 = vor.u32 %v6810_v34, %v6207_v50 }
 0x5c9   :  { %v3750_v21 = vpop.f32.mrf.mxu2 }
 0x5ca   :  { %v3751_v25 = vadd.f32 %v3750_v21, %v8465_v28  ;;  %v3839_v30 = vpop.f32.mrf.mxu3  ;;  %4492 = vmatpush.bf16.msrb.mxu3 %v6208_v13 }
 0x5cc   :  { %v3840_v55 = vadd.f32 %v3839_v30, %v3751_v25  ;;  %v4020_v31 = vpop.f32.mrf.mxu1 }
 0x5ce   :  { %v3929_v58 = vadd.f32 %v3928_v9, %v3840_v55  ;;  %4068 = vmatmul.bf16.gmra.mxu2 %v9283_v40 }
 0x5cf   :  { %4157 = vmatmul.bf16.gmra.mxu3 %v9325_v53  ;;  %4335 = vmatmul.bf16.gmra.mxu1 %v9326_v0  ;;  %v3931_v27 = vpop.f32.mrf.mxu0  ;;  %v6906_v0 = vld [vmem:[#allocation5 + $0x594] sm:$0xf0] }
 0x5d0   :  { %v8578_v59 = vadd.f32 %v4017_v22, %v3929_v58 }
 0x5d1   :  { %v3753_v37 = vpop.f32.mrf.mxu2 }
 0x5d2   :  { %9327 = vst [vmem:[#allocation64_spill] sm:$0xff] %v8578_v59  ;;  %v3754_v10 = vadd.f32 %v3753_v37, %v8465_v28  ;;  %v3842_v54 = vpop.f32.mrf.mxu3  ;;  %4246 = vmatmul.bf16.gmra.mxu0 %v9328_v63  ;;  %v6591_v59 = vld [vmem:[#allocation5 + $0x580] sm:$0xf] }
 0x5d3   :  { %v6592_v37 = vor.u32 %v6906_v0, %v6591_v59  ;;  %v5991_v0 = vld [vmem:[#allocation5 + $0xd0] sm:$0xf]  ;;  %v6756_v59 = vld [vmem:[#allocation5 + $0xe4] sm:$0xf0] }
 0x5d4   :  { %v3843_v21 = vadd.f32 %v3842_v54, %v3754_v10  ;;  %v4022_v55 = vpop.f32.mrf.mxu1  ;;  %v9329_v10 = vld [vmem:[#allocation17_spill] sm:$0xff]  ;;  %v9330_v54 = vld [vmem:[#allocation36_spill] sm:$0xff] }
 0x5d5   :  { %4670 = vmatpush.bf16.msrb.mxu1 %v6592_v37 }
 0x5d6   :  { %v3932_v9 = vadd.f32 %v3931_v27, %v3843_v21  ;;  %v9332_v21 = vld [vmem:[#allocation37_spill] sm:$0xff] }
 0x5d7   :  { %v3933_v25 = vpop.f32.mrf.mxu0 }
 0x5d8   :  { %v8582_v30 = vadd.f32 %v4020_v31, %v3932_v9  ;;  %v5992_v9 = vor.u32 %v6756_v59, %v5991_v0 }
 0x5d9   :  { %v3755_v57 = vpop.f32.mrf.mxu2 }
 0x5da   :  { %v3756_v58 = vadd.f32 %v3755_v57, %v8465_v28  ;;  %v3844_v22 = vpop.f32.mrf.mxu3  ;;  %4404 = vmatpush.bf16.msrb.mxu2 %v5992_v9  ;;  %v9335_v9 = vld [vmem:[#allocation39_spill] sm:$0xff] }
 0x5dc   :  { %v3845_v53 = vadd.f32 %v3844_v22, %v3756_v58  ;;  %v4025_v40 = vpop.f32.mrf.mxu1 }
 0x5de   :  { %v3934_v63 = vadd.f32 %v3933_v25, %v3845_v53  ;;  %4073 = vmatmul.bf16.gmra.mxu2 %v9288_v3 }
 0x5df   :  { %4162 = vmatmul.bf16.gmra.mxu3 %v9329_v10  ;;  %4340 = vmatmul.bf16.gmra.mxu1 %v9330_v54  ;;  %v3936_v27 = vpop.f32.mrf.mxu0  ;;  %v6858_v54 = vld [vmem:[#allocation5 + $0x414] sm:$0xf0] }
 0x5e0   :  { %v8588_v31 = vadd.f32 %v4022_v55, %v3934_v63 }
 0x5e1   :  { %v3758_v50 = vpop.f32.mrf.mxu2 }
 0x5e2   :  { %9331 = vst [vmem:[#allocation65_spill] sm:$0xff] %v8588_v31  ;;  %v3759_v34 = vadd.f32 %v3758_v50, %v8465_v28  ;;  %v3847_v13 = vpop.f32.mrf.mxu3  ;;  %4251 = vmatmul.bf16.gmra.mxu0 %v9332_v21  ;;  %v6399_v31 = vld [vmem:[#allocation5 + $0x400] sm:$0xf] }
 0x5e3   :  { %v6400_v50 = vor.u32 %v6858_v54, %v6399_v31  ;;  %v6183_v54 = vld [vmem:[#allocation5 + $0x250] sm:$0xf]  ;;  %v6804_v31 = vld [vmem:[#allocation5 + $0x264] sm:$0xf0] }
 0x5e4   :  { %v3848_v57 = vadd.f32 %v3847_v13, %v3759_v34  ;;  %v4027_v53 = vpop.f32.mrf.mxu1  ;;  %v9333_v34 = vld [vmem:[#allocation38_spill] sm:$0xff] }
 0x5e5   :  { %4581 = vmatpush.bf16.msrb.mxu0 %v6400_v50  ;;  %v6567_v50 = vld [vmem:[#allocation5 + $0x550] sm:$0xf] }
 0x5e6   :  { %v3937_v25 = vadd.f32 %v3936_v27, %v3848_v57  ;;  %v6184_v57 = vor.u32 %v6804_v31, %v6183_v54  ;;  %v9337_v31 = vld [vmem:[#allocation41_spill] sm:$0xff] }
 0x5e7   :  { %v3938_v58 = vpop.f32.mrf.mxu0 }
 0x5e8   :  { %v8592_v22 = vadd.f32 %v4025_v40, %v3937_v25  ;;  %4493 = vmatpush.bf16.msrb.mxu3 %v6184_v57  ;;  %v6750_v57 = vld [vmem:[#allocation5 + $0xb4] sm:$0xf0] }
 0x5e9   :  { %v3760_v37 = vpop.f32.mrf.mxu2 }
 0x5ea   :  { %v3761_v63 = vadd.f32 %v3760_v37, %v8465_v28  ;;  %v3849_v55 = vpop.f32.mrf.mxu3 }
 0x5ec   :  { %v3850_v10 = vadd.f32 %v3849_v55, %v3761_v63  ;;  %v4030_v3 = vpop.f32.mrf.mxu1 }
 0x5ee   :  { %v3939_v21 = vadd.f32 %v3938_v58, %v3850_v10  ;;  %4078 = vmatmul.bf16.gmra.mxu2 %v7836_v42 }
 0x5ef   :  { %4167 = vmatmul.bf16.gmra.mxu3 %v9293_v45  ;;  %4345 = vmatmul.bf16.gmra.mxu1 %v9333_v34  ;;  %v3941_v27 = vpop.f32.mrf.mxu0 }
 0x5f0   :  { %v8598_v40 = vadd.f32 %v4027_v53, %v3939_v21 }
 0x5f1   :  { %v3763_v13 = vpop.f32.mrf.mxu2 }
 0x5f2   :  { %9334 = vst [vmem:[#allocation66_spill] sm:$0xff] %v8598_v40  ;;  %v3764_v0 = vadd.f32 %v3763_v13, %v8465_v28  ;;  %v3852_v59 = vpop.f32.mrf.mxu3  ;;  %4256 = vmatmul.bf16.gmra.mxu0 %v9335_v9  ;;  %v6900_v40 = vld [vmem:[#allocation5 + $0x564] sm:$0xf0] }
 0x5f3   :  { %v6568_v13 = vor.u32 %v6900_v40, %v6567_v50  ;;  %v5967_v40 = vld [vmem:[#allocation5 + $0xa0] sm:$0xf] }
 0x5f4   :  { %v3853_v25 = vadd.f32 %v3852_v59, %v3764_v0  ;;  %v4032_v10 = vpop.f32.mrf.mxu1 }
 0x5f5   :  { %4671 = vmatpush.bf16.msrb.mxu1 %v6568_v13 }
 0x5f6   :  { %v3942_v58 = vadd.f32 %v3941_v27, %v3853_v25  ;;  %v5968_v25 = vor.u32 %v6750_v57, %v5967_v40  ;;  %v9342_v57 = vld [vmem:[#allocation43_spill] sm:$0xff] }
 0x5f7   :  { %v3943_v37 = vpop.f32.mrf.mxu0 }
 0x5f8   :  { %v8602_v63 = vadd.f32 %v4030_v3, %v3942_v58  ;;  %4405 = vmatpush.bf16.msrb.mxu2 %v5968_v25  ;;  %v6375_v25 = vld [vmem:[#allocation5 + $0x3d0] sm:$0xf] }
 0x5f9   :  { %v3765_v55 = vpop.f32.mrf.mxu2 }
 0x5fa   :  { %v3766_v21 = vadd.f32 %v3765_v55, %v8465_v28  ;;  %v3854_v53 = vpop.f32.mrf.mxu3 }
 0x5fc   :  { %v3855_v34 = vadd.f32 %v3854_v53, %v3766_v21  ;;  %v4035_v45 = vpop.f32.mrf.mxu1 }
 0x5fe   :  { %v3944_v9 = vadd.f32 %v3943_v37, %v3855_v34  ;;  %4083 = vmatmul.bf16.gmra.mxu2 %v7854_v38 }
 0x5ff   :  { %4172 = vmatmul.bf16.gmra.mxu3 %v7849_v1  ;;  %4350 = vmatmul.bf16.gmra.mxu1 %v9244_v33  ;;  %v3946_v27 = vpop.f32.mrf.mxu0  ;;  %v9343_v33 = vld [vmem:[#allocation25_spill] sm:$0xff] }
 0x600   :  { %v8608_v3 = vadd.f32 %v4032_v10, %v3944_v9 }
 0x601   :  { %v3768_v0 = vpop.f32.mrf.mxu2 }
 0x602   :  { %9336 = vst [vmem:[#allocation67_spill] sm:$0xff] %v8608_v3  ;;  %v3769_v59 = vadd.f32 %v3768_v0, %v8465_v28  ;;  %v3857_v54 = vpop.f32.mrf.mxu3  ;;  %4261 = vmatmul.bf16.gmra.mxu0 %v9337_v31  ;;  %v9339_v31 = vld [vmem:[#allocation22_spill] sm:$0xff] }
 0x603   :  { %v9340_v3 = vld [vmem:[#allocation42_spill] sm:$0xff] }
 0x604   :  { %v3858_v58 = vadd.f32 %v3857_v54, %v3769_v59  ;;  %v4037_v34 = vpop.f32.mrf.mxu1 }
 0x606   :  { %v3947_v37 = vadd.f32 %v3946_v27, %v3858_v58  ;;  %v6852_v58 = vld [vmem:[#allocation5 + $0x3e4] sm:$0xf0] }
 0x607   :  { %v3948_v55 = vpop.f32.mrf.mxu0 }
 0x608   :  { %v8612_v21 = vadd.f32 %v4035_v45, %v3947_v37 }
 0x609   :  { %v3770_v53 = vpop.f32.mrf.mxu2 }
 0x60a   :  { %9338 = vst [vmem:[#allocation68_spill] sm:$0xff] %v8612_v21  ;;  %v3771_v9 = vadd.f32 %v3770_v53, %v8465_v28  ;;  %v3859_v10 = vpop.f32.mrf.mxu3 }
 0x60c   :  { %v3860_v50 = vadd.f32 %v3859_v10, %v3771_v9  ;;  %v4040_v13 = vpop.f32.mrf.mxu1 }
 0x60e   :  { %v3949_v0 = vadd.f32 %v3948_v55, %v3860_v50  ;;  %4088 = vmatmul.bf16.gmra.mxu2 %v9299_v20  ;;  %v6376_v55 = vor.u32 %v6852_v58, %v6375_v25 }
 0x60f   :  { %4177 = vmatmul.bf16.gmra.mxu3 %v9339_v31  ;;  %4355 = vmatmul.bf16.gmra.mxu1 %v9340_v3  ;;  %v3951_v59 = vpop.f32.mrf.mxu0  ;;  %v6798_v31 = vld [vmem:[#allocation5 + $0x234] sm:$0xf0] }
 0x610   :  { %v8618_v54 = vadd.f32 %v4037_v34, %v3949_v0  ;;  %4582 = vmatpush.bf16.msrb.mxu0 %v6376_v55  ;;  %v9348_v55 = vld [vmem:[#allocation45_spill] sm:$0xff] }
 0x611   :  { %v3773_v27 = vpop.f32.mrf.mxu2 }
 0x612   :  { %9341 = vst [vmem:[#allocation69_spill] sm:$0xff] %v8618_v54  ;;  %v3774_v45 = vadd.f32 %v3773_v27, %v8465_v28  ;;  %v3862_v40 = vpop.f32.mrf.mxu3  ;;  %4266 = vmatmul.bf16.gmra.mxu0 %v9342_v57  ;;  %v6159_v54 = vld [vmem:[#allocation5 + $0x220] sm:$0xf] }
 0x613   :  { %v6160_v21 = vor.u32 %v6798_v31, %v6159_v54  ;;  %v6543_v31 = vld [vmem:[#allocation5 + $0x520] sm:$0xf]  ;;  %v6894_v54 = vld [vmem:[#allocation5 + $0x534] sm:$0xf0] }
 0x614   :  { %v3863_v37 = vadd.f32 %v3862_v40, %v3774_v45  ;;  %v4042_v53 = vpop.f32.mrf.mxu1  ;;  %v9344_v45 = vld [vmem:[#allocation56_spill] sm:$0xff] }
 0x615   :  { %v8627_v40 = vperm.slane %v9344_v45, 3  ;;  %4494 = vmatpush.bf16.msrb.mxu3 %v6160_v21 }
 0x616   :  { %v3952_v9 = vadd.f32 %v3951_v59, %v3863_v37  ;;  %v9345_v59 = vld [vmem:[#allocation24_spill] sm:$0xff] }
 0x617   :  { %v3953_v10 = vpop.f32.mrf.mxu0 }
 0x618   :  { %v8622_v50 = vadd.f32 %v4040_v13, %v3952_v9  ;;  %v9346_v13 = vld [vmem:[#allocation44_spill] sm:$0xff] }
 0x619   :  { %v3775_v3 = vpop.f32.mrf.mxu2 }
 0x61a   :  { %v3776_v34 = vadd.f32 %v3775_v3, %v8465_v28  ;;  %v3864_v0 = vpop.f32.mrf.mxu3 }
 0x61c   :  { %v3865_v27 = vadd.f32 %v3864_v0, %v3776_v34  ;;  %v4321_v20 = vpop.f32.mrf.mxu1  ;;  %v6544_v34 = vor.u32 %v6894_v54, %v6543_v31 }
 0x61e   :  { %v3954_v57 = vadd.f32 %v3953_v10, %v3865_v27  ;;  %4093 = vmatmul.bf16.gmra.mxu2 %v9343_v33  ;;  %4672 = vmatpush.bf16.msrb.mxu1 %v6544_v34  ;;  %v6846_v34 = vld [vmem:[#allocation5 + $0x3b4] sm:$0xf0] }
 0x61f   :  { %4182 = vmatmul.bf16.gmra.mxu3 %v9345_v59  ;;  %4360 = vmatmul.bf16.gmra.mxu1 %v9346_v13  ;;  %v4232_v25 = vpop.f32.mrf.mxu0 }
 0x620   :  { %v8631_v58 = vadd.f32 %v4042_v53, %v3954_v57 }
 0x621   :  { %v4054_v28 = vpop.f32.mrf.mxu2 }
 0x622   :  { %9347 = vst [vmem:[#allocation70_spill] sm:$0xff] %v8631_v58  ;;  %v4055_v3 = vadd.f32 %v4054_v28, %v8627_v40  ;;  %v4143_v37 = vpop.f32.mrf.mxu3  ;;  %4271 = vmatmul.bf16.gmra.mxu0 %v9348_v55  ;;  %v5943_v28 = vld [vmem:[#allocation5 + $0x70] sm:$0xf]  ;;  %v6744_v58 = vld [vmem:[#allocation5 + $0x84] sm:$0xf0] }
 0x623   :  { %v5944_v59 = vor.u32 %v6744_v58, %v5943_v28 }
 0x624   :  { %v4144_v9 = vadd.f32 %v4143_v37, %v4055_v3  ;;  %v4323_v10 = vpop.f32.mrf.mxu1  ;;  %v7065_v3 = vpop.eup %7064 }
 0x625   :  { %4406 = vmatpush.bf16.msrb.mxu2 %v5944_v59 }
 0x626   :  { %v4233_v0 = vadd.f32 %v4232_v25, %v4144_v9  ;;  %v6351_v9 = vld [vmem:[#allocation5 + $0x3a0] sm:$0xf] }
 0x627   :  { %v4234_v21 = vpop.f32.mrf.mxu0 }
 0x628   :  { %v4322_v27 = vadd.f32 %v4321_v20, %v4233_v0 }
 0x629   :  { %v4056_v45 = vpop.f32.mrf.mxu2 }
 0x62a   :  { %7066 = vtanh.f32 %v4322_v27  ;;  %v4057_v57 = vadd.f32 %v4056_v45, %v8627_v40  ;;  %v4145_v53 = vpop.f32.mrf.mxu3  ;;  %v6352_v27 = vor.u32 %v6846_v34, %v6351_v9  ;;  %v9350_v34 = vld [vmem:[#allocation57_spill] sm:$0xff] }
 0x62b   :  { %7068 = vtanh.f32 %v8478_v2 }
 0x62c   :  { %v4146_v13 = vadd.f32 %v4145_v53, %v4057_v57  ;;  %v4326_v55 = vpop.f32.mrf.mxu1  ;;  %4583 = vmatpush.bf16.msrb.mxu0 %v6352_v27 }
 0x62e   :  { %v4235_v33 = vadd.f32 %v4234_v21, %v4146_v13  ;;  %4098 = vmatmul.bf16.gmra.mxu2 %v7890_v36  ;;  %v9349_v13 = vld [vmem:[#allocation46_spill] sm:$0xff] }
 0x62f   :  { %4187 = vmatmul.bf16.gmra.mxu3 %v7885_v19  ;;  %4365 = vmatmul.bf16.gmra.mxu1 %v8084_v62  ;;  %v4237_v20 = vpop.f32.mrf.mxu0 }
 0x630   :  { %v7067_v52 = vpop.eup %7066  ;;  %v4324_v25 = vadd.f32 %v4323_v10, %v4235_v33 }
 0x631   :  { %v5306_v37 = vpack.c.bf16 %v7067_v52, %v7065_v3  ;;  %v4059_v31 = vpop.f32.mrf.mxu2  ;;  %v7069_v33 = vpop.eup %7068  ;;  %v6135_v52 = vld [vmem:[#allocation5 + $0x1f0] sm:$0xf] }
 0x632   :  { %7070 = vtanh.f32 %v4324_v25  ;;  %v4060_v54 = vadd.f32 %v4059_v31, %v8627_v40  ;;  %v4148_v58 = vpop.f32.mrf.mxu3  ;;  %4276 = vmatmul.bf16.gmra.mxu0 %v9349_v13  ;;  %v6792_v25 = vld [vmem:[#allocation5 + $0x204] sm:$0xf0] }
 0x633   :  { %5402 = vst [vmem:[#allocation7 + $0x8] sm:$0xff] %v5306_v37  ;;  %7072 = vtanh.f32 %v8482_v46 }
 0x634   :  { %v4149_v0 = vadd.f32 %v4148_v58, %v4060_v54  ;;  %v4328_v21 = vpop.f32.mrf.mxu1  ;;  %v6136_v54 = vor.u32 %v6792_v25, %v6135_v52 }
 0x636   :  { %v4238_v45 = vadd.f32 %v4237_v20, %v4149_v0  ;;  %4495 = vmatpush.bf16.msrb.mxu3 %v6136_v54 }
 0x637   :  { %v4239_v59 = vpop.f32.mrf.mxu0 }
 0x638   :  { %v7071_v10 = vpop.eup %7070  ;;  %v4327_v2 = vadd.f32 %v4326_v55, %v4238_v45 }
 0x639   :  { %v5309_v57 = vpack.c.bf16 %v7071_v10, %v7069_v33  ;;  %v4061_v53 = vpop.f32.mrf.mxu2  ;;  %v7073_v58 = vpop.eup %7072  ;;  %v6519_v10 = vld [vmem:[#allocation5 + $0x4f0] sm:$0xf] }
 0x63a   :  { %7074 = vtanh.f32 %v4327_v2  ;;  %v4062_v28 = vadd.f32 %v4061_v53, %v8627_v40  ;;  %v4150_v3 = vpop.f32.mrf.mxu3  ;;  %v6888_v2 = vld [vmem:[#allocation5 + $0x504] sm:$0xf0] }
 0x63b   :  { %5405 = vst [vmem:[#allocation7 + $0x20] sm:$0xff] %v5309_v57  ;;  %7076 = vtanh.f32 %v9350_v34  ;;  %v6738_v34 = vld [vmem:[#allocation5 + $0x54] sm:$0xf0] }
 0x63c   :  { %v4151_v37 = vadd.f32 %v4150_v3, %v4062_v28  ;;  %v4331_v31 = vpop.f32.mrf.mxu1  ;;  %v6520_v28 = vor.u32 %v6888_v2, %v6519_v10  ;;  %v9352_v2 = vld [vmem:[#allocation58_spill] sm:$0xff] }
 0x63e   :  { %v4240_v20 = vadd.f32 %v4239_v59, %v4151_v37  ;;  %4103 = vmatmul.bf16.gmra.mxu2 %v7902_v11  ;;  %v9351_v59 = vld [vmem:[#allocation47_spill] sm:$0xff]  ;;  %4673 = vmatpush.bf16.msrb.mxu1 %v6520_v28 }
 0x63f   :  { %4192 = vmatmul.bf16.gmra.mxu3 %v7897_v48  ;;  %4370 = vmatmul.bf16.gmra.mxu1 %v8096_v43  ;;  %v4242_v46 = vpop.f32.mrf.mxu0 }
 0x640   :  { %v7075_v55 = vpop.eup %7074  ;;  %v4329_v9 = vadd.f32 %v4328_v21, %v4240_v20 }
 0x641   :  { %v5312_v0 = vpack.c.bf16 %v7075_v55, %v7073_v58  ;;  %v4064_v27 = vpop.f32.mrf.mxu2  ;;  %v7077_v52 = vpop.eup %7076 }
 0x642   :  { %7078 = vtanh.f32 %v4329_v9  ;;  %v4065_v45 = vadd.f32 %v4064_v27, %v8627_v40  ;;  %v4153_v33 = vpop.f32.mrf.mxu3  ;;  %4281 = vmatmul.bf16.gmra.mxu0 %v9351_v59  ;;  %v5919_v9 = vld [vmem:[#allocation5 + $0x40] sm:$0xf] }
 0x643   :  { %5408 = vst [vmem:[#allocation7 + $0x38] sm:$0xff] %v5312_v0  ;;  %7080 = vtanh.f32 %v8492_v41 }
 0x644   :  { %v4154_v57 = vadd.f32 %v4153_v33, %v4065_v45  ;;  %v4333_v53 = vpop.f32.mrf.mxu1  ;;  %v5920_v45 = vor.u32 %v6738_v34, %v5919_v9 }
 0x646   :  { %v4243_v3 = vadd.f32 %v4242_v46, %v4154_v57  ;;  %4407 = vmatpush.bf16.msrb.mxu2 %v5920_v45 }
 0x647   :  { %v4244_v21 = vpop.f32.mrf.mxu0 }
 0x648   :  { %v7079_v25 = vpop.eup %7078  ;;  %v4332_v37 = vadd.f32 %v4331_v31, %v4243_v3 }
 0x649   :  { %v5315_v54 = vpack.c.bf16 %v7079_v25, %v7077_v52  ;;  %v4066_v20 = vpop.f32.mrf.mxu2  ;;  %v7081_v33 = vpop.eup %7080  ;;  %v6327_v25 = vld [vmem:[#allocation5 + $0x370] sm:$0xf] }
 0x64a   :  { %7082 = vtanh.f32 %v4332_v37  ;;  %v4067_v58 = vadd.f32 %v4066_v20, %v8627_v40  ;;  %v4155_v55 = vpop.f32.mrf.mxu3  ;;  %v6840_v37 = vld [vmem:[#allocation5 + $0x384] sm:$0xf0] }
 0x64b   :  { %5411 = vst [vmem:[#allocation7 + $0x50] sm:$0xff] %v5315_v54  ;;  %7084 = vtanh.f32 %v9352_v2  ;;  %v6786_v2 = vld [vmem:[#allocation5 + $0x1d4] sm:$0xf0] }
 0x64c   :  { %v4156_v0 = vadd.f32 %v4155_v55, %v4067_v58  ;;  %v4336_v27 = vpop.f32.mrf.mxu1  ;;  %v6328_v58 = vor.u32 %v6840_v37, %v6327_v25  ;;  %v9354_v37 = vld [vmem:[#allocation59_spill] sm:$0xff] }
 0x64e   :  { %v4245_v46 = vadd.f32 %v4244_v21, %v4156_v0  ;;  %4108 = vmatmul.bf16.gmra.mxu2 %v7914_v44  ;;  %v9353_v21 = vld [vmem:[#allocation49_spill] sm:$0xff]  ;;  %4584 = vmatpush.bf16.msrb.mxu0 %v6328_v58 }
 0x64f   :  { %4197 = vmatmul.bf16.gmra.mxu3 %v7909_v7  ;;  %4375 = vmatmul.bf16.gmra.mxu1 %v8108_v35  ;;  %v4247_v41 = vpop.f32.mrf.mxu0 }
 0x650   :  { %v7083_v31 = vpop.eup %7082  ;;  %v4334_v10 = vadd.f32 %v4333_v53, %v4245_v46 }
 0x651   :  { %v5318_v57 = vpack.c.bf16 %v7083_v31, %v7081_v33  ;;  %v4069_v28 = vpop.f32.mrf.mxu2  ;;  %v7085_v53 = vpop.eup %7084 }
 0x652   :  { %7086 = vtanh.f32 %v4334_v10  ;;  %v4070_v3 = vadd.f32 %v4069_v28, %v8627_v40  ;;  %v4158_v52 = vpop.f32.mrf.mxu3  ;;  %4286 = vmatmul.bf16.gmra.mxu0 %v9353_v21  ;;  %v6111_v10 = vld [vmem:[#allocation5 + $0x1c0] sm:$0xf] }
 0x653   :  { %5414 = vst [vmem:[#allocation7 + $0x68] sm:$0xff] %v5318_v57  ;;  %7088 = vtanh.f32 %v8502_v8 }
 0x654   :  { %v4159_v54 = vadd.f32 %v4158_v52, %v4070_v3  ;;  %v4338_v20 = vpop.f32.mrf.mxu1  ;;  %v6112_v3 = vor.u32 %v6786_v2, %v6111_v10 }
 0x656   :  { %v4248_v55 = vadd.f32 %v4247_v41, %v4159_v54  ;;  %4496 = vmatpush.bf16.msrb.mxu3 %v6112_v3 }
 0x657   :  { %v4249_v9 = vpop.f32.mrf.mxu0 }
 0x658   :  { %v7087_v34 = vpop.eup %7086  ;;  %v4337_v0 = vadd.f32 %v4336_v27, %v4248_v55 }
 0x659   :  { %v5321_v45 = vpack.c.bf16 %v7087_v34, %v7085_v53  ;;  %v4071_v46 = vpop.f32.mrf.mxu2  ;;  %v7089_v52 = vpop.eup %7088  ;;  %v6495_v34 = vld [vmem:[#allocation5 + $0x4c0] sm:$0xf] }
 0x65a   :  { %7090 = vtanh.f32 %v4337_v0  ;;  %v4072_v33 = vadd.f32 %v4071_v46, %v8627_v40  ;;  %v4160_v31 = vpop.f32.mrf.mxu3  ;;  %v6882_v0 = vld [vmem:[#allocation5 + $0x4d4] sm:$0xf0] }
 0x65b   :  { %5417 = vst [vmem:[#allocation7 + $0x80] sm:$0xff] %v5321_v45  ;;  %7092 = vtanh.f32 %v9354_v37  ;;  %v6732_v37 = vld [vmem:[#allocation5 + $0x24] sm:$0xf0] }
 0x65c   :  { %v4161_v57 = vadd.f32 %v4160_v31, %v4072_v33  ;;  %v4341_v28 = vpop.f32.mrf.mxu1  ;;  %v6496_v33 = vor.u32 %v6882_v0, %v6495_v34  ;;  %v9356_v34 = vld [vmem:[#allocation27_spill] sm:$0xff] }
 0x65e   :  { %v4250_v41 = vadd.f32 %v4249_v9, %v4161_v57  ;;  %4113 = vmatmul.bf16.gmra.mxu2 %v7926_v32  ;;  %v9355_v9 = vld [vmem:[#allocation50_spill] sm:$0xff]  ;;  %4674 = vmatpush.bf16.msrb.mxu1 %v6496_v33  ;;  %v9358_v33 = vld [vmem:[#allocation60_spill] sm:$0xff] }
 0x65f   :  { %4202 = vmatmul.bf16.gmra.mxu3 %v7921_v51  ;;  %4380 = vmatmul.bf16.gmra.mxu1 %v8120_v4  ;;  %v4252_v8 = vpop.f32.mrf.mxu0 }
 0x660   :  { %v7091_v27 = vpop.eup %7090  ;;  %v4339_v25 = vadd.f32 %v4338_v20, %v4250_v41 }
 0x661   :  { %v5324_v54 = vpack.c.bf16 %v7091_v27, %v7089_v52  ;;  %v4074_v58 = vpop.f32.mrf.mxu2  ;;  %v7093_v10 = vpop.eup %7092 }
 0x662   :  { %7094 = vtanh.f32 %v4339_v25  ;;  %v4075_v55 = vadd.f32 %v4074_v58, %v8627_v40  ;;  %v4163_v53 = vpop.f32.mrf.mxu3  ;;  %4291 = vmatmul.bf16.gmra.mxu0 %v9355_v9  ;;  %v5895_v25 = vld [vmem:[#allocation5 + $0x10] sm:$0xf] }
 0x663   :  { %5420 = vst [vmem:[#allocation7 + $0x98] sm:$0xff] %v5324_v54  ;;  %7096 = vtanh.f32 %v8512_v14 }
 0x664   :  { %v4164_v45 = vadd.f32 %v4163_v53, %v4075_v55  ;;  %v4343_v46 = vpop.f32.mrf.mxu1  ;;  %v5896_v55 = vor.u32 %v6732_v37, %v5895_v25 }
 0x666   :  { %v4253_v31 = vadd.f32 %v4252_v8, %v4164_v45  ;;  %4408 = vmatpush.bf16.msrb.mxu2 %v5896_v55 }
 0x667   :  { %v4254_v20 = vpop.f32.mrf.mxu0 }
 0x668   :  { %v7095_v2 = vpop.eup %7094  ;;  %v4342_v57 = vadd.f32 %v4341_v28, %v4253_v31  ;;  %v9357_v28 = vld [vmem:[#allocation51_spill] sm:$0xff] }
 0x669   :  { %v5327_v3 = vpack.c.bf16 %v7095_v2, %v7093_v10  ;;  %v4076_v41 = vpop.f32.mrf.mxu2  ;;  %v7097_v53 = vpop.eup %7096 }
 0x66a   :  { %7098 = vtanh.f32 %v4342_v57  ;;  %v4077_v52 = vadd.f32 %v4076_v41, %v8627_v40  ;;  %v4165_v27 = vpop.f32.mrf.mxu3  ;;  %v6834_v41 = vld [vmem:[#allocation5 + $0x354] sm:$0xf0] }
 0x66b   :  { %5423 = vst [vmem:[#allocation7 + $0xb0] sm:$0xff] %v5327_v3  ;;  %7100 = vtanh.f32 %v9358_v33  ;;  %v6303_v3 = vld [vmem:[#allocation5 + $0x340] sm:$0xf]  ;;  %v6780_v33 = vld [vmem:[#allocation5 + $0x1a4] sm:$0xf0] }
 0x66c   :  { %v4166_v54 = vadd.f32 %v4165_v27, %v4077_v52  ;;  %v4346_v58 = vpop.f32.mrf.mxu1  ;;  %v6304_v25 = vor.u32 %v6834_v41, %v6303_v3 }
 0x66e   :  { %v4255_v8 = vadd.f32 %v4254_v20, %v4166_v54  ;;  %4118 = vmatmul.bf16.gmra.mxu2 %v7938_v18  ;;  %v9359_v20 = vld [vmem:[#allocation52_spill] sm:$0xff]  ;;  %4585 = vmatpush.bf16.msrb.mxu0 %v6304_v25 }
 0x66f   :  { %4207 = vmatmul.bf16.gmra.mxu3 %v9356_v34  ;;  %4385 = vmatmul.bf16.gmra.mxu1 %v9357_v28  ;;  %v4257_v14 = vpop.f32.mrf.mxu0 }
 0x670   :  { %v7099_v0 = vpop.eup %7098  ;;  %v4344_v45 = vadd.f32 %v4343_v46, %v4255_v8 }
 0x671   :  { %v5330_v31 = vpack.c.bf16 %v7099_v0, %v7097_v53  ;;  %v4079_v10 = vpop.f32.mrf.mxu2  ;;  %v7101_v46 = vpop.eup %7100 }
 0x672   :  { %7102 = vtanh.f32 %v4344_v45  ;;  %v4080_v2 = vadd.f32 %v4079_v10, %v8627_v40  ;;  %v4168_v57 = vpop.f32.mrf.mxu3  ;;  %4296 = vmatmul.bf16.gmra.mxu0 %v9359_v20  ;;  %v6087_v45 = vld [vmem:[#allocation5 + $0x190] sm:$0xf] }
 0x673   :  { %5426 = vst [vmem:[#allocation7 + $0xc8] sm:$0xff] %v5330_v31  ;;  %7104 = vtanh.f32 %v8522_v24  ;;  %v6471_v10 = vld [vmem:[#allocation5 + $0x490] sm:$0xf] }
 0x674   :  { %v4169_v52 = vadd.f32 %v4168_v57, %v4080_v2  ;;  %v4348_v27 = vpop.f32.mrf.mxu1  ;;  %v6088_v2 = vor.u32 %v6780_v33, %v6087_v45  ;;  %v6876_v57 = vld [vmem:[#allocation5 + $0x4a4] sm:$0xf0] }
 0x676   :  { %v4258_v37 = vadd.f32 %v4257_v14, %v4169_v52  ;;  %v6472_v14 = vor.u32 %v6876_v57, %v6471_v10  ;;  %4497 = vmatpush.bf16.msrb.mxu3 %v6088_v2  ;;  %v6828_v52 = vld [vmem:[#allocation5 + $0x324] sm:$0xf0] }
 0x677   :  { %v4259_v54 = vpop.f32.mrf.mxu0 }
 0x678   :  { %v7103_v55 = vpop.eup %7102  ;;  %v4347_v8 = vadd.f32 %v4346_v58, %v4258_v37  ;;  %4675 = vmatpush.bf16.msrb.mxu1 %v6472_v14  ;;  %v6279_v58 = vld [vmem:[#allocation5 + $0x310] sm:$0xf] }
 0x679   :  { %v5333_v53 = vpack.c.bf16 %v7103_v55, %v7101_v46  ;;  %v4081_v0 = vpop.f32.mrf.mxu2  ;;  %v6280_v25 = vor.u32 %v6828_v52, %v6279_v58  ;;  %v7105_v37 = vpop.eup %7104  ;;  %v6771_v52 = vld [vmem:[#allocation5 + $0x164] sm:$0xf] }
 0x67a   :  { %7106 = vtanh.f32 %v4347_v8  ;;  %v4082_v31 = vadd.f32 %v4081_v0, %v8627_v40  ;;  %v4170_v20 = vpop.f32.mrf.mxu3 }
 0x67b   :  { %5429 = vst [vmem:[#allocation7 + $0xe0] sm:$0xff] %v5333_v53  ;;  %4586 = vmatpush.bf16.msrb.mxu0 %v6280_v25  ;;  %7108 = vtanh.f32 %v8528_v16 }
 0x67c   :  { %v4171_v3 = vadd.f32 %v4170_v20, %v4082_v31  ;;  %v4351_v41 = vpop.f32.mrf.mxu1 }
 0x67e   :  { %v4260_v24 = vadd.f32 %v4259_v54, %v4171_v3  ;;  %4123 = vmatmul.bf16.gmra.mxu2 %v7950_v47 }
 0x67f   :  { %4212 = vmatmul.bf16.gmra.mxu3 %v7945_v5  ;;  %4390 = vmatmul.bf16.gmra.mxu1 %v8144_v12  ;;  %v4262_v46 = vpop.f32.mrf.mxu0 }
 0x680   :  { %v7107_v55 = vpop.eup %7106  ;;  %v4349_v8 = vadd.f32 %v4348_v27, %v4260_v24  ;;  %v6065_v24 = vld [vmem:[#allocation5 + $0x178] sm:$0xf0] }
 0x681   :  { %v5336_v20 = vpack.c.bf16 %v7107_v55, %v7105_v37  ;;  %v4084_v53 = vpop.f32.mrf.mxu2  ;;  %v7109_v31 = vpop.eup %7108  ;;  %v6068_v55 = vor.u32 %v6771_v52, %v6065_v24 }
 0x682   :  { %7110 = vtanh.f32 %v4349_v8  ;;  %v4085_v0 = vadd.f32 %v4084_v53, %v8627_v40  ;;  %v4173_v54 = vpop.f32.mrf.mxu3  ;;  %4301 = vmatmul.bf16.gmra.mxu0 %v8149_v6 }
 0x683   :  { %5432 = vst [vmem:[#allocation7 + $0xf8] sm:$0xff] %v5336_v20  ;;  %7112 = vtanh.f32 %v8532_v26  ;;  %4757 = vmatpush.bf16.msra.mxu2 %v6068_v55 }
 0x684   :  { %v4174_v45 = vadd.f32 %v4173_v54, %v4085_v0  ;;  %v4353_v33 = vpop.f32.mrf.mxu1  ;;  %v9361_v0 = vld [vmem:[#allocation61_spill] sm:$0xff] }
 0x686   :  { %v4263_v10 = vadd.f32 %v4262_v46, %v4174_v45 }
 0x687   :  { %v4264_v2 = vpop.f32.mrf.mxu0 }
 0x688   :  { %v7111_v57 = vpop.eup %7110  ;;  %v4352_v14 = vadd.f32 %v4351_v41, %v4263_v10  ;;  %v9360_v41 = vld [vmem:[#allocation54_spill] sm:$0xff] }
 0x689   :  { %v5339_v27 = vpack.c.bf16 %v7111_v57, %v7109_v31  ;;  %v4086_v16 = vpop.f32.mrf.mxu2  ;;  %v7113_v46 = vpop.eup %7112 }
 0x68a   :  { %7114 = vtanh.f32 %v4352_v14  ;;  %v4087_v3 = vadd.f32 %v4086_v16, %v8627_v40  ;;  %v4175_v58 = vpop.f32.mrf.mxu3 }
 0x68b   :  { %5435 = vst [vmem:[#allocation7 + $0x110] sm:$0xff] %v5339_v27  ;;  %7116 = vtanh.f32 %v9361_v0 }
 0x68c   :  { %v4176_v25 = vadd.f32 %v4175_v58, %v4087_v3  ;;  %v4356_v37 = vpop.f32.mrf.mxu1 }
 0x68e   :  { %v4265_v8 = vadd.f32 %v4264_v2, %v4176_v25  ;;  %4128 = vmatmul.bf16.gmra.mxu2 %v7969_v23  ;;  %v9362_v2 = vld [vmem:[#allocation55_spill] sm:$0xff] }
 0x68f   :  { %4217 = vmatmul.bf16.gmra.mxu3 %v7962_v29  ;;  %4395 = vmatmul.bf16.gmra.mxu1 %v9360_v41  ;;  %v4267_v26 = vpop.f32.mrf.mxu0 }
 0x690   :  { %v7115_v20 = vpop.eup %7114  ;;  %v4354_v53 = vadd.f32 %v4353_v33, %v4265_v8  ;;  %v6819_v8 = vld [vmem:[#allocation5 + $0x2e4] sm:$0xf] }
 0x691   :  { %v5342_v54 = vpack.c.bf16 %v7115_v20, %v7113_v46  ;;  %v4089_v45 = vpop.f32.mrf.mxu2  ;;  %v7117_v16 = vpop.eup %7116  ;;  %v6257_v46 = vld [vmem:[#allocation5 + $0x2f8] sm:$0xf0] }
 0x692   :  { %7118 = vtanh.f32 %v4354_v53  ;;  %v4090_v10 = vadd.f32 %v4089_v45, %v8627_v40  ;;  %v4178_v31 = vpop.f32.mrf.mxu3  ;;  %4306 = vmatmul.bf16.gmra.mxu0 %v9362_v2  ;;  %v6260_v0 = vor.u32 %v6819_v8, %v6257_v46 }
 0x693   :  { %5438 = vst [vmem:[#allocation7 + $0x128] sm:$0xff] %v5342_v54  ;;  %7120 = vtanh.f32 %v8542_v61 }
 0x694   :  { %v4179_v57 = vadd.f32 %v4178_v31, %v4090_v10  ;;  %v4358_v14 = vpop.f32.mrf.mxu1  ;;  %4846 = vmatpush.bf16.msra.mxu3 %v6260_v0  ;;  %v9363_v10 = vld [vmem:[#allocation28_spill] sm:$0xff] }
 0x696   :  { %v4268_v27 = vadd.f32 %v4267_v26, %v4179_v57 }
 0x697   :  { %v4269_v3 = vpop.f32.mrf.mxu0 }
 0x698   :  { %v7119_v58 = vpop.eup %7118  ;;  %v4357_v52 = vadd.f32 %v4356_v37, %v4268_v27 }
 0x699   :  { %v5345_v33 = vpack.c.bf16 %v7119_v58, %v7117_v16  ;;  %v4091_v24 = vpop.f32.mrf.mxu2  ;;  %v7121_v26 = vpop.eup %7120  ;;  %v6915_v58 = vld [vmem:[#allocation5 + $0x5e4] sm:$0xf] }
 0x69a   :  { %7122 = vtanh.f32 %v4357_v52  ;;  %v4092_v25 = vadd.f32 %v4091_v24, %v8627_v40  ;;  %v4180_v55 = vpop.f32.mrf.mxu3  ;;  %v6641_v52 = vld [vmem:[#allocation5 + $0x5f8] sm:$0xf0] }
 0x69b   :  { %5441 = vst [vmem:[#allocation7 + $0x140] sm:$0xff] %v5345_v33  ;;  %7124 = vtanh.f32 %v9363_v10  ;;  %v6041_v10 = vld [vmem:[#allocation5 + $0x148] sm:$0xf0] }
 0x69c   :  { %v4181_v20 = vadd.f32 %v4180_v55, %v4092_v25  ;;  %v4361_v53 = vpop.f32.mrf.mxu1  ;;  %v6644_v25 = vor.u32 %v6915_v58, %v6641_v52  ;;  %v9366_v52 = vld [vmem:[#allocation11_spill] sm:$0xff] }
 0x69e   :  { %v4270_v54 = vadd.f32 %v4269_v3, %v4181_v20  ;;  %4409 = vmatmul.bf16.vlgmr.msrb.gmra.mxu2 %v7746_v60  ;;  %v9364_v3 = vld [vmem:[#allocation29_spill] sm:$0xff]  ;;  %5024 = vmatpush.bf16.msra.mxu1 %v6644_v25 }
 0x69f   :  { %4498 = vmatmul.bf16.vlgmr.msrb.gmra.mxu3 %v7741_v56  ;;  %4676 = vmatmul.bf16.vlgmr.msrb.gmra.mxu1 %v9269_v39  ;;  %v4272_v61 = vpop.f32.mrf.mxu0 }
 0x6a0   :  { %v7123_v37 = vpop.eup %7122  ;;  %v4359_v45 = vadd.f32 %v4358_v14, %v4270_v54 }
 0x6a1   :  { %v5348_v31 = vpack.c.bf16 %v7123_v37, %v7121_v26  ;;  %v4094_v57 = vpop.f32.mrf.mxu2  ;;  %v7125_v8 = vpop.eup %7124 }
 0x6a2   :  { %7126 = vtanh.f32 %v4359_v45  ;;  %v4095_v27 = vadd.f32 %v4094_v57, %v8627_v40  ;;  %v4183_v16 = vpop.f32.mrf.mxu3  ;;  %4587 = vmatmul.bf16.vlgmr.msrb.gmra.mxu0 %v9364_v3  ;;  %v6765_v45 = vld [vmem:[#allocation5 + $0x134] sm:$0xf] }
 0x6a3   :  { %5444 = vst [vmem:[#allocation7 + $0x158] sm:$0xff] %v5348_v31  ;;  %7128 = vtanh.f32 %v8552_v49 }
 0x6a4   :  { %v4184_v33 = vadd.f32 %v4183_v16, %v4095_v27  ;;  %v4363_v24 = vpop.f32.mrf.mxu1  ;;  %v6044_v27 = vor.u32 %v6765_v45, %v6041_v10  ;;  %v9365_v16 = vld [vmem:[#allocation12_spill] sm:$0xff] }
 0x6a6   :  { %v4273_v55 = vadd.f32 %v4272_v61, %v4184_v33  ;;  %4758 = vmatpush.bf16.msra.mxu2 %v6044_v27 }
 0x6a7   :  { %v4274_v14 = vpop.f32.mrf.mxu0 }
 0x6a8   :  { %v7127_v46 = vpop.eup %7126  ;;  %v4362_v20 = vadd.f32 %v4361_v53, %v4273_v55  ;;  %v9367_v53 = vld [vmem:[#allocation30_spill] sm:$0xff] }
 0x6a9   :  { %v5351_v0 = vpack.c.bf16 %v7127_v46, %v7125_v8  ;;  %v4096_v54 = vpop.f32.mrf.mxu2  ;;  %v7129_v58 = vpop.eup %7128  ;;  %v9368_v55 = vld [vmem:[#allocation62_spill] sm:$0xff] }
 0x6aa   :  { %7130 = vtanh.f32 %v4362_v20  ;;  %v4097_v26 = vadd.f32 %v4096_v54, %v8627_v40  ;;  %v4185_v37 = vpop.f32.mrf.mxu3  ;;  %v6867_v54 = vld [vmem:[#allocation5 + $0x464] sm:$0xf] }
 0x6ab   :  { %5447 = vst [vmem:[#allocation7 + $0x170] sm:$0xff] %v5351_v0  ;;  %7132 = vtanh.f32 %v9368_v55 }
 0x6ac   :  { %v4186_v31 = vadd.f32 %v4185_v37, %v4097_v26  ;;  %v4366_v57 = vpop.f32.mrf.mxu1  ;;  %v6449_v26 = vld [vmem:[#allocation5 + $0x478] sm:$0xf0] }
 0x6ad   :  { %v8707_v10 = vor.u32 %v6867_v54, %v6449_v26 }
 0x6ae   :  { %v4275_v61 = vadd.f32 %v4274_v14, %v4186_v31  ;;  %4414 = vmatmul.bf16.gmra.mxu2 %v9365_v16  ;;  %v9369_v14 = vld [vmem:[#allocation31_spill] sm:$0xff] }
 0x6af   :  { %4503 = vmatmul.bf16.gmra.mxu3 %v9366_v52  ;;  %4681 = vmatmul.bf16.gmra.mxu1 %v9367_v53  ;;  %v4277_v49 = vpop.f32.mrf.mxu0 }
 0x6b0   :  { %v7131_v33 = vpop.eup %7130  ;;  %v4364_v25 = vadd.f32 %v4363_v24, %v4275_v61  ;;  %4935 = vmatpush.bf16.msra.mxu0 %v8707_v10 }
 0x6b1   :  { %v5354_v8 = vpack.c.bf16 %v7131_v33, %v7129_v58  ;;  %v4099_v46 = vpop.f32.mrf.mxu2  ;;  %v7133_v24 = vpop.eup %7132 }
 0x6b2   :  { %7134 = vtanh.f32 %v4364_v25  ;;  %v4100_v20 = vadd.f32 %v4099_v46, %v8627_v40  ;;  %v4188_v0 = vpop.f32.mrf.mxu3  ;;  %4592 = vmatmul.bf16.gmra.mxu0 %v9369_v14  ;;  %v6813_v46 = vld [vmem:[#allocation5 + $0x2b4] sm:$0xf] }
 0x6b3   :  { %5450 = vst [vmem:[#allocation7 + $0x188] sm:$0xff] %v5354_v8  ;;  %7136 = vtanh.f32 %v8562_v15  ;;  %v9372_v15 = vld [vmem:[#allocation32_spill] sm:$0xff] }
 0x6b4   :  { %v4189_v37 = vadd.f32 %v4188_v0, %v4100_v20  ;;  %v4368_v45 = vpop.f32.mrf.mxu1  ;;  %v6233_v20 = vld [vmem:[#allocation5 + $0x2c8] sm:$0xf0] }
 0x6b6   :  { %v4278_v31 = vadd.f32 %v4277_v49, %v4189_v37  ;;  %v6236_v49 = vor.u32 %v6813_v46, %v6233_v20  ;;  %v9370_v37 = vld [vmem:[#allocation14_spill] sm:$0xff]  ;;  %v6909_v46 = vld [vmem:[#allocation5 + $0x5b4] sm:$0xf]  ;;  %v6617_v20 = vld [vmem:[#allocation5 + $0x5c8] sm:$0xf0] }
 0x6b7   :  { %v4279_v27 = vpop.f32.mrf.mxu0 }
 0x6b8   :  { %v7135_v61 = vpop.eup %7134  ;;  %v4367_v58 = vadd.f32 %v4366_v57, %v4278_v31  ;;  %4847 = vmatpush.bf16.msra.mxu3 %v6236_v49  ;;  %v9371_v57 = vld [vmem:[#allocation13_spill] sm:$0xff] }
 0x6b9   :  { %v5357_v33 = vpack.c.bf16 %v7135_v61, %v7133_v24  ;;  %v4101_v25 = vpop.f32.mrf.mxu2  ;;  %v7137_v14 = vpop.eup %7136 }
 0x6ba   :  { %7138 = vtanh.f32 %v4367_v58  ;;  %v4102_v55 = vadd.f32 %v4101_v25, %v8627_v40  ;;  %v4190_v8 = vpop.f32.mrf.mxu3  ;;  %v9373_v58 = vld [vmem:[#allocation63_spill] sm:$0xff] }
 0x6bb   :  { %5453 = vst [vmem:[#allocation7 + $0x1a0] sm:$0xff] %v5357_v33  ;;  %7140 = vtanh.f32 %v9373_v58 }
 0x6bc   :  { %v4191_v0 = vadd.f32 %v4190_v8, %v4102_v55  ;;  %v4371_v54 = vpop.f32.mrf.mxu1 }
 0x6be   :  { %v4280_v26 = vadd.f32 %v4279_v27, %v4191_v0  ;;  %4419 = vmatmul.bf16.gmra.mxu2 %v9370_v37  ;;  %v9374_v27 = vld [vmem:[#allocation33_spill] sm:$0xff] }
 0x6bf   :  { %4508 = vmatmul.bf16.gmra.mxu3 %v9371_v57  ;;  %4686 = vmatmul.bf16.gmra.mxu1 %v9372_v15  ;;  %v4282_v31 = vpop.f32.mrf.mxu0  ;;  %v6620_v57 = vor.u32 %v6909_v46, %v6617_v20 }
 0x6c0   :  { %v7139_v24 = vpop.eup %7138  ;;  %v4369_v61 = vadd.f32 %v4368_v45, %v4280_v26 }
 0x6c1   :  { %v5360_v33 = vpack.c.bf16 %v7139_v24, %v7137_v14  ;;  %v4104_v25 = vpop.f32.mrf.mxu2  ;;  %5025 = vmatpush.bf16.msra.mxu1 %v6620_v57  ;;  %v7141_v37 = vpop.eup %7140  ;;  %v9375_v57 = vld [vmem:[#allocation16_spill] sm:$0xff] }
 0x6c2   :  { %7142 = vtanh.f32 %v4369_v61  ;;  %v4105_v55 = vadd.f32 %v4104_v25, %v8627_v40  ;;  %v4193_v8 = vpop.f32.mrf.mxu3  ;;  %4597 = vmatmul.bf16.gmra.mxu0 %v9374_v27  ;;  %v6017_v27 = vld [vmem:[#allocation5 + $0x118] sm:$0xf0] }
 0x6c3   :  { %5456 = vst [vmem:[#allocation7 + $0x1b8] sm:$0xff] %v5360_v33  ;;  %7144 = vtanh.f32 %v8572_v17  ;;  %v6759_v33 = vld [vmem:[#allocation5 + $0x104] sm:$0xf] }
 0x6c4   :  { %v4194_v0 = vadd.f32 %v4193_v8, %v4105_v55  ;;  %v4373_v49 = vpop.f32.mrf.mxu1  ;;  %v6020_v46 = vor.u32 %v6759_v33, %v6017_v27 }
 0x6c6   :  { %v4283_v15 = vadd.f32 %v4282_v31, %v4194_v0  ;;  %v9376_v0 = vld [vmem:[#allocation15_spill] sm:$0xff]  ;;  %4759 = vmatpush.bf16.msra.mxu2 %v6020_v46 }
 0x6c7   :  { %v4284_v45 = vpop.f32.mrf.mxu0 }
 0x6c8   :  { %v7143_v26 = vpop.eup %7142  ;;  %v4372_v58 = vadd.f32 %v4371_v54, %v4283_v15  ;;  %v9377_v54 = vld [vmem:[#allocation34_spill] sm:$0xff] }
 0x6c9   :  { %v5363_v14 = vpack.c.bf16 %v7143_v26, %v7141_v37  ;;  %v4106_v24 = vpop.f32.mrf.mxu2  ;;  %v7145_v20 = vpop.eup %7144  ;;  %v9378_v26 = vld [vmem:[#allocation64_spill] sm:$0xff] }
 0x6ca   :  { %7146 = vtanh.f32 %v4372_v58  ;;  %v4107_v61 = vadd.f32 %v4106_v24, %v8627_v40  ;;  %v4195_v25 = vpop.f32.mrf.mxu3 }
 0x6cb   :  { %5459 = vst [vmem:[#allocation7 + $0x1d0] sm:$0xff] %v5363_v14  ;;  %7148 = vtanh.f32 %v9378_v26 }
 0x6cc   :  { %v4196_v55 = vadd.f32 %v4195_v25, %v4107_v61  ;;  %v4376_v8 = vpop.f32.mrf.mxu1  ;;  %v6861_v61 = vld [vmem:[#allocation5 + $0x434] sm:$0xf]  ;;  %v6425_v25 = vld [vmem:[#allocation5 + $0x448] sm:$0xf0] }
 0x6ce   :  { %v4285_v31 = vadd.f32 %v4284_v45, %v4196_v55  ;;  %4424 = vmatmul.bf16.gmra.mxu2 %v9375_v57  ;;  %v9379_v45 = vld [vmem:[#allocation35_spill] sm:$0xff] }
 0x6cf   :  { %4513 = vmatmul.bf16.gmra.mxu3 %v9376_v0  ;;  %4691 = vmatmul.bf16.gmra.mxu1 %v9377_v54  ;;  %v4287_v17 = vpop.f32.mrf.mxu0  ;;  %v8726_v54 = vor.u32 %v6861_v61, %v6425_v25 }
 0x6d0   :  { %v7147_v37 = vpop.eup %7146  ;;  %v4374_v15 = vadd.f32 %v4373_v49, %v4285_v31 }
 0x6d1   :  { %v5366_v58 = vpack.c.bf16 %v7147_v37, %v7145_v20  ;;  %v4109_v14 = vpop.f32.mrf.mxu2  ;;  %4936 = vmatpush.bf16.msra.mxu0 %v8726_v54  ;;  %v7149_v49 = vpop.eup %7148 }
 0x6d2   :  { %7150 = vtanh.f32 %v4374_v15  ;;  %v4110_v24 = vadd.f32 %v4109_v14, %v8627_v40  ;;  %v4198_v27 = vpop.f32.mrf.mxu3  ;;  %4602 = vmatmul.bf16.gmra.mxu0 %v9379_v45  ;;  %v6807_v14 = vld [vmem:[#allocation5 + $0x284] sm:$0xf] }
 0x6d3   :  { %5462 = vst [vmem:[#allocation7 + $0x1e8] sm:$0xff] %v5366_v58  ;;  %7152 = vtanh.f32 %v8582_v30  ;;  %v9382_v30 = vld [vmem:[#allocation36_spill] sm:$0xff] }
 0x6d4   :  { %v4199_v33 = vadd.f32 %v4198_v27, %v4110_v24  ;;  %v4378_v55 = vpop.f32.mrf.mxu1  ;;  %v6209_v24 = vld [vmem:[#allocation5 + $0x298] sm:$0xf0] }
 0x6d6   :  { %v4288_v0 = vadd.f32 %v4287_v17, %v4199_v33  ;;  %v6212_v17 = vor.u32 %v6807_v14, %v6209_v24  ;;  %v9380_v33 = vld [vmem:[#allocation18_spill] sm:$0xff]  ;;  %v6903_v14 = vld [vmem:[#allocation5 + $0x584] sm:$0xf] }
 0x6d7   :  { %v4289_v46 = vpop.f32.mrf.mxu0  ;;  %v6593_v24 = vld [vmem:[#allocation5 + $0x598] sm:$0xf0] }
 0x6d8   :  { %v7151_v31 = vpop.eup %7150  ;;  %v4377_v20 = vadd.f32 %v4376_v8, %v4288_v0  ;;  %4848 = vmatpush.bf16.msra.mxu3 %v6212_v17  ;;  %v9381_v8 = vld [vmem:[#allocation17_spill] sm:$0xff] }
 0x6d9   :  { %v5369_v37 = vpack.c.bf16 %v7151_v31, %v7149_v49  ;;  %v4111_v15 = vpop.f32.mrf.mxu2  ;;  %v7153_v45 = vpop.eup %7152 }
 0x6da   :  { %7154 = vtanh.f32 %v4377_v20  ;;  %v4112_v26 = vadd.f32 %v4111_v15, %v8627_v40  ;;  %v4200_v58 = vpop.f32.mrf.mxu3  ;;  %v9383_v20 = vld [vmem:[#allocation65_spill] sm:$0xff] }
 0x6db   :  { %5465 = vst [vmem:[#allocation7 + $0x200] sm:$0xff] %v5369_v37  ;;  %7156 = vtanh.f32 %v9383_v20 }
 0x6dc   :  { %v4201_v27 = vadd.f32 %v4200_v58, %v4112_v26  ;;  %v4381_v61 = vpop.f32.mrf.mxu1 }
 0x6de   :  { %v4290_v25 = vadd.f32 %v4289_v46, %v4201_v27  ;;  %4429 = vmatmul.bf16.gmra.mxu2 %v9380_v33  ;;  %v9384_v46 = vld [vmem:[#allocation37_spill] sm:$0xff] }
 0x6df   :  { %4518 = vmatmul.bf16.gmra.mxu3 %v9381_v8  ;;  %4696 = vmatmul.bf16.gmra.mxu1 %v9382_v30  ;;  %v4292_v0 = vpop.f32.mrf.mxu0  ;;  %v6596_v8 = vor.u32 %v6903_v14, %v6593_v24  ;;  %v9385_v24 = vld [vmem:[#allocation19_spill] sm:$0xff] }
 0x6e0   :  { %v7155_v49 = vpop.eup %7154  ;;  %v4379_v31 = vadd.f32 %v4378_v55, %v4290_v25 }
 0x6e1   :  { %v5372_v37 = vpack.c.bf16 %v7155_v49, %v7153_v45  ;;  %v4114_v15 = vpop.f32.mrf.mxu2  ;;  %5026 = vmatpush.bf16.msra.mxu1 %v6596_v8  ;;  %v7157_v33 = vpop.eup %7156 }
 0x6e2   :  { %7158 = vtanh.f32 %v4379_v31  ;;  %v4115_v26 = vadd.f32 %v4114_v15, %v8627_v40  ;;  %v4203_v58 = vpop.f32.mrf.mxu3  ;;  %4607 = vmatmul.bf16.gmra.mxu0 %v9384_v46  ;;  %v5993_v46 = vld [vmem:[#allocation5 + $0xe8] sm:$0xf0] }
 0x6e3   :  { %5468 = vst [vmem:[#allocation7 + $0x218] sm:$0xff] %v5372_v37  ;;  %7160 = vtanh.f32 %v8592_v22  ;;  %v6753_v37 = vld [vmem:[#allocation5 + $0xd4] sm:$0xf] }
 0x6e4   :  { %v4204_v27 = vadd.f32 %v4203_v58, %v4115_v26  ;;  %v4383_v17 = vpop.f32.mrf.mxu1  ;;  %v5996_v14 = vor.u32 %v6753_v37, %v5993_v46 }
 0x6e6   :  { %v4293_v30 = vadd.f32 %v4292_v0, %v4204_v27  ;;  %4760 = vmatpush.bf16.msra.mxu2 %v5996_v14  ;;  %v9387_v27 = vld [vmem:[#allocation66_spill] sm:$0xff] }
 0x6e7   :  { %v4294_v55 = vpop.f32.mrf.mxu0 }
 0x6e8   :  { %v7159_v25 = vpop.eup %7158  ;;  %v4382_v20 = vadd.f32 %v4381_v61, %v4293_v30  ;;  %v9386_v61 = vld [vmem:[#allocation38_spill] sm:$0xff] }
 0x6e9   :  { %v5375_v45 = vpack.c.bf16 %v7159_v25, %v7157_v33  ;;  %v4116_v49 = vpop.f32.mrf.mxu2  ;;  %v7161_v8 = vpop.eup %7160 }
 0x6ea   :  { %7162 = vtanh.f32 %v4382_v20  ;;  %v4117_v31 = vadd.f32 %v4116_v49, %v8627_v40  ;;  %v4205_v15 = vpop.f32.mrf.mxu3  ;;  %v6855_v49 = vld [vmem:[#allocation5 + $0x404] sm:$0xf] }
 0x6eb   :  { %5471 = vst [vmem:[#allocation7 + $0x230] sm:$0xff] %v5375_v45  ;;  %7164 = vtanh.f32 %v9387_v27 }
 0x6ec   :  { %v4206_v26 = vadd.f32 %v4205_v15, %v4117_v31  ;;  %v4386_v58 = vpop.f32.mrf.mxu1  ;;  %v6401_v31 = vld [vmem:[#allocation5 + $0x418] sm:$0xf0] }
 0x6ee   :  { %v4295_v0 = vadd.f32 %v4294_v55, %v4206_v26  ;;  %4434 = vmatmul.bf16.gmra.mxu2 %v7836_v42  ;;  %v9388_v55 = vld [vmem:[#allocation39_spill] sm:$0xff]  ;;  %v8745_v26 = vor.u32 %v6855_v49, %v6401_v31 }
 0x6ef   :  { %4523 = vmatmul.bf16.gmra.mxu3 %v9385_v24  ;;  %4701 = vmatmul.bf16.gmra.mxu1 %v9386_v61  ;;  %v4297_v22 = vpop.f32.mrf.mxu0 }
 0x6f0   :  { %v7163_v33 = vpop.eup %7162  ;;  %v4384_v30 = vadd.f32 %v4383_v17, %v4295_v0  ;;  %4937 = vmatpush.bf16.msra.mxu0 %v8745_v26 }
 0x6f1   :  { %v5378_v25 = vpack.c.bf16 %v7163_v33, %v7161_v8  ;;  %v4119_v20 = vpop.f32.mrf.mxu2  ;;  %v7165_v17 = vpop.eup %7164 }
 0x6f2   :  { %7166 = vtanh.f32 %v4384_v30  ;;  %v4120_v45 = vadd.f32 %v4119_v20, %v8627_v40  ;;  %v4208_v46 = vpop.f32.mrf.mxu3  ;;  %4612 = vmatmul.bf16.gmra.mxu0 %v9388_v55  ;;  %v6801_v20 = vld [vmem:[#allocation5 + $0x254] sm:$0xf]  ;;  %v6545_v55 = vld [vmem:[#allocation5 + $0x538] sm:$0xf0] }
 0x6f3   :  { %5474 = vst [vmem:[#allocation7 + $0x248] sm:$0xff] %v5378_v25  ;;  %7168 = vtanh.f32 %v8602_v63  ;;  %v9389_v63 = vld [vmem:[#allocation40_spill] sm:$0xff] }
 0x6f4   :  { %v4209_v15 = vadd.f32 %v4208_v46, %v4120_v45  ;;  %v4388_v37 = vpop.f32.mrf.mxu1  ;;  %v6185_v45 = vld [vmem:[#allocation5 + $0x268] sm:$0xf0] }
 0x6f6   :  { %v4298_v61 = vadd.f32 %v4297_v22, %v4209_v15  ;;  %v6188_v22 = vor.u32 %v6801_v20, %v6185_v45  ;;  %v6569_v20 = vld [vmem:[#allocation5 + $0x568] sm:$0xf0] }
 0x6f7   :  { %v4299_v14 = vpop.f32.mrf.mxu0 }
 0x6f8   :  { %v7167_v0 = vpop.eup %7166  ;;  %v4387_v8 = vadd.f32 %v4386_v58, %v4298_v61  ;;  %4849 = vmatpush.bf16.msra.mxu3 %v6188_v22 }
 0x6f9   :  { %v5381_v33 = vpack.c.bf16 %v7167_v0, %v7165_v17  ;;  %v4121_v30 = vpop.f32.mrf.mxu2  ;;  %v7169_v15 = vpop.eup %7168  ;;  %v9390_v0 = vld [vmem:[#allocation67_spill] sm:$0xff] }
 0x6fa   :  { %7170 = vtanh.f32 %v4387_v8  ;;  %v4122_v27 = vadd.f32 %v4121_v30, %v8627_v40  ;;  %v4210_v25 = vpop.f32.mrf.mxu3 }
 0x6fb   :  { %5477 = vst [vmem:[#allocation7 + $0x260] sm:$0xff] %v5381_v33  ;;  %7172 = vtanh.f32 %v9390_v0 }
 0x6fc   :  { %v4211_v46 = vadd.f32 %v4210_v25, %v4122_v27  ;;  %v4391_v49 = vpop.f32.mrf.mxu1  ;;  %v6897_v25 = vld [vmem:[#allocation5 + $0x554] sm:$0xf] }
 0x6fd   :  { %v6572_v22 = vor.u32 %v6897_v25, %v6569_v20  ;;  %v6377_v20 = vld [vmem:[#allocation5 + $0x3e8] sm:$0xf0] }
 0x6fe   :  { %v4300_v31 = vadd.f32 %v4299_v14, %v4211_v46  ;;  %4439 = vmatmul.bf16.gmra.mxu2 %v7854_v38  ;;  %v9391_v14 = vld [vmem:[#allocation41_spill] sm:$0xff]  ;;  %v5969_v38 = vld [vmem:[#allocation5 + $0xb8] sm:$0xf0] }
 0x6ff   :  { %4528 = vmatmul.bf16.gmra.mxu3 %v7849_v1  ;;  %4706 = vmatmul.bf16.gmra.mxu1 %v9389_v63  ;;  %v4302_v58 = vpop.f32.mrf.mxu0 }
 0x700   :  { %v7171_v61 = vpop.eup %7170  ;;  %v4389_v17 = vadd.f32 %v4388_v37, %v4300_v31  ;;  %5027 = vmatpush.bf16.msra.mxu1 %v6572_v22 }
 0x701   :  { %v5384_v8 = vpack.c.bf16 %v7171_v61, %v7169_v15  ;;  %v4124_v33 = vpop.f32.mrf.mxu2  ;;  %v7173_v1 = vpop.eup %7172  ;;  %v9392_v15 = vld [vmem:[#allocation68_spill] sm:$0xff] }
 0x702   :  { %7174 = vtanh.f32 %v4389_v17  ;;  %v4125_v30 = vadd.f32 %v4124_v33, %v8627_v40  ;;  %v4213_v27 = vpop.f32.mrf.mxu3  ;;  %4617 = vmatmul.bf16.gmra.mxu0 %v9391_v14 }
 0x703   :  { %5480 = vst [vmem:[#allocation7 + $0x278] sm:$0xff] %v5384_v8  ;;  %7176 = vtanh.f32 %v9392_v15  ;;  %v6747_v8 = vld [vmem:[#allocation5 + $0xa4] sm:$0xf] }
 0x704   :  { %v4214_v45 = vadd.f32 %v4213_v27, %v4125_v30  ;;  %v4393_v46 = vpop.f32.mrf.mxu1  ;;  %v5972_v25 = vor.u32 %v6747_v8, %v5969_v38  ;;  %v9397_v8 = vld [vmem:[#allocation43_spill] sm:$0xff] }
 0x706   :  { %v4303_v63 = vadd.f32 %v4302_v58, %v4214_v45  ;;  %v6849_v58 = vld [vmem:[#allocation5 + $0x3d4] sm:$0xf]  ;;  %4761 = vmatpush.bf16.msra.mxu2 %v5972_v25 }
 0x707   :  { %v4304_v37 = vpop.f32.mrf.mxu0  ;;  %v8758_v45 = vor.u32 %v6849_v58, %v6377_v20  ;;  %v6161_v58 = vld [vmem:[#allocation5 + $0x238] sm:$0xf0] }
 0x708   :  { %v7175_v31 = vpop.eup %7174  ;;  %v4392_v0 = vadd.f32 %v4391_v49, %v4303_v63  ;;  %v9393_v49 = vld [vmem:[#allocation23_spill] sm:$0xff] }
 0x709   :  { %v5387_v61 = vpack.c.bf16 %v7175_v31, %v7173_v1  ;;  %v4126_v17 = vpop.f32.mrf.mxu2  ;;  %v7177_v63 = vpop.eup %7176  ;;  %v9394_v1 = vld [vmem:[#allocation22_spill] sm:$0xff]  ;;  %4938 = vmatpush.bf16.msra.mxu0 %v8758_v45 }
 0x70a   :  { %7178 = vtanh.f32 %v4392_v0  ;;  %v4127_v33 = vadd.f32 %v4126_v17, %v8627_v40  ;;  %v4215_v14 = vpop.f32.mrf.mxu3  ;;  %v9395_v31 = vld [vmem:[#allocation42_spill] sm:$0xff] }
 0x70b   :  { %5483 = vst [vmem:[#allocation7 + $0x290] sm:$0xff] %v5387_v61 }
 0x70c   :  { %v4216_v30 = vadd.f32 %v4215_v14, %v4127_v33  ;;  %v4396_v27 = vpop.f32.mrf.mxu1  ;;  %v9396_v14 = vld [vmem:[#allocation69_spill] sm:$0xff] }
 0x70d   :  { %7180 = vtanh.f32 %v9396_v14 }
 0x70e   :  { %v4305_v22 = vadd.f32 %v4304_v37, %v4216_v30  ;;  %4444 = vmatmul.bf16.gmra.mxu2 %v9393_v49  ;;  %v6795_v30 = vld [vmem:[#allocation5 + $0x224] sm:$0xf] }
 0x70f   :  { %4533 = vmatmul.bf16.gmra.mxu3 %v9394_v1  ;;  %4711 = vmatmul.bf16.gmra.mxu1 %v9395_v31  ;;  %v4307_v0 = vpop.f32.mrf.mxu0  ;;  %v6164_v20 = vor.u32 %v6795_v30, %v6161_v58  ;;  %v9401_v30 = vld [vmem:[#allocation44_spill] sm:$0xff] }
 0x710   :  { %v7179_v15 = vpop.eup %7178  ;;  %v4394_v61 = vadd.f32 %v4393_v46, %v4305_v22 }
 0x711   :  { %v5390_v38 = vpack.c.bf16 %v7179_v15, %v7177_v63  ;;  %v4129_v17 = vpop.f32.mrf.mxu2  ;;  %4850 = vmatpush.bf16.msra.mxu3 %v6164_v20  ;;  %v9402_v20 = vld [vmem:[#allocation70_spill] sm:$0xff] }
 0x712   :  { %7182 = vtanh.f32 %v4394_v61  ;;  %v4130_v37 = vadd.f32 %v4129_v17, %v8627_v40  ;;  %v4218_v33 = vpop.f32.mrf.mxu3  ;;  %4622 = vmatmul.bf16.gmra.mxu0 %v9397_v8  ;;  %v6891_v8 = vld [vmem:[#allocation5 + $0x524] sm:$0xf] }
 0x713   :  { %5486 = vst [vmem:[#allocation7 + $0x2a8] sm:$0xff] %v5390_v38  ;;  %v7181_v25 = vpop.eup %7180  ;;  %7184 = vtanh.f32 %v8622_v50  ;;  %v6548_v38 = vor.u32 %v6891_v8, %v6545_v55  ;;  %v8773_v50 = vld [vmem:[%s9061_s6] sm:$0x3f]  ;;  %s7407_s6 = smov [#allocation7]  }
 0x714   :  { %v4219_v31 = vadd.f32 %v4218_v33, %v4130_v37  ;;  %v4398_v1 = vpop.f32.mrf.mxu1  ;;  %9399 = vst [vmem:[#allocation71_spill] sm:$0xff] %v8773_v50  ;;  %s5501_s15 = sshll.u32 %s7407_s6, 4  ;;  %s5502_s15 = int_to_ptr.vmem [resolvable:$true] %s5501_s15 }
 0x715   :  { %5028 = vmatpush.bf16.msra.mxu1 %v6548_v38 }
 0x716   :  { %v4308_v46 = vadd.f32 %v4307_v0, %v4219_v31  ;;  %v9398_v0 = vld [vmem:[#allocation25_spill] sm:$0xff] }
 0x717   :  { %v4309_v22 = vpop.f32.mrf.mxu0 }
 0x718   :  { %v7183_v49 = vpop.eup %7182  ;;  %v4397_v14 = vadd.f32 %v4396_v27, %v4308_v46  ;;  %v8776_v27 = vperm.slane %v8773_v50, 4  ;;  %v6843_v50 = vld [vmem:[#allocation5 + $0x3a4] sm:$0xf] }
 0x719   :  { %v5393_v63 = vpack.c.bf16 %v7183_v49, %v7181_v25  ;;  %v4131_v15 = vpop.f32.mrf.mxu2  ;;  %v9400_v49 = vld [vmem:[#allocation24_spill] sm:$0xff] }
 0x71a   :  { %7186 = vtanh.f32 %v4397_v14  ;;  %v4132_v61 = vadd.f32 %v4131_v15, %v8627_v40  ;;  %v4220_v17 = vpop.f32.mrf.mxu3  ;;  %v7185_v40 = vpop.eup %7184  ;;  %v6741_v15 = vld [vmem:[#allocation5 + $0x74] sm:$0xf] }
 0x71b   :  { %5489 = vst [vmem:[#allocation7 + $0x2c0] sm:$0xff] %v5393_v63  ;;  %7188 = vtanh.f32 %v9402_v20  ;;  %v9403_v63 = vld [vmem:[#allocation45_spill] sm:$0xff] }
 0x71c   :  { %v4221_v37 = vadd.f32 %v4220_v17, %v4132_v61  ;;  %v4677_v33 = vpop.f32.mrf.mxu1  ;;  %v5945_v61 = vld [vmem:[#allocation5 + $0x88] sm:$0xf0] }
 0x71d   :  { %v5948_v17 = vor.u32 %v6741_v15, %v5945_v61 }
 0x71e   :  { %v4310_v31 = vadd.f32 %v4309_v22, %v4221_v37  ;;  %4449 = vmatmul.bf16.gmra.mxu2 %v9398_v0 }
 0x71f   :  { %4538 = vmatmul.bf16.gmra.mxu3 %v9400_v49  ;;  %4716 = vmatmul.bf16.gmra.mxu1 %v9401_v30  ;;  %v4588_v55 = vpop.f32.mrf.mxu0 }
 0x720   :  { %v7187_v8 = vpop.eup %7186  ;;  %v4399_v58 = vadd.f32 %v4398_v1, %v4310_v31  ;;  %4762 = vmatpush.bf16.msra.mxu2 %v5948_v17 }
 0x721   :  { %v5396_v46 = vpack.c.bf16 %v7187_v8, %v7185_v40  ;;  %v4410_v25 = vpop.f32.mrf.mxu2  ;;  %v7189_v49 = vpop.eup %7188 }
 0x722   :  { %7190 = vtanh.f32 %v4399_v58  ;;  %v4411_v22 = vadd.f32 %v4410_v25, %v8776_v27  ;;  %v4499_v14 = vpop.f32.mrf.mxu3  ;;  %4627 = vmatmul.bf16.gmra.mxu0 %v9403_v63  ;;  %v6353_v63 = vld [vmem:[#allocation5 + $0x3b8] sm:$0xf0] }
 0x723   :  { %5492 = vst [vmem:[#allocation7 + $0x2d8] sm:$0xff] %v5396_v46  ;;  %v8786_v0 = vor.u32 %v6843_v50, %v6353_v63  ;;  %v6789_v50 = vld [vmem:[#allocation5 + $0x1f4] sm:$0xf]  ;;  %v6137_v63 = vld [vmem:[#allocation5 + $0x208] sm:$0xf0] }
 0x724   :  { %v4500_v38 = vadd.f32 %v4499_v14, %v4411_v22  ;;  %v4679_v37 = vpop.f32.mrf.mxu1  ;;  %v6140_v61 = vor.u32 %v6789_v50, %v6137_v63  ;;  %v6735_v63 = vld [vmem:[#allocation5 + $0x44] sm:$0xf] }
 0x725   :  { %4939 = vmatpush.bf16.msra.mxu0 %v8786_v0 }
 0x726   :  { %v4589_v30 = vadd.f32 %v4588_v55, %v4500_v38  ;;  %4851 = vmatpush.bf16.msra.mxu3 %v6140_v61  ;;  %v5921_v61 = vld [vmem:[#allocation5 + $0x58] sm:$0xf0] }
 0x727   :  { %v4590_v1 = vpop.f32.mrf.mxu0 }
 0x728   :  { %v7191_v31 = vpop.eup %7190  ;;  %v8783_v20 = vadd.f32 %v4677_v33, %v4589_v30 }
 0x729   :  { %v5399_v40 = vpack.c.bf16 %v7191_v31, %v7189_v49  ;;  %v4412_v8 = vpop.f32.mrf.mxu2 }
 0x72a   :  { %v4413_v58 = vadd.f32 %v4412_v8, %v8776_v27  ;;  %v4501_v25 = vpop.f32.mrf.mxu3  ;;  %7192 = vtanh.f32 %v8783_v20 }
 0x72b   :  { %5495 = vst [vmem:[#allocation7 + $0x2f0] sm:$0xff] %v5399_v40 }
 0x72c   :  { %v4502_v46 = vadd.f32 %v4501_v25, %v4413_v58  ;;  %v4682_v22 = vpop.f32.mrf.mxu1  ;;  %v6885_v25 = vld [vmem:[#allocation5 + $0x4f4] sm:$0xf] }
 0x72e   :  { %v4591_v55 = vadd.f32 %v4590_v1, %v4502_v46  ;;  %4454 = vmatmul.bf16.gmra.mxu2 %v7890_v36  ;;  %v6521_v46 = vld [vmem:[#allocation5 + $0x508] sm:$0xf0] }
 0x72f   :  { %4543 = vmatmul.bf16.gmra.mxu3 %v7885_v19  ;;  %4721 = vmatmul.bf16.gmra.mxu1 %v8084_v62  ;;  %v4593_v33 = vpop.f32.mrf.mxu0 }
 0x730   :  { %v8792_v49 = vadd.f32 %v4679_v37, %v4591_v55  ;;  %v6524_v55 = vor.u32 %v6885_v25, %v6521_v46  ;;  %v6837_v46 = vld [vmem:[#allocation5 + $0x374] sm:$0xf] }
 0x731   :  { %v4415_v30 = vpop.f32.mrf.mxu2 }
 0x732   :  { %9404 = vst [vmem:[#allocation53_spill] sm:$0xff] %v8792_v49  ;;  %v4416_v14 = vadd.f32 %v4415_v30, %v8776_v27  ;;  %v4504_v15 = vpop.f32.mrf.mxu3  ;;  %4632 = vmatmul.bf16.gmra.mxu0 %v9349_v13  ;;  %5029 = vmatpush.bf16.msra.mxu1 %v6524_v55  ;;  %v6329_v55 = vld [vmem:[#allocation5 + $0x388] sm:$0xf0] }
 0x734   :  { %v4505_v17 = vadd.f32 %v4504_v15, %v4416_v14  ;;  %v4684_v38 = vpop.f32.mrf.mxu1 }
 0x736   :  { %v4594_v1 = vadd.f32 %v4593_v33, %v4505_v17  ;;  %v5924_v17 = vor.u32 %v6735_v63, %v5921_v61 }
 0x737   :  { %v4595_v31 = vpop.f32.mrf.mxu0 }
 0x738   :  { %v8796_v40 = vadd.f32 %v4682_v22, %v4594_v1  ;;  %4763 = vmatpush.bf16.msra.mxu2 %v5924_v17  ;;  %v6783_v17 = vld [vmem:[#allocation5 + $0x1c4] sm:$0xf] }
 0x739   :  { %v4417_v8 = vpop.f32.mrf.mxu2 }
 0x73a   :  { %v4418_v37 = vadd.f32 %v4417_v8, %v8776_v27  ;;  %v4506_v58 = vpop.f32.mrf.mxu3 }
 0x73c   :  { %v4507_v30 = vadd.f32 %v4506_v58, %v4418_v37  ;;  %v4687_v49 = vpop.f32.mrf.mxu1 }
 0x73e   :  { %v4596_v13 = vadd.f32 %v4595_v31, %v4507_v30  ;;  %4459 = vmatmul.bf16.gmra.mxu2 %v7902_v11  ;;  %v8809_v30 = vor.u32 %v6837_v46, %v6329_v55 }
 0x73f   :  { %4548 = vmatmul.bf16.gmra.mxu3 %v7897_v48  ;;  %4726 = vmatmul.bf16.gmra.mxu1 %v8096_v43  ;;  %v4598_v33 = vpop.f32.mrf.mxu0 }
 0x740   :  { %v8802_v22 = vadd.f32 %v4684_v38, %v4596_v13  ;;  %4940 = vmatpush.bf16.msra.mxu0 %v8809_v30 }
 0x741   :  { %v4420_v14 = vpop.f32.mrf.mxu2 }
 0x742   :  { %v4421_v15 = vadd.f32 %v4420_v14, %v8776_v27  ;;  %v4509_v50 = vpop.f32.mrf.mxu3  ;;  %4637 = vmatmul.bf16.gmra.mxu0 %v9351_v59 }
 0x744   :  { %v4510_v1 = vadd.f32 %v4509_v50, %v4421_v15  ;;  %v4689_v31 = vpop.f32.mrf.mxu1 }
 0x746   :  { %v4599_v8 = vadd.f32 %v4598_v33, %v4510_v1  ;;  %v6113_v1 = vld [vmem:[#allocation5 + $0x1d8] sm:$0xf0] }
 0x747   :  { %v4600_v37 = vpop.f32.mrf.mxu0 }
 0x748   :  { %v8806_v58 = vadd.f32 %v4687_v49, %v4599_v8  ;;  %v6116_v8 = vor.u32 %v6783_v17, %v6113_v1  ;;  %v5897_v1 = vld [vmem:[#allocation5 + $0x28] sm:$0xf0] }
 0x749   :  { %v4422_v25 = vpop.f32.mrf.mxu2 }
 0x74a   :  { %v4423_v13 = vadd.f32 %v4422_v25, %v8776_v27  ;;  %v4511_v38 = vpop.f32.mrf.mxu3  ;;  %4852 = vmatpush.bf16.msra.mxu3 %v6116_v8 }
 0x74c   :  { %v4512_v14 = vadd.f32 %v4511_v38, %v4423_v13  ;;  %v4692_v59 = vpop.f32.mrf.mxu1 }
 0x74e   :  { %v4601_v63 = vadd.f32 %v4600_v37, %v4512_v14  ;;  %4464 = vmatmul.bf16.gmra.mxu2 %v7914_v44 }
 0x74f   :  { %4553 = vmatmul.bf16.gmra.mxu3 %v7909_v7  ;;  %4731 = vmatmul.bf16.gmra.mxu1 %v8108_v35  ;;  %v4603_v49 = vpop.f32.mrf.mxu0 }
 0x750   :  { %v8815_v33 = vadd.f32 %v4689_v31, %v4601_v63  ;;  %v6879_v63 = vld [vmem:[#allocation5 + $0x4c4] sm:$0xf] }
 0x751   :  { %v4425_v15 = vpop.f32.mrf.mxu2 }
 0x752   :  { %9405 = vst [vmem:[#allocation56_spill] sm:$0xff] %v8815_v33  ;;  %v4426_v50 = vadd.f32 %v4425_v15, %v8776_v27  ;;  %v4514_v61 = vpop.f32.mrf.mxu3  ;;  %4642 = vmatmul.bf16.gmra.mxu0 %v9353_v21  ;;  %v6497_v33 = vld [vmem:[#allocation5 + $0x4d8] sm:$0xf0] }
 0x753   :  { %v6500_v15 = vor.u32 %v6879_v63, %v6497_v33  ;;  %v6729_v33 = vld [vmem:[#allocation5 + $0x14] sm:$0xf]  ;;  %v6305_v63 = vld [vmem:[#allocation5 + $0x358] sm:$0xf0] }
 0x754   :  { %v4515_v25 = vadd.f32 %v4514_v61, %v4426_v50  ;;  %v4694_v37 = vpop.f32.mrf.mxu1  ;;  %v5900_v8 = vor.u32 %v6729_v33, %v5897_v1  ;;  %v9406_v1 = vld [vmem:[#allocation52_spill] sm:$0xff] }
 0x755   :  { %5030 = vmatpush.bf16.msra.mxu1 %v6500_v15 }
 0x756   :  { %v4604_v13 = vadd.f32 %v4603_v49, %v4515_v25  ;;  %4764 = vmatpush.bf16.msra.mxu2 %v5900_v8  ;;  %v6777_v8 = vld [vmem:[#allocation5 + $0x194] sm:$0xf] }
 0x757   :  { %v4605_v38 = vpop.f32.mrf.mxu0 }
 0x758   :  { %v8819_v46 = vadd.f32 %v4692_v59, %v4604_v13 }
 0x759   :  { %v4427_v55 = vpop.f32.mrf.mxu2 }
 0x75a   :  { %v4428_v31 = vadd.f32 %v4427_v55, %v8776_v27  ;;  %v4516_v14 = vpop.f32.mrf.mxu3  ;;  %6921 = vmatpush.bf16.msrb.mxu2 %v8707_v10 }
 0x75c   :  { %v4517_v35 = vadd.f32 %v4516_v14, %v4428_v31  ;;  %v4697_v7 = vpop.f32.mrf.mxu1  ;;  %v6831_v14 = vld [vmem:[#allocation5 + $0x344] sm:$0xf] }
 0x75d   :  { %v6308_v15 = vor.u32 %v6831_v14, %v6305_v63  ;;  %v6873_v14 = vld [vmem:[#allocation5 + $0x494] sm:$0xf]  ;;  %v6473_v63 = vld [vmem:[#allocation5 + $0x4a8] sm:$0xf0] }
 0x75e   :  { %v4606_v21 = vadd.f32 %v4605_v38, %v4517_v35  ;;  %4469 = vmatmul.bf16.gmra.mxu2 %v7926_v32 }
 0x75f   :  { %4558 = vmatmul.bf16.gmra.mxu3 %v7921_v51  ;;  %4736 = vmatmul.bf16.gmra.mxu1 %v8120_v4  ;;  %v4608_v49 = vpop.f32.mrf.mxu0 }
 0x760   :  { %v8825_v59 = vadd.f32 %v4694_v37, %v4606_v21  ;;  %6922 = vmatpush.bf16.msrb.mxu2 %v8726_v54  ;;  %4941 = vmatpush.bf16.msra.mxu0 %v6308_v15 }
 0x761   :  { %v4430_v50 = vpop.f32.mrf.mxu2 }
 0x762   :  { %v4431_v61 = vadd.f32 %v4430_v50, %v8776_v27  ;;  %v4519_v17 = vpop.f32.mrf.mxu3  ;;  %4647 = vmatmul.bf16.gmra.mxu0 %v9355_v9 }
 0x764   :  { %v4520_v25 = vadd.f32 %v4519_v17, %v4431_v61  ;;  %v4699_v35 = vpop.f32.mrf.mxu1  ;;  %6923 = vmatpush.bf16.msrb.mxu2 %v8745_v26 }
 0x766   :  { %v4609_v13 = vadd.f32 %v4608_v49, %v4520_v25  ;;  %v6089_v25 = vld [vmem:[#allocation5 + $0x1a8] sm:$0xf0] }
 0x767   :  { %v4610_v38 = vpop.f32.mrf.mxu0 }
 0x768   :  { %v8830_v55 = vadd.f32 %v4697_v7, %v4609_v13  ;;  %v6092_v13 = vor.u32 %v6777_v8, %v6089_v25  ;;  %6924 = vmatpush.bf16.msrb.mxu2 %v8758_v45  ;;  %v6825_v45 = vld [vmem:[#allocation5 + $0x314] sm:$0xf] }
 0x769   :  { %v4432_v21 = vpop.f32.mrf.mxu2 }
 0x76a   :  { %v4433_v37 = vadd.f32 %v4432_v21, %v8776_v27  ;;  %v4521_v31 = vpop.f32.mrf.mxu3  ;;  %4853 = vmatpush.bf16.msra.mxu3 %v6092_v13 }
 0x76c   :  { %v4522_v50 = vadd.f32 %v4521_v31, %v4433_v37  ;;  %v4702_v33 = vpop.f32.mrf.mxu1  ;;  %6925 = vmatpush.bf16.msrb.mxu2 %v8786_v0 }
 0x76e   :  { %v4611_v61 = vadd.f32 %v4610_v38, %v4522_v50  ;;  %4474 = vmatmul.bf16.gmra.mxu2 %v7938_v18 }
 0x76f   :  { %4563 = vmatmul.bf16.gmra.mxu3 %v9356_v34  ;;  %4741 = vmatmul.bf16.gmra.mxu1 %v9357_v28  ;;  %v4613_v7 = vpop.f32.mrf.mxu0 }
 0x770   :  { %v8837_v10 = vadd.f32 %v4699_v35, %v4611_v61  ;;  %6926 = vmatpush.bf16.msrb.mxu2 %v8809_v30 }
 0x771   :  { %v4435_v49 = vpop.f32.mrf.mxu2 }
 0x772   :  { %v4436_v17 = vadd.f32 %v4435_v49, %v8776_v27  ;;  %v4524_v54 = vpop.f32.mrf.mxu3  ;;  %4652 = vmatmul.bf16.gmra.mxu0 %v9406_v1  ;;  %v6476_v49 = vor.u32 %v6873_v14, %v6473_v63 }
 0x774   :  { %v4525_v38 = vadd.f32 %v4524_v54, %v4436_v17  ;;  %v4704_v21 = vpop.f32.mrf.mxu1  ;;  %5031 = vmatpush.bf16.msra.mxu1 %v6476_v49  ;;  %v6281_v17 = vld [vmem:[#allocation5 + $0x328] sm:$0xf0]  ;;  %6927 = vmatpush.bf16.msrb.mxu2 %v6308_v15 }
 0x776   :  { %v4614_v37 = vadd.f32 %v4613_v7, %v4525_v38 }
 0x777   :  { %v4615_v31 = vpop.f32.mrf.mxu0 }
 0x778   :  { %v8843_v35 = vadd.f32 %v4702_v33, %v4614_v37  ;;  %v6284_v33 = vor.u32 %v6825_v45, %v6281_v17 }
 0x779   :  { %v4437_v26 = vpop.f32.mrf.mxu2 }
 0x77a   :  { %v4438_v50 = vadd.f32 %v4437_v26, %v8776_v27  ;;  %v4526_v61 = vpop.f32.mrf.mxu3  ;;  %4942 = vmatpush.bf16.msra.mxu0 %v6284_v33  ;;  %6928 = vmatpush.bf16.msrb.mxu2 %v6284_v33 }
 0x77c   :  { %v4527_v1 = vadd.f32 %v4526_v61, %v4438_v50  ;;  %v4707_v8 = vpop.f32.mrf.mxu1 }
 0x77e   :  { %v4616_v7 = vadd.f32 %v4615_v31, %v4527_v1  ;;  %4479 = vmatmul.bf16.gmra.mxu2 %v7950_v47 }
 0x77f   :  { %4568 = vmatmul.bf16.gmra.mxu3 %v7945_v5  ;;  %4746 = vmatmul.bf16.gmra.mxu1 %v8144_v12  ;;  %v4618_v0 = vpop.f32.mrf.mxu0 }
 0x780   :  { %v8851_v54 = vadd.f32 %v4704_v21, %v4616_v7 }
 0x781   :  { %v4440_v25 = vpop.f32.mrf.mxu2 }
 0x782   :  { %v4441_v13 = vadd.f32 %v4440_v25, %v8776_v27  ;;  %v4529_v38 = vpop.f32.mrf.mxu3  ;;  %4657 = vmatmul.bf16.gmra.mxu0 %v8149_v6 }
 0x784   :  { %v4530_v30 = vadd.f32 %v4529_v38, %v4441_v13  ;;  %v4709_v1 = vpop.f32.mrf.mxu1 }
 0x786   :  { %v4619_v37 = vadd.f32 %v4618_v0, %v4530_v30 }
 0x787   :  { %v4620_v31 = vpop.f32.mrf.mxu0 }
 0x788   :  { %v8855_v26 = vadd.f32 %v4707_v8, %v4619_v37 }
 0x789   :  { %v4442_v14 = vpop.f32.mrf.mxu2 }
 0x78a   :  { %v4443_v63 = vadd.f32 %v4442_v14, %v8776_v27  ;;  %v4531_v21 = vpop.f32.mrf.mxu3 }
 0x78c   :  { %v4532_v50 = vadd.f32 %v4531_v21, %v4443_v63  ;;  %v4712_v61 = vpop.f32.mrf.mxu1 }
 0x78e   :  { %v4621_v15 = vadd.f32 %v4620_v31, %v4532_v50  ;;  %4484 = vmatmul.bf16.gmra.mxu2 %v7969_v23 }
 0x78f   :  { %4573 = vmatmul.bf16.gmra.mxu3 %v7962_v29  ;;  %4751 = vmatmul.bf16.gmra.mxu1 %v9360_v41  ;;  %v4623_v49 = vpop.f32.mrf.mxu0 }
 0x790   :  { %v8861_v45 = vadd.f32 %v4709_v1, %v4621_v15 }
 0x791   :  { %v4445_v17 = vpop.f32.mrf.mxu2 }
 0x792   :  { %v4446_v8 = vadd.f32 %v4445_v17, %v8776_v27  ;;  %v4534_v7 = vpop.f32.mrf.mxu3  ;;  %4662 = vmatmul.bf16.gmra.mxu0 %v9362_v2 }
 0x794   :  { %v4535_v33 = vadd.f32 %v4534_v7, %v4446_v8  ;;  %v4714_v0 = vpop.f32.mrf.mxu1 }
 0x796   :  { %v4624_v25 = vadd.f32 %v4623_v49, %v4535_v33 }
 0x797   :  { %v4625_v13 = vpop.f32.mrf.mxu0 }
 0x798   :  { %v8865_v38 = vadd.f32 %v4712_v61, %v4624_v25 }
 0x799   :  { %v4447_v30 = vpop.f32.mrf.mxu2 }
 0x79a   :  { %v4448_v37 = vadd.f32 %v4447_v30, %v8776_v27  ;;  %v4536_v31 = vpop.f32.mrf.mxu3 }
 0x79c   :  { %v4537_v14 = vadd.f32 %v4536_v31, %v4448_v37  ;;  %v4717_v63 = vpop.f32.mrf.mxu1 }
 0x79e   :  { %v4626_v1 = vadd.f32 %v4625_v13, %v4537_v14  ;;  %4765 = vmatmul.bf16.vlgmr.msra.gmra.mxu2 %v7746_v60 }
 0x79f   :  { %4854 = vmatmul.bf16.vlgmr.msra.gmra.mxu3 %v7741_v56  ;;  %5032 = vmatmul.bf16.vlgmr.msra.gmra.mxu1 %v9269_v39  ;;  %v4628_v21 = vpop.f32.mrf.mxu0 }
 0x7a0   :  { %v8871_v50 = vadd.f32 %v4714_v0, %v4626_v1  ;;  %v9407_v1 = vld [vmem:[#allocation31_spill] sm:$0xff] }
 0x7a1   :  { %v4450_v15 = vpop.f32.mrf.mxu2 }
 0x7a2   :  { %v4451_v61 = vadd.f32 %v4450_v15, %v8776_v27  ;;  %v4539_v49 = vpop.f32.mrf.mxu3  ;;  %4943 = vmatmul.bf16.vlgmr.msra.gmra.mxu0 %v9364_v3 }
 0x7a4   :  { %v4540_v17 = vadd.f32 %v4539_v49, %v4451_v61  ;;  %v4719_v8 = vpop.f32.mrf.mxu1 }
 0x7a6   :  { %v4629_v7 = vadd.f32 %v4628_v21, %v4540_v17 }
 0x7a7   :  { %v4630_v33 = vpop.f32.mrf.mxu0 }
 0x7a8   :  { %v8875_v25 = vadd.f32 %v4717_v63, %v4629_v7 }
 0x7a9   :  { %v4452_v60 = vpop.f32.mrf.mxu2 }
 0x7aa   :  { %v4453_v56 = vadd.f32 %v4452_v60, %v8776_v27  ;;  %v4541_v13 = vpop.f32.mrf.mxu3  ;;  %v9408_v60 = vld [vmem:[#allocation14_spill] sm:$0xff] }
 0x7ac   :  { %v4542_v39 = vadd.f32 %v4541_v13, %v4453_v56  ;;  %v4722_v30 = vpop.f32.mrf.mxu1  ;;  %v9409_v56 = vld [vmem:[#allocation13_spill] sm:$0xff]  ;;  %v9410_v13 = vld [vmem:[#allocation32_spill] sm:$0xff] }
 0x7ae   :  { %v4631_v0 = vadd.f32 %v4630_v33, %v4542_v39  ;;  %4770 = vmatmul.bf16.gmra.mxu2 %v9365_v16 }
 0x7af   :  { %4859 = vmatmul.bf16.gmra.mxu3 %v9366_v52  ;;  %5037 = vmatmul.bf16.gmra.mxu1 %v9367_v53  ;;  %v4633_v3 = vpop.f32.mrf.mxu0 }
 0x7b0   :  { %v8881_v37 = vadd.f32 %v4719_v8, %v4631_v0 }
 0x7b1   :  { %v4455_v31 = vpop.f32.mrf.mxu2 }
 0x7b2   :  { %v4456_v14 = vadd.f32 %v4455_v31, %v8776_v27  ;;  %v4544_v63 = vpop.f32.mrf.mxu3  ;;  %4948 = vmatmul.bf16.gmra.mxu0 %v9407_v1 }
 0x7b4   :  { %v4545_v21 = vadd.f32 %v4544_v63, %v4456_v14  ;;  %v4724_v15 = vpop.f32.mrf.mxu1  ;;  %v9411_v14 = vld [vmem:[#allocation33_spill] sm:$0xff] }
 0x7b6   :  { %v4634_v61 = vadd.f32 %v4633_v3, %v4545_v21 }
 0x7b7   :  { %v4635_v49 = vpop.f32.mrf.mxu0 }
 0x7b8   :  { %v8885_v17 = vadd.f32 %v4722_v30, %v4634_v61 }
 0x7b9   :  { %v4457_v16 = vpop.f32.mrf.mxu2 }
 0x7ba   :  { %v4458_v52 = vadd.f32 %v4457_v16, %v8776_v27  ;;  %v4546_v7 = vpop.f32.mrf.mxu3 }
 0x7bc   :  { %v4547_v53 = vadd.f32 %v4546_v7, %v4458_v52  ;;  %v4727_v33 = vpop.f32.mrf.mxu1 }
 0x7be   :  { %v4636_v8 = vadd.f32 %v4635_v49, %v4547_v53  ;;  %4775 = vmatmul.bf16.gmra.mxu2 %v9408_v60 }
 0x7bf   :  { %4864 = vmatmul.bf16.gmra.mxu3 %v9409_v56  ;;  %5042 = vmatmul.bf16.gmra.mxu1 %v9410_v13  ;;  %v4638_v39 = vpop.f32.mrf.mxu0  ;;  %v9413_v56 = vld [vmem:[#allocation34_spill] sm:$0xff] }
 0x7c0   :  { %v8891_v0 = vadd.f32 %v4724_v15, %v4636_v8  ;;  %v9412_v8 = vld [vmem:[#allocation15_spill] sm:$0xff] }
 0x7c1   :  { %v4460_v3 = vpop.f32.mrf.mxu2 }
 0x7c2   :  { %v4461_v30 = vadd.f32 %v4460_v3, %v8776_v27  ;;  %v4549_v31 = vpop.f32.mrf.mxu3  ;;  %4953 = vmatmul.bf16.gmra.mxu0 %v9411_v14 }
 0x7c4   :  { %v4550_v63 = vadd.f32 %v4549_v31, %v4461_v30  ;;  %v4729_v1 = vpop.f32.mrf.mxu1  ;;  %v9414_v31 = vld [vmem:[#allocation35_spill] sm:$0xff] }
 0x7c6   :  { %v4639_v21 = vadd.f32 %v4638_v39, %v4550_v63 }
 0x7c7   :  { %v4640_v61 = vpop.f32.mrf.mxu0 }
 0x7c8   :  { %v8895_v49 = vadd.f32 %v4727_v33, %v4639_v21 }
 0x7c9   :  { %v4462_v16 = vpop.f32.mrf.mxu2 }
 0x7ca   :  { %v4463_v52 = vadd.f32 %v4462_v16, %v8776_v27  ;;  %v4551_v7 = vpop.f32.mrf.mxu3 }
 0x7cc   :  { %v4552_v53 = vadd.f32 %v4551_v7, %v4463_v52  ;;  %v4732_v60 = vpop.f32.mrf.mxu1 }
 0x7ce   :  { %v4641_v15 = vadd.f32 %v4640_v61, %v4552_v53  ;;  %4780 = vmatmul.bf16.gmra.mxu2 %v9375_v57 }
 0x7cf   :  { %4869 = vmatmul.bf16.gmra.mxu3 %v9412_v8  ;;  %5047 = vmatmul.bf16.gmra.mxu1 %v9413_v56  ;;  %v4643_v13 = vpop.f32.mrf.mxu0  ;;  %v9417_v56 = vld [vmem:[#allocation17_spill] sm:$0xff] }
 0x7d0   :  { %v8901_v3 = vadd.f32 %v4729_v1, %v4641_v15  ;;  %v9416_v15 = vld [vmem:[#allocation18_spill] sm:$0xff] }
 0x7d1   :  { %v4465_v39 = vpop.f32.mrf.mxu2 }
 0x7d2   :  { %v4466_v33 = vadd.f32 %v4465_v39, %v8776_v27  ;;  %v4554_v30 = vpop.f32.mrf.mxu3  ;;  %4958 = vmatmul.bf16.gmra.mxu0 %v9414_v31  ;;  %v9418_v39 = vld [vmem:[#allocation36_spill] sm:$0xff] }
 0x7d4   :  { %v4555_v14 = vadd.f32 %v4554_v30, %v4466_v33  ;;  %v4734_v63 = vpop.f32.mrf.mxu1 }
 0x7d6   :  { %v4644_v21 = vadd.f32 %v4643_v13, %v4555_v14  ;;  %v9419_v14 = vld [vmem:[#allocation37_spill] sm:$0xff] }
 0x7d7   :  { %v4645_v16 = vpop.f32.mrf.mxu0 }
 0x7d8   :  { %v8905_v61 = vadd.f32 %v4732_v60, %v4644_v21 }
 0x7d9   :  { %v4467_v57 = vpop.f32.mrf.mxu2 }
 0x7da   :  { %9415 = vst [vmem:[#allocation57_spill] sm:$0xff] %v8905_v61  ;;  %v4468_v52 = vadd.f32 %v4467_v57, %v8776_v27  ;;  %v4556_v7 = vpop.f32.mrf.mxu3 }
 0x7dc   :  { %v4557_v53 = vadd.f32 %v4556_v7, %v4468_v52  ;;  %v4737_v8 = vpop.f32.mrf.mxu1 }
 0x7de   :  { %v4646_v1 = vadd.f32 %v4645_v16, %v4557_v53  ;;  %4785 = vmatmul.bf16.gmra.mxu2 %v9416_v15 }
 0x7df   :  { %4874 = vmatmul.bf16.gmra.mxu3 %v9417_v56  ;;  %5052 = vmatmul.bf16.gmra.mxu1 %v9418_v39  ;;  %v4648_v31 = vpop.f32.mrf.mxu0 }
 0x7e0   :  { %v8911_v33 = vadd.f32 %v4734_v63, %v4646_v1  ;;  %v9421_v1 = vld [vmem:[#allocation38_spill] sm:$0xff] }
 0x7e1   :  { %v4470_v13 = vpop.f32.mrf.mxu2 }
 0x7e2   :  { %v4471_v60 = vadd.f32 %v4470_v13, %v8776_v27  ;;  %v4559_v30 = vpop.f32.mrf.mxu3  ;;  %4963 = vmatmul.bf16.gmra.mxu0 %v9419_v14  ;;  %v9423_v14 = vld [vmem:[#allocation39_spill] sm:$0xff] }
 0x7e4   :  { %v4560_v21 = vadd.f32 %v4559_v30, %v4471_v60  ;;  %v4739_v57 = vpop.f32.mrf.mxu1 }
 0x7e6   :  { %v4649_v52 = vadd.f32 %v4648_v31, %v4560_v21 }
 0x7e7   :  { %v4650_v7 = vpop.f32.mrf.mxu0 }
 0x7e8   :  { %v8915_v16 = vadd.f32 %v4737_v8, %v4649_v52 }
 0x7e9   :  { %v4472_v53 = vpop.f32.mrf.mxu2 }
 0x7ea   :  { %9420 = vst [vmem:[#allocation58_spill] sm:$0xff] %v8915_v16  ;;  %v4473_v15 = vadd.f32 %v4472_v53, %v8776_v27  ;;  %v4561_v56 = vpop.f32.mrf.mxu3  ;;  %v9438_v16 = vld [vmem:[#allocation24_spill] sm:$0xff] }
 0x7ec   :  { %v4562_v39 = vadd.f32 %v4561_v56, %v4473_v15  ;;  %v4742_v61 = vpop.f32.mrf.mxu1 }
 0x7ee   :  { %v4651_v63 = vadd.f32 %v4650_v7, %v4562_v39  ;;  %4790 = vmatmul.bf16.gmra.mxu2 %v7836_v42 }
 0x7ef   :  { %4879 = vmatmul.bf16.gmra.mxu3 %v9385_v24  ;;  %5057 = vmatmul.bf16.gmra.mxu1 %v9421_v1  ;;  %v4653_v13 = vpop.f32.mrf.mxu0 }
 0x7f0   :  { %v8921_v60 = vadd.f32 %v4739_v57, %v4651_v63  ;;  %v9425_v63 = vld [vmem:[#allocation21_spill] sm:$0xff] }
 0x7f1   :  { %v4475_v31 = vpop.f32.mrf.mxu2 }
 0x7f2   :  { %9422 = vst [vmem:[#allocation59_spill] sm:$0xff] %v8921_v60  ;;  %v4476_v8 = vadd.f32 %v4475_v31, %v8776_v27  ;;  %v4564_v30 = vpop.f32.mrf.mxu3  ;;  %4968 = vmatmul.bf16.gmra.mxu0 %v9423_v14  ;;  %v9426_v60 = vld [vmem:[#allocation20_spill] sm:$0xff] }
 0x7f3   :  { %v9427_v31 = vld [vmem:[#allocation40_spill] sm:$0xff] }
 0x7f4   :  { %v4565_v21 = vadd.f32 %v4564_v30, %v4476_v8  ;;  %v4744_v52 = vpop.f32.mrf.mxu1 }
 0x7f6   :  { %v4654_v53 = vadd.f32 %v4653_v13, %v4565_v21  ;;  %v9429_v21 = vld [vmem:[#allocation41_spill] sm:$0xff] }
 0x7f7   :  { %v4655_v15 = vpop.f32.mrf.mxu0 }
 0x7f8   :  { %v8925_v7 = vadd.f32 %v4742_v61, %v4654_v53 }
 0x7f9   :  { %v4477_v42 = vpop.f32.mrf.mxu2 }
 0x7fa   :  { %9424 = vst [vmem:[#allocation50_spill] sm:$0xff] %v8925_v7  ;;  %v4478_v24 = vadd.f32 %v4477_v42, %v8776_v27  ;;  %v4566_v56 = vpop.f32.mrf.mxu3 }
 0x7fc   :  { %v4567_v39 = vadd.f32 %v4566_v56, %v4478_v24  ;;  %v4747_v1 = vpop.f32.mrf.mxu1 }
 0x7fe   :  { %v4656_v57 = vadd.f32 %v4655_v15, %v4567_v39  ;;  %4795 = vmatmul.bf16.gmra.mxu2 %v9425_v63 }
 0x7ff   :  { %4884 = vmatmul.bf16.gmra.mxu3 %v9426_v60  ;;  %5062 = vmatmul.bf16.gmra.mxu1 %v9427_v31  ;;  %v4658_v14 = vpop.f32.mrf.mxu0 }
 0x800   :  { %v8931_v8 = vadd.f32 %v4744_v52, %v4656_v57  ;;  %v9431_v57 = vld [vmem:[#allocation23_spill] sm:$0xff] }
 0x801   :  { %v4480_v13 = vpop.f32.mrf.mxu2 }
 0x802   :  { %9428 = vst [vmem:[#allocation27_spill] sm:$0xff] %v8931_v8  ;;  %v4481_v61 = vadd.f32 %v4480_v13, %v8776_v27  ;;  %v4569_v30 = vpop.f32.mrf.mxu3  ;;  %4973 = vmatmul.bf16.gmra.mxu0 %v9429_v21  ;;  %v9432_v8 = vld [vmem:[#allocation22_spill] sm:$0xff] }
 0x803   :  { %v9433_v13 = vld [vmem:[#allocation42_spill] sm:$0xff] }
 0x804   :  { %v4570_v53 = vadd.f32 %v4569_v30, %v4481_v61  ;;  %v4749_v42 = vpop.f32.mrf.mxu1 }
 0x806   :  { %v4659_v24 = vadd.f32 %v4658_v14, %v4570_v53  ;;  %v9435_v53 = vld [vmem:[#allocation43_spill] sm:$0xff] }
 0x807   :  { %v4660_v56 = vpop.f32.mrf.mxu0 }
 0x808   :  { %v8935_v15 = vadd.f32 %v4747_v1, %v4659_v24 }
 0x809   :  { %v4482_v39 = vpop.f32.mrf.mxu2 }
 0x80a   :  { %9430 = vst [vmem:[#allocation51_spill] sm:$0xff] %v8935_v15  ;;  %v4483_v60 = vadd.f32 %v4482_v39, %v8776_v27  ;;  %v4571_v63 = vpop.f32.mrf.mxu3 }
 0x80c   :  { %v4572_v31 = vadd.f32 %v4571_v63, %v4483_v60  ;;  %v4752_v7 = vpop.f32.mrf.mxu1 }
 0x80e   :  { %v4661_v52 = vadd.f32 %v4660_v56, %v4572_v31  ;;  %4800 = vmatmul.bf16.gmra.mxu2 %v9431_v57 }
 0x80f   :  { %4889 = vmatmul.bf16.gmra.mxu3 %v9432_v8  ;;  %5067 = vmatmul.bf16.gmra.mxu1 %v9433_v13  ;;  %v4663_v21 = vpop.f32.mrf.mxu0 }
 0x810   :  { %v8941_v61 = vadd.f32 %v4749_v42, %v4661_v52  ;;  %v9436_v52 = vld [vmem:[#allocation25_spill] sm:$0xff] }
 0x811   :  { %v4485_v14 = vpop.f32.mrf.mxu2 }
 0x812   :  { %9434 = vst [vmem:[#allocation60_spill] sm:$0xff] %v8941_v61  ;;  %v4486_v1 = vadd.f32 %v4485_v14, %v8776_v27  ;;  %v4574_v30 = vpop.f32.mrf.mxu3  ;;  %4978 = vmatmul.bf16.gmra.mxu0 %v9435_v53  ;;  %v9437_v61 = vld [vmem:[#allocation71_spill] sm:$0xff] }
 0x813   :  { %v8950_v14 = vperm.slane %v9437_v61, 5 }
 0x814   :  { %v4575_v24 = vadd.f32 %v4574_v30, %v4486_v1  ;;  %v4754_v39 = vpop.f32.mrf.mxu1  ;;  %v9439_v1 = vld [vmem:[#allocation44_spill] sm:$0xff] }
 0x816   :  { %v4664_v60 = vadd.f32 %v4663_v21, %v4575_v24  ;;  %v9440_v24 = vld [vmem:[#allocation45_spill] sm:$0xff] }
 0x817   :  { %v4665_v63 = vpop.f32.mrf.mxu0 }
 0x818   :  { %v8945_v56 = vadd.f32 %v4752_v7, %v4664_v60 }
 0x819   :  { %v4487_v31 = vpop.f32.mrf.mxu2 }
 0x81a   :  { %v4488_v8 = vadd.f32 %v4487_v31, %v8776_v27  ;;  %v4576_v57 = vpop.f32.mrf.mxu3 }
 0x81c   :  { %v4577_v13 = vadd.f32 %v4576_v57, %v4488_v8  ;;  %v5033_v15 = vpop.f32.mrf.mxu1 }
 0x81e   :  { %v4666_v42 = vadd.f32 %v4665_v63, %v4577_v13  ;;  %4805 = vmatmul.bf16.gmra.mxu2 %v9436_v52 }
 0x81f   :  { %4894 = vmatmul.bf16.gmra.mxu3 %v9438_v16  ;;  %5072 = vmatmul.bf16.gmra.mxu1 %v9439_v1  ;;  %v4944_v21 = vpop.f32.mrf.mxu0  ;;  %v7193_v1 = vpop.eup %7192 }
 0x820   :  { %v8954_v30 = vadd.f32 %v4754_v39, %v4666_v42 }
 0x821   :  { %v4766_v7 = vpop.f32.mrf.mxu2 }
 0x822   :  { %v4767_v53 = vadd.f32 %v4766_v7, %v8950_v14  ;;  %v4855_v27 = vpop.f32.mrf.mxu3  ;;  %4983 = vmatmul.bf16.gmra.mxu0 %v9440_v24 }
 0x824   :  { %v4856_v60 = vadd.f32 %v4855_v27, %v4767_v53  ;;  %v5035_v63 = vpop.f32.mrf.mxu1  ;;  %v9441_v53 = vld [vmem:[#allocation53_spill] sm:$0xff] }
 0x826   :  { %v4945_v31 = vadd.f32 %v4944_v21, %v4856_v60 }
 0x827   :  { %v4946_v8 = vpop.f32.mrf.mxu0 }
 0x828   :  { %v5034_v57 = vadd.f32 %v5033_v15, %v4945_v31  ;;  %v9442_v31 = vld [vmem:[#allocation46_spill] sm:$0xff] }
 0x829   :  { %v4768_v61 = vpop.f32.mrf.mxu2 }
 0x82a   :  { %7194 = vtanh.f32 %v5034_v57  ;;  %v4769_v16 = vadd.f32 %v4768_v61, %v8950_v14  ;;  %v4857_v13 = vpop.f32.mrf.mxu3 }
 0x82b   :  { %7196 = vtanh.f32 %v9441_v53 }
 0x82c   :  { %v4858_v39 = vadd.f32 %v4857_v13, %v4769_v16  ;;  %v5038_v42 = vpop.f32.mrf.mxu1 }
 0x82e   :  { %v4947_v52 = vadd.f32 %v4946_v8, %v4858_v39  ;;  %4810 = vmatmul.bf16.gmra.mxu2 %v7890_v36 }
 0x82f   :  { %4899 = vmatmul.bf16.gmra.mxu3 %v7885_v19  ;;  %5077 = vmatmul.bf16.gmra.mxu1 %v8084_v62  ;;  %v4949_v21 = vpop.f32.mrf.mxu0 }
 0x830   :  { %v7195_v7 = vpop.eup %7194  ;;  %v5036_v15 = vadd.f32 %v5035_v63, %v4947_v52 }
 0x831   :  { %v5307_v20 = vpack.c.bf16 %v7195_v7, %v7193_v1  ;;  %v4771_v27 = vpop.f32.mrf.mxu2  ;;  %v7197_v19 = vpop.eup %7196 }
 0x832   :  { %7198 = vtanh.f32 %v5036_v15  ;;  %v4772_v24 = vadd.f32 %v4771_v27, %v8950_v14  ;;  %v4860_v60 = vpop.f32.mrf.mxu3  ;;  %4988 = vmatmul.bf16.gmra.mxu0 %v9442_v31  ;;  %v9443_v31 = vld [vmem:[#allocation47_spill] sm:$0xff] }
 0x833   :  { %5403 = vst [vmem:[#allocation7 + $0x10] sm:$0xff] %v5307_v20  ;;  %7200 = vtanh.f32 %v8796_v40 }
 0x834   :  { %v4861_v36 = vadd.f32 %v4860_v60, %v4772_v24  ;;  %v5040_v8 = vpop.f32.mrf.mxu1 }
 0x836   :  { %v4950_v57 = vadd.f32 %v4949_v21, %v4861_v36 }
 0x837   :  { %v4951_v61 = vpop.f32.mrf.mxu0 }
 0x838   :  { %v7199_v62 = vpop.eup %7198  ;;  %v5039_v16 = vadd.f32 %v5038_v42, %v4950_v57 }
 0x839   :  { %v5310_v63 = vpack.c.bf16 %v7199_v62, %v7197_v19  ;;  %v4773_v13 = vpop.f32.mrf.mxu2  ;;  %v7201_v53 = vpop.eup %7200 }
 0x83a   :  { %7202 = vtanh.f32 %v5039_v16  ;;  %v4774_v39 = vadd.f32 %v4773_v13, %v8950_v14  ;;  %v4862_v52 = vpop.f32.mrf.mxu3 }
 0x83b   :  { %5406 = vst [vmem:[#allocation7 + $0x28] sm:$0xff] %v5310_v63  ;;  %7204 = vtanh.f32 %v8802_v22 }
 0x83c   :  { %v4863_v1 = vadd.f32 %v4862_v52, %v4774_v39  ;;  %v5043_v7 = vpop.f32.mrf.mxu1 }
 0x83e   :  { %v4952_v15 = vadd.f32 %v4951_v61, %v4863_v1  ;;  %4815 = vmatmul.bf16.gmra.mxu2 %v7902_v11  ;;  %v9444_v1 = vld [vmem:[#allocation26_spill] sm:$0xff] }
 0x83f   :  { %4904 = vmatmul.bf16.gmra.mxu3 %v7897_v48  ;;  %5082 = vmatmul.bf16.gmra.mxu1 %v8096_v43  ;;  %v4954_v42 = vpop.f32.mrf.mxu0 }
 0x840   :  { %v7203_v21 = vpop.eup %7202  ;;  %v5041_v40 = vadd.f32 %v5040_v8, %v4952_v15  ;;  %v9445_v15 = vld [vmem:[#allocation48_spill] sm:$0xff] }
 0x841   :  { %v5313_v20 = vpack.c.bf16 %v7203_v21, %v7201_v53  ;;  %v4776_v27 = vpop.f32.mrf.mxu2  ;;  %v7205_v48 = vpop.eup %7204 }
 0x842   :  { %7206 = vtanh.f32 %v5041_v40  ;;  %v4777_v24 = vadd.f32 %v4776_v27, %v8950_v14  ;;  %v4865_v60 = vpop.f32.mrf.mxu3  ;;  %4993 = vmatmul.bf16.gmra.mxu0 %v9443_v31 }
 0x843   :  { %5409 = vst [vmem:[#allocation7 + $0x40] sm:$0xff] %v5313_v20  ;;  %7208 = vtanh.f32 %v8806_v58 }
 0x844   :  { %v4866_v11 = vadd.f32 %v4865_v60, %v4777_v24  ;;  %v5045_v36 = vpop.f32.mrf.mxu1  ;;  %v9447_v24 = vld [vmem:[#allocation49_spill] sm:$0xff] }
 0x846   :  { %v4955_v57 = vadd.f32 %v4954_v42, %v4866_v11  ;;  %v9446_v42 = vld [vmem:[#allocation56_spill] sm:$0xff] }
 0x847   :  { %v4956_v19 = vpop.f32.mrf.mxu0 }
 0x848   :  { %v7207_v43 = vpop.eup %7206  ;;  %v5044_v61 = vadd.f32 %v5043_v7, %v4955_v57 }
 0x849   :  { %v5316_v8 = vpack.c.bf16 %v7207_v43, %v7205_v48  ;;  %v4778_v22 = vpop.f32.mrf.mxu2  ;;  %v7209_v52 = vpop.eup %7208 }
 0x84a   :  { %7210 = vtanh.f32 %v5044_v61  ;;  %v4779_v62 = vadd.f32 %v4778_v22, %v8950_v14  ;;  %v4867_v16 = vpop.f32.mrf.mxu3 }
 0x84b   :  { %5412 = vst [vmem:[#allocation7 + $0x58] sm:$0xff] %v5316_v8  ;;  %7212 = vtanh.f32 %v9446_v42 }
 0x84c   :  { %v4868_v63 = vadd.f32 %v4867_v16, %v4779_v62  ;;  %v5048_v13 = vpop.f32.mrf.mxu1 }
 0x84e   :  { %v4957_v39 = vadd.f32 %v4956_v19, %v4868_v63  ;;  %4820 = vmatmul.bf16.gmra.mxu2 %v7914_v44 }
 0x84f   :  { %4909 = vmatmul.bf16.gmra.mxu3 %v9444_v1  ;;  %5087 = vmatmul.bf16.gmra.mxu1 %v9445_v15  ;;  %v4959_v7 = vpop.f32.mrf.mxu0 }
 0x850   :  { %v7211_v53 = vpop.eup %7210  ;;  %v5046_v58 = vadd.f32 %v5045_v36, %v4957_v39 }
 0x851   :  { %v5319_v21 = vpack.c.bf16 %v7211_v53, %v7209_v52  ;;  %v4781_v40 = vpop.f32.mrf.mxu2  ;;  %v7213_v11 = vpop.eup %7212 }
 0x852   :  { %7214 = vtanh.f32 %v5046_v58  ;;  %v4782_v20 = vadd.f32 %v4781_v40, %v8950_v14  ;;  %v4870_v27 = vpop.f32.mrf.mxu3  ;;  %4998 = vmatmul.bf16.gmra.mxu0 %v9447_v24 }
 0x853   :  { %5415 = vst [vmem:[#allocation7 + $0x70] sm:$0xff] %v5319_v21  ;;  %7216 = vtanh.f32 %v8819_v46 }
 0x854   :  { %v4871_v44 = vadd.f32 %v4870_v27, %v4782_v20  ;;  %v5050_v60 = vpop.f32.mrf.mxu1 }
 0x856   :  { %v4960_v31 = vadd.f32 %v4959_v7, %v4871_v44 }
 0x857   :  { %v4961_v57 = vpop.f32.mrf.mxu0 }
 0x858   :  { %v7215_v48 = vpop.eup %7214  ;;  %v5049_v19 = vadd.f32 %v5048_v13, %v4960_v31 }
 0x859   :  { %v5322_v36 = vpack.c.bf16 %v7215_v48, %v7213_v11  ;;  %v4783_v43 = vpop.f32.mrf.mxu2  ;;  %v7217_v63 = vpop.eup %7216 }
 0x85a   :  { %7218 = vtanh.f32 %v5049_v19  ;;  %v4784_v61 = vadd.f32 %v4783_v43, %v8950_v14  ;;  %v4872_v8 = vpop.f32.mrf.mxu3  ;;  %v9448_v43 = vld [vmem:[#allocation52_spill] sm:$0xff] }
 0x85b   :  { %5418 = vst [vmem:[#allocation7 + $0x88] sm:$0xff] %v5322_v36  ;;  %7220 = vtanh.f32 %v8825_v59 }
 0x85c   :  { %v4873_v22 = vadd.f32 %v4872_v8, %v4784_v61  ;;  %v5053_v62 = vpop.f32.mrf.mxu1 }
 0x85e   :  { %v4962_v16 = vadd.f32 %v4961_v57, %v4873_v22  ;;  %4825 = vmatmul.bf16.gmra.mxu2 %v7926_v32 }
 0x85f   :  { %4914 = vmatmul.bf16.gmra.mxu3 %v7921_v51  ;;  %5092 = vmatmul.bf16.gmra.mxu1 %v8120_v4  ;;  %v4964_v13 = vpop.f32.mrf.mxu0 }
 0x860   :  { %v7219_v39 = vpop.eup %7218  ;;  %v5051_v46 = vadd.f32 %v5050_v60, %v4962_v16 }
 0x861   :  { %v5325_v52 = vpack.c.bf16 %v7219_v39, %v7217_v63  ;;  %v4786_v1 = vpop.f32.mrf.mxu2  ;;  %v7221_v51 = vpop.eup %7220 }
 0x862   :  { %7222 = vtanh.f32 %v5051_v46  ;;  %v4787_v15 = vadd.f32 %v4786_v1, %v8950_v14  ;;  %v4875_v7 = vpop.f32.mrf.mxu3  ;;  %5003 = vmatmul.bf16.gmra.mxu0 %v9355_v9 }
 0x863   :  { %5421 = vst [vmem:[#allocation7 + $0xa0] sm:$0xff] %v5325_v52  ;;  %7224 = vtanh.f32 %v8830_v55 }
 0x864   :  { %v4876_v32 = vadd.f32 %v4875_v7, %v4787_v15  ;;  %v5055_v53 = vpop.f32.mrf.mxu1 }
 0x866   :  { %v4965_v58 = vadd.f32 %v4964_v13, %v4876_v32 }
 0x867   :  { %v4966_v42 = vpop.f32.mrf.mxu0 }
 0x868   :  { %v7223_v4 = vpop.eup %7222  ;;  %v5054_v21 = vadd.f32 %v5053_v62, %v4965_v58 }
 0x869   :  { %v5328_v40 = vpack.c.bf16 %v7223_v4, %v7221_v51  ;;  %v4788_v59 = vpop.f32.mrf.mxu2  ;;  %v7225_v60 = vpop.eup %7224 }
 0x86a   :  { %7226 = vtanh.f32 %v5054_v21  ;;  %v4789_v20 = vadd.f32 %v4788_v59, %v8950_v14  ;;  %v4877_v27 = vpop.f32.mrf.mxu3 }
 0x86b   :  { %5424 = vst [vmem:[#allocation7 + $0xb8] sm:$0xff] %v5328_v40  ;;  %7228 = vtanh.f32 %v8837_v10 }
 0x86c   :  { %v4878_v24 = vadd.f32 %v4877_v27, %v4789_v20  ;;  %v5058_v44 = vpop.f32.mrf.mxu1 }
 0x86e   :  { %v4967_v9 = vadd.f32 %v4966_v42, %v4878_v24  ;;  %4830 = vmatmul.bf16.gmra.mxu2 %v7938_v18 }
 0x86f   :  { %4919 = vmatmul.bf16.gmra.mxu3 %v9356_v34  ;;  %5097 = vmatmul.bf16.gmra.mxu1 %v9357_v28  ;;  %v4969_v31 = vpop.f32.mrf.mxu0 }
 0x870   :  { %v7227_v11 = vpop.eup %7226  ;;  %v5056_v55 = vadd.f32 %v5055_v53, %v4967_v9 }
 0x871   :  { %v5331_v57 = vpack.c.bf16 %v7227_v11, %v7225_v60  ;;  %v4791_v48 = vpop.f32.mrf.mxu2  ;;  %v7229_v34 = vpop.eup %7228 }
 0x872   :  { %7230 = vtanh.f32 %v5056_v55  ;;  %v4792_v19 = vadd.f32 %v4791_v48, %v8950_v14  ;;  %v4880_v36 = vpop.f32.mrf.mxu3  ;;  %5008 = vmatmul.bf16.gmra.mxu0 %v9448_v43 }
 0x873   :  { %5427 = vst [vmem:[#allocation7 + $0xd0] sm:$0xff] %v5331_v57  ;;  %7232 = vtanh.f32 %v8843_v35 }
 0x874   :  { %v4881_v18 = vadd.f32 %v4880_v36, %v4792_v19  ;;  %v5060_v61 = vpop.f32.mrf.mxu1 }
 0x876   :  { %v4970_v8 = vadd.f32 %v4969_v31, %v4881_v18 }
 0x877   :  { %v4971_v22 = vpop.f32.mrf.mxu0 }
 0x878   :  { %v7231_v28 = vpop.eup %7230  ;;  %v5059_v62 = vadd.f32 %v5058_v44, %v4970_v8 }
 0x879   :  { %v5334_v16 = vpack.c.bf16 %v7231_v28, %v7229_v34  ;;  %v4793_v10 = vpop.f32.mrf.mxu2  ;;  %v7233_v1 = vpop.eup %7232 }
 0x87a   :  { %7234 = vtanh.f32 %v5059_v62  ;;  %v4794_v63 = vadd.f32 %v4793_v10, %v8950_v14  ;;  %v4882_v13 = vpop.f32.mrf.mxu3 }
 0x87b   :  { %5430 = vst [vmem:[#allocation7 + $0xe8] sm:$0xff] %v5334_v16  ;;  %7236 = vtanh.f32 %v8851_v54 }
 0x87c   :  { %v4883_v39 = vadd.f32 %v4882_v13, %v4794_v63  ;;  %v5063_v46 = vpop.f32.mrf.mxu1 }
 0x87e   :  { %v4972_v52 = vadd.f32 %v4971_v22, %v4883_v39  ;;  %4835 = vmatmul.bf16.gmra.mxu2 %v7950_v47 }
 0x87f   :  { %4924 = vmatmul.bf16.gmra.mxu3 %v7945_v5  ;;  %5102 = vmatmul.bf16.gmra.mxu1 %v8144_v12  ;;  %v4974_v15 = vpop.f32.mrf.mxu0 }
 0x880   :  { %v7235_v7 = vpop.eup %7234  ;;  %v5061_v35 = vadd.f32 %v5060_v61, %v4972_v52 }
 0x881   :  { %v5337_v32 = vpack.c.bf16 %v7235_v7, %v7233_v1  ;;  %v4796_v53 = vpop.f32.mrf.mxu2  ;;  %v7237_v5 = vpop.eup %7236 }
 0x882   :  { %7238 = vtanh.f32 %v5061_v35  ;;  %v4797_v58 = vadd.f32 %v4796_v53, %v8950_v14  ;;  %v4885_v51 = vpop.f32.mrf.mxu3  ;;  %5013 = vmatmul.bf16.gmra.mxu0 %v8149_v6 }
 0x883   :  { %5433 = vst [vmem:[#allocation7 + $0x100] sm:$0xff] %v5337_v32  ;;  %7240 = vtanh.f32 %v8855_v26 }
 0x884   :  { %v4886_v47 = vadd.f32 %v4885_v51, %v4797_v58  ;;  %v5065_v42 = vpop.f32.mrf.mxu1 }
 0x886   :  { %v4975_v4 = vadd.f32 %v4974_v15, %v4886_v47 }
 0x887   :  { %v4976_v21 = vpop.f32.mrf.mxu0 }
 0x888   :  { %v7239_v12 = vpop.eup %7238  ;;  %v5064_v40 = vadd.f32 %v5063_v46, %v4975_v4 }
 0x889   :  { %v5340_v59 = vpack.c.bf16 %v7239_v12, %v7237_v5  ;;  %v4798_v54 = vpop.f32.mrf.mxu2  ;;  %v7241_v9 = vpop.eup %7240 }
 0x88a   :  { %7242 = vtanh.f32 %v5064_v40  ;;  %v4799_v20 = vadd.f32 %v4798_v54, %v8950_v14  ;;  %v4887_v27 = vpop.f32.mrf.mxu3 }
 0x88b   :  { %5436 = vst [vmem:[#allocation7 + $0x118] sm:$0xff] %v5340_v59  ;;  %7244 = vtanh.f32 %v8861_v45 }
 0x88c   :  { %v4888_v24 = vadd.f32 %v4887_v27, %v4799_v20  ;;  %v5068_v44 = vpop.f32.mrf.mxu1 }
 0x88e   :  { %v4977_v6 = vadd.f32 %v4976_v21, %v4888_v24  ;;  %4840 = vmatmul.bf16.gmra.mxu2 %v7969_v23 }
 0x88f   :  { %4929 = vmatmul.bf16.gmra.mxu3 %v7962_v29  ;;  %5107 = vmatmul.bf16.gmra.mxu1 %v9360_v41  ;;  %v4979_v60 = vpop.f32.mrf.mxu0 }
 0x890   :  { %v7243_v31 = vpop.eup %7242  ;;  %v5066_v26 = vadd.f32 %v5065_v42, %v4977_v6 }
 0x891   :  { %v5343_v11 = vpack.c.bf16 %v7243_v31, %v7241_v9  ;;  %v4801_v55 = vpop.f32.mrf.mxu2  ;;  %v7245_v43 = vpop.eup %7244 }
 0x892   :  { %7246 = vtanh.f32 %v5066_v26  ;;  %v4802_v57 = vadd.f32 %v4801_v55, %v8950_v14  ;;  %v4890_v48 = vpop.f32.mrf.mxu3 }
 0x893   :  { %5439 = vst [vmem:[#allocation7 + $0x130] sm:$0xff] %v5343_v11  ;;  %7248 = vtanh.f32 %v8865_v38 }
 0x894   :  { %v4891_v19 = vadd.f32 %v4890_v48, %v4802_v57  ;;  %v5070_v36 = vpop.f32.mrf.mxu1 }
 0x896   :  { %v4980_v23 = vadd.f32 %v4979_v60, %v4891_v19 }
 0x897   :  { %v4981_v18 = vpop.f32.mrf.mxu0 }
 0x898   :  { %v7247_v29 = vpop.eup %7246  ;;  %v5069_v61 = vadd.f32 %v5068_v44, %v4980_v23 }
 0x899   :  { %v5346_v41 = vpack.c.bf16 %v7247_v29, %v7245_v43  ;;  %v4803_v8 = vpop.f32.mrf.mxu2  ;;  %v7249_v16 = vpop.eup %7248 }
 0x89a   :  { %7250 = vtanh.f32 %v5069_v61  ;;  %v4804_v45 = vadd.f32 %v4803_v8, %v8950_v14  ;;  %v4892_v34 = vpop.f32.mrf.mxu3 }
 0x89b   :  { %5442 = vst [vmem:[#allocation7 + $0x148] sm:$0xff] %v5346_v41  ;;  %7252 = vtanh.f32 %v8871_v50 }
 0x89c   :  { %v4893_v22 = vadd.f32 %v4892_v34, %v4804_v45  ;;  %v5073_v28 = vpop.f32.mrf.mxu1 }
 0x89e   :  { %v4982_v62 = vadd.f32 %v4981_v18, %v4893_v22  ;;  %5018 = vmatmul.bf16.vlgmr.msrb.gmra.mxu2 %v9362_v2 }
 0x89f   :  { %v4984_v10 = vpop.f32.mrf.mxu0 }
 0x8a0   :  { %v7251_v63 = vpop.eup %7250  ;;  %v5071_v13 = vadd.f32 %v5070_v36, %v4982_v62 }
 0x8a1   :  { %v5349_v39 = vpack.c.bf16 %v7251_v63, %v7249_v16  ;;  %v4806_v38 = vpop.f32.mrf.mxu2  ;;  %v7253_v35 = vpop.eup %7252 }
 0x8a2   :  { %7254 = vtanh.f32 %v5071_v13  ;;  %v4807_v46 = vadd.f32 %v4806_v38, %v8950_v14  ;;  %v4895_v52 = vpop.f32.mrf.mxu3 }
 0x8a3   :  { %5445 = vst [vmem:[#allocation7 + $0x160] sm:$0xff] %v5349_v39  ;;  %7256 = vtanh.f32 %v8875_v25 }
 0x8a4   :  { %v4896_v1 = vadd.f32 %v4895_v52, %v4807_v46  ;;  %v5075_v15 = vpop.f32.mrf.mxu1 }
 0x8a6   :  { %v4985_v7 = vadd.f32 %v4984_v10, %v4896_v1 }
 0x8a7   :  { %v4986_v32 = vpop.f32.mrf.mxu0 }
 0x8a8   :  { %v7255_v53 = vpop.eup %7254  ;;  %v5074_v2 = vadd.f32 %v5073_v28, %v4985_v7 }
 0x8a9   :  { %v5352_v58 = vpack.c.bf16 %v7255_v53, %v7253_v35  ;;  %v4808_v51 = vpop.f32.mrf.mxu2  ;;  %v7257_v21 = vpop.eup %7256 }
 0x8aa   :  { %7258 = vtanh.f32 %v5074_v2  ;;  %v4809_v50 = vadd.f32 %v4808_v51, %v8950_v14  ;;  %v4897_v47 = vpop.f32.mrf.mxu3 }
 0x8ab   :  { %5448 = vst [vmem:[#allocation7 + $0x178] sm:$0xff] %v5352_v58  ;;  %7260 = vtanh.f32 %v8881_v37 }
 0x8ac   :  { %v4898_v42 = vadd.f32 %v4897_v47, %v4809_v50  ;;  %v5078_v4 = vpop.f32.mrf.mxu1 }
 0x8ae   :  { %v4987_v5 = vadd.f32 %v4986_v32, %v4898_v42 }
 0x8af   :  { %v4989_v12 = vpop.f32.mrf.mxu0 }
 0x8b0   :  { %v7259_v40 = vpop.eup %7258  ;;  %v5076_v59 = vadd.f32 %v5075_v15, %v4987_v5 }
 0x8b1   :  { %v5355_v54 = vpack.c.bf16 %v7259_v40, %v7257_v21  ;;  %v4811_v20 = vpop.f32.mrf.mxu2  ;;  %v7261_v9 = vpop.eup %7260  ;;  %v9449_v21 = vld [vmem:[#allocation57_spill] sm:$0xff] }
 0x8b2   :  { %7262 = vtanh.f32 %v5076_v59  ;;  %v4812_v25 = vadd.f32 %v4811_v20, %v8950_v14  ;;  %v4900_v27 = vpop.f32.mrf.mxu3 }
 0x8b3   :  { %5451 = vst [vmem:[#allocation7 + $0x190] sm:$0xff] %v5355_v54  ;;  %7264 = vtanh.f32 %v8885_v17 }
 0x8b4   :  { %v4901_v24 = vadd.f32 %v4900_v27, %v4812_v25  ;;  %v5080_v44 = vpop.f32.mrf.mxu1 }
 0x8b6   :  { %v4990_v6 = vadd.f32 %v4989_v12, %v4901_v24 }
 0x8b7   :  { %v4991_v60 = vpop.f32.mrf.mxu0 }
 0x8b8   :  { %v7263_v31 = vpop.eup %7262  ;;  %v5079_v26 = vadd.f32 %v5078_v4, %v4990_v6 }
 0x8b9   :  { %v5358_v11 = vpack.c.bf16 %v7263_v31, %v7261_v9  ;;  %v4813_v55 = vpop.f32.mrf.mxu2  ;;  %v7265_v23 = vpop.eup %7264 }
 0x8ba   :  { %7266 = vtanh.f32 %v5079_v26  ;;  %v4814_v37 = vadd.f32 %v4813_v55, %v8950_v14  ;;  %v4902_v57 = vpop.f32.mrf.mxu3 }
 0x8bb   :  { %5454 = vst [vmem:[#allocation7 + $0x1a8] sm:$0xff] %v5358_v11  ;;  %7268 = vtanh.f32 %v8891_v0 }
 0x8bc   :  { %v4903_v48 = vadd.f32 %v4902_v57, %v4814_v37  ;;  %v5083_v19 = vpop.f32.mrf.mxu1 }
 0x8be   :  { %v4992_v36 = vadd.f32 %v4991_v60, %v4903_v48 }
 0x8bf   :  { %v4994_v43 = vpop.f32.mrf.mxu0 }
 0x8c0   :  { %v7267_v18 = vpop.eup %7266  ;;  %v5081_v29 = vadd.f32 %v5080_v44, %v4992_v36 }
 0x8c1   :  { %v5361_v61 = vpack.c.bf16 %v7267_v18, %v7265_v23  ;;  %v4816_v41 = vpop.f32.mrf.mxu2  ;;  %v7269_v28 = vpop.eup %7268  ;;  %v9450_v23 = vld [vmem:[#allocation58_spill] sm:$0xff] }
 0x8c2   :  { %7270 = vtanh.f32 %v5081_v29  ;;  %v4817_v17 = vadd.f32 %v4816_v41, %v8950_v14  ;;  %v4905_v8 = vpop.f32.mrf.mxu3 }
 0x8c3   :  { %5457 = vst [vmem:[#allocation7 + $0x1c0] sm:$0xff] %v5361_v61  ;;  %7272 = vtanh.f32 %v8895_v49 }
 0x8c4   :  { %v4906_v45 = vadd.f32 %v4905_v8, %v4817_v17  ;;  %v5085_v34 = vpop.f32.mrf.mxu1 }
 0x8c6   :  { %v4995_v22 = vadd.f32 %v4994_v43, %v4906_v45 }
 0x8c7   :  { %v4996_v62 = vpop.f32.mrf.mxu0 }
 0x8c8   :  { %v7271_v16 = vpop.eup %7270  ;;  %v5084_v10 = vadd.f32 %v5083_v19, %v4995_v22  ;;  %v9451_v22 = vld [vmem:[#allocation59_spill] sm:$0xff] }
 0x8c9   :  { %v5364_v63 = vpack.c.bf16 %v7271_v16, %v7269_v28  ;;  %v4818_v13 = vpop.f32.mrf.mxu2  ;;  %v7273_v1 = vpop.eup %7272 }
 0x8ca   :  { %7274 = vtanh.f32 %v5084_v10  ;;  %v4819_v0 = vadd.f32 %v4818_v13, %v8950_v14  ;;  %v4907_v39 = vpop.f32.mrf.mxu3 }
 0x8cb   :  { %5460 = vst [vmem:[#allocation7 + $0x1d8] sm:$0xff] %v5364_v63  ;;  %7276 = vtanh.f32 %v8901_v3 }
 0x8cc   :  { %v4908_v38 = vadd.f32 %v4907_v39, %v4819_v0  ;;  %v5088_v46 = vpop.f32.mrf.mxu1 }
 0x8ce   :  { %v4997_v52 = vadd.f32 %v4996_v62, %v4908_v38 }
 0x8cf   :  { %v4999_v15 = vpop.f32.mrf.mxu0 }
 0x8d0   :  { %v7275_v7 = vpop.eup %7274  ;;  %v5086_v35 = vadd.f32 %v5085_v34, %v4997_v52  ;;  %v9452_v52 = vld [vmem:[#allocation50_spill] sm:$0xff] }
 0x8d1   :  { %v5367_v32 = vpack.c.bf16 %v7275_v7, %v7273_v1  ;;  %v4821_v53 = vpop.f32.mrf.mxu2  ;;  %v7277_v47 = vpop.eup %7276 }
 0x8d2   :  { %7278 = vtanh.f32 %v5086_v35  ;;  %v4822_v49 = vadd.f32 %v4821_v53, %v8950_v14  ;;  %v4910_v2 = vpop.f32.mrf.mxu3 }
 0x8d3   :  { %5463 = vst [vmem:[#allocation7 + $0x1f0] sm:$0xff] %v5367_v32  ;;  %7280 = vtanh.f32 %v9449_v21 }
 0x8d4   :  { %v4911_v58 = vadd.f32 %v4910_v2, %v4822_v49  ;;  %v5090_v51 = vpop.f32.mrf.mxu1 }
 0x8d6   :  { %v5000_v50 = vadd.f32 %v4999_v15, %v4911_v58 }
 0x8d7   :  { %v5001_v42 = vpop.f32.mrf.mxu0 }
 0x8d8   :  { %v7279_v4 = vpop.eup %7278  ;;  %v5089_v5 = vadd.f32 %v5088_v46, %v5000_v50 }
 0x8d9   :  { %v5370_v12 = vpack.c.bf16 %v7279_v4, %v7277_v47  ;;  %v4823_v40 = vpop.f32.mrf.mxu2  ;;  %v7281_v27 = vpop.eup %7280  ;;  %v9453_v47 = vld [vmem:[#allocation27_spill] sm:$0xff] }
 0x8da   :  { %7282 = vtanh.f32 %v5089_v5  ;;  %v4824_v3 = vadd.f32 %v4823_v40, %v8950_v14  ;;  %v4912_v59 = vpop.f32.mrf.mxu3 }
 0x8db   :  { %5466 = vst [vmem:[#allocation7 + $0x208] sm:$0xff] %v5370_v12  ;;  %7284 = vtanh.f32 %v8911_v33 }
 0x8dc   :  { %v4913_v54 = vadd.f32 %v4912_v59, %v4824_v3  ;;  %v5093_v20 = vpop.f32.mrf.mxu1 }
 0x8de   :  { %v5002_v25 = vadd.f32 %v5001_v42, %v4913_v54 }
 0x8df   :  { %v5004_v24 = vpop.f32.mrf.mxu0 }
 0x8e0   :  { %v7283_v44 = vpop.eup %7282  ;;  %v5091_v6 = vadd.f32 %v5090_v51, %v5002_v25 }
 0x8e1   :  { %v5373_v9 = vpack.c.bf16 %v7283_v44, %v7281_v27  ;;  %v4826_v60 = vpop.f32.mrf.mxu2  ;;  %v7285_v37 = vpop.eup %7284  ;;  %v9454_v27 = vld [vmem:[#allocation51_spill] sm:$0xff] }
 0x8e2   :  { %7286 = vtanh.f32 %v5091_v6  ;;  %v4827_v31 = vadd.f32 %v4826_v60, %v8950_v14  ;;  %v4915_v26 = vpop.f32.mrf.mxu3 }
 0x8e3   :  { %5469 = vst [vmem:[#allocation7 + $0x220] sm:$0xff] %v5373_v9  ;;  %7288 = vtanh.f32 %v9450_v23 }
 0x8e4   :  { %v4916_v11 = vadd.f32 %v4915_v26, %v4827_v31  ;;  %v5095_v57 = vpop.f32.mrf.mxu1 }
 0x8e6   :  { %v5005_v55 = vadd.f32 %v5004_v24, %v4916_v11 }
 0x8e7   :  { %v5006_v48 = vpop.f32.mrf.mxu0 }
 0x8e8   :  { %v7287_v19 = vpop.eup %7286  ;;  %v5094_v36 = vadd.f32 %v5093_v20, %v5005_v55 }
 0x8e9   :  { %v5376_v43 = vpack.c.bf16 %v7287_v19, %v7285_v37  ;;  %v4828_v18 = vpop.f32.mrf.mxu2  ;;  %v7289_v17 = vpop.eup %7288 }
 0x8ea   :  { %7290 = vtanh.f32 %v5094_v36  ;;  %v4829_v33 = vadd.f32 %v4828_v18, %v8950_v14  ;;  %v4917_v29 = vpop.f32.mrf.mxu3 }
 0x8eb   :  { %5472 = vst [vmem:[#allocation7 + $0x238] sm:$0xff] %v5376_v43  ;;  %7292 = vtanh.f32 %v9451_v22 }
 0x8ec   :  { %v4918_v61 = vadd.f32 %v4917_v29, %v4829_v33  ;;  %v5098_v62 = vpop.f32.mrf.mxu1 }
 0x8ee   :  { %v5007_v41 = vadd.f32 %v5006_v48, %v4918_v61  ;;  %v9455_v48 = vld [vmem:[#allocation60_spill] sm:$0xff] }
 0x8ef   :  { %v5009_v8 = vpop.f32.mrf.mxu0 }
 0x8f0   :  { %v7291_v45 = vpop.eup %7290  ;;  %v5096_v34 = vadd.f32 %v5095_v57, %v5007_v41 }
 0x8f1   :  { %v5379_v28 = vpack.c.bf16 %v7291_v45, %v7289_v17  ;;  %v4831_v16 = vpop.f32.mrf.mxu2  ;;  %v7293_v39 = vpop.eup %7292 }
 0x8f2   :  { %7294 = vtanh.f32 %v5096_v34  ;;  %v4832_v10 = vadd.f32 %v4831_v16, %v8950_v14  ;;  %v4920_v63 = vpop.f32.mrf.mxu3 }
 0x8f3   :  { %5475 = vst [vmem:[#allocation7 + $0x250] sm:$0xff] %v5379_v28  ;;  %7296 = vtanh.f32 %v9452_v52 }
 0x8f4   :  { %v4921_v13 = vadd.f32 %v4920_v63, %v4832_v10  ;;  %v5100_v53 = vpop.f32.mrf.mxu1 }
 0x8f6   :  { %v5010_v0 = vadd.f32 %v5009_v8, %v4921_v13 }
 0x8f7   :  { %v5011_v15 = vpop.f32.mrf.mxu0 }
 0x8f8   :  { %v7295_v38 = vpop.eup %7294  ;;  %v5099_v46 = vadd.f32 %v5098_v62, %v5010_v0 }
 0x8f9   :  { %v5382_v1 = vpack.c.bf16 %v7295_v38, %v7293_v39  ;;  %v4833_v7 = vpop.f32.mrf.mxu2  ;;  %v7297_v58 = vpop.eup %7296 }
 0x8fa   :  { %7298 = vtanh.f32 %v5099_v46  ;;  %v4834_v35 = vadd.f32 %v4833_v7, %v8950_v14  ;;  %v4922_v32 = vpop.f32.mrf.mxu3 }
 0x8fb   :  { %5478 = vst [vmem:[#allocation7 + $0x268] sm:$0xff] %v5382_v1  ;;  %7300 = vtanh.f32 %v9453_v47 }
 0x8fc   :  { %v4923_v49 = vadd.f32 %v4922_v32, %v4834_v35  ;;  %v5103_v3 = vpop.f32.mrf.mxu1 }
 0x8fe   :  { %v5012_v2 = vadd.f32 %v5011_v15, %v4923_v49 }
 0x8ff   :  { %v5014_v12 = vpop.f32.mrf.mxu0 }
 0x900   :  { %v7299_v51 = vpop.eup %7298  ;;  %v5101_v50 = vadd.f32 %v5100_v53, %v5012_v2 }
 0x901   :  { %v5385_v42 = vpack.c.bf16 %v7299_v51, %v7297_v58  ;;  %v4836_v4 = vpop.f32.mrf.mxu2  ;;  %v7301_v54 = vpop.eup %7300 }
 0x902   :  { %7302 = vtanh.f32 %v5101_v50  ;;  %v4837_v5 = vadd.f32 %v4836_v4, %v8950_v14  ;;  %v4925_v21 = vpop.f32.mrf.mxu3 }
 0x903   :  { %5481 = vst [vmem:[#allocation7 + $0x280] sm:$0xff] %v5385_v42  ;;  %7304 = vtanh.f32 %v9454_v27 }
 0x904   :  { %v4926_v40 = vadd.f32 %v4925_v21, %v4837_v5  ;;  %v5105_v55 = vpop.f32.mrf.mxu1 }
 0x906   :  { %v5015_v59 = vadd.f32 %v5014_v12, %v4926_v40 }
 0x907   :  { %v5016_v31 = vpop.f32.mrf.mxu0 }
 0x908   :  { %v7303_v20 = vpop.eup %7302  ;;  %v5104_v25 = vadd.f32 %v5103_v3, %v5015_v59 }
 0x909   :  { %v5388_v24 = vpack.c.bf16 %v7303_v20, %v7301_v54  ;;  %v4838_v44 = vpop.f32.mrf.mxu2  ;;  %v7305_v11 = vpop.eup %7304 }
 0x90a   :  { %7306 = vtanh.f32 %v5104_v25  ;;  %v4839_v6 = vadd.f32 %v4838_v44, %v8950_v14  ;;  %v4927_v9 = vpop.f32.mrf.mxu3 }
 0x90b   :  { %5484 = vst [vmem:[#allocation7 + $0x298] sm:$0xff] %v5388_v24  ;;  %7308 = vtanh.f32 %v9455_v48 }
 0x90c   :  { %v4928_v60 = vadd.f32 %v4927_v9, %v4839_v6  ;;  %v5108_v17 = vpop.f32.mrf.mxu1 }
 0x90e   :  { %v5017_v26 = vadd.f32 %v5016_v31, %v4928_v60 }
 0x910   :  { %v7307_v37 = vpop.eup %7306  ;;  %v5106_v57 = vadd.f32 %v5105_v55, %v5017_v26 }
 0x911   :  { %v5391_v19 = vpack.c.bf16 %v7307_v37, %v7305_v11  ;;  %v4841_v36 = vpop.f32.mrf.mxu2  ;;  %v7309_v23 = vpop.eup %7308 }
 0x912   :  { %7310 = vtanh.f32 %v5106_v57  ;;  %v4842_v29 = vadd.f32 %v4841_v36, %v8950_v14  ;;  %v4930_v61 = vpop.f32.mrf.mxu3 }
 0x913   :  { %5487 = vst [vmem:[#allocation7 + $0x2b0] sm:$0xff] %v5391_v19  ;;  %7312 = vtanh.f32 %v8945_v56 }
 0x914   :  { %v4931_v41 = vadd.f32 %v4930_v61, %v4842_v29  ;;  %v5110_v13 = vpop.f32.mrf.mxu1 }
 0x918   :  { %v7311_v43 = vpop.eup %7310 }
 0x919   :  { %v5394_v18 = vpack.c.bf16 %v7311_v43, %v7309_v23  ;;  %v4843_v33 = vpop.f32.mrf.mxu2  ;;  %v7313_v63 = vpop.eup %7312 }
 0x91a   :  { %v4844_v34 = vadd.f32 %v4843_v33, %v8950_v14  ;;  %v4932_v28 = vpop.f32.mrf.mxu3 }
 0x91b   :  { %5490 = vst [vmem:[#allocation7 + $0x2c8] sm:$0xff] %v5394_v18 }
 0x91c   :  { %v4933_v62 = vadd.f32 %v4932_v28, %v4844_v34 }
 0x921   :  { %v5019_v8 = vpop.f32.mrf.mxu2 }
 0x922   :  { %v5020_v45 = vadd.f32 %v5019_v8, %v4931_v41 }
 0x924   :  { %v5109_v22 = vadd.f32 %v5108_v17, %v5020_v45 }
 0x926   :  { %7314 = vtanh.f32 %v5109_v22 }
 0x927   :  { %7316 = vtanh.f32 %v8954_v30 }
 0x929   :  { %v5021_v16 = vpop.f32.mrf.mxu2 }
 0x92a   :  { %v5022_v10 = vadd.f32 %v5021_v16, %v4933_v62 }
 0x92c   :  { %v7315_v0 = vpop.eup %7314  ;;  %v5111_v39 = vadd.f32 %v5110_v13, %v5022_v10 }
 0x92d   :  { %v5397_v38 = vpack.c.bf16 %v7315_v0, %v7313_v63  ;;  %v7317_v56 = vpop.eup %7316 }
 0x92e   :  { %7318 = vtanh.f32 %v5111_v39 }
 0x92f   :  { %5493 = vst [vmem:[#allocation7 + $0x2e0] sm:$0xff] %v5397_v38 }
 0x934   :  { %v7319_v14 = vpop.eup %7318 }
 0x935   :  { %v5400_v46 = vpack.c.bf16 %v7319_v14, %v7317_v56 }
 0x937   :  { %5496 = vst [vmem:[#allocation7 + $0x2f8] sm:$0xff] %v5400_v46 }
 0x938   :  { %5509 = dma.vmem_to_hbm [thread:$0]  %s5502_s15, 12288, %s5504_s17, [#allocation4], %s7405_s13, %s7405_s13, %s7406_s14  }
 0x939   :  { %7399 = dma.done.wait [#allocation4], 12288  }
 0x93a   :  { %7400 = vsyncadd [#allocation4], 4294955008 }
 0x93b   :  { %5514 = vsyncpa [#allocation3], 1 }
 0x93c   :  { %5515 = vsyncpa [#allocation6], 1 }
 0x93d   :  { %5516 = vsyncpa [#allocation4], 1 }

</bundles_post_ra>
